<compile_context>
chip_gen: v7x
topology: tpu7x:2x2x1
jax: 0.10.0
libtpu: 0.0.40
codegen_flags: <defaults>
</compile_context>

<pallas_src>
import jax
import jax.numpy as jnp
from jax.experimental import pallas as pl
from jax.experimental.pallas import tpu as pltpu

# ------------------------- model hyper-parameters --------------------------
IN_CH = 3
NUM_ZONES = 10
NUM_FIBER = 5
ENSEMBLE = 3
HID = 128
B_SZ, H_SP, W_SP = 2, 16, 16
HW = H_SP * W_SP

BF16 = jnp.bfloat16
F32 = jnp.float32


# ----------------------------- BlockSpec helpers ----------------------------
def _per_sample(tail):
    """Array of shape (B, *tail); one sample per grid step."""
    tail = tuple(tail)
    zeros = (0,) * len(tail)
    return pl.BlockSpec((1,) + tail, lambda b: (b,) + zeros)


def _whole(shape):
    """Whole-array block (weights / biases), identical for every grid step."""
    shape = tuple(shape)
    zeros = (0,) * len(shape)
    return pl.BlockSpec(shape, lambda b: zeros)


# ------------------------------- kernel bodies ------------------------------
def _kernel_A(patch_ref, wd_ref, bd_ref, w1_ref, b1_ref, w2_ref, b2_ref,
              p_ref, x_ref, jm_ref):
    # conv D as an im2col matmul (bf16 operands, f32 accumulate) + bias epilogue
    pd = jnp.dot(patch_ref[0], wd_ref[...],
                 preferred_element_type=jnp.float32) + bd_ref[...]        # (HW,64)
    # adaptive_avg_pool2d(D(L), (1,1)) == per-channel mean over the pixels
    feat = jnp.mean(pd, axis=0, keepdims=True)                            # (1,64)
    # hypernet: Linear(64,128) + ReLU + Linear(128,10), fused in the same kernel
    h1 = jnp.dot(feat.astype(BF16), w1_ref[...],
                 preferred_element_type=jnp.float32) + b1_ref[...]
    h1 = jnp.maximum(h1, 0.0)
    xx = jnp.dot(h1.astype(BF16), w2_ref[...],
                 preferred_element_type=jnp.float32) + b2_ref[...]        # (1,10)
    x_ref[0] = xx
    x_d = xx[:, 0:1]                                                      # (1,1)
    p_ref[0] = pd * x_d                                                   # P = D(L)*x_D
    # J_mean = mean(P over c,h,w) = x_D * mean_c(feat)   (exact)
    jm_ref[0] = x_d * jnp.mean(feat, axis=1, keepdims=True)


def _kernel_B(patch_ref, we_ref, be_ref, p_ref, x_ref,
              f_ref, mk_ref, fs_ref):
    x_e = x_ref[0][:, 1:2]                                                # (1,1)
    # E(P * x_E): the per-sample input scale is folded into the epilogue
    # (conv is linear), so the P patches are reused unscaled.
    logits = (jnp.dot(patch_ref[0], we_ref[...],
                      preferred_element_type=jnp.float32) * x_e
              + be_ref[...])                                              # (HW,10)
    m = jnp.max(logits, axis=-1, keepdims=True)
    e = jnp.exp(logits - m)
    fz = e / jnp.sum(e, axis=-1, keepdims=True)                           # zone softmax
    f_ref[0] = fz
    fsum = jnp.sum(fz, axis=-1, keepdims=True)                            # (HW,1)
    fs_ref[0] = fsum
    # masked_P = sum_z F_z * P (kept faithful even though sum_z softmax == 1)
    mk_ref[0] = p_ref[0] * fsum


def _kernel_C(pm_ref, wb_ref, bb_ref, fm_ref, wg_ref, bg_ref,
              ws_ref, wc_ref, bc_ref, x_ref,
              m_ref, g_ref, h_ref):
    xx = x_ref[0]                                                         # (1,10)
    x_g, x_h, x_b = xx[:, 2:3], xx[:, 3:4], xx[:, 4:5]
    # M = B(masked_P) * x_B  (bias + scale epilogue fused)
    m_ref[0] = (jnp.dot(pm_ref[0], wb_ref[...],
                        preferred_element_type=jnp.float32)
                + bb_ref[...]) * x_b                                      # (HW,128)
    # G = softmax( C_G(masked_P.flatten() / 16) * x_G )
    # TODO(synk): reference C_G in_features (64*224*224//16) is inconsistent
    # with the tensor it receives; sized to the actual flattened masked_P.
    glog = (jnp.dot(fm_ref[0], wg_ref[...],
                    preferred_element_type=jnp.float32) * (1.0 / 16.0)
            + bg_ref[...]) * x_g                                          # (1,5)
    gm = jnp.max(glog, axis=-1, keepdims=True)
    ge = jnp.exp(glog - gm)
    G = ge / jnp.sum(ge, axis=-1, keepdims=True)
    g_ref[0] = G
    # mean_hw(conv_core(P)) via precomputed 5x5 window means (exact, linearity)
    core_mean = jnp.sum(ws_ref[0].astype(jnp.float32)
                        * wc_ref[...].astype(jnp.float32),
                        axis=-1, keepdims=True) + bc_ref[...]             # (1,1)
    # TODO(synk): reference H multiplies diag_embed(G) (5x5) with core_feat
    # (HW x 1) which is shape-invalid; use the spatially pooled core feature.
    h_ref[0] = jnp.mean(G * core_mean, axis=1, keepdims=True) * x_h


def _kernel_D(pm_ref, wc_ref, bc_ref, fs_ref, x_ref, wih_ref, bl_ref,
              k_ref, kzm_ref, h_ref):
    x_c = x_ref[0][:, 5:6]                                                # (1,1)
    # the 3 ensemble convs fused into a single Cout=3 matmul (+bias, *x_C)
    kz = (jnp.dot(pm_ref[0], wc_ref[...],
                  preferred_element_type=jnp.float32)
          + bc_ref[...]) * x_c                                            # (HW,3)
    fsum = fs_ref[0]                                                      # (HW,1)
    # TODO(synk): reference K = F.unsq(1).T @ K_zone only broadcasts when
    # num_zones == batch; implemented as the zone-weighted spatial contraction.
    K = jnp.sum(kz * fsum, axis=0, keepdims=True)                         # (1,3)
    k_ref[0] = K
    kzm_ref[0] = jnp.mean(kz, axis=0, keepdims=True)                      # (1,3)
    # single-step LSTM with zero initial state (forget gate * c0 == 0).
    # TODO(synk): reference feeds K (3 features) into LSTM(128,128); the
    # zero-pad-to-128 fallback == using only the first 3 columns of w_ih.
    gates = (K[:, 0:1] * wih_ref[0:1, :].astype(jnp.float32)
             + K[:, 1:2] * wih_ref[1:2, :].astype(jnp.float32)
             + K[:, 2:3] * wih_ref[2:3, :].astype(jnp.float32)
             + bl_ref[...])                                               # (1,512)
    i_g = jax.nn.sigmoid(gates[:, 0:HID])
    g_g = jnp.tanh(gates[:, 2 * HID:3 * HID])
    o_g = jax.nn.sigmoid(gates[:, 3 * HID:4 * HID])
    c_t = i_g * g_g
    h_ref[0] = o_g * jnp.tanh(c_t)                                        # (1,128)


# ------------------------------ pallas_call wrappers -------------------------
_PARALLEL = pltpu.CompilerParams(dimension_semantics=("parallel",))


def _call_A(patches_L, p):
    B = patches_L.shape[0]
    kd = patches_L.shape[-1]
    return pl.pallas_call(
        _kernel_A,
        out_shape=(jax.ShapeDtypeStruct((B, HW, 64), F32),
                   jax.ShapeDtypeStruct((B, 1, 10), F32),
                   jax.ShapeDtypeStruct((B, 1, 1), F32)),
        grid=(B,),
        in_specs=[_per_sample((HW, kd)), _whole((kd, 64)), _whole((1, 64)),
                  _whole((64, HID)), _whole((1, HID)),
                  _whole((HID, 10)), _whole((1, 10))],
        out_specs=(_per_sample((HW, 64)), _per_sample((1, 10)),
                   _per_sample((1, 1))),
        compiler_params=_PARALLEL,
    )(patches_L, p['D_w'], p['D_b'], p['hyper1_w'], p['hyper1_b'],
      p['hyper2_w'], p['hyper2_b'])


def _call_B(patches_P, P, x3, p):
    B = P.shape[0]
    return pl.pallas_call(
        _kernel_B,
        out_shape=(jax.ShapeDtypeStruct((B, HW, NUM_ZONES), F32),
                   jax.ShapeDtypeStruct((B, HW, 64), F32),
                   jax.ShapeDtypeStruct((B, HW, 1), F32)),
        grid=(B,),
        in_specs=[_per_sample((HW, 9 * 64)), _whole((9 * 64, NUM_ZONES)),
                  _whole((1, NUM_ZONES)), _per_sample((HW, 64)),
                  _per_sample((1, 10))],
        out_specs=(_per_sample((HW, NUM_ZONES)), _per_sample((HW, 64)),
                   _per_sample((HW, 1))),
        compiler_params=_PARALLEL,
    )(patches_P, p['E_w'], p['E_b'], P, x3)


def _call_C(patches_MP, flatm, wsmean, x3, p):
    B = x3.shape[0]
    return pl.pallas_call(
        _kernel_C,
        out_shape=(jax.ShapeDtypeStruct((B, HW, HID), F32),
                   jax.ShapeDtypeStruct((B, 1, NUM_FIBER), F32),
                   jax.ShapeDtypeStruct((B, 1, 1), F32)),
        grid=(B,),
        in_specs=[_per_sample((HW, 9 * 64)), _whole((9 * 64, HID)),
                  _whole((1, HID)),
                  _per_sample((1, 64 * HW)), _whole((64 * HW, NUM_FIBER)),
                  _whole((1, NUM_FIBER)),
                  _per_sample((1, 25 * 64)), _whole((1, 25 * 64)),
                  _whole((1, 1)),
                  _per_sample((1, 10))],
        out_specs=(_per_sample((HW, HID)), _per_sample((1, NUM_FIBER)),
                   _per_sample((1, 1))),
        compiler_params=_PARALLEL,
    )(patches_MP, p['B_w'], p['B_b'], flatm, p['CG_w'], p['CG_b'],
      wsmean, p['core_w'], p['core_b'], x3)


def _call_D(patches_M, fsum, x3, p):
    B = x3.shape[0]
    return pl.pallas_call(
        _kernel_D,
        out_shape=(jax.ShapeDtypeStruct((B, 1, ENSEMBLE), F32),
                   jax.ShapeDtypeStruct((B, 1, ENSEMBLE), F32),
                   jax.ShapeDtypeStruct((B, 1, HID), F32)),
        grid=(B,),
        in_specs=[_per_sample((HW, 9 * HID)), _whole((9 * HID, ENSEMBLE)),
                  _whole((1, ENSEMBLE)), _per_sample((HW, 1)),
                  _per_sample((1, 10)),
                  _whole((ENSEMBLE, 4 * HID)), _whole((1, 4 * HID))],
        out_specs=(_per_sample((1, ENSEMBLE)), _per_sample((1, ENSEMBLE)),
                   _per_sample((1, HID))),
        compiler_params=_PARALLEL,
    )(patches_M, p['C_w'], p['C_b'], fsum, x3, p['lstm_w_ih3'], p['lstm_b'])


# --------------------------- XLA glue (layout only) --------------------------
def im2col_3x3(img):
    """Channels-last im2col: (B,H,W,C) -> (B, H*W, 9*C), zero padding=1."""
    Bn, Hn, Wn, C = img.shape
    xp = jnp.pad(img, ((0, 0), (1, 1), (1, 1), (0, 0)))
    cols = [xp[:, dy:dy + Hn, dx:dx + Wn, :]
            for dy in range(3) for dx in range(3)]
    return jnp.concatenate(cols, axis=-1).reshape(Bn, Hn * Wn, 9 * C)


# --------------------------- parameter construction --------------------------
def init_params(key):
    ks = jax.random.split(key, 32)

    def nrm(k, shape, scale=0.1):
        return scale * jax.random.normal(k, shape, dtype=F32)

    def conv_w(k, cout, cin, ksz, scale=0.1):
        # (Cout,Cin,k,k) -> (k*k*Cin, Cout), matching channels-last im2col order
        w = nrm(k, (cout, cin, ksz, ksz), scale)
        return w.transpose(2, 3, 1, 0).reshape(ksz * ksz * cin, cout)

    p = {}
    wd = conv_w(ks[0], 64, IN_CH, 3)                                   # (27,64)
    p['D_w'] = jnp.pad(wd, ((0, 32 - wd.shape[0]), (0, 0))).astype(BF16)
    p['D_b'] = nrm(ks[1], (1, 64))
    p['E_w'] = conv_w(ks[2], NUM_ZONES, 64, 3).astype(BF16)            # (576,10)
    p['E_b'] = nrm(ks[3], (1, NUM_ZONES))
    p['CG_w'] = nrm(ks[4], (64 * HW, NUM_FIBER), 0.01).astype(BF16)
    p['CG_b'] = nrm(ks[5], (1, NUM_FIBER))
    p['core_w'] = conv_w(ks[6], 1, 64, 5).reshape(1, 25 * 64).astype(BF16)
    p['core_b'] = nrm(ks[7], (1, 1))
    p['B_w'] = conv_w(ks[8], HID, 64, 3).astype(BF16)                  # (576,128)
    p['B_b'] = nrm(ks[9], (1, HID))
    # ensemble convs fused into one weight with Cout = ENSEMBLE
    p['C_w'] = jnp.concatenate([conv_w(ks[10 + i], 1, HID, 3)
                                for i in range(ENSEMBLE)], axis=1).astype(BF16)
    p['C_b'] = nrm(ks[13], (1, ENSEMBLE))
    p['W'] = jax.random.normal(ks[14], (ENSEMBLE, 1), dtype=F32)
    w_ih = nrm(ks[15], (4 * HID, HID))
    b_ih = nrm(ks[16], (4 * HID,))
    b_hh = nrm(ks[18], (4 * HID,))
    p['lstm_w_ih3'] = w_ih[:, :ENSEMBLE].T.astype(BF16)                # (3,512)
    p['lstm_b'] = (b_ih + b_hh).reshape(1, 4 * HID)
    p['I_w'] = nrm(ks[19], (1, 1))
    p['I_b'] = nrm(ks[20], (1,))
    p['hyper1_w'] = nrm(ks[21], (64, HID)).astype(BF16)
    p['hyper1_b'] = nrm(ks[22], (1, HID))
    p['hyper2_w'] = nrm(ks[23], (HID, 10)).astype(BF16)
    p['hyper2_b'] = nrm(ks[24], (1, 10))
    p['theta_base'] = jnp.zeros((1,), F32)
    return p


# --------------------------------- forward -----------------------------------
def forward(params, L, A):
    Bn = L.shape[0]
    Lh = jnp.transpose(L, (0, 2, 3, 1))                                # NCHW->NHWC

    # --- kernel A: conv D + global pool + hypernet + P + J_mean -------------
    pL = im2col_3x3(Lh)                                                # (B,HW,27)
    pL = jnp.pad(pL, ((0, 0), (0, 0), (0, 32 - pL.shape[-1]))).astype(BF16)
    P, x3, jmean3 = _call_A(pL, params)
    x = x3[:, 0, :]                                                    # (B,10)
    J_mean = jmean3[:, 0, :]                                           # (B,1)
    Pimg = P.reshape(Bn, H_SP, W_SP, 64)

    # --- J_mode histogram (cheap XLA reductions, no big one-hot) ------------
    # TODO(synk): reference torch.histc is a global 1-D histogram followed by
    # argmax(dim=1); implemented as a per-sample 10-bin histogram over [0, 1].
    flat = P.reshape(Bn, -1)
    valid = (flat >= 0.0) & (flat <= 1.0)
    idx = jnp.clip(jnp.floor(flat * 10.0), 0, 9).astype(jnp.int32)
    hist = jnp.stack([jnp.sum(jnp.where((idx == k) & valid, 1.0, 0.0), axis=1)
                      for k in range(10)], axis=1)
    J_mode = jnp.argmax(hist, axis=1).astype(F32)[:, None]
    J = jnp.concatenate([J_mean, J_mode], axis=1)                      # (B,2)

    # --- kernel B: conv E (*x_E) -> zone softmax -> masked_P ----------------
    pP = im2col_3x3(Pimg).astype(BF16)                                 # (B,HW,576)
    Fz, masked, fsum = _call_B(pP, P, x3, params)

    # 5x5 window means of P for conv_core's spatial mean (exact by linearity)
    Pp = jnp.pad(Pimg, ((0, 0), (2, 2), (2, 2), (0, 0)))
    ws = jnp.stack([jnp.mean(Pp[:, dy:dy + H_SP, dx:dx + W_SP, :], axis=(1, 2))
                    for dy in range(5) for dx in range(5)], axis=1)    # (B,25,64)
    wsmean = ws.reshape(Bn, 1, 25 * 64).astype(BF16)

    # --- kernel C: conv B + C_G / G + core / H ------------------------------
    maskedimg = masked.reshape(Bn, H_SP, W_SP, 64)
    pMP = im2col_3x3(maskedimg).astype(BF16)                           # (B,HW,576)
    flatm = masked.reshape(Bn, 1, 64 * HW).astype(BF16)
    M, G3, H3 = _call_C(pMP, flatm, wsmean, x3, params)
    G = G3[:, 0, :]                                                    # (B,5)
    H_out = H3[:, 0, 0]                                                # (B,)

    # --- kernel D: fused ensemble convs + K + Kz_mean + LSTM ----------------
    Mimg = M.reshape(Bn, H_SP, W_SP, HID)
    pM = im2col_3x3(Mimg).astype(BF16)                                 # (B,HW,1152)
    K3, Kzm3, h3 = _call_D(pM, fsum, x3, params)
    K = K3[:, 0, :]                                                    # (B,3)
    Kz_mean = Kzm3[:, 0, :]                                            # (B,3)
    h_t = h3[:, 0, :]                                                  # (B,128)

    x_ens, x_theta, x_A = x[:, 6:7], x[:, 7:8], x[:, 8:9]

    # theta — TODO(synk): reference .t() on a 3-D tensor is invalid; per-sample.
    theta = jnp.sum(J, axis=1, keepdims=True) * x_theta + params['theta_base']

    diff = K[:, :, None] - theta[:, :, None]                           # (B,3,1)
    Q = (diff * params['I_w'][0, 0] + params['I_b'][0] > 0).astype(F32)

    temporal_K = (h_t * x_A)[:, :ENSEMBLE]
    K_A = jnp.where(jnp.mean(A) > 0,
                    A[:, None] * temporal_K + (1.0 - A[:, None]) * K,
                    K)

    O = jnp.sum(Kz_mean * params['W'][:, 0][None, :] * x_ens, axis=1)  # (B,)

    # TODO(synk): reference V / N_noise use a Conv2d constructed inside forward
    # with fresh random weights and are never returned; skipped as dead code.
    return {'P': jnp.transpose(Pimg, (0, 3, 1, 2)),
            'J': J,
            'F': jnp.transpose(Fz.reshape(Bn, H_SP, W_SP, NUM_ZONES),
                               (0, 3, 1, 2)),
            'G': G,
            'H': H_out,
            'M': jnp.transpose(Mimg, (0, 3, 1, 2)),
            'K': K, 'Q': Q, 'K_A': K_A, 'O': O}


# ----------------------------------- main ------------------------------------
if __name__ == "__main__":
    key = jax.random.PRNGKey(0)
    k_L, k_A = jax.random.split(key)
    L = jax.random.normal(k_L, (B_SZ, IN_CH, H_SP, W_SP), dtype=jnp.float32)
    A = jax.random.uniform(k_A, (B_SZ,), dtype=jnp.float32)

    params = init_params(jax.random.PRNGKey(42))

    out = jax.jit(forward)(params, L, A)
    out = jax.block_until_ready(out)

    # sanity checks on shapes / values
    assert out['P'].shape == (B_SZ, 64, H_SP, W_SP)
    assert out['F'].shape == (B_SZ, NUM_ZONES, H_SP, W_SP)
    assert out['G'].shape == (B_SZ, NUM_FIBER)
    assert out['M'].shape == (B_SZ, HID, H_SP, W_SP)
    assert out['K'].shape == (B_SZ, ENSEMBLE)
    assert out['Q'].shape == (B_SZ, ENSEMBLE, 1)
    assert out['K_A'].shape == (B_SZ, ENSEMBLE)
    assert out['J'].shape == (B_SZ, 2)
    assert out['H'].shape == (B_SZ,)
    assert out['O'].shape == (B_SZ,)
    assert all(bool(jnp.all(jnp.isfinite(v))) for v in out.values())
    print("KERNEL_OK")
</pallas_src>

<mosaic_0001>
module attributes {stable_mosaic.version = 11 : i64} {
  func.func @_kernel_A(%arg0: i32, %arg1: memref<1x256x32xbf16, #tpu.memory_space<vmem>>, %arg2: memref<32x64xbf16, #tpu.memory_space<vmem>>, %arg3: memref<1x64xf32, #tpu.memory_space<vmem>>, %arg4: memref<64x128xbf16, #tpu.memory_space<vmem>>, %arg5: memref<1x128xf32, #tpu.memory_space<vmem>>, %arg6: memref<128x10xbf16, #tpu.memory_space<vmem>>, %arg7: memref<1x10xf32, #tpu.memory_space<vmem>>, %arg8: memref<1x256x64xf32, #tpu.memory_space<vmem>>, %arg9: memref<1x1x10xf32, #tpu.memory_space<vmem>>, %arg10: memref<1x1x1xf32, #tpu.memory_space<vmem>>) attributes {dimension_semantics = [#tpu.dimension_semantics<parallel>], iteration_bounds = array<i64: 2>, scalar_prefetch = 0 : i64, scratch_operands = 0 : i64, tpu.core_type = #tpu.core_type<tc>, window_params = [{transform_indices = @transform_0, window_bounds = array<i64: 1, 256, 32>}, {pipeline_mode = #tpu.pipeline_mode<synchronous>, transform_indices = @transform_1, window_bounds = array<i64: 32, 64>}, {pipeline_mode = #tpu.pipeline_mode<synchronous>, transform_indices = @transform_2, window_bounds = array<i64: 1, 64>}, {pipeline_mode = #tpu.pipeline_mode<synchronous>, transform_indices = @transform_3, window_bounds = array<i64: 64, 128>}, {pipeline_mode = #tpu.pipeline_mode<synchronous>, transform_indices = @transform_4, window_bounds = array<i64: 1, 128>}, {pipeline_mode = #tpu.pipeline_mode<synchronous>, transform_indices = @transform_5, window_bounds = array<i64: 128, 10>}, {pipeline_mode = #tpu.pipeline_mode<synchronous>, transform_indices = @transform_6, window_bounds = array<i64: 1, 10>}, {transform_indices = @transform_7, window_bounds = array<i64: 1, 256, 64>}, {transform_indices = @transform_8, window_bounds = array<i64: 1, 1, 10>}, {transform_indices = @transform_9, window_bounds = array<i64: 1, 1, 1>}]} {
    %c0 = arith.constant 0 : index
    %c0_0 = arith.constant 0 : index
    %c0_1 = arith.constant 0 : index
    %0 = vector.load %arg1[%c0, %c0_0, %c0_1] : memref<1x256x32xbf16, #tpu.memory_space<vmem>>, vector<1x256x32xbf16>
    %1 = vector.shape_cast %0 : vector<1x256x32xbf16> to vector<256x32xbf16>
    %c0_2 = arith.constant 0 : index
    %c0_3 = arith.constant 0 : index
    %2 = vector.load %arg2[%c0_2, %c0_3] : memref<32x64xbf16, #tpu.memory_space<vmem>>, vector<32x64xbf16>
    %cst = arith.constant dense<0.000000e+00> : vector<256x64xf32>
    %3 = tpu.matmul %1, %2, %cst {dimension_numbers = #tpu.dot_dimension_numbers<[1], [0], [0], [1], [0, 0, 1, 1], [], []>} : vector<256x32xbf16>, vector<32x64xbf16>, vector<256x64xf32> -> vector<256x64xf32>
    %c0_4 = arith.constant 0 : index
    %c0_5 = arith.constant 0 : index
    %4 = vector.load %arg3[%c0_4, %c0_5] : memref<1x64xf32, #tpu.memory_space<vmem>>, vector<1x64xf32>
    %5 = vector.broadcast %4 : vector<1x64xf32> to vector<256x64xf32>
    %6 = arith.addf %3, %5 : vector<256x64xf32>
    %cst_6 = arith.constant dense<0.000000e+00> : vector<64xf32>
    %7 = vector.multi_reduction <add>, %6, %cst_6 [0] : vector<256x64xf32> to vector<64xf32>
    %8 = vector.shape_cast %7 : vector<64xf32> to vector<1x64xf32>
    %cst_7 = arith.constant 2.560000e+02 : f32
    %9 = vector.broadcast %cst_7 : f32 to vector<1x64xf32>
    %10 = arith.divf %8, %9 : vector<1x64xf32>
    %11 = arith.truncf %10 : vector<1x64xf32> to vector<1x64xbf16>
    %c0_8 = arith.constant 0 : index
    %c0_9 = arith.constant 0 : index
    %12 = vector.load %arg4[%c0_8, %c0_9] : memref<64x128xbf16, #tpu.memory_space<vmem>>, vector<64x128xbf16>
    %cst_10 = arith.constant dense<0.000000e+00> : vector<1x128xf32>
    %13 = tpu.matmul %11, %12, %cst_10 {dimension_numbers = #tpu.dot_dimension_numbers<[1], [0], [0], [1], [0, 0, 1, 1], [], []>} : vector<1x64xbf16>, vector<64x128xbf16>, vector<1x128xf32> -> vector<1x128xf32>
    %c0_11 = arith.constant 0 : index
    %c0_12 = arith.constant 0 : index
    %14 = vector.load %arg5[%c0_11, %c0_12] : memref<1x128xf32, #tpu.memory_space<vmem>>, vector<1x128xf32>
    %15 = arith.addf %13, %14 : vector<1x128xf32>
    %cst_13 = arith.constant 0.000000e+00 : f32
    %16 = vector.broadcast %cst_13 : f32 to vector<1x128xf32>
    %17 = arith.maximumf %15, %16 : vector<1x128xf32>
    %18 = arith.truncf %17 : vector<1x128xf32> to vector<1x128xbf16>
    %c0_14 = arith.constant 0 : index
    %c0_15 = arith.constant 0 : index
    %19 = vector.load %arg6[%c0_14, %c0_15] : memref<128x10xbf16, #tpu.memory_space<vmem>>, vector<128x10xbf16>
    %cst_16 = arith.constant dense<0.000000e+00> : vector<1x10xf32>
    %20 = tpu.matmul %18, %19, %cst_16 {dimension_numbers = #tpu.dot_dimension_numbers<[1], [0], [0], [1], [0, 0, 1, 1], [], []>} : vector<1x128xbf16>, vector<128x10xbf16>, vector<1x10xf32> -> vector<1x10xf32>
    %c0_17 = arith.constant 0 : index
    %c0_18 = arith.constant 0 : index
    %21 = vector.load %arg7[%c0_17, %c0_18] : memref<1x10xf32, #tpu.memory_space<vmem>>, vector<1x10xf32>
    %22 = arith.addf %20, %21 : vector<1x10xf32>
    %c0_19 = arith.constant 0 : index
    %c0_20 = arith.constant 0 : index
    %c0_21 = arith.constant 0 : index
    %23 = vector.load %arg9[%c0_19, %c0_20, %c0_21] : memref<1x1x10xf32, #tpu.memory_space<vmem>>, vector<1x1x10xf32>
    %24 = vector.shape_cast %23 : vector<1x1x10xf32> to vector<1x10xf32>
    %25 = vector.shape_cast %22 : vector<1x10xf32> to vector<1x1x10xf32>
    tpu.vector_store %arg9[%c0_19, %c0_20, %c0_21], %25 {strides = array<i32>} : memref<1x1x10xf32, #tpu.memory_space<vmem>>, vector<1x1x10xf32>,
    %26 = vector.extract_strided_slice %22 {offsets = [0, 0], sizes = [1, 1], strides = [1, 1]} : vector<1x10xf32> to vector<1x1xf32>
    %27 = vector.broadcast %26 : vector<1x1xf32> to vector<256x64xf32>
    %28 = arith.mulf %6, %27 : vector<256x64xf32>
    %c0_22 = arith.constant 0 : index
    %c0_23 = arith.constant 0 : index
    %c0_24 = arith.constant 0 : index
    %29 = vector.load %arg8[%c0_22, %c0_23, %c0_24] : memref<1x256x64xf32, #tpu.memory_space<vmem>>, vector<1x256x64xf32>
    %30 = vector.shape_cast %29 : vector<1x256x64xf32> to vector<256x64xf32>
    %31 = vector.shape_cast %28 : vector<256x64xf32> to vector<1x256x64xf32>
    tpu.vector_store %arg8[%c0_22, %c0_23, %c0_24], %31 {strides = array<i32>} : memref<1x256x64xf32, #tpu.memory_space<vmem>>, vector<1x256x64xf32>,
    %cst_25 = arith.constant dense<0.000000e+00> : vector<1xf32>
    %32 = vector.multi_reduction <add>, %10, %cst_25 [1] : vector<1x64xf32> to vector<1xf32>
    %33 = vector.shape_cast %32 : vector<1xf32> to vector<1x1xf32>
    %cst_26 = arith.constant 6.400000e+01 : f32
    %34 = vector.broadcast %cst_26 : f32 to vector<1x1xf32>
    %35 = arith.divf %33, %34 : vector<1x1xf32>
    %36 = arith.mulf %26, %35 : vector<1x1xf32>
    %c0_27 = arith.constant 0 : index
    %c0_28 = arith.constant 0 : index
    %c0_29 = arith.constant 0 : index
    %37 = vector.load %arg10[%c0_27, %c0_28, %c0_29] : memref<1x1x1xf32, #tpu.memory_space<vmem>>, vector<1x1x1xf32>
    %38 = vector.shape_cast %37 : vector<1x1x1xf32> to vector<1x1xf32>
    %39 = vector.shape_cast %36 : vector<1x1xf32> to vector<1x1x1xf32>
    tpu.vector_store %arg10[%c0_27, %c0_28, %c0_29], %39 {strides = array<i32>} : memref<1x1x1xf32, #tpu.memory_space<vmem>>, vector<1x1x1xf32>,
    return
  }
  func.func @transform_0(%arg0: i32) -> (i32, i32, i32) {
    %c0_i32 = arith.constant 0 : i32
    %c0_i32_0 = arith.constant 0 : i32
    %c0_i32_1 = arith.constant 0 : i32
    return %arg0, %c0_i32, %c0_i32_0 : i32, i32, i32
  }
  func.func @transform_1(%arg0: i32) -> (i32, i32) {
    %c0_i32 = arith.constant 0 : i32
    %c0_i32_0 = arith.constant 0 : i32
    %c0_i32_1 = arith.constant 0 : i32
    return %c0_i32, %c0_i32_0 : i32, i32
  }
  func.func @transform_2(%arg0: i32) -> (i32, i32) {
    %c0_i32 = arith.constant 0 : i32
    %c0_i32_0 = arith.constant 0 : i32
    %c0_i32_1 = arith.constant 0 : i32
    return %c0_i32, %c0_i32_0 : i32, i32
  }
  func.func @transform_3(%arg0: i32) -> (i32, i32) {
    %c0_i32 = arith.constant 0 : i32
    %c0_i32_0 = arith.constant 0 : i32
    %c0_i32_1 = arith.constant 0 : i32
    return %c0_i32, %c0_i32_0 : i32, i32
  }
  func.func @transform_4(%arg0: i32) -> (i32, i32) {
    %c0_i32 = arith.constant 0 : i32
    %c0_i32_0 = arith.constant 0 : i32
    %c0_i32_1 = arith.constant 0 : i32
    return %c0_i32, %c0_i32_0 : i32, i32
  }
  func.func @transform_5(%arg0: i32) -> (i32, i32) {
    %c0_i32 = arith.constant 0 : i32
    %c0_i32_0 = arith.constant 0 : i32
    %c0_i32_1 = arith.constant 0 : i32
    return %c0_i32, %c0_i32_0 : i32, i32
  }
  func.func @transform_6(%arg0: i32) -> (i32, i32) {
    %c0_i32 = arith.constant 0 : i32
    %c0_i32_0 = arith.constant 0 : i32
    %c0_i32_1 = arith.constant 0 : i32
    return %c0_i32, %c0_i32_0 : i32, i32
  }
  func.func @transform_7(%arg0: i32) -> (i32, i32, i32) {
    %c0_i32 = arith.constant 0 : i32
    %c0_i32_0 = arith.constant 0 : i32
    %c0_i32_1 = arith.constant 0 : i32
    return %arg0, %c0_i32, %c0_i32_0 : i32, i32, i32
  }
  func.func @transform_8(%arg0: i32) -> (i32, i32, i32) {
    %c0_i32 = arith.constant 0 : i32
    %c0_i32_0 = arith.constant 0 : i32
    %c0_i32_1 = arith.constant 0 : i32
    return %arg0, %c0_i32, %c0_i32_0 : i32, i32, i32
  }
  func.func @transform_9(%arg0: i32) -> (i32, i32, i32) {
    %c0_i32 = arith.constant 0 : i32
    %c0_i32_0 = arith.constant 0 : i32
    %c0_i32_1 = arith.constant 0 : i32
    return %arg0, %c0_i32, %c0_i32_0 : i32, i32, i32
  }
}

module attributes {stable_mosaic.version = 11 : i64} {
  func.func @_kernel_B(%arg0: i32, %arg1: memref<1x256x576xbf16, #tpu.memory_space<vmem>>, %arg2: memref<576x10xbf16, #tpu.memory_space<vmem>>, %arg3: memref<1x10xf32, #tpu.memory_space<vmem>>, %arg4: memref<1x256x64xf32, #tpu.memory_space<vmem>>, %arg5: memref<1x1x10xf32, #tpu.memory_space<vmem>>, %arg6: memref<1x256x10xf32, #tpu.memory_space<vmem>>, %arg7: memref<1x256x64xf32, #tpu.memory_space<vmem>>, %arg8: memref<1x256x1xf32, #tpu.memory_space<vmem>>) attributes {dimension_semantics = [#tpu.dimension_semantics<parallel>], iteration_bounds = array<i64: 2>, scalar_prefetch = 0 : i64, scratch_operands = 0 : i64, tpu.core_type = #tpu.core_type<tc>, window_params = [{transform_indices = @transform_0, window_bounds = array<i64: 1, 256, 576>}, {pipeline_mode = #tpu.pipeline_mode<synchronous>, transform_indices = @transform_1, window_bounds = array<i64: 576, 10>}, {pipeline_mode = #tpu.pipeline_mode<synchronous>, transform_indices = @transform_2, window_bounds = array<i64: 1, 10>}, {transform_indices = @transform_3, window_bounds = array<i64: 1, 256, 64>}, {transform_indices = @transform_4, window_bounds = array<i64: 1, 1, 10>}, {transform_indices = @transform_5, window_bounds = array<i64: 1, 256, 10>}, {transform_indices = @transform_6, window_bounds = array<i64: 1, 256, 64>}, {transform_indices = @transform_7, window_bounds = array<i64: 1, 256, 1>}]} {
    %c0 = arith.constant 0 : index
    %c0_0 = arith.constant 0 : index
    %c0_1 = arith.constant 0 : index
    %0 = vector.load %arg5[%c0, %c0_0, %c0_1] : memref<1x1x10xf32, #tpu.memory_space<vmem>>, vector<1x1x10xf32>
    %1 = vector.shape_cast %0 : vector<1x1x10xf32> to vector<1x10xf32>
    %2 = vector.extract_strided_slice %1 {offsets = [0, 1], sizes = [1, 1], strides = [1, 1]} : vector<1x10xf32> to vector<1x1xf32>
    %c0_2 = arith.constant 0 : index
    %c0_3 = arith.constant 0 : index
    %c0_4 = arith.constant 0 : index
    %3 = vector.load %arg1[%c0_2, %c0_3, %c0_4] : memref<1x256x576xbf16, #tpu.memory_space<vmem>>, vector<1x256x576xbf16>
    %4 = vector.shape_cast %3 : vector<1x256x576xbf16> to vector<256x576xbf16>
    %c0_5 = arith.constant 0 : index
    %c0_6 = arith.constant 0 : index
    %5 = vector.load %arg2[%c0_5, %c0_6] : memref<576x10xbf16, #tpu.memory_space<vmem>>, vector<576x10xbf16>
    %cst = arith.constant dense<0.000000e+00> : vector<256x10xf32>
    %6 = tpu.matmul %4, %5, %cst {dimension_numbers = #tpu.dot_dimension_numbers<[1], [0], [0], [1], [0, 0, 1, 1], [], []>} : vector<256x576xbf16>, vector<576x10xbf16>, vector<256x10xf32> -> vector<256x10xf32>
    %7 = vector.broadcast %2 : vector<1x1xf32> to vector<256x10xf32>
    %8 = arith.mulf %6, %7 : vector<256x10xf32>
    %c0_7 = arith.constant 0 : index
    %c0_8 = arith.constant 0 : index
    %9 = vector.load %arg3[%c0_7, %c0_8] : memref<1x10xf32, #tpu.memory_space<vmem>>, vector<1x10xf32>
    %10 = vector.broadcast %9 : vector<1x10xf32> to vector<256x10xf32>
    %11 = arith.addf %8, %10 : vector<256x10xf32>
    %cst_9 = arith.constant dense<0xFF800000> : vector<256xf32>
    %12 = vector.multi_reduction <maximumf>, %11, %cst_9 [1] : vector<256x10xf32> to vector<256xf32>
    %13 = vector.shape_cast %12 : vector<256xf32> to vector<256x1xf32>
    %14 = vector.broadcast %13 : vector<256x1xf32> to vector<256x10xf32>
    %15 = arith.subf %11, %14 : vector<256x10xf32>
    %16 = math.exp %15 : vector<256x10xf32>
    %cst_10 = arith.constant dense<0.000000e+00> : vector<256xf32>
    %17 = vector.multi_reduction <add>, %16, %cst_10 [1] : vector<256x10xf32> to vector<256xf32>
    %18 = vector.shape_cast %17 : vector<256xf32> to vector<256x1xf32>
    %19 = vector.broadcast %18 : vector<256x1xf32> to vector<256x10xf32>
    %20 = arith.divf %16, %19 : vector<256x10xf32>
    %c0_11 = arith.constant 0 : index
    %c0_12 = arith.constant 0 : index
    %c0_13 = arith.constant 0 : index
    %21 = vector.load %arg6[%c0_11, %c0_12, %c0_13] : memref<1x256x10xf32, #tpu.memory_space<vmem>>, vector<1x256x10xf32>
    %22 = vector.shape_cast %21 : vector<1x256x10xf32> to vector<256x10xf32>
    %23 = vector.shape_cast %20 : vector<256x10xf32> to vector<1x256x10xf32>
    tpu.vector_store %arg6[%c0_11, %c0_12, %c0_13], %23 {strides = array<i32>} : memref<1x256x10xf32, #tpu.memory_space<vmem>>, vector<1x256x10xf32>,
    %cst_14 = arith.constant dense<0.000000e+00> : vector<256xf32>
    %24 = vector.multi_reduction <add>, %20, %cst_14 [1] : vector<256x10xf32> to vector<256xf32>
    %25 = vector.shape_cast %24 : vector<256xf32> to vector<256x1xf32>
    %c0_15 = arith.constant 0 : index
    %c0_16 = arith.constant 0 : index
    %c0_17 = arith.constant 0 : index
    %26 = vector.load %arg8[%c0_15, %c0_16, %c0_17] : memref<1x256x1xf32, #tpu.memory_space<vmem>>, vector<1x256x1xf32>
    %27 = vector.shape_cast %26 : vector<1x256x1xf32> to vector<256x1xf32>
    %28 = vector.shape_cast %25 : vector<256x1xf32> to vector<1x256x1xf32>
    tpu.vector_store %arg8[%c0_15, %c0_16, %c0_17], %28 {strides = array<i32>} : memref<1x256x1xf32, #tpu.memory_space<vmem>>, vector<1x256x1xf32>,
    %c0_18 = arith.constant 0 : index
    %c0_19 = arith.constant 0 : index
    %c0_20 = arith.constant 0 : index
    %29 = vector.load %arg4[%c0_18, %c0_19, %c0_20] : memref<1x256x64xf32, #tpu.memory_space<vmem>>, vector<1x256x64xf32>
    %30 = vector.shape_cast %29 : vector<1x256x64xf32> to vector<256x64xf32>
    %31 = vector.broadcast %25 : vector<256x1xf32> to vector<256x64xf32>
    %32 = arith.mulf %30, %31 : vector<256x64xf32>
    %c0_21 = arith.constant 0 : index
    %c0_22 = arith.constant 0 : index
    %c0_23 = arith.constant 0 : index
    %33 = vector.load %arg7[%c0_21, %c0_22, %c0_23] : memref<1x256x64xf32, #tpu.memory_space<vmem>>, vector<1x256x64xf32>
    %34 = vector.shape_cast %33 : vector<1x256x64xf32> to vector<256x64xf32>
    %35 = vector.shape_cast %32 : vector<256x64xf32> to vector<1x256x64xf32>
    tpu.vector_store %arg7[%c0_21, %c0_22, %c0_23], %35 {strides = array<i32>} : memref<1x256x64xf32, #tpu.memory_space<vmem>>, vector<1x256x64xf32>,
    return
  }
  func.func @transform_0(%arg0: i32) -> (i32, i32, i32) {
    %c0_i32 = arith.constant 0 : i32
    %c0_i32_0 = arith.constant 0 : i32
    %c0_i32_1 = arith.constant 0 : i32
    return %arg0, %c0_i32, %c0_i32_0 : i32, i32, i32
  }
  func.func @transform_1(%arg0: i32) -> (i32, i32) {
    %c0_i32 = arith.constant 0 : i32
    %c0_i32_0 = arith.constant 0 : i32
    %c0_i32_1 = arith.constant 0 : i32
    return %c0_i32, %c0_i32_0 : i32, i32
  }
  func.func @transform_2(%arg0: i32) -> (i32, i32) {
    %c0_i32 = arith.constant 0 : i32
    %c0_i32_0 = arith.constant 0 : i32
    %c0_i32_1 = arith.constant 0 : i32
    return %c0_i32, %c0_i32_0 : i32, i32
  }
  func.func @transform_3(%arg0: i32) -> (i32, i32, i32) {
    %c0_i32 = arith.constant 0 : i32
    %c0_i32_0 = arith.constant 0 : i32
    %c0_i32_1 = arith.constant 0 : i32
    return %arg0, %c0_i32, %c0_i32_0 : i32, i32, i32
  }
  func.func @transform_4(%arg0: i32) -> (i32, i32, i32) {
    %c0_i32 = arith.constant 0 : i32
    %c0_i32_0 = arith.constant 0 : i32
    %c0_i32_1 = arith.constant 0 : i32
    return %arg0, %c0_i32, %c0_i32_0 : i32, i32, i32
  }
  func.func @transform_5(%arg0: i32) -> (i32, i32, i32) {
    %c0_i32 = arith.constant 0 : i32
    %c0_i32_0 = arith.constant 0 : i32
    %c0_i32_1 = arith.constant 0 : i32
    return %arg0, %c0_i32, %c0_i32_0 : i32, i32, i32
  }
  func.func @transform_6(%arg0: i32) -> (i32, i32, i32) {
    %c0_i32 = arith.constant 0 : i32
    %c0_i32_0 = arith.constant 0 : i32
    %c0_i32_1 = arith.constant 0 : i32
    return %arg0, %c0_i32, %c0_i32_0 : i32, i32, i32
  }
  func.func @transform_7(%arg0: i32) -> (i32, i32, i32) {
    %c0_i32 = arith.constant 0 : i32
    %c0_i32_0 = arith.constant 0 : i32
    %c0_i32_1 = arith.constant 0 : i32
    return %arg0, %c0_i32, %c0_i32_0 : i32, i32, i32
  }
}

module attributes {stable_mosaic.version = 11 : i64} {
  func.func @_kernel_C(%arg0: i32, %arg1: memref<1x256x576xbf16, #tpu.memory_space<vmem>>, %arg2: memref<576x128xbf16, #tpu.memory_space<vmem>>, %arg3: memref<1x128xf32, #tpu.memory_space<vmem>>, %arg4: memref<1x1x16384xbf16, #tpu.memory_space<vmem>>, %arg5: memref<16384x5xbf16, #tpu.memory_space<vmem>>, %arg6: memref<1x5xf32, #tpu.memory_space<vmem>>, %arg7: memref<1x1x1600xbf16, #tpu.memory_space<vmem>>, %arg8: memref<1x1600xbf16, #tpu.memory_space<vmem>>, %arg9: memref<1x1xf32, #tpu.memory_space<vmem>>, %arg10: memref<1x1x10xf32, #tpu.memory_space<vmem>>, %arg11: memref<1x256x128xf32, #tpu.memory_space<vmem>>, %arg12: memref<1x1x5xf32, #tpu.memory_space<vmem>>, %arg13: memref<1x1x1xf32, #tpu.memory_space<vmem>>) attributes {dimension_semantics = [#tpu.dimension_semantics<parallel>], iteration_bounds = array<i64: 2>, scalar_prefetch = 0 : i64, scratch_operands = 0 : i64, tpu.core_type = #tpu.core_type<tc>, window_params = [{transform_indices = @transform_0, window_bounds = array<i64: 1, 256, 576>}, {pipeline_mode = #tpu.pipeline_mode<synchronous>, transform_indices = @transform_1, window_bounds = array<i64: 576, 128>}, {pipeline_mode = #tpu.pipeline_mode<synchronous>, transform_indices = @transform_2, window_bounds = array<i64: 1, 128>}, {transform_indices = @transform_3, window_bounds = array<i64: 1, 1, 16384>}, {pipeline_mode = #tpu.pipeline_mode<synchronous>, transform_indices = @transform_4, window_bounds = array<i64: 16384, 5>}, {pipeline_mode = #tpu.pipeline_mode<synchronous>, transform_indices = @transform_5, window_bounds = array<i64: 1, 5>}, {transform_indices = @transform_6, window_bounds = array<i64: 1, 1, 1600>}, {pipeline_mode = #tpu.pipeline_mode<synchronous>, transform_indices = @transform_7, window_bounds = array<i64: 1, 1600>}, {pipeline_mode = #tpu.pipeline_mode<synchronous>, transform_indices = @transform_8, window_bounds = array<i64: 1, 1>}, {transform_indices = @transform_9, window_bounds = array<i64: 1, 1, 10>}, {transform_indices = @transform_10, window_bounds = array<i64: 1, 256, 128>}, {transform_indices = @transform_11, window_bounds = array<i64: 1, 1, 5>}, {transform_indices = @transform_12, window_bounds = array<i64: 1, 1, 1>}]} {
    %c0 = arith.constant 0 : index
    %c0_0 = arith.constant 0 : index
    %c0_1 = arith.constant 0 : index
    %0 = vector.load %arg10[%c0, %c0_0, %c0_1] : memref<1x1x10xf32, #tpu.memory_space<vmem>>, vector<1x1x10xf32>
    %1 = vector.shape_cast %0 : vector<1x1x10xf32> to vector<1x10xf32>
    %2 = vector.extract_strided_slice %1 {offsets = [0, 2], sizes = [1, 1], strides = [1, 1]} : vector<1x10xf32> to vector<1x1xf32>
    %3 = vector.extract_strided_slice %1 {offsets = [0, 3], sizes = [1, 1], strides = [1, 1]} : vector<1x10xf32> to vector<1x1xf32>
    %4 = vector.extract_strided_slice %1 {offsets = [0, 4], sizes = [1, 1], strides = [1, 1]} : vector<1x10xf32> to vector<1x1xf32>
    %c0_2 = arith.constant 0 : index
    %c0_3 = arith.constant 0 : index
    %c0_4 = arith.constant 0 : index
    %5 = vector.load %arg1[%c0_2, %c0_3, %c0_4] : memref<1x256x576xbf16, #tpu.memory_space<vmem>>, vector<1x256x576xbf16>
    %6 = vector.shape_cast %5 : vector<1x256x576xbf16> to vector<256x576xbf16>
    %c0_5 = arith.constant 0 : index
    %c0_6 = arith.constant 0 : index
    %7 = vector.load %arg2[%c0_5, %c0_6] : memref<576x128xbf16, #tpu.memory_space<vmem>>, vector<576x128xbf16>
    %cst = arith.constant dense<0.000000e+00> : vector<256x128xf32>
    %8 = tpu.matmul %6, %7, %cst {dimension_numbers = #tpu.dot_dimension_numbers<[1], [0], [0], [1], [0, 0, 1, 1], [], []>} : vector<256x576xbf16>, vector<576x128xbf16>, vector<256x128xf32> -> vector<256x128xf32>
    %c0_7 = arith.constant 0 : index
    %c0_8 = arith.constant 0 : index
    %9 = vector.load %arg3[%c0_7, %c0_8] : memref<1x128xf32, #tpu.memory_space<vmem>>, vector<1x128xf32>
    %10 = vector.broadcast %9 : vector<1x128xf32> to vector<256x128xf32>
    %11 = arith.addf %8, %10 : vector<256x128xf32>
    %12 = vector.broadcast %4 : vector<1x1xf32> to vector<256x128xf32>
    %13 = arith.mulf %11, %12 : vector<256x128xf32>
    %c0_9 = arith.constant 0 : index
    %c0_10 = arith.constant 0 : index
    %c0_11 = arith.constant 0 : index
    %14 = vector.load %arg11[%c0_9, %c0_10, %c0_11] : memref<1x256x128xf32, #tpu.memory_space<vmem>>, vector<1x256x128xf32>
    %15 = vector.shape_cast %14 : vector<1x256x128xf32> to vector<256x128xf32>
    %16 = vector.shape_cast %13 : vector<256x128xf32> to vector<1x256x128xf32>
    tpu.vector_store %arg11[%c0_9, %c0_10, %c0_11], %16 {strides = array<i32>} : memref<1x256x128xf32, #tpu.memory_space<vmem>>, vector<1x256x128xf32>,
    %c0_12 = arith.constant 0 : index
    %c0_13 = arith.constant 0 : index
    %c0_14 = arith.constant 0 : index
    %17 = vector.load %arg4[%c0_12, %c0_13, %c0_14] : memref<1x1x16384xbf16, #tpu.memory_space<vmem>>, vector<1x1x16384xbf16>
    %18 = vector.shape_cast %17 : vector<1x1x16384xbf16> to vector<1x16384xbf16>
    %c0_15 = arith.constant 0 : index
    %c0_16 = arith.constant 0 : index
    %19 = vector.load %arg5[%c0_15, %c0_16] : memref<16384x5xbf16, #tpu.memory_space<vmem>>, vector<16384x5xbf16>
    %cst_17 = arith.constant dense<0.000000e+00> : vector<1x5xf32>
    %20 = tpu.matmul %18, %19, %cst_17 {dimension_numbers = #tpu.dot_dimension_numbers<[1], [0], [0], [1], [0, 0, 1, 1], [], []>} : vector<1x16384xbf16>, vector<16384x5xbf16>, vector<1x5xf32> -> vector<1x5xf32>
    %cst_18 = arith.constant 6.250000e-02 : f32
    %21 = vector.broadcast %cst_18 : f32 to vector<1x5xf32>
    %22 = arith.mulf %20, %21 : vector<1x5xf32>
    %c0_19 = arith.constant 0 : index
    %c0_20 = arith.constant 0 : index
    %23 = vector.load %arg6[%c0_19, %c0_20] : memref<1x5xf32, #tpu.memory_space<vmem>>, vector<1x5xf32>
    %24 = arith.addf %22, %23 : vector<1x5xf32>
    %25 = vector.broadcast %2 : vector<1x1xf32> to vector<1x5xf32>
    %26 = arith.mulf %24, %25 : vector<1x5xf32>
    %cst_21 = arith.constant dense<0xFF800000> : vector<1xf32>
    %27 = vector.multi_reduction <maximumf>, %26, %cst_21 [1] : vector<1x5xf32> to vector<1xf32>
    %28 = vector.shape_cast %27 : vector<1xf32> to vector<1x1xf32>
    %29 = vector.broadcast %28 : vector<1x1xf32> to vector<1x5xf32>
    %30 = arith.subf %26, %29 : vector<1x5xf32>
    %31 = math.exp %30 : vector<1x5xf32>
    %cst_22 = arith.constant dense<0.000000e+00> : vector<1xf32>
    %32 = vector.multi_reduction <add>, %31, %cst_22 [1] : vector<1x5xf32> to vector<1xf32>
    %33 = vector.shape_cast %32 : vector<1xf32> to vector<1x1xf32>
    %34 = vector.broadcast %33 : vector<1x1xf32> to vector<1x5xf32>
    %35 = arith.divf %31, %34 : vector<1x5xf32>
    %c0_23 = arith.constant 0 : index
    %c0_24 = arith.constant 0 : index
    %c0_25 = arith.constant 0 : index
    %36 = vector.load %arg12[%c0_23, %c0_24, %c0_25] : memref<1x1x5xf32, #tpu.memory_space<vmem>>, vector<1x1x5xf32>
    %37 = vector.shape_cast %36 : vector<1x1x5xf32> to vector<1x5xf32>
    %38 = vector.shape_cast %35 : vector<1x5xf32> to vector<1x1x5xf32>
    tpu.vector_store %arg12[%c0_23, %c0_24, %c0_25], %38 {strides = array<i32>} : memref<1x1x5xf32, #tpu.memory_space<vmem>>, vector<1x1x5xf32>,
    %c0_26 = arith.constant 0 : index
    %c0_27 = arith.constant 0 : index
    %c0_28 = arith.constant 0 : index
    %39 = vector.load %arg7[%c0_26, %c0_27, %c0_28] : memref<1x1x1600xbf16, #tpu.memory_space<vmem>>, vector<1x1x1600xbf16>
    %40 = vector.shape_cast %39 : vector<1x1x1600xbf16> to vector<1x1600xbf16>
    %41 = arith.extf %40 : vector<1x1600xbf16> to vector<1x1600xf32>
    %c0_29 = arith.constant 0 : index
    %c0_30 = arith.constant 0 : index
    %42 = vector.load %arg8[%c0_29, %c0_30] : memref<1x1600xbf16, #tpu.memory_space<vmem>>, vector<1x1600xbf16>
    %43 = arith.extf %42 : vector<1x1600xbf16> to vector<1x1600xf32>
    %44 = arith.mulf %41, %43 : vector<1x1600xf32>
    %cst_31 = arith.constant dense<0.000000e+00> : vector<1xf32>
    %45 = vector.multi_reduction <add>, %44, %cst_31 [1] : vector<1x1600xf32> to vector<1xf32>
    %46 = vector.shape_cast %45 : vector<1xf32> to vector<1x1xf32>
    %c0_32 = arith.constant 0 : index
    %c0_33 = arith.constant 0 : index
    %47 = vector.load %arg9[%c0_32, %c0_33] : memref<1x1xf32, #tpu.memory_space<vmem>>, vector<1x1xf32>
    %48 = arith.addf %46, %47 : vector<1x1xf32>
    %49 = vector.broadcast %48 : vector<1x1xf32> to vector<1x5xf32>
    %50 = arith.mulf %35, %49 : vector<1x5xf32>
    %cst_34 = arith.constant dense<0.000000e+00> : vector<1xf32>
    %51 = vector.multi_reduction <add>, %50, %cst_34 [1] : vector<1x5xf32> to vector<1xf32>
    %52 = vector.shape_cast %51 : vector<1xf32> to vector<1x1xf32>
    %cst_35 = arith.constant 5.000000e+00 : f32
    %53 = vector.broadcast %cst_35 : f32 to vector<1x1xf32>
    %54 = arith.divf %52, %53 : vector<1x1xf32>
    %55 = arith.mulf %54, %3 : vector<1x1xf32>
    %c0_36 = arith.constant 0 : index
    %c0_37 = arith.constant 0 : index
    %c0_38 = arith.constant 0 : index
    %56 = vector.load %arg13[%c0_36, %c0_37, %c0_38] : memref<1x1x1xf32, #tpu.memory_space<vmem>>, vector<1x1x1xf32>
    %57 = vector.shape_cast %56 : vector<1x1x1xf32> to vector<1x1xf32>
    %58 = vector.shape_cast %55 : vector<1x1xf32> to vector<1x1x1xf32>
    tpu.vector_store %arg13[%c0_36, %c0_37, %c0_38], %58 {strides = array<i32>} : memref<1x1x1xf32, #tpu.memory_space<vmem>>, vector<1x1x1xf32>,
    return
  }
  func.func @transform_0(%arg0: i32) -> (i32, i32, i32) {
    %c0_i32 = arith.constant 0 : i32
    %c0_i32_0 = arith.constant 0 : i32
    %c0_i32_1 = arith.constant 0 : i32
    return %arg0, %c0_i32, %c0_i32_0 : i32, i32, i32
  }
  func.func @transform_1(%arg0: i32) -> (i32, i32) {
    %c0_i32 = arith.constant 0 : i32
    %c0_i32_0 = arith.constant 0 : i32
    %c0_i32_1 = arith.constant 0 : i32
    return %c0_i32, %c0_i32_0 : i32, i32
  }
  func.func @transform_2(%arg0: i32) -> (i32, i32) {
    %c0_i32 = arith.constant 0 : i32
    %c0_i32_0 = arith.constant 0 : i32
    %c0_i32_1 = arith.constant 0 : i32
    return %c0_i32, %c0_i32_0 : i32, i32
  }
  func.func @transform_3(%arg0: i32) -> (i32, i32, i32) {
    %c0_i32 = arith.constant 0 : i32
    %c0_i32_0 = arith.constant 0 : i32
    %c0_i32_1 = arith.constant 0 : i32
    return %arg0, %c0_i32, %c0_i32_0 : i32, i32, i32
  }
  func.func @transform_4(%arg0: i32) -> (i32, i32) {
    %c0_i32 = arith.constant 0 : i32
    %c0_i32_0 = arith.constant 0 : i32
    %c0_i32_1 = arith.constant 0 : i32
    return %c0_i32, %c0_i32_0 : i32, i32
  }
  func.func @transform_5(%arg0: i32) -> (i32, i32) {
    %c0_i32 = arith.constant 0 : i32
    %c0_i32_0 = arith.constant 0 : i32
    %c0_i32_1 = arith.constant 0 : i32
    return %c0_i32, %c0_i32_0 : i32, i32
  }
  func.func @transform_6(%arg0: i32) -> (i32, i32, i32) {
    %c0_i32 = arith.constant 0 : i32
    %c0_i32_0 = arith.constant 0 : i32
    %c0_i32_1 = arith.constant 0 : i32
    return %arg0, %c0_i32, %c0_i32_0 : i32, i32, i32
  }
  func.func @transform_7(%arg0: i32) -> (i32, i32) {
    %c0_i32 = arith.constant 0 : i32
    %c0_i32_0 = arith.constant 0 : i32
    %c0_i32_1 = arith.constant 0 : i32
    return %c0_i32, %c0_i32_0 : i32, i32
  }
  func.func @transform_8(%arg0: i32) -> (i32, i32) {
    %c0_i32 = arith.constant 0 : i32
    %c0_i32_0 = arith.constant 0 : i32
    %c0_i32_1 = arith.constant 0 : i32
    return %c0_i32, %c0_i32_0 : i32, i32
  }
  func.func @transform_9(%arg0: i32) -> (i32, i32, i32) {
    %c0_i32 = arith.constant 0 : i32
    %c0_i32_0 = arith.constant 0 : i32
    %c0_i32_1 = arith.constant 0 : i32
    return %arg0, %c0_i32, %c0_i32_0 : i32, i32, i32
  }
  func.func @transform_10(%arg0: i32) -> (i32, i32, i32) {
    %c0_i32 = arith.constant 0 : i32
    %c0_i32_0 = arith.constant 0 : i32
    %c0_i32_1 = arith.constant 0 : i32
    return %arg0, %c0_i32, %c0_i32_0 : i32, i32, i32
  }
  func.func @transform_11(%arg0: i32) -> (i32, i32, i32) {
    %c0_i32 = arith.constant 0 : i32
    %c0_i32_0 = arith.constant 0 : i32
    %c0_i32_1 = arith.constant 0 : i32
    return %arg0, %c0_i32, %c0_i32_0 : i32, i32, i32
  }
  func.func @transform_12(%arg0: i32) -> (i32, i32, i32) {
    %c0_i32 = arith.constant 0 : i32
    %c0_i32_0 = arith.constant 0 : i32
    %c0_i32_1 = arith.constant 0 : i32
    return %arg0, %c0_i32, %c0_i32_0 : i32, i32, i32
  }
}

module attributes {stable_mosaic.version = 11 : i64} {
  func.func @_kernel_D(%arg0: i32, %arg1: memref<1x256x1152xbf16, #tpu.memory_space<vmem>>, %arg2: memref<1152x3xbf16, #tpu.memory_space<vmem>>, %arg3: memref<1x3xf32, #tpu.memory_space<vmem>>, %arg4: memref<1x256x1xf32, #tpu.memory_space<vmem>>, %arg5: memref<1x1x10xf32, #tpu.memory_space<vmem>>, %arg6: memref<3x512xbf16, #tpu.memory_space<vmem>>, %arg7: memref<1x512xf32, #tpu.memory_space<vmem>>, %arg8: memref<1x1x3xf32, #tpu.memory_space<vmem>>, %arg9: memref<1x1x3xf32, #tpu.memory_space<vmem>>, %arg10: memref<1x1x128xf32, #tpu.memory_space<vmem>>) attributes {dimension_semantics = [#tpu.dimension_semantics<parallel>], iteration_bounds = array<i64: 2>, scalar_prefetch = 0 : i64, scratch_operands = 0 : i64, tpu.core_type = #tpu.core_type<tc>, window_params = [{transform_indices = @transform_0, window_bounds = array<i64: 1, 256, 1152>}, {pipeline_mode = #tpu.pipeline_mode<synchronous>, transform_indices = @transform_1, window_bounds = array<i64: 1152, 3>}, {pipeline_mode = #tpu.pipeline_mode<synchronous>, transform_indices = @transform_2, window_bounds = array<i64: 1, 3>}, {transform_indices = @transform_3, window_bounds = array<i64: 1, 256, 1>}, {transform_indices = @transform_4, window_bounds = array<i64: 1, 1, 10>}, {pipeline_mode = #tpu.pipeline_mode<synchronous>, transform_indices = @transform_5, window_bounds = array<i64: 3, 512>}, {pipeline_mode = #tpu.pipeline_mode<synchronous>, transform_indices = @transform_6, window_bounds = array<i64: 1, 512>}, {transform_indices = @transform_7, window_bounds = array<i64: 1, 1, 3>}, {transform_indices = @transform_8, window_bounds = array<i64: 1, 1, 3>}, {transform_indices = @transform_9, window_bounds = array<i64: 1, 1, 128>}]} {
    %c0 = arith.constant 0 : index
    %c0_0 = arith.constant 0 : index
    %c0_1 = arith.constant 0 : index
    %0 = vector.load %arg5[%c0, %c0_0, %c0_1] : memref<1x1x10xf32, #tpu.memory_space<vmem>>, vector<1x1x10xf32>
    %1 = vector.shape_cast %0 : vector<1x1x10xf32> to vector<1x10xf32>
    %2 = vector.extract_strided_slice %1 {offsets = [0, 5], sizes = [1, 1], strides = [1, 1]} : vector<1x10xf32> to vector<1x1xf32>
    %c0_2 = arith.constant 0 : index
    %c0_3 = arith.constant 0 : index
    %c0_4 = arith.constant 0 : index
    %3 = vector.load %arg1[%c0_2, %c0_3, %c0_4] : memref<1x256x1152xbf16, #tpu.memory_space<vmem>>, vector<1x256x1152xbf16>
    %4 = vector.shape_cast %3 : vector<1x256x1152xbf16> to vector<256x1152xbf16>
    %c0_5 = arith.constant 0 : index
    %c0_6 = arith.constant 0 : index
    %5 = vector.load %arg2[%c0_5, %c0_6] : memref<1152x3xbf16, #tpu.memory_space<vmem>>, vector<1152x3xbf16>
    %cst = arith.constant dense<0.000000e+00> : vector<256x3xf32>
    %6 = tpu.matmul %4, %5, %cst {dimension_numbers = #tpu.dot_dimension_numbers<[1], [0], [0], [1], [0, 0, 1, 1], [], []>} : vector<256x1152xbf16>, vector<1152x3xbf16>, vector<256x3xf32> -> vector<256x3xf32>
    %c0_7 = arith.constant 0 : index
    %c0_8 = arith.constant 0 : index
    %7 = vector.load %arg3[%c0_7, %c0_8] : memref<1x3xf32, #tpu.memory_space<vmem>>, vector<1x3xf32>
    %8 = vector.broadcast %7 : vector<1x3xf32> to vector<256x3xf32>
    %9 = arith.addf %6, %8 : vector<256x3xf32>
    %10 = vector.broadcast %2 : vector<1x1xf32> to vector<256x3xf32>
    %11 = arith.mulf %9, %10 : vector<256x3xf32>
    %c0_9 = arith.constant 0 : index
    %c0_10 = arith.constant 0 : index
    %c0_11 = arith.constant 0 : index
    %12 = vector.load %arg4[%c0_9, %c0_10, %c0_11] : memref<1x256x1xf32, #tpu.memory_space<vmem>>, vector<1x256x1xf32>
    %13 = vector.shape_cast %12 : vector<1x256x1xf32> to vector<256x1xf32>
    %14 = vector.broadcast %13 : vector<256x1xf32> to vector<256x3xf32>
    %15 = arith.mulf %11, %14 : vector<256x3xf32>
    %cst_12 = arith.constant dense<0.000000e+00> : vector<3xf32>
    %16 = vector.multi_reduction <add>, %15, %cst_12 [0] : vector<256x3xf32> to vector<3xf32>
    %17 = vector.shape_cast %16 : vector<3xf32> to vector<1x3xf32>
    %c0_13 = arith.constant 0 : index
    %c0_14 = arith.constant 0 : index
    %c0_15 = arith.constant 0 : index
    %18 = vector.load %arg8[%c0_13, %c0_14, %c0_15] : memref<1x1x3xf32, #tpu.memory_space<vmem>>, vector<1x1x3xf32>
    %19 = vector.shape_cast %18 : vector<1x1x3xf32> to vector<1x3xf32>
    %20 = vector.shape_cast %17 : vector<1x3xf32> to vector<1x1x3xf32>
    tpu.vector_store %arg8[%c0_13, %c0_14, %c0_15], %20 {strides = array<i32>} : memref<1x1x3xf32, #tpu.memory_space<vmem>>, vector<1x1x3xf32>,
    %cst_16 = arith.constant dense<0.000000e+00> : vector<3xf32>
    %21 = vector.multi_reduction <add>, %11, %cst_16 [0] : vector<256x3xf32> to vector<3xf32>
    %22 = vector.shape_cast %21 : vector<3xf32> to vector<1x3xf32>
    %cst_17 = arith.constant 2.560000e+02 : f32
    %23 = vector.broadcast %cst_17 : f32 to vector<1x3xf32>
    %24 = arith.divf %22, %23 : vector<1x3xf32>
    %c0_18 = arith.constant 0 : index
    %c0_19 = arith.constant 0 : index
    %c0_20 = arith.constant 0 : index
    %25 = vector.load %arg9[%c0_18, %c0_19, %c0_20] : memref<1x1x3xf32, #tpu.memory_space<vmem>>, vector<1x1x3xf32>
    %26 = vector.shape_cast %25 : vector<1x1x3xf32> to vector<1x3xf32>
    %27 = vector.shape_cast %24 : vector<1x3xf32> to vector<1x1x3xf32>
    tpu.vector_store %arg9[%c0_18, %c0_19, %c0_20], %27 {strides = array<i32>} : memref<1x1x3xf32, #tpu.memory_space<vmem>>, vector<1x1x3xf32>,
    %28 = vector.extract_strided_slice %17 {offsets = [0, 0], sizes = [1, 1], strides = [1, 1]} : vector<1x3xf32> to vector<1x1xf32>
    %c0_21 = arith.constant 0 : index
    %c0_22 = arith.constant 0 : index
    %29 = vector.load %arg6[%c0_21, %c0_22] : memref<3x512xbf16, #tpu.memory_space<vmem>>, vector<1x512xbf16>
    %30 = arith.extf %29 : vector<1x512xbf16> to vector<1x512xf32>
    %31 = vector.broadcast %28 : vector<1x1xf32> to vector<1x512xf32>
    %32 = arith.mulf %31, %30 : vector<1x512xf32>
    %33 = vector.extract_strided_slice %17 {offsets = [0, 1], sizes = [1, 1], strides = [1, 1]} : vector<1x3xf32> to vector<1x1xf32>
    %c1 = arith.constant 1 : index
    %c0_23 = arith.constant 0 : index
    %34 = vector.load %arg6[%c1, %c0_23] : memref<3x512xbf16, #tpu.memory_space<vmem>>, vector<1x512xbf16>
    %35 = arith.extf %34 : vector<1x512xbf16> to vector<1x512xf32>
    %36 = vector.broadcast %33 : vector<1x1xf32> to vector<1x512xf32>
    %37 = arith.mulf %36, %35 : vector<1x512xf32>
    %38 = arith.addf %32, %37 : vector<1x512xf32>
    %39 = vector.extract_strided_slice %17 {offsets = [0, 2], sizes = [1, 1], strides = [1, 1]} : vector<1x3xf32> to vector<1x1xf32>
    %c2 = arith.constant 2 : index
    %c0_24 = arith.constant 0 : index
    %40 = vector.load %arg6[%c2, %c0_24] : memref<3x512xbf16, #tpu.memory_space<vmem>>, vector<1x512xbf16>
    %41 = arith.extf %40 : vector<1x512xbf16> to vector<1x512xf32>
    %42 = vector.broadcast %39 : vector<1x1xf32> to vector<1x512xf32>
    %43 = arith.mulf %42, %41 : vector<1x512xf32>
    %44 = arith.addf %38, %43 : vector<1x512xf32>
    %c0_25 = arith.constant 0 : index
    %c0_26 = arith.constant 0 : index
    %45 = vector.load %arg7[%c0_25, %c0_26] : memref<1x512xf32, #tpu.memory_space<vmem>>, vector<1x512xf32>
    %46 = arith.addf %44, %45 : vector<1x512xf32>
    %47 = vector.extract_strided_slice %46 {offsets = [0, 0], sizes = [1, 128], strides = [1, 1]} : vector<1x512xf32> to vector<1x128xf32>
    %48 = arith.negf %47 : vector<1x128xf32>
    %49 = math.exp %48 : vector<1x128xf32>
    %cst_27 = arith.constant 1.000000e+00 : f32
    %50 = vector.broadcast %cst_27 : f32 to vector<1x128xf32>
    %51 = arith.addf %50, %49 : vector<1x128xf32>
    %52 = arith.divf %50, %51 : vector<1x128xf32>
    %53 = vector.extract_strided_slice %46 {offsets = [0, 256], sizes = [1, 128], strides = [1, 1]} : vector<1x512xf32> to vector<1x128xf32>
    %54 = math.tanh %53 : vector<1x128xf32>
    %55 = vector.extract_strided_slice %46 {offsets = [0, 384], sizes = [1, 128], strides = [1, 1]} : vector<1x512xf32> to vector<1x128xf32>
    %56 = arith.negf %55 : vector<1x128xf32>
    %57 = math.exp %56 : vector<1x128xf32>
    %cst_28 = arith.constant 1.000000e+00 : f32
    %58 = vector.broadcast %cst_28 : f32 to vector<1x128xf32>
    %59 = arith.addf %58, %57 : vector<1x128xf32>
    %60 = arith.divf %58, %59 : vector<1x128xf32>
    %61 = arith.mulf %52, %54 : vector<1x128xf32>
    %62 = math.tanh %61 : vector<1x128xf32>
    %63 = arith.mulf %60, %62 : vector<1x128xf32>
    %c0_29 = arith.constant 0 : index
    %c0_30 = arith.constant 0 : index
    %c0_31 = arith.constant 0 : index
    %64 = vector.load %arg10[%c0_29, %c0_30, %c0_31] : memref<1x1x128xf32, #tpu.memory_space<vmem>>, vector<1x1x128xf32>
    %65 = vector.shape_cast %64 : vector<1x1x128xf32> to vector<1x128xf32>
    %66 = vector.shape_cast %63 : vector<1x128xf32> to vector<1x1x128xf32>
    tpu.vector_store %arg10[%c0_29, %c0_30, %c0_31], %66 {strides = array<i32>} : memref<1x1x128xf32, #tpu.memory_space<vmem>>, vector<1x1x128xf32>,
    return
  }
  func.func @transform_0(%arg0: i32) -> (i32, i32, i32) {
    %c0_i32 = arith.constant 0 : i32
    %c0_i32_0 = arith.constant 0 : i32
    %c0_i32_1 = arith.constant 0 : i32
    return %arg0, %c0_i32, %c0_i32_0 : i32, i32, i32
  }
  func.func @transform_1(%arg0: i32) -> (i32, i32) {
    %c0_i32 = arith.constant 0 : i32
    %c0_i32_0 = arith.constant 0 : i32
    %c0_i32_1 = arith.constant 0 : i32
    return %c0_i32, %c0_i32_0 : i32, i32
  }
  func.func @transform_2(%arg0: i32) -> (i32, i32) {
    %c0_i32 = arith.constant 0 : i32
    %c0_i32_0 = arith.constant 0 : i32
    %c0_i32_1 = arith.constant 0 : i32
    return %c0_i32, %c0_i32_0 : i32, i32
  }
  func.func @transform_3(%arg0: i32) -> (i32, i32, i32) {
    %c0_i32 = arith.constant 0 : i32
    %c0_i32_0 = arith.constant 0 : i32
    %c0_i32_1 = arith.constant 0 : i32
    return %arg0, %c0_i32, %c0_i32_0 : i32, i32, i32
  }
  func.func @transform_4(%arg0: i32) -> (i32, i32, i32) {
    %c0_i32 = arith.constant 0 : i32
    %c0_i32_0 = arith.constant 0 : i32
    %c0_i32_1 = arith.constant 0 : i32
    return %arg0, %c0_i32, %c0_i32_0 : i32, i32, i32
  }
  func.func @transform_5(%arg0: i32) -> (i32, i32) {
    %c0_i32 = arith.constant 0 : i32
    %c0_i32_0 = arith.constant 0 : i32
    %c0_i32_1 = arith.constant 0 : i32
    return %c0_i32, %c0_i32_0 : i32, i32
  }
  func.func @transform_6(%arg0: i32) -> (i32, i32) {
    %c0_i32 = arith.constant 0 : i32
    %c0_i32_0 = arith.constant 0 : i32
    %c0_i32_1 = arith.constant 0 : i32
    return %c0_i32, %c0_i32_0 : i32, i32
  }
  func.func @transform_7(%arg0: i32) -> (i32, i32, i32) {
    %c0_i32 = arith.constant 0 : i32
    %c0_i32_0 = arith.constant 0 : i32
    %c0_i32_1 = arith.constant 0 : i32
    return %arg0, %c0_i32, %c0_i32_0 : i32, i32, i32
  }
  func.func @transform_8(%arg0: i32) -> (i32, i32, i32) {
    %c0_i32 = arith.constant 0 : i32
    %c0_i32_0 = arith.constant 0 : i32
    %c0_i32_1 = arith.constant 0 : i32
    return %arg0, %c0_i32, %c0_i32_0 : i32, i32, i32
  }
  func.func @transform_9(%arg0: i32) -> (i32, i32, i32) {
    %c0_i32 = arith.constant 0 : i32
    %c0_i32_0 = arith.constant 0 : i32
    %c0_i32_1 = arith.constant 0 : i32
    return %arg0, %c0_i32, %c0_i32_0 : i32, i32, i32
  }
}

</mosaic_0001>

<bundles_post_ra>
// kernel: forward.4
= control target key start
LH: loop header
LB: loop body
LE: loop exit
PB: predicated region body
PF: predicated region fallthrough
CT: control target
= control target key end

     0   :  { %s1398_s30 = smov 0   ;;  %s1790_s0 = inlined_call_operand.vmem [shape: bf16[2,256,32], index: 0, kind: input, shape index: {}]   ;;  %s1791_s1 = inlined_call_operand.vmem [shape: bf16[32,64], index: 1, kind: input, shape index: {}]   ;;  %s1792_s2 = inlined_call_operand.vmem [shape: f32[1,64], index: 2, kind: input, shape index: {}]   ;;  %s1793_s3 = inlined_call_operand.vmem [shape: bf16[64,128], index: 3, kind: input, shape index: {}]   ;;  %s1794_s4 = inlined_call_operand.vmem [shape: f32[1,128], index: 4, kind: input, shape index: {}]   ;;  %s1795_s5 = inlined_call_operand.vmem [shape: bf16[128,10], index: 5, kind: input, shape index: {}]   ;;  %s1796_s6 = inlined_call_operand.vmem [shape: f32[1,10], index: 6, kind: input, shape index: {}]   ;;  %s1797_s7 = inlined_call_operand.vmem [shape: f32[2,256,64], index: 7, kind: output, shape index: {0}]   ;;  %s1798_s8 = inlined_call_operand.vmem [shape: f32[2,1,10], index: 8, kind: output, shape index: {1}]   ;;  %s1799_s9 = inlined_call_operand.vmem [shape: f32[2,1,1], index: 9, kind: output, shape index: {2}]  }
   0x1 LB: > { %s1135_s10 = sadd.s32 4294967295, %s1344_s30   ;;  %p1139_p0 = scmp.ge.s32.totalorder %s1344_s30, 1  ;;  %s1344_s30 = sphi %s1398_s30, %s20_s30  }
   0x2   : > { %p292_p1 = scmp.lt.s32.totalorder %s1344_s30, 3 }
   0x4   : > { %p293_p2 = pnand %p1139_p0, %p292_p1 }
   0x5   : > { %v1308_v0 = vld [vmem:[%s1791_s1] sm:$0xff] (!%p293_p2)   ;;  %p334_p3 = scmp.lt.s32.totalorder (!%p293_p2), %s1135_s10, 1  ;;  %v1309_v1 = vld [vmem:[%s1791_s1 + $0x8] sm:$0xff] (!%p293_p2)   ;;  %vm486_vm0 = vcmask (!%p293_p2), 261120   ;;  %v1346_v19 = vmov (!%p293_p2), 0.0   ;;  %vm1347_vm1 = vmmov (!%p293_p2), 0  }
   0x6   : > { %296 = sbr.rel (%p293_p2) target bundleno = 817 (0x331), region = 48  ;;  %1228 = vmatprep.subr.bf16.mxu0 (!%p293_p2), %v1308_v0  ;;  %v1326_v18 = vld [vmem:[%s1793_s3] sm:$0xff] (!%p293_p2)   ;;  %1264 = vmatprep.subr.bf16.mxu1 (!%p293_p2), %v1346_v19  ;;  %v1327_v20 = vld [vmem:[%s1793_s3 + $0x8] sm:$0xff] (!%p293_p2)   ;;  %v1328_v21 = vld [vmem:[%s1793_s3 + $0x10] sm:$0xff] (!%p293_p2)   ;;  %vm696_vm2 = vcmask (!%p293_p2), 523264   ;;  %vm952_vm3 = vcmask (!%p293_p2), 73728  }
   0x7   : > { %1229 = vmatpush3.bf16.msra.mxu0 (!%p293_p2), %v1308_v0  ;;  %1272 = vmatprep.mubr.msk.bf16.mxu1 (!%p293_p2), %vm1347_vm1, %v1346_v19  ;;  %v1329_v22 = vld [vmem:[%s1793_s3 + $0x18] sm:$0xff] (!%p293_p2)   ;;  %v1474_v23 = vld [vmem:[%s1792_s2] ss:$0 sm:$0xff] (!%p293_p2)  ;;  %vm1028_vm4 = vcmask (!%p293_p2), 0  }
   0x8   : > { %1230 = vmatprep.subr.bf16.mxu0 (!%p293_p2), %v1309_v1  ;;  %1265 = vmatpush3.bf16.msra.mxu1 (!%p293_p2), %v1326_v18 }
   0x9   : > { %1266 = vmatprep.subr.bf16.mxu1 (!%p293_p2), %v1346_v19 }
   0xb   : > { %1231 = vmatpush3.bf16.msra.mxu0 (!%p293_p2), %v1309_v1 }
   0xc   : > { %1267 = vmatpush3.bf16.msra.mxu1 (!%p293_p2), %v1327_v20 }
   0xd   : > { %s1801_s10 = smov (!%p334_p3, %s1135_s10), 1  ;;  %1268 = vmatprep.subr.bf16.mxu1 %v1346_v19 }
   0xe   : > { %s1194_s15 = sshll.u32 %s1801_s10, 7  ;;  %s346_s13 = scalar_lea.vmem %s1798_s8, %s1801_s10 }
   0xf   : > { %s1418_s18 = scalar_lea.vmem %s1790_s0, %s1194_s15  ;;  %s349_s16 = scalar_lea.vmem %s1799_s9, %s1801_s10 }
  0x10   : > { %v1310_v2 = vld [vmem:[%s1418_s18] sm:$0xff]   ;;  %v1311_v3 = vld [vmem:[%s1418_s18 + $0x8] sm:$0xff]   ;;  %v1312_v4 = vld [vmem:[%s1418_s18 + $0x10] sm:$0xff]   ;;  %1269 = vmatpush3.bf16.msra.mxu1 %v1328_v21  ;;  %s1195_s17 = sshll.u32 %s1801_s10, 8 }
  0x11   : > { %1232 = vmatprep.mubr.msk.bf16.mxu0 %vm486_vm0, %v1310_v2  ;;  %v1313_v5 = vld [vmem:[%s1418_s18 + $0x18] sm:$0xff]   ;;  %v1314_v6 = vld [vmem:[%s1418_s18 + $0x20] sm:$0xff]   ;;  %v1315_v7 = vld [vmem:[%s1418_s18 + $0x28] sm:$0xff]   ;;  %1270 = vmatprep.subr.bf16.mxu1 %v1346_v19  ;;  %s1689_s21 = scalar_lea.vmem %s1797_s7, %s1195_s17 }
  0x12   : > { %1233 = vmatmul.mubr.msk.bf16.vlgmr.msra.gmra.mrb[0].mxu0 %vm486_vm0, %v1311_v3  ;;  %v1316_v8 = vld [vmem:[%s1418_s18 + $0x30] sm:$0xff]   ;;  %v1317_v9 = vld [vmem:[%s1418_s18 + $0x38] sm:$0xff]   ;;  %v1318_v10 = vld [vmem:[%s1418_s18 + $0x40] sm:$0xff]  }
  0x13   : > { %1236 = vmatprep.mubr.msk.bf16.mxu0 %vm486_vm0, %v1312_v4  ;;  %v1319_v11 = vld [vmem:[%s1418_s18 + $0x48] sm:$0xff]   ;;  %v1320_v12 = vld [vmem:[%s1418_s18 + $0x50] sm:$0xff]   ;;  %v1321_v13 = vld [vmem:[%s1418_s18 + $0x58] sm:$0xff]  }
  0x14   : > { %v1322_v14 = vld [vmem:[%s1418_s18 + $0x60] sm:$0xff]   ;;  %v1323_v15 = vld [vmem:[%s1418_s18 + $0x68] sm:$0xff]   ;;  %v1324_v16 = vld [vmem:[%s1418_s18 + $0x70] sm:$0xff]   ;;  %1271 = vmatpush3.bf16.msra.mxu1 %v1329_v22 }
  0x15   : > { %v1325_v17 = vld [vmem:[%s1418_s18 + $0x78] sm:$0xff]   ;;  %1276 = vmatprep.subr.bf16.mxu1 %v1346_v19 }
  0x1a   : > { %1237 = vmatmul.mubr.msk.bf16.gmra.mrb[4].mxu0 %vm486_vm0, %v1313_v5 }
  0x1b   : > { %1240 = vmatprep.mubr.msk.bf16.mxu0 %vm486_vm0, %v1314_v6 }
  0x22   : > { %1241 = vmatmul.mubr.msk.bf16.gmra.mrb[8].mxu0 %vm486_vm0, %v1315_v7 }
  0x23   : > { %1244 = vmatprep.mubr.msk.bf16.mxu0 %vm486_vm0, %v1316_v8 }
  0x2a   : > { %1245 = vmatmul.mubr.msk.bf16.gmra.mrb[12].mxu0 %vm486_vm0, %v1317_v9 }
  0x2b   : > { %1248 = vmatprep.mubr.msk.bf16.mxu0 %vm486_vm0, %v1318_v10 }
  0x32   : > { %1249 = vmatmul.mubr.msk.bf16.gmra.mrb[16].mxu0 %vm486_vm0, %v1319_v11 }
  0x33   : > { %1252 = vmatprep.mubr.msk.bf16.mxu0 %vm486_vm0, %v1320_v12 }
  0x3a   : > { %1253 = vmatmul.mubr.msk.bf16.gmra.mrb[20].mxu0 %vm486_vm0, %v1321_v13 }
  0x3b   : > { %1256 = vmatprep.mubr.msk.bf16.mxu0 %vm486_vm0, %v1322_v14 }
  0x42   : > { %1257 = vmatmul.mubr.msk.bf16.gmra.mrb[24].mxu0 %vm486_vm0, %v1323_v15 }
  0x43   : > { %1260 = vmatprep.mubr.msk.bf16.mxu0 %vm486_vm0, %v1324_v16 }
  0x4a   : > { %1261 = vmatmul.mubr.msk.bf16.gmra.mrb[28].mxu0 %vm486_vm0, %v1325_v17 }
  0xe5   : > { %v1234_v24 = vpop.f32.mrb[0].mxu0 }
  0xe6   : > { %v569_v25 = vpop.f32.mrb[1].mxu0  ;;  %v1480_v29 = vadd.f32 %v1234_v24, %v1474_v23 }
  0xe7   : > { %v1477_v26 = vadd.f32 %v1474_v23, %v569_v25  ;;  %v1235_v27 = vpop.f32.mrb[2].mxu0 }
  0xe8   : > { %v572_v28 = vpop.f32.mrb[3].mxu0  ;;  %v1488_v32 = vadd.f32 %v1235_v27, %v1474_v23  ;;  %v700_v35 = vsel %vm696_vm2, %v1480_v29, 0.0 }
  0xe9   : > { %v1483_v30 = vadd.f32 %v1474_v23, %v572_v28  ;;  %v697_v31 = vsel %vm696_vm2, %v1477_v26, 0.0 }
  0xea   : > { %v702_v39 = vsel %vm696_vm2, %v1488_v32, 0.0 }
  0xeb   : > { %v698_v33 = vsel %vm696_vm2, %v1483_v30, 0.0 }
  0xec   : > { %v699_v34 = vadd.f32 %v698_v33, %v697_v31 }
  0xed   : > { %v1238_v36 = vpop.f32.mrb[4].mxu0 }
  0xee   : > { %v701_v37 = vadd.f32 %v700_v35, %v699_v34  ;;  %v585_v38 = vpop.f32.mrb[5].mxu0  ;;  %v1500_v44 = vadd.f32 %v1238_v36, %v1474_v23 }
  0xef   : > { %v1497_v40 = vadd.f32 %v1474_v23, %v585_v38  ;;  %v1239_v41 = vpop.f32.mrb[6].mxu0 }
  0xf0   : > { %v703_v42 = vadd.f32 %v702_v39, %v701_v37  ;;  %v588_v43 = vpop.f32.mrb[7].mxu0  ;;  %v1508_v48 = vadd.f32 %v1239_v41, %v1474_v23  ;;  %v708_v51 = vsel %vm696_vm2, %v1500_v44, 0.0 }
  0xf1   : > { %v704_v45 = vsel %vm696_vm2, %v1497_v40, 0.0  ;;  %v1505_v46 = vadd.f32 %v1474_v23, %v588_v43 }
  0xf2   : > { %v705_v47 = vadd.f32 %v704_v45, %v703_v42  ;;  %v710_v55 = vsel %vm696_vm2, %v1508_v48, 0.0 }
  0xf3   : > { %v706_v49 = vsel %vm696_vm2, %v1505_v46, 0.0 }
  0xf4   : > { %v707_v50 = vadd.f32 %v706_v49, %v705_v47 }
  0xf5   : > { %v1242_v52 = vpop.f32.mrb[8].mxu0 }
  0xf6   : > { %v709_v53 = vadd.f32 %v708_v51, %v707_v50  ;;  %v601_v54 = vpop.f32.mrb[9].mxu0  ;;  %v1520_v60 = vadd.f32 %v1242_v52, %v1474_v23 }
  0xf7   : > { %v1517_v56 = vadd.f32 %v1474_v23, %v601_v54  ;;  %v1243_v57 = vpop.f32.mrb[10].mxu0 }
  0xf8   : > { %v711_v58 = vadd.f32 %v710_v55, %v709_v53  ;;  %v604_v59 = vpop.f32.mrb[11].mxu0  ;;  %v1528_v0 = vadd.f32 %v1243_v57, %v1474_v23  ;;  %v716_v3 = vsel %vm696_vm2, %v1520_v60, 0.0 }
  0xf9   : > { %v712_v61 = vsel %vm696_vm2, %v1517_v56, 0.0  ;;  %v1525_v62 = vadd.f32 %v1474_v23, %v604_v59 }
  0xfa   : > { %v713_v63 = vadd.f32 %v712_v61, %v711_v58  ;;  %v718_v7 = vsel %vm696_vm2, %v1528_v0, 0.0 }
  0xfb   : > { %v714_v1 = vsel %vm696_vm2, %v1525_v62, 0.0 }
  0xfc   : > { %v715_v2 = vadd.f32 %v714_v1, %v713_v63 }
  0xfd   : > { %v1246_v4 = vpop.f32.mrb[12].mxu0 }
  0xfe   : > { %v717_v5 = vadd.f32 %v716_v3, %v715_v2  ;;  %v617_v6 = vpop.f32.mrb[13].mxu0  ;;  %v1540_v12 = vadd.f32 %v1246_v4, %v1474_v23 }
  0xff   : > { %v1537_v8 = vadd.f32 %v1474_v23, %v617_v6  ;;  %v1247_v9 = vpop.f32.mrb[14].mxu0 }
 0x100   : > { %v719_v10 = vadd.f32 %v718_v7, %v717_v5  ;;  %v620_v11 = vpop.f32.mrb[15].mxu0  ;;  %v1548_v16 = vadd.f32 %v1247_v9, %v1474_v23  ;;  %v724_v20 = vsel %vm696_vm2, %v1540_v12, 0.0 }
 0x101   : > { %v720_v13 = vsel %vm696_vm2, %v1537_v8, 0.0  ;;  %v1545_v14 = vadd.f32 %v1474_v23, %v620_v11 }
 0x102   : > { %v721_v15 = vadd.f32 %v720_v13, %v719_v10  ;;  %v726_v25 = vsel %vm696_vm2, %v1548_v16, 0.0 }
 0x103   : > { %v722_v17 = vsel %vm696_vm2, %v1545_v14, 0.0 }
 0x104   : > { %v723_v18 = vadd.f32 %v722_v17, %v721_v15 }
 0x105   : > { %v1250_v21 = vpop.f32.mrb[16].mxu0 }
 0x106   : > { %v725_v22 = vadd.f32 %v724_v20, %v723_v18  ;;  %v633_v24 = vpop.f32.mrb[17].mxu0  ;;  %v1560_v34 = vadd.f32 %v1250_v21, %v1474_v23 }
 0x107   : > { %v1557_v27 = vadd.f32 %v1474_v23, %v633_v24  ;;  %v1251_v28 = vpop.f32.mrb[18].mxu0 }
 0x108   : > { %v727_v31 = vadd.f32 %v726_v25, %v725_v22  ;;  %v636_v33 = vpop.f32.mrb[19].mxu0  ;;  %v1568_v38 = vadd.f32 %v1251_v28, %v1474_v23  ;;  %v732_v42 = vsel %vm696_vm2, %v1560_v34, 0.0 }
 0x109   : > { %v728_v35 = vsel %vm696_vm2, %v1557_v27, 0.0  ;;  %v1565_v36 = vadd.f32 %v1474_v23, %v636_v33 }
 0x10a   : > { %v729_v37 = vadd.f32 %v728_v35, %v727_v31  ;;  %v734_v49 = vsel %vm696_vm2, %v1568_v38, 0.0 }
 0x10b   : > { %v730_v39 = vsel %vm696_vm2, %v1565_v36, 0.0 }
 0x10c   : > { %v731_v41 = vadd.f32 %v730_v39, %v729_v37 }
 0x10d   : > { %v1254_v43 = vpop.f32.mrb[20].mxu0 }
 0x10e   : > { %v733_v45 = vadd.f32 %v732_v42, %v731_v41  ;;  %v649_v47 = vpop.f32.mrb[21].mxu0  ;;  %v1580_v54 = vadd.f32 %v1254_v43, %v1474_v23 }
 0x10f   : > { %v1577_v50 = vadd.f32 %v1474_v23, %v649_v47  ;;  %v1255_v51 = vpop.f32.mrb[22].mxu0 }
 0x110   : > { %v735_v52 = vadd.f32 %v734_v49, %v733_v45  ;;  %v652_v53 = vpop.f32.mrb[23].mxu0  ;;  %v1588_v59 = vadd.f32 %v1255_v51, %v1474_v23  ;;  %v740_v1 = vsel %vm696_vm2, %v1580_v54, 0.0 }
 0x111   : > { %v736_v55 = vsel %vm696_vm2, %v1577_v50, 0.0  ;;  %v1585_v57 = vadd.f32 %v1474_v23, %v652_v53 }
 0x112   : > { %v737_v58 = vadd.f32 %v736_v55, %v735_v52  ;;  %v742_v5 = vsel %vm696_vm2, %v1588_v59, 0.0 }
 0x113   : > { %v738_v61 = vsel %vm696_vm2, %v1585_v57, 0.0 }
 0x114   : > { %v739_v63 = vadd.f32 %v738_v61, %v737_v58 }
 0x115   : > { %v1258_v2 = vpop.f32.mrb[24].mxu0 }
 0x116   : > { %v741_v3 = vadd.f32 %v740_v1, %v739_v63  ;;  %v665_v4 = vpop.f32.mrb[25].mxu0  ;;  %v1600_v11 = vadd.f32 %v1258_v2, %v1474_v23 }
 0x117   : > { %v1597_v6 = vadd.f32 %v1474_v23, %v665_v4  ;;  %v1259_v7 = vpop.f32.mrb[26].mxu0 }
 0x118   : > { %v743_v9 = vadd.f32 %v742_v5, %v741_v3  ;;  %v668_v10 = vpop.f32.mrb[27].mxu0  ;;  %v1608_v18 = vadd.f32 %v1259_v7, %v1474_v23  ;;  %v748_v22 = vsel %vm696_vm2, %v1600_v11, 0.0 }
 0x119   : > { %v744_v13 = vsel %vm696_vm2, %v1597_v6, 0.0  ;;  %v1605_v15 = vadd.f32 %v1474_v23, %v668_v10  ;;  %v1331_v10 = vld [vmem:[%s1795_s5 + $0x8] sm:$0xff]  }
 0x11a   : > { %v745_v17 = vadd.f32 %v744_v13, %v743_v9  ;;  %v750_v31 = vsel %vm696_vm2, %v1608_v18, 0.0  ;;  %v1330_v9 = vld [vmem:[%s1795_s5] sm:$0xff]   ;;  %v1332_v13 = vld [vmem:[%s1795_s5 + $0x10] sm:$0xff]  }
 0x11b   : > { %v746_v20 = vsel %vm696_vm2, %v1605_v15, 0.0 }
 0x11c   : > { %v747_v21 = vadd.f32 %v746_v20, %v745_v17  ;;  %v1333_v17 = vld [vmem:[%s1795_s5 + $0x18] sm:$0xff]   ;;  %v1334_v20 = vld [vmem:[%s1795_s5 + $0x20] sm:$0xff]  }
 0x11d   : > { %v1262_v24 = vpop.f32.mrb[28].mxu0 }
 0x11e   : > { %v749_v25 = vadd.f32 %v748_v22, %v747_v21  ;;  %v681_v28 = vpop.f32.mrb[29].mxu0  ;;  %v1620_v41 = vadd.f32 %v1262_v24, %v1474_v23  ;;  %v1335_v21 = vld [vmem:[%s1795_s5 + $0x28] sm:$0xff]   ;;  %v1336_v22 = vld [vmem:[%s1795_s5 + $0x30] sm:$0xff]   ;;  %v1337_v24 = vld [vmem:[%s1795_s5 + $0x38] sm:$0xff]  }
 0x11f   : > { %v1617_v33 = vadd.f32 %v1474_v23, %v681_v28  ;;  %v1263_v35 = vpop.f32.mrb[30].mxu0 }
 0x120   : > { %v751_v37 = vadd.f32 %v750_v31, %v749_v25  ;;  %v684_v39 = vpop.f32.mrb[31].mxu0  ;;  %v1628_v47 = vadd.f32 %v1263_v35, %v1474_v23  ;;  %v756_v52 = vsel %vm696_vm2, %v1620_v41, 0.0  ;;  %v777_v25 = vld [vmem:[%s1794_s4] sm:$0x1] }
 0x121   : > { %v752_v42 = vsel %vm696_vm2, %v1617_v33, 0.0  ;;  %v1625_v43 = vadd.f32 %v1474_v23, %v684_v39 }
 0x122   : > { %v753_v45 = vadd.f32 %v752_v42, %v751_v37  ;;  %v758_v55 = vsel %vm696_vm2, %v1628_v47, 0.0 }
 0x123   : > { %v754_v49 = vsel %vm696_vm2, %v1625_v43, 0.0 }
 0x124   : > { %v755_v51 = vadd.f32 %v754_v49, %v753_v45 }
 0x126   : > { %v757_v53 = vadd.f32 %v756_v52, %v755_v51 }
 0x128   : > { %v759_v58 = vadd.f32 %v758_v55, %v757_v53 }
 0x12a   : > { %v760_v61 = vrot.slane %v759_v58, 4 }
 0x12c   : > { %v761_v63 = vadd.f32 %v760_v61, %v759_v58 }
 0x12e   : > { %v762_v1 = vrot.slane %v761_v63, 2 }
 0x130   : > { %v763_v2 = vadd.f32 %v762_v1, %v761_v63 }
 0x132   : > { %v764_v3 = vrot.slane %v763_v2, 1 }
 0x134   : > { %v765_v4 = vadd.f32 %v764_v3, %v763_v2 }
 0x136   : > { %v767_v23 = vmul.f32 0.00390625, %v765_v4 }
 0x138   : > { %v768_v5 = vpack.c.bf16 %v767_v23, %v767_v23  ;;  %v1022_v7 = vsel %vm696_vm2, %v767_v23, 0.0 }
 0x139   : > { %1023 = vadd.xlane.f32.xlu0 %v1022_v7 }
 0x13a   : > { %1273 = vmatmul.mubr.msk.bf16.vlgmr.msra.gmra.mrb[0].mxu1 %vm696_vm2, %v768_v5 }
 0x13b   : > { %1292 = vmatprep.mubr.msk.bf16.mxu1 %vm1347_vm1, %v1346_v19  ;;  %1277 = vmatpush3.bf16.msra.mxu1 %v1330_v9 }
 0x13c   : > { %1278 = vmatprep.subr.bf16.mxu1 %v1346_v19 }
 0x13f   : > { %1279 = vmatpush3.bf16.msra.mxu1 %v1331_v10 }
 0x140   : > { %1280 = vmatprep.subr.bf16.mxu1 %v1346_v19 }
 0x143   : > { %1281 = vmatpush3.bf16.msra.mxu1 %v1332_v13 }
 0x144   : > { %1282 = vmatprep.subr.bf16.mxu1 %v1346_v19 }
 0x147   : > { %1283 = vmatpush3.bf16.msra.mxu1 %v1333_v17 }
 0x148   : > { %1284 = vmatprep.subr.bf16.mxu1 %v1346_v19 }
 0x14b   : > { %1285 = vmatpush3.bf16.msra.mxu1 %v1334_v20 }
 0x14c   : > { %1286 = vmatprep.subr.bf16.mxu1 %v1346_v19 }
 0x14f   : > { %1287 = vmatpush3.bf16.msra.mxu1 %v1335_v21 }
 0x150   : > { %1288 = vmatprep.subr.bf16.mxu1 %v1346_v19 }
 0x153   : > { %1289 = vmatpush3.bf16.msra.mxu1 %v1336_v22 }
 0x154   : > { %1290 = vmatprep.subr.bf16.mxu1 %v1346_v19  ;;  %v863_v19 = vld [vmem:[%s1796_s6] sm:$0x1] }
 0x157   : > { %1291 = vmatpush3.bf16.msra.mxu1 %v1337_v24 }
 0x1c6   : > { %v1024_v49 = vpop.xlane.xlu0 %1023 }
 0x1c7   : > { %v1026_v52 = vmul.f32 0.015625, %v1024_v49 }
 0x20d   : > { %v839_v28 = vpop.f32.mrb[0].mxu1 }
 0x20e   : > { %v840_v31 = vadd.f32 %v839_v28, %v777_v25  ;;  %v1274_v35 = vpop.f32.mrb[1].mxu1 }
 0x20f   : > { %v842_v37 = vpop.f32.mrb[2].mxu1 }
 0x210   : > { %v845_v39 = vmax.f32 %v840_v31, 0.0  ;;  %v1275_v42 = vpop.f32.mrb[3].mxu1 }
 0x212   : > { %v846_v45 = vpack.c.bf16 %v845_v39, %v845_v39 }
 0x214   : > { %1293 = vmatmul.mubr.bf16.vlgmr.msra.gmra.mrb[4].mxu1 %v846_v45 }
 0x2e7   : > { %v946_v51 = vpop.f32.mrb[4].mxu1 }
 0x2e8   : > { %v947_v53 = vadd.f32 %v946_v51, %v863_v19  ;;  %v1294_v55 = vpop.f32.mrb[5].mxu1 }
 0x2e9   : > { %v949_v58 = vpop.f32.mrb[6].mxu1 }
 0x2ea   : > { %953 = vst.msk [vmem:[%s346_s13] sm:$0x1] %vm952_vm3, %v947_v53  ;;  %v1027_v61 = vmul.f32 %v1026_v52, %v947_v53  ;;  %v1295_v63 = vpop.f32.mrb[7].mxu1 }
 0x2eb   : > { %1296 = vpush %v947_v53 }
 0x2ec   : > { %1029 = vst.msk [vmem:[%s349_s16] sm:$0x1] %vm1028_vm4, %v1027_v61 }
 0x31c   : > { %s1297_s18 = spop %1296 }
 0x31d   : > { %v956_v1 = vstv %s1297_s18 }
 0x31e   : > { %v958_v2 = vmul.f32 %v956_v1, %v1477_v26  ;;  %v959_v3 = vmul.f32 %v956_v1, %v1483_v30  ;;  %v960_v4 = vmul.f32 %v956_v1, %v1480_v29  ;;  %v961_v23 = vmul.f32 %v956_v1, %v1488_v32 }
 0x31f   : > { %v962_v5 = vmul.f32 %v956_v1, %v1497_v40  ;;  %v963_v7 = vmul.f32 %v956_v1, %v1505_v46  ;;  %v964_v9 = vmul.f32 %v956_v1, %v1500_v44  ;;  %v965_v10 = vmul.f32 %v956_v1, %v1508_v48 }
 0x320   : > { %v966_v26 = vmul.f32 %v956_v1, %v1517_v56  ;;  %v967_v30 = vmul.f32 %v956_v1, %v1525_v62  ;;  %v968_v29 = vmul.f32 %v956_v1, %v1520_v60  ;;  %v969_v32 = vmul.f32 %v956_v1, %v1528_v0  ;;  %990 = vst.msk [vmem:[%s1689_s21] sm:$0xff] %vm696_vm2, %v958_v2 }
 0x321   : > { %991 = vst.msk [vmem:[%s1689_s21 + $0x8] sm:$0xff] %vm696_vm2, %v959_v3  ;;  %992 = vst.msk [vmem:[%s1689_s21 + $0x10] sm:$0xff] %vm696_vm2, %v960_v4  ;;  %v970_v40 = vmul.f32 %v956_v1, %v1537_v8  ;;  %v971_v44 = vmul.f32 %v956_v1, %v1545_v14  ;;  %v972_v46 = vmul.f32 %v956_v1, %v1540_v12 }
 0x322   : > { %993 = vst.msk [vmem:[%s1689_s21 + $0x18] sm:$0xff] %vm696_vm2, %v961_v23  ;;  %v973_v48 = vmul.f32 %v956_v1, %v1548_v16  ;;  %994 = vst.msk [vmem:[%s1689_s21 + $0x20] sm:$0xff] %vm696_vm2, %v962_v5  ;;  %v974_v56 = vmul.f32 %v956_v1, %v1557_v27  ;;  %v975_v60 = vmul.f32 %v956_v1, %v1565_v36 }
 0x323   : > { %995 = vst.msk [vmem:[%s1689_s21 + $0x28] sm:$0xff] %vm696_vm2, %v963_v7  ;;  %996 = vst.msk [vmem:[%s1689_s21 + $0x30] sm:$0xff] %vm696_vm2, %v964_v9  ;;  %v976_v62 = vmul.f32 %v956_v1, %v1560_v34  ;;  %v977_v0 = vmul.f32 %v956_v1, %v1568_v38  ;;  %v978_v8 = vmul.f32 %v956_v1, %v1577_v50 }
 0x324   : > { %997 = vst.msk [vmem:[%s1689_s21 + $0x38] sm:$0xff] %vm696_vm2, %v965_v10  ;;  %998 = vst.msk [vmem:[%s1689_s21 + $0x40] sm:$0xff] %vm696_vm2, %v966_v26  ;;  %v979_v12 = vmul.f32 %v956_v1, %v1585_v57  ;;  %v980_v14 = vmul.f32 %v956_v1, %v1580_v54  ;;  %v981_v16 = vmul.f32 %v956_v1, %v1588_v59 }
 0x325   : > { %999 = vst.msk [vmem:[%s1689_s21 + $0x48] sm:$0xff] %vm696_vm2, %v967_v30  ;;  %1000 = vst.msk [vmem:[%s1689_s21 + $0x50] sm:$0xff] %vm696_vm2, %v968_v29  ;;  %v982_v27 = vmul.f32 %v956_v1, %v1597_v6  ;;  %v983_v34 = vmul.f32 %v956_v1, %v1605_v15  ;;  %v984_v36 = vmul.f32 %v956_v1, %v1600_v11 }
 0x326   : > { %1001 = vst.msk [vmem:[%s1689_s21 + $0x58] sm:$0xff] %vm696_vm2, %v969_v32  ;;  %1002 = vst.msk [vmem:[%s1689_s21 + $0x60] sm:$0xff] %vm696_vm2, %v970_v40  ;;  %v985_v38 = vmul.f32 %v956_v1, %v1608_v18  ;;  %v986_v50 = vmul.f32 %v956_v1, %v1617_v33  ;;  %v987_v54 = vmul.f32 %v956_v1, %v1625_v43 }
 0x327   : > { %1003 = vst.msk [vmem:[%s1689_s21 + $0x68] sm:$0xff] %vm696_vm2, %v971_v44  ;;  %1004 = vst.msk [vmem:[%s1689_s21 + $0x70] sm:$0xff] %vm696_vm2, %v972_v46  ;;  %v988_v57 = vmul.f32 %v956_v1, %v1620_v41  ;;  %v989_v59 = vmul.f32 %v956_v1, %v1628_v47 }
 0x328   : > { %1005 = vst.msk [vmem:[%s1689_s21 + $0x78] sm:$0xff] %vm696_vm2, %v973_v48  ;;  %1006 = vst.msk [vmem:[%s1689_s21 + $0x80] sm:$0xff] %vm696_vm2, %v974_v56 }
 0x329   : > { %1007 = vst.msk [vmem:[%s1689_s21 + $0x88] sm:$0xff] %vm696_vm2, %v975_v60  ;;  %1008 = vst.msk [vmem:[%s1689_s21 + $0x90] sm:$0xff] %vm696_vm2, %v976_v62 }
 0x32a   : > { %1009 = vst.msk [vmem:[%s1689_s21 + $0x98] sm:$0xff] %vm696_vm2, %v977_v0  ;;  %1010 = vst.msk [vmem:[%s1689_s21 + $0xa0] sm:$0xff] %vm696_vm2, %v978_v8 }
 0x32b   : > { %1011 = vst.msk [vmem:[%s1689_s21 + $0xa8] sm:$0xff] %vm696_vm2, %v979_v12  ;;  %1012 = vst.msk [vmem:[%s1689_s21 + $0xb0] sm:$0xff] %vm696_vm2, %v980_v14 }
 0x32c   : > { %1013 = vst.msk [vmem:[%s1689_s21 + $0xb8] sm:$0xff] %vm696_vm2, %v981_v16  ;;  %1014 = vst.msk [vmem:[%s1689_s21 + $0xc0] sm:$0xff] %vm696_vm2, %v982_v27 }
 0x32d   : > { %1015 = vst.msk [vmem:[%s1689_s21 + $0xc8] sm:$0xff] %vm696_vm2, %v983_v34  ;;  %1016 = vst.msk [vmem:[%s1689_s21 + $0xd0] sm:$0xff] %vm696_vm2, %v984_v36 }
 0x32e   : > { %1017 = vst.msk [vmem:[%s1689_s21 + $0xd8] sm:$0xff] %vm696_vm2, %v985_v38  ;;  %1018 = vst.msk [vmem:[%s1689_s21 + $0xe0] sm:$0xff] %vm696_vm2, %v986_v50 }
 0x32f   : > { %1019 = vst.msk [vmem:[%s1689_s21 + $0xe8] sm:$0xff] %vm696_vm2, %v987_v54  ;;  %1020 = vst.msk [vmem:[%s1689_s21 + $0xf0] sm:$0xff] %vm696_vm2, %v988_v57 }
 0x330   : > { %1021 = vst.msk [vmem:[%s1689_s21 + $0xf8] sm:$0xff] %vm696_vm2, %v989_v59 }
 0x331 PF: > { %s20_s30 = sadd.s32 1, %s1344_s30  }
 0x332   : > { %p17_p4 = scmp.ge.s32.totalorder %s20_s30, 4  }
 0x334   :  { %19 = sbr.rel (!%p17_p4) target bundleno = 1 (0x1), region = 102 }

// kernel: forward.5
= control target key start
LH: loop header
LB: loop body
LE: loop exit
PB: predicated region body
PF: predicated region fallthrough
CT: control target
= control target key end

     0   :  { %s3278_s24 = smov 0   ;;  %s4305_s0 = inlined_call_operand.vmem [shape: bf16[2,256,576], index: 0, kind: input, shape index: {}]   ;;  %s4306_s1 = inlined_call_operand.vmem [shape: bf16[576,10], index: 1, kind: input, shape index: {}]   ;;  %s4307_s2 = inlined_call_operand.vmem [shape: f32[1,10], index: 2, kind: input, shape index: {}]   ;;  %s4308_s3 = inlined_call_operand.vmem [shape: f32[2,256,64], index: 3, kind: input, shape index: {}]   ;;  %s4309_s4 = inlined_call_operand.vmem [shape: f32[2,1,10], index: 4, kind: input, shape index: {}]   ;;  %s4310_s5 = inlined_call_operand.vmem [shape: f32[2,256,10], index: 5, kind: output, shape index: {0}]   ;;  %s4311_s6 = inlined_call_operand.vmem [shape: f32[2,256,64], index: 6, kind: output, shape index: {1}]   ;;  %s4312_s7 = inlined_call_operand.vmem [shape: f32[2,256,1], index: 7, kind: output, shape index: {2}]  }
   0x1 LB: > { %s2488_s25 = sadd.s32 4294967295, %s3235_s24   ;;  %p2492_p0 = scmp.ge.s32.totalorder %s3235_s24, 1  ;;  %s3235_s24 = sphi %s3278_s24, %s18_s24  }
   0x2   : > { %p260_p1 = scmp.lt.s32.totalorder %s3235_s24, 3 }
   0x4   : > { %p261_p2 = pnand %p2492_p0, %p260_p1 }
   0x5   : > { %v2953_v0 = vld [vmem:[%s4306_s1 + $0x40] sm:$0xff] (!%p261_p2)   ;;  %v2955_v2 = vld [vmem:[%s4306_s1 + $0x48] sm:$0xff] (!%p261_p2)   ;;  %p310_p3 = scmp.lt.s32.totalorder (!%p261_p2), %s2488_s25, 1  ;;  %v2957_v4 = vld [vmem:[%s4306_s1 + $0x50] sm:$0xff] (!%p261_p2)   ;;  %v3237_v56 = vmov (!%p261_p2), 1   ;;  %vm1124_vm0 = vcmask (!%p261_p2), 523264  }
   0x6   : > { %264 = sbr.rel (%p261_p2) target bundleno = 888 (0x378), region = 40  ;;  %v2954_v1 = vld [vmem:[%s4306_s1] sm:$0xff] (!%p261_p2)   ;;  %2642 = vmatprep.subr.bf16.mxu0 (!%p261_p2), %v2953_v0  ;;  %2926 = vmatprep.subr.bf16.mxu1 (!%p261_p2), %v2953_v0  ;;  %v2956_v3 = vld [vmem:[%s4306_s1 + $0x8] sm:$0xff] (!%p261_p2)   ;;  %v2958_v5 = vld [vmem:[%s4306_s1 + $0x10] sm:$0xff] (!%p261_p2)   ;;  %vm1736_vm1 = vcmask (!%p261_p2), 80896   ;;  %vm2217_vm2 = vcmask (!%p261_p2), 7168  }
   0x7   : > { %2643 = vmatpush3.bf16.msra.mxu0 (!%p261_p2), %v2954_v1  ;;  %2934 = vmatpush3.bf16.msra.mxu1 (!%p261_p2), %v2954_v1  ;;  %v2959_v6 = vld [vmem:[%s4306_s1 + $0x58] sm:$0xff] (!%p261_p2)   ;;  %v2961_v8 = vld [vmem:[%s4306_s1 + $0x60] sm:$0xff] (!%p261_p2)   ;;  %v2963_v10 = vld [vmem:[%s4306_s1 + $0x68] sm:$0xff] (!%p261_p2)  }
   0x8   : > { %2644 = vmatprep.subr.bf16.mxu0 (!%p261_p2), %v2955_v2  ;;  %2927 = vmatprep.subr.bf16.mxu1 (!%p261_p2), %v2955_v2  ;;  %v2960_v7 = vld [vmem:[%s4306_s1 + $0x18] sm:$0xff] (!%p261_p2)   ;;  %v2962_v9 = vld [vmem:[%s4306_s1 + $0x20] sm:$0xff] (!%p261_p2)   ;;  %v2964_v13 = vld [vmem:[%s4306_s1 + $0x28] sm:$0xff] (!%p261_p2)  }
   0x9   : > { %v2965_v14 = vld [vmem:[%s4306_s1 + $0x70] sm:$0xff] (!%p261_p2)   ;;  %v2967_v16 = vld [vmem:[%s4306_s1 + $0x78] sm:$0xff] (!%p261_p2)   ;;  %v2975_v18 = vld [vmem:[%s4306_s1 + $0xc0] sm:$0xff] (!%p261_p2)   ;;  %2952 = vset.pattern.permute.xlu0 (!%p261_p2), %v3237_v56 }
   0xa   : > { %v2966_v15 = vld [vmem:[%s4306_s1 + $0x30] sm:$0xff] (!%p261_p2)   ;;  %v2968_v17 = vld [vmem:[%s4306_s1 + $0x38] sm:$0xff] (!%p261_p2)   ;;  %v2976_v19 = vld [vmem:[%s4306_s1 + $0x100] sm:$0xff] (!%p261_p2)  }
   0xb   : > { %2645 = vmatpush3.bf16.msra.mxu0 (!%p261_p2), %v2956_v3  ;;  %2935 = vmatpush3.bf16.msra.mxu1 (!%p261_p2), %v2956_v3  ;;  %v2977_v22 = vld [vmem:[%s4306_s1 + $0x80] sm:$0xff] (!%p261_p2)   ;;  %v2978_v23 = vld [vmem:[%s4306_s1 + $0xc8] sm:$0xff] (!%p261_p2)   ;;  %v2986_v28 = vld [vmem:[%s4306_s1 + $0xd0] sm:$0xff] (!%p261_p2)  }
   0xc   : > { %2646 = vmatprep.subr.bf16.mxu0 (!%p261_p2), %v2957_v4  ;;  %2928 = vmatprep.subr.bf16.mxu1 (!%p261_p2), %v2957_v4  ;;  %v2979_v26 = vld [vmem:[%s4306_s1 + $0x88] sm:$0xff] (!%p261_p2)   ;;  %v2987_v30 = vld [vmem:[%s4306_s1 + $0x90] sm:$0xff] (!%p261_p2)   ;;  %v2988_v31 = vld [vmem:[%s4306_s1 + $0xd8] sm:$0xff] (!%p261_p2)  }
   0xd   : > { %s4314_s25 = smov (!%p310_p3, %s2488_s25), 1  ;;  %v3007_v34 = vld [vmem:[%s4306_s1 + $0x108] sm:$0xff]   ;;  %v2989_v35 = vld [vmem:[%s4306_s1 + $0x98] sm:$0xff]   ;;  %v2996_v37 = vld [vmem:[%s4306_s1 + $0xe0] sm:$0xff]  }
   0xe   : > { %s2942_s17 = smul.u32 640, %s4314_s25  ;;  %v2997_v39 = vld [vmem:[%s4306_s1 + $0xa0] sm:$0xff]   ;;  %v2998_v40 = vld [vmem:[%s4306_s1 + $0xe8] sm:$0xff]   ;;  %v3006_v46 = vld [vmem:[%s4306_s1 + $0xf0] sm:$0xff]   ;;  %s322_s20 = scalar_lea.vmem %s4309_s4, %s4314_s25 }
   0xf   : > { %2647 = vmatpush3.bf16.msra.mxu0 %v2958_v5  ;;  %2936 = vmatpush3.bf16.msra.mxu1 %v2958_v5  ;;  %v2999_v43 = vld [vmem:[%s4306_s1 + $0xa8] sm:$0xff]   ;;  %v3029_v47 = vld [vmem:[%s4306_s1 + $0x110] sm:$0xff]   ;;  %v3009_v49 = vld [vmem:[%s4306_s1 + $0xf8] sm:$0xff]   ;;  %s3988_s22 = sshll.u32 %s4314_s25, 8 }
  0x10   : > { %2648 = vmatprep.subr.bf16.mxu0 %v2959_v6  ;;  %2929 = vmatprep.subr.bf16.mxu1 %v2959_v6  ;;  %s3319_s26 = scalar_lea.vmem %s4305_s0, %s2942_s17  ;;  %v3008_v48 = vld [vmem:[%s4306_s1 + $0xb0] sm:$0xff]   ;;  %v3010_v52 = vld [vmem:[%s4306_s1 + $0xb8] sm:$0xff]   ;;  %s3994_s28 = scalar_lea.vmem %s4310_s5, %s3988_s22 }
  0x11   : > { %v2971_v11 = vld [vmem:[%s3319_s26 + $0x4] ss:$20 sps:$4 sm:$0xff]   ;;  %v2969_v20 = vld [vmem:[%s3319_s26] ss:$20 sps:$4 sm:$0xff]   ;;  %v2984_v27 = vld [vmem:[%s3319_s26 + $0x28] ss:$20 sps:$4 sm:$0xff]   ;;  %s4128_s30 = scalar_lea.vmem %s4308_s3, %s3988_s22  ;;  %s4134_s10 = scalar_lea.vmem %s4312_s7, %s3988_s22 }
  0x12   : > { %v2974_v12 = vld [vmem:[%s3319_s26 + $0x1e4] ss:$20 sps:$4 sm:$0xff]   ;;  %1205 = vmatprep.mubr.bf16.mxu0 %v2971_v11  ;;  %v2972_v21 = vld [vmem:[%s3319_s26 + $0x1e0] ss:$20 sps:$4 sm:$0xff]   ;;  %v2985_v29 = vld [vmem:[%s3319_s26 + $0x208] ss:$20 sps:$4 sm:$0xff]   ;;  %s4141_s13 = scalar_lea.vmem %s4311_s6, %s3988_s22 }
  0x13   : > { %2649 = vmatpush3.bf16.msra.mxu0 %v2960_v7  ;;  %2937 = vmatpush3.bf16.msra.mxu1 %v2960_v7  ;;  %v2980_v24 = vld [vmem:[%s3319_s26 + $0x2c] ss:$20 sps:$4 sm:$0xff]   ;;  %v2990_v32 = vld [vmem:[%s3319_s26 + $0x54] ss:$20 sps:$4 sm:$0xff]   ;;  %v2994_v36 = vld [vmem:[%s3319_s26 + $0x50] ss:$20 sps:$4 sm:$0xff]  }
  0x14   : > { %2650 = vmatprep.subr.bf16.mxu0 %v2961_v8  ;;  %2930 = vmatprep.subr.bf16.mxu1 %v2961_v8  ;;  %v2982_v25 = vld [vmem:[%s3319_s26 + $0x20c] ss:$20 sps:$4 sm:$0xff]   ;;  %v2992_v33 = vld [vmem:[%s3319_s26 + $0x234] ss:$20 sps:$4 sm:$0xff]   ;;  %v2995_v38 = vld [vmem:[%s3319_s26 + $0x230] ss:$20 sps:$4 sm:$0xff]  }
  0x15   : > { %1301 = vmatprep.mubr.bf16.mxu1 %v2974_v12  ;;  %v3000_v41 = vld [vmem:[%s3319_s26 + $0x7c] ss:$20 sps:$4 sm:$0xff]   ;;  %v3004_v44 = vld [vmem:[%s3319_s26 + $0x78] ss:$20 sps:$4 sm:$0xff]   ;;  %v3016_v54 = vld [vmem:[%s3319_s26 + $0xa0] ss:$20 sps:$4 sm:$0xff]  }
  0x16   : > { %v3002_v42 = vld [vmem:[%s3319_s26 + $0x25c] ss:$20 sps:$4 sm:$0xff]   ;;  %v3005_v45 = vld [vmem:[%s3319_s26 + $0x258] ss:$20 sps:$4 sm:$0xff]   ;;  %v3019_v58 = vld [vmem:[%s3319_s26 + $0x34] ss:$20 sps:$4 sm:$0xff]  }
  0x17   : > { %2651 = vmatpush3.bf16.msra.mxu0 %v2962_v9  ;;  %2938 = vmatpush3.bf16.msra.mxu1 %v2962_v9  ;;  %v3011_v50 = vld [vmem:[%s3319_s26 + $0xa4] ss:$20 sps:$4 sm:$0xff]   ;;  %v3015_v51 = vld [vmem:[%s3319_s26 + $0xc] ss:$20 sps:$4 sm:$0xff]   ;;  %v3013_v53 = vld [vmem:[%s3319_s26 + $0x8] ss:$20 sps:$4 sm:$0xff]  }
  0x18   : > { %2652 = vmatprep.subr.bf16.mxu0 %v2963_v10  ;;  %2931 = vmatprep.subr.bf16.mxu1 %v2963_v10  ;;  %v3017_v55 = vld [vmem:[%s3319_s26 + $0xcc] ss:$20 sps:$4 sm:$0xff]   ;;  %v3048_v57 = vld [vmem:[%s4306_s1 + $0x118] sm:$0xff]   ;;  %v3022_v60 = vld [vmem:[%s3319_s26 + $0x30] ss:$20 sps:$4 sm:$0xff]  }
  0x19   : > { %v3021_v59 = vld [vmem:[%s3319_s26 + $0xc8] ss:$20 sps:$4 sm:$0xff]   ;;  %v3027_v63 = vld [vmem:[%s3319_s26 + $0xf0] ss:$20 sps:$4 sm:$0xff]   ;;  %v3028_v0 = vld [vmem:[%s3319_s26 + $0x58] ss:$20 sps:$4 sm:$0xff]  }
  0x1a   : > { %v3023_v61 = vld [vmem:[%s3319_s26 + $0xf4] ss:$20 sps:$4 sm:$0xff]   ;;  %v3025_v62 = vld [vmem:[%s3319_s26 + $0x5c] ss:$20 sps:$4 sm:$0xff]   ;;  %v3032_v2 = vld [vmem:[%s3319_s26 + $0x84] ss:$20 sps:$4 sm:$0xff]  }
  0x1b   : > { %2653 = vmatpush3.bf16.msra.mxu0 %v2964_v13  ;;  %2939 = vmatpush3.bf16.msra.mxu1 %v2964_v13  ;;  %v3030_v1 = vld [vmem:[%s3319_s26 + $0x11c] ss:$20 sps:$4 sm:$0xff]   ;;  %v3034_v3 = vld [vmem:[%s3319_s26 + $0x118] ss:$20 sps:$4 sm:$0xff]   ;;  %v3035_v4 = vld [vmem:[%s3319_s26 + $0x80] ss:$20 sps:$4 sm:$0xff]  }
  0x1c   : > { %2654 = vmatprep.subr.bf16.mxu0 %v2965_v14  ;;  %2932 = vmatprep.subr.bf16.mxu1 %v2965_v14  ;;  %v3036_v5 = vld [vmem:[%s3319_s26 + $0x144] ss:$20 sps:$4 sm:$0xff]   ;;  %v3038_v6 = vld [vmem:[%s3319_s26 + $0xac] ss:$20 sps:$4 sm:$0xff]   ;;  %v3041_v8 = vld [vmem:[%s3319_s26 + $0xa8] ss:$20 sps:$4 sm:$0xff]  }
  0x1d   : > { %v3040_v7 = vld [vmem:[%s3319_s26 + $0x140] ss:$20 sps:$4 sm:$0xff]   ;;  %v3046_v12 = vld [vmem:[%s3319_s26 + $0x168] ss:$20 sps:$4 sm:$0xff]   ;;  %v3047_v13 = vld [vmem:[%s3319_s26 + $0xd0] ss:$20 sps:$4 sm:$0xff]  }
  0x1e   : > { %v2634_v9 = vld [vmem:[%s322_s20] ss:$0 sm:$0xff]  ;;  %v3044_v11 = vld [vmem:[%s3319_s26 + $0xd4] ss:$20 sps:$4 sm:$0xff]  }
  0x1f   : > { %2655 = vmatpush3.bf16.msra.mxu0 %v2966_v15  ;;  %2940 = vmatpush3.bf16.msra.mxu1 %v2966_v15  ;;  %v3042_v10 = vld [vmem:[%s3319_s26 + $0x16c] ss:$20 sps:$4 sm:$0xff]   ;;  %v3049_v14 = vld [vmem:[%s3319_s26 + $0x194] ss:$20 sps:$4 sm:$0xff]   ;;  %v3051_v15 = vld [vmem:[%s3319_s26 + $0xfc] ss:$20 sps:$4 sm:$0xff]  }
  0x20   : > { %2656 = vmatprep.subr.bf16.mxu0 %v2967_v16  ;;  %2933 = vmatprep.subr.bf16.mxu1 %v2967_v16  ;;  %v3053_v16 = vld [vmem:[%s3319_s26 + $0x190] ss:$20 sps:$4 sm:$0xff]  }
  0x21   : > { %1662 = vperm.xlu0 %2952, %v2634_v9  }
  0x23   : > { %2657 = vmatpush3.bf16.msra.mxu0 %v2968_v17  ;;  %2941 = vmatpush3.bf16.msra.mxu1 %v2968_v17  ;;  %v3054_v17 = vld [vmem:[%s3319_s26 + $0xf8] ss:$20 sps:$4 sm:$0xff]  }
  0x24   : > { %2754 = vmatprep.subr.bf16.mxu1 %v2975_v18  ;;  %2886 = vmatprep.subr.bf16.mxu0 %v2976_v19  ;;  %v3055_v18 = vld [vmem:[%s3319_s26 + $0x1bc] ss:$20 sps:$4 sm:$0xff]  }
  0x26   : > { %1206 = vmatmul.mubr.bf16.vlgmr.msra.gmra.mrb[0].mxu0 %v2969_v20  ;;  %1302 = vmatmul.mubr.bf16.vlgmr.msra.gmra.mrb[0].mxu1 %v2972_v21  ;;  %v3059_v20 = vld [vmem:[%s3319_s26 + $0x1b8] ss:$20 sps:$4 sm:$0xff]   ;;  %v3060_v21 = vld [vmem:[%s3319_s26 + $0x120] ss:$20 sps:$4 sm:$0xff]  }
  0x27   : > { %2755 = vmatpush3.bf16.msra.mxu1 %v2977_v22  ;;  %2887 = vmatpush3.bf16.msra.mxu0 %v2976_v19  ;;  %v3057_v19 = vld [vmem:[%s3319_s26 + $0x124] ss:$20 sps:$4 sm:$0xff]   ;;  %v3061_v22 = vld [vmem:[%s3319_s26 + $0x14c] ss:$20 sps:$4 sm:$0xff]  }
  0x28   : > { %2756 = vmatprep.subr.bf16.mxu1 %v2978_v23  ;;  %1213 = vmatprep.mubr.bf16.mxu0 %v2980_v24  ;;  %v3063_v23 = vld [vmem:[%s3319_s26 + $0x10] ss:$20 sps:$4 sm:$0xff]   ;;  %v3064_v24 = vld [vmem:[%s3319_s26 + $0x148] ss:$20 sps:$4 sm:$0xff]  }
  0x29   : > { %1309 = vmatprep.mubr.bf16.mxu1 %v2982_v25  ;;  %2888 = vmatprep.subr.bf16.mxu0 %v3007_v34  ;;  %v3065_v25 = vld [vmem:[%s3319_s26 + $0x38] ss:$20 sps:$4 sm:$0xff]  }
  0x2b   : > { %2757 = vmatpush3.bf16.msra.mxu1 %v2979_v26  ;;  %2889 = vmatpush3.bf16.msra.mxu0 %v3007_v34  ;;  %v3066_v26 = vld [vmem:[%s3319_s26 + $0x174] ss:$20 sps:$4 sm:$0xff]   ;;  %v3076_v34 = vld [vmem:[%s3319_s26 + $0x1c4] ss:$20 sps:$4 sm:$0xff]  }
  0x2c   : > { %2758 = vmatprep.subr.bf16.mxu1 %v2986_v28  ;;  %2890 = vmatprep.subr.bf16.mxu0 %v3029_v47  ;;  %v3069_v28 = vld [vmem:[%s3319_s26 + $0x170] ss:$20 sps:$4 sm:$0xff]  }
  0x2e   : > { %1214 = vmatmul.mubr.bf16.gmra.mrb[4].mxu0 %v2984_v27  ;;  %1310 = vmatmul.mubr.bf16.gmra.mrb[4].mxu1 %v2985_v29  ;;  %v3068_v27 = vld [vmem:[%s3319_s26 + $0x60] ss:$20 sps:$4 sm:$0xff]   ;;  %v3070_v29 = vld [vmem:[%s3319_s26 + $0x88] ss:$20 sps:$4 sm:$0xff]  }
  0x2f   : > { %2759 = vmatpush3.bf16.msra.mxu1 %v2987_v30  ;;  %1221 = vmatprep.mubr.bf16.mxu0 %v2990_v32  ;;  %v3071_v30 = vld [vmem:[%s3319_s26 + $0x19c] ss:$20 sps:$4 sm:$0xff]   ;;  %v3074_v32 = vld [vmem:[%s3319_s26 + $0x198] ss:$20 sps:$4 sm:$0xff]  }
  0x30   : > { %2760 = vmatprep.subr.bf16.mxu1 %v2988_v31  ;;  %1317 = vmatprep.mubr.bf16.mxu1 %v2992_v33  ;;  %v3073_v31 = vld [vmem:[%s3319_s26 + $0xb0] ss:$20 sps:$4 sm:$0xff]   ;;  %v3075_v33 = vld [vmem:[%s3319_s26 + $0xd8] ss:$20 sps:$4 sm:$0xff]  }
  0x31   : > { %2891 = vmatpush3.bf16.msra.mxu0 %v3029_v47  ;;  %v3093_v47 = vld [vmem:[%s3319_s26 + $0x1f0] ss:$20 sps:$4 sm:$0xff]  }
  0x32   : > { %2892 = vmatprep.subr.bf16.mxu0 %v3048_v57 }
  0x33   : > { %2761 = vmatpush3.bf16.msra.mxu1 %v2989_v35  ;;  %v3078_v35 = vld [vmem:[%s3319_s26 + $0x100] ss:$20 sps:$4 sm:$0xff]  }
  0x34   : > { %2762 = vmatprep.subr.bf16.mxu1 %v2996_v37  ;;  %v3080_v37 = vld [vmem:[%s3319_s26 + $0x128] ss:$20 sps:$4 sm:$0xff]  }
  0x35   : > { %2893 = vmatpush3.bf16.msra.mxu0 %v3048_v57 }
  0x36   : > { %1222 = vmatmul.mubr.bf16.gmra.mrb[8].mxu0 %v2994_v36  ;;  %1318 = vmatmul.mubr.bf16.gmra.mrb[8].mxu1 %v2995_v38  ;;  %v3079_v36 = vld [vmem:[%s3319_s26 + $0x1c0] ss:$20 sps:$4 sm:$0xff]  }
  0x37   : > { %2763 = vmatpush3.bf16.msra.mxu1 %v2997_v39  ;;  %1229 = vmatprep.mubr.bf16.mxu0 %v3000_v41  ;;  %v3081_v38 = vld [vmem:[%s3319_s26 + $0x1ec] ss:$20 sps:$4 sm:$0xff]   ;;  %v3083_v39 = vld [vmem:[%s3319_s26 + $0x150] ss:$20 sps:$4 sm:$0xff]  }
  0x38   : > { %2764 = vmatprep.subr.bf16.mxu1 %v2998_v40  ;;  %1325 = vmatprep.mubr.bf16.mxu1 %v3002_v42  ;;  %v3084_v40 = vld [vmem:[%s3319_s26 + $0x1e8] ss:$20 sps:$4 sm:$0xff]   ;;  %v3085_v41 = vld [vmem:[%s3319_s26 + $0x178] ss:$20 sps:$4 sm:$0xff]  }
  0x39   : > { %v3086_v42 = vld [vmem:[%s3319_s26 + $0x214] ss:$20 sps:$4 sm:$0xff]  }
  0x3b   : > { %2765 = vmatpush3.bf16.msra.mxu1 %v2999_v43  ;;  %v3088_v43 = vld [vmem:[%s3319_s26 + $0x1a0] ss:$20 sps:$4 sm:$0xff]  }
  0x3c   : > { %2766 = vmatprep.subr.bf16.mxu1 %v3006_v46  ;;  %v3091_v46 = vld [vmem:[%s3319_s26 + $0x23c] ss:$20 sps:$4 sm:$0xff]  }
  0x3e   : > { %1230 = vmatmul.mubr.bf16.gmra.mrb[12].mxu0 %v3004_v44  ;;  %1326 = vmatmul.mubr.bf16.gmra.mrb[12].mxu1 %v3005_v45  ;;  %v3089_v44 = vld [vmem:[%s3319_s26 + $0x210] ss:$20 sps:$4 sm:$0xff]   ;;  %v3090_v45 = vld [vmem:[%s3319_s26 + $0x1c8] ss:$20 sps:$4 sm:$0xff]  }
  0x3f   : > { %2767 = vmatpush3.bf16.msra.mxu1 %v3008_v48  ;;  %1237 = vmatprep.mubr.bf16.mxu0 %v3011_v50  ;;  %v3094_v48 = vld [vmem:[%s3319_s26 + $0x238] ss:$20 sps:$4 sm:$0xff]  }
  0x40   : > { %2768 = vmatprep.subr.bf16.mxu1 %v3009_v49  ;;  %1366 = vmatprep.mubr.bf16.mxu1 %v3015_v51  ;;  %v3095_v49 = vld [vmem:[%s3319_s26 + $0x218] ss:$20 sps:$4 sm:$0xff]   ;;  %v3098_v51 = vld [vmem:[%s3319_s26 + $0x240] ss:$20 sps:$4 sm:$0xff]  }
  0x41   : > { %v3096_v50 = vld [vmem:[%s3319_s26 + $0x264] ss:$20 sps:$4 sm:$0xff]  }
  0x43   : > { %2769 = vmatpush3.bf16.msra.mxu1 %v3010_v52  ;;  %v3099_v52 = vld [vmem:[%s3319_s26 + $0x260] ss:$20 sps:$4 sm:$0xff]  }
  0x46   : > { %1238 = vmatmul.mubr.bf16.gmra.mrb[16].mxu0 %v3016_v54  ;;  %1367 = vmatmul.mubr.bf16.vlgmr.msra.gmra.mrb[16].mxu1 %v3013_v53  ;;  %v3100_v53 = vld [vmem:[%s3319_s26 + $0x268] ss:$20 sps:$4 sm:$0xff]  }
  0x47   : > { %1245 = vmatprep.mubr.bf16.mxu0 %v3017_v55  ;;  %1374 = vmatprep.mubr.bf16.mxu1 %v3019_v58 }
  0x4e   : > { %1246 = vmatmul.mubr.bf16.gmra.mrb[20].mxu0 %v3021_v59  ;;  %1375 = vmatmul.mubr.bf16.gmra.mrb[20].mxu1 %v3022_v60 }
  0x4f   : > { %1253 = vmatprep.mubr.bf16.mxu0 %v3023_v61  ;;  %1382 = vmatprep.mubr.bf16.mxu1 %v3025_v62 }
  0x56   : > { %1254 = vmatmul.mubr.bf16.gmra.mrb[24].mxu0 %v3027_v63  ;;  %1383 = vmatmul.mubr.bf16.gmra.mrb[24].mxu1 %v3028_v0 }
  0x57   : > { %1261 = vmatprep.mubr.bf16.mxu0 %v3030_v1  ;;  %1390 = vmatprep.mubr.bf16.mxu1 %v3032_v2 }
  0x5e   : > { %1262 = vmatmul.mubr.bf16.gmra.mrb[28].mxu0 %v3034_v3  ;;  %1391 = vmatmul.mubr.bf16.gmra.mrb[28].mxu1 %v3035_v4 }
  0x5f   : > { %1269 = vmatprep.mubr.bf16.mxu0 %v3036_v5  ;;  %1398 = vmatprep.mubr.bf16.mxu1 %v3038_v6 }
  0x66   : > { %1270 = vmatmul.mubr.bf16.gmra.mrb[32].mxu0 %v3040_v7  ;;  %1399 = vmatmul.mubr.bf16.gmra.mrb[32].mxu1 %v3041_v8 }
  0x67   : > { %1277 = vmatprep.mubr.bf16.mxu0 %v3042_v10  ;;  %1406 = vmatprep.mubr.bf16.mxu1 %v3044_v11 }
  0x6e   : > { %1278 = vmatmul.mubr.bf16.gmra.mrb[36].mxu0 %v3046_v12  ;;  %1407 = vmatmul.mubr.bf16.gmra.mrb[36].mxu1 %v3047_v13 }
  0x6f   : > { %1285 = vmatprep.mubr.bf16.mxu0 %v3049_v14  ;;  %1414 = vmatprep.mubr.bf16.mxu1 %v3051_v15 }
  0x76   : > { %1286 = vmatmul.mubr.bf16.gmra.mrb[40].mxu0 %v3053_v16  ;;  %1415 = vmatmul.mubr.bf16.gmra.mrb[40].mxu1 %v3054_v17 }
  0x77   : > { %1293 = vmatprep.mubr.bf16.mxu0 %v3055_v18  ;;  %1422 = vmatprep.mubr.bf16.mxu1 %v3057_v19 }
  0x7e   : > { %1294 = vmatmul.mubr.bf16.gmra.mrb[44].mxu0 %v3059_v20  ;;  %1423 = vmatmul.mubr.bf16.gmra.mrb[44].mxu1 %v3060_v21 }
  0x7f   : > { %1430 = vmatprep.mubr.bf16.mxu1 %v3061_v22  ;;  %2894 = vmatprep.mubr.msk.bf16.mxu0 %vm1124_vm0, %v3063_v23 }
  0x86   : > { %1431 = vmatmul.mubr.bf16.gmra.mrb[48].mxu1 %v3064_v24  ;;  %2895 = vmatmul.mubr.msk.bf16.vlgmr.msra.gmra.mrb[48].mxu0 %vm1124_vm0, %v3065_v25 }
  0x87   : > { %1438 = vmatprep.mubr.bf16.mxu1 %v3066_v26  ;;  %2898 = vmatprep.mubr.msk.bf16.mxu0 %vm1124_vm0, %v3068_v27 }
  0x8e   : > { %1439 = vmatmul.mubr.bf16.gmra.mrb[52].mxu1 %v3069_v28  ;;  %2899 = vmatmul.mubr.msk.bf16.gmra.mrb[52].mxu0 %vm1124_vm0, %v3070_v29 }
  0x8f   : > { %1446 = vmatprep.mubr.bf16.mxu1 %v3071_v30  ;;  %2902 = vmatprep.mubr.msk.bf16.mxu0 %vm1124_vm0, %v3073_v31 }
  0x96   : > { %1447 = vmatmul.mubr.bf16.gmra.mrb[56].mxu1 %v3074_v32  ;;  %2903 = vmatmul.mubr.msk.bf16.gmra.mrb[56].mxu0 %vm1124_vm0, %v3075_v33 }
  0x97   : > { %1454 = vmatprep.mubr.bf16.mxu1 %v3076_v34  ;;  %2906 = vmatprep.mubr.msk.bf16.mxu0 %vm1124_vm0, %v3078_v35 }
  0x9e   : > { %1455 = vmatmul.mubr.bf16.gmra.mrb[60].mxu1 %v3079_v36  ;;  %2907 = vmatmul.mubr.msk.bf16.gmra.mrb[60].mxu0 %vm1124_vm0, %v3080_v37 }
  0x9f   : > { %1462 = vmatprep.mubr.bf16.mxu1 %v3081_v38  ;;  %2910 = vmatprep.mubr.msk.bf16.mxu0 %vm1124_vm0, %v3083_v39 }
  0xa6   : > { %1463 = vmatmul.mubr.bf16.gmra.mrb[64].mxu1 %v3084_v40  ;;  %2911 = vmatmul.mubr.msk.bf16.gmra.mrb[64].mxu0 %vm1124_vm0, %v3085_v41 }
  0xa7   : > { %1470 = vmatprep.mubr.bf16.mxu1 %v3086_v42  ;;  %2914 = vmatprep.mubr.msk.bf16.mxu0 %vm1124_vm0, %v3088_v43 }
  0xae   : > { %1471 = vmatmul.mubr.bf16.gmra.mrb[68].mxu1 %v3089_v44  ;;  %2915 = vmatmul.mubr.msk.bf16.gmra.mrb[68].mxu0 %vm1124_vm0, %v3090_v45 }
  0xaf   : > { %1478 = vmatprep.mubr.bf16.mxu1 %v3091_v46  ;;  %2918 = vmatprep.mubr.msk.bf16.mxu0 %vm1124_vm0, %v3093_v47 }
  0xb6   : > { %1479 = vmatmul.mubr.bf16.gmra.mrb[72].mxu1 %v3094_v48  ;;  %2919 = vmatmul.mubr.msk.bf16.gmra.mrb[72].mxu0 %vm1124_vm0, %v3095_v49 }
  0xb7   : > { %1486 = vmatprep.mubr.bf16.mxu1 %v3096_v50  ;;  %2922 = vmatprep.mubr.msk.bf16.mxu0 %vm1124_vm0, %v3098_v51 }
  0xbe   : > { %1487 = vmatmul.mubr.bf16.gmra.mrb[76].mxu1 %v3099_v52  ;;  %2923 = vmatmul.mubr.msk.bf16.gmra.mrb[76].mxu0 %vm1124_vm0, %v3100_v53 }
  0xf9   : > { %v2658_v54 = vpop.f32.mrb[0].mxu0  ;;  %v2730_v55 = vpop.f32.mrb[0].mxu1 }
  0xfa   : > { %v2659_v56 = vpop.f32.mrb[1].mxu0  ;;  %v2731_v57 = vpop.f32.mrb[1].mxu1 }
  0xfb   : > { %v2660_v58 = vadd.f32 %v2659_v56, %v2658_v54  ;;  %v2661_v59 = vpop.f32.mrb[2].mxu0  ;;  %v3502_v60 = vadd.f32 %v2731_v57, %v2730_v55  ;;  %v2733_v61 = vpop.f32.mrb[2].mxu1 }
  0xfc   : > { %v2662_v62 = vpop.f32.mrb[3].mxu0  ;;  %v2734_v63 = vpop.f32.mrb[3].mxu1 }
  0xfd   : > { %v2663_v0 = vadd.f32 %v2662_v62, %v2661_v59  ;;  %v3504_v1 = vadd.f32 %v2734_v63, %v2733_v61 }
 0x101   : > { %v2664_v2 = vpop.f32.mrb[4].mxu0  ;;  %v2736_v3 = vpop.f32.mrb[4].mxu1 }
 0x102   : > { %v2665_v4 = vpop.f32.mrb[5].mxu0  ;;  %v2737_v5 = vpop.f32.mrb[5].mxu1 }
 0x103   : > { %v2666_v6 = vadd.f32 %v2665_v4, %v2664_v2  ;;  %v2667_v7 = vpop.f32.mrb[6].mxu0  ;;  %v3506_v8 = vadd.f32 %v2737_v5, %v2736_v3  ;;  %v2739_v9 = vpop.f32.mrb[6].mxu1 }
 0x104   : > { %v2668_v10 = vpop.f32.mrb[7].mxu0  ;;  %v2740_v11 = vpop.f32.mrb[7].mxu1 }
 0x105   : > { %v2669_v12 = vadd.f32 %v2668_v10, %v2667_v7  ;;  %v3508_v13 = vadd.f32 %v2740_v11, %v2739_v9 }
 0x109   : > { %v2670_v14 = vpop.f32.mrb[8].mxu0  ;;  %v2742_v15 = vpop.f32.mrb[8].mxu1 }
 0x10a   : > { %v2671_v16 = vpop.f32.mrb[9].mxu0  ;;  %v2743_v17 = vpop.f32.mrb[9].mxu1 }
 0x10b   : > { %v2672_v18 = vadd.f32 %v2671_v16, %v2670_v14  ;;  %v2673_v19 = vpop.f32.mrb[10].mxu0  ;;  %v3510_v20 = vadd.f32 %v2743_v17, %v2742_v15  ;;  %v2745_v21 = vpop.f32.mrb[10].mxu1 }
 0x10c   : > { %v2674_v22 = vpop.f32.mrb[11].mxu0  ;;  %v2746_v23 = vpop.f32.mrb[11].mxu1 }
 0x10d   : > { %v2675_v24 = vadd.f32 %v2674_v22, %v2673_v19  ;;  %v3512_v25 = vadd.f32 %v2746_v23, %v2745_v21 }
 0x111   : > { %v2676_v26 = vpop.f32.mrb[12].mxu0  ;;  %v2748_v27 = vpop.f32.mrb[12].mxu1 }
 0x112   : > { %v2677_v28 = vpop.f32.mrb[13].mxu0  ;;  %v2749_v29 = vpop.f32.mrb[13].mxu1 }
 0x113   : > { %v2678_v30 = vadd.f32 %v2677_v28, %v2676_v26  ;;  %v2679_v31 = vpop.f32.mrb[14].mxu0  ;;  %v3514_v32 = vadd.f32 %v2749_v29, %v2748_v27  ;;  %v2751_v33 = vpop.f32.mrb[14].mxu1 }
 0x114   : > { %v2680_v34 = vpop.f32.mrb[15].mxu0  ;;  %v2752_v35 = vpop.f32.mrb[15].mxu1 }
 0x115   : > { %v2681_v36 = vadd.f32 %v2680_v34, %v2679_v31  ;;  %v3516_v37 = vadd.f32 %v2752_v35, %v2751_v33 }
 0x119   : > { %v2682_v38 = vpop.f32.mrb[16].mxu0  ;;  %v2770_v39 = vpop.f32.mrb[16].mxu1 }
 0x11a   : > { %v2683_v40 = vpop.f32.mrb[17].mxu0  ;;  %v2771_v41 = vpop.f32.mrb[17].mxu1 }
 0x11b   : > { %v3518_v42 = vadd.f32 %v2683_v40, %v2682_v38  ;;  %v2772_v43 = vadd.f32 %v2771_v41, %v2770_v39  ;;  %v2685_v44 = vpop.f32.mrb[18].mxu0  ;;  %v2773_v45 = vpop.f32.mrb[18].mxu1 }
 0x11c   : > { %v2686_v46 = vpop.f32.mrb[19].mxu0  ;;  %v2774_v47 = vpop.f32.mrb[19].mxu1 }
 0x11d   : > { %v2687_v48 = vadd.f32 %v2686_v46, %v2685_v44  ;;  %v2775_v49 = vadd.f32 %v2774_v47, %v2773_v45  ;;  %v3520_v50 = vadd.f32 %v2772_v43, %v2660_v58 }
 0x11f   : > { %v3522_v51 = vadd.f32 %v2775_v49, %v2663_v0 }
 0x121   : > { %v2688_v52 = vpop.f32.mrb[20].mxu0  ;;  %v2776_v53 = vpop.f32.mrb[20].mxu1 }
 0x122   : > { %v2689_v54 = vpop.f32.mrb[21].mxu0  ;;  %v2777_v55 = vpop.f32.mrb[21].mxu1 }
 0x123   : > { %v3524_v56 = vadd.f32 %v2689_v54, %v2688_v52  ;;  %v2778_v57 = vadd.f32 %v2777_v55, %v2776_v53  ;;  %v2691_v59 = vpop.f32.mrb[22].mxu0  ;;  %v2779_v61 = vpop.f32.mrb[22].mxu1 }
 0x124   : > { %v2692_v62 = vpop.f32.mrb[23].mxu0  ;;  %v2780_v63 = vpop.f32.mrb[23].mxu1 }
 0x125   : > { %v2693_v2 = vadd.f32 %v2692_v62, %v2691_v59  ;;  %v2781_v3 = vadd.f32 %v2780_v63, %v2779_v61  ;;  %v3526_v4 = vadd.f32 %v2778_v57, %v2666_v6 }
 0x127   : > { %v3528_v5 = vadd.f32 %v2781_v3, %v2669_v12 }
 0x129   : > { %v2694_v58 = vpop.f32.mrb[24].mxu0  ;;  %v2782_v0 = vpop.f32.mrb[24].mxu1 }
 0x12a   : > { %v2695_v7 = vpop.f32.mrb[25].mxu0  ;;  %v2783_v9 = vpop.f32.mrb[25].mxu1 }
 0x12b   : > { %v3530_v10 = vadd.f32 %v2695_v7, %v2694_v58  ;;  %v2784_v11 = vadd.f32 %v2783_v9, %v2782_v0  ;;  %v2697_v14 = vpop.f32.mrb[26].mxu0  ;;  %v2785_v15 = vpop.f32.mrb[26].mxu1 }
 0x12c   : > { %v2698_v16 = vpop.f32.mrb[27].mxu0  ;;  %v2786_v17 = vpop.f32.mrb[27].mxu1 }
 0x12d   : > { %v2699_v19 = vadd.f32 %v2698_v16, %v2697_v14  ;;  %v2787_v21 = vadd.f32 %v2786_v17, %v2785_v15  ;;  %v3532_v22 = vadd.f32 %v2784_v11, %v2672_v18 }
 0x12f   : > { %v3534_v23 = vadd.f32 %v2787_v21, %v2675_v24 }
 0x131   : > { %v2700_v6 = vpop.f32.mrb[28].mxu0  ;;  %v2788_v12 = vpop.f32.mrb[28].mxu1 }
 0x132   : > { %v2701_v26 = vpop.f32.mrb[29].mxu0  ;;  %v2789_v27 = vpop.f32.mrb[29].mxu1 }
 0x133   : > { %v3536_v28 = vadd.f32 %v2701_v26, %v2700_v6  ;;  %v2790_v29 = vadd.f32 %v2789_v27, %v2788_v12  ;;  %v2703_v31 = vpop.f32.mrb[30].mxu0  ;;  %v2791_v33 = vpop.f32.mrb[30].mxu1 }
 0x134   : > { %v2704_v34 = vpop.f32.mrb[31].mxu0  ;;  %v2792_v35 = vpop.f32.mrb[31].mxu1 }
 0x135   : > { %v2705_v38 = vadd.f32 %v2704_v34, %v2703_v31  ;;  %v2793_v39 = vadd.f32 %v2792_v35, %v2791_v33  ;;  %v3538_v40 = vadd.f32 %v2790_v29, %v2678_v30 }
 0x137   : > { %v3540_v41 = vadd.f32 %v2793_v39, %v2681_v36 }
 0x139   : > { %v2706_v18 = vpop.f32.mrb[32].mxu0  ;;  %v2794_v24 = vpop.f32.mrb[32].mxu1 }
 0x13a   : > { %v2707_v43 = vpop.f32.mrb[33].mxu0  ;;  %v2795_v44 = vpop.f32.mrb[33].mxu1 }
 0x13b   : > { %v3542_v45 = vadd.f32 %v2707_v43, %v2706_v18  ;;  %v2796_v46 = vadd.f32 %v2795_v44, %v2794_v24  ;;  %v2709_v47 = vpop.f32.mrb[34].mxu0  ;;  %v2797_v49 = vpop.f32.mrb[34].mxu1 }
 0x13c   : > { %v2710_v52 = vpop.f32.mrb[35].mxu0  ;;  %v2798_v53 = vpop.f32.mrb[35].mxu1 }
 0x13d   : > { %v3544_v54 = vadd.f32 %v2710_v52, %v2709_v47  ;;  %v2799_v55 = vadd.f32 %v2798_v53, %v2797_v49  ;;  %v3547_v57 = vadd.f32 %v2796_v46, %v3518_v42 }
 0x13f   : > { %v3549_v30 = vadd.f32 %v2799_v55, %v2687_v48 }
 0x141   : > { %v2712_v36 = vpop.f32.mrb[36].mxu0  ;;  %v2800_v59 = vpop.f32.mrb[36].mxu1 }
 0x142   : > { %v2713_v61 = vpop.f32.mrb[37].mxu0  ;;  %v2801_v62 = vpop.f32.mrb[37].mxu1 }
 0x143   : > { %v3551_v63 = vadd.f32 %v2713_v61, %v2712_v36  ;;  %v2802_v3 = vadd.f32 %v2801_v62, %v2800_v59  ;;  %v2715_v58 = vpop.f32.mrb[38].mxu0  ;;  %v2803_v0 = vpop.f32.mrb[38].mxu1 }
 0x144   : > { %v2716_v7 = vpop.f32.mrb[39].mxu0  ;;  %v2804_v9 = vpop.f32.mrb[39].mxu1 }
 0x145   : > { %v3553_v11 = vadd.f32 %v2716_v7, %v2715_v58  ;;  %v2805_v14 = vadd.f32 %v2804_v9, %v2803_v0  ;;  %v3556_v15 = vadd.f32 %v2802_v3, %v3524_v56 }
 0x147   : > { %v3558_v42 = vadd.f32 %v2805_v14, %v2693_v2 }
 0x149   : > { %v2718_v48 = vpop.f32.mrb[40].mxu0  ;;  %v2806_v16 = vpop.f32.mrb[40].mxu1 }
 0x14a   : > { %v2719_v17 = vpop.f32.mrb[41].mxu0  ;;  %v2807_v21 = vpop.f32.mrb[41].mxu1 }
 0x14b   : > { %v3560_v6 = vadd.f32 %v2719_v17, %v2718_v48  ;;  %v2808_v12 = vadd.f32 %v2807_v21, %v2806_v16  ;;  %v2721_v26 = vpop.f32.mrb[42].mxu0  ;;  %v2809_v27 = vpop.f32.mrb[42].mxu1 }
 0x14c   : > { %v2722_v29 = vpop.f32.mrb[43].mxu0  ;;  %v2810_v31 = vpop.f32.mrb[43].mxu1 }
 0x14d   : > { %v3562_v33 = vadd.f32 %v2722_v29, %v2721_v26  ;;  %v2811_v34 = vadd.f32 %v2810_v31, %v2809_v27  ;;  %v3565_v35 = vadd.f32 %v2808_v12, %v3530_v10 }
 0x14f   : > { %v3567_v56 = vadd.f32 %v2811_v34, %v2699_v19  ;;  %v3578_v19 = vpop.permute.xlu0 %1662 }
 0x151   : > { %v2724_v2 = vpop.f32.mrb[44].mxu0  ;;  %v2812_v39 = vpop.f32.mrb[44].mxu1 }
 0x152   : > { %v2725_v18 = vpop.f32.mrb[45].mxu0  ;;  %v2813_v24 = vpop.f32.mrb[45].mxu1 }
 0x153   : > { %v3569_v43 = vadd.f32 %v2725_v18, %v2724_v2  ;;  %v2814_v44 = vadd.f32 %v2813_v24, %v2812_v39  ;;  %v2727_v46 = vpop.f32.mrb[46].mxu0  ;;  %v2815_v47 = vpop.f32.mrb[46].mxu1 }
 0x154   : > { %v2728_v49 = vpop.f32.mrb[47].mxu0  ;;  %v2816_v52 = vpop.f32.mrb[47].mxu1 }
 0x155   : > { %v3571_v53 = vadd.f32 %v2728_v49, %v2727_v46  ;;  %v2817_v55 = vadd.f32 %v2816_v52, %v2815_v47  ;;  %v3574_v36 = vadd.f32 %v2814_v44, %v3536_v28  ;;  %v3585_v28 = vld [vmem:[%s4307_s2] ss:$0 sm:$0xff] }
 0x157   : > { %v3576_v10 = vadd.f32 %v2817_v55, %v2705_v38 }
 0x159   : > { %v2818_v59 = vpop.f32.mrb[48].mxu1  ;;  %v2896_v61 = vpop.f32.mrb[48].mxu0 }
 0x15a   : > { %v1538_v62 = vadd.f32 %v2896_v61, %v3526_v4  ;;  %v2819_v3 = vpop.f32.mrb[49].mxu1  ;;  %v1529_v58 = vpop.f32.mrb[49].mxu0 }
 0x15b   : > { %v2820_v0 = vadd.f32 %v2819_v3, %v2818_v59  ;;  %v1530_v7 = vadd.f32 %v1529_v58, %v3520_v50  ;;  %v2821_v9 = vpop.f32.mrb[50].mxu1  ;;  %v2897_v14 = vpop.f32.mrb[50].mxu0 }
 0x15c   : > { %v1541_v38 = vadd.f32 %v2897_v14, %v3528_v5  ;;  %v2822_v48 = vpop.f32.mrb[51].mxu1  ;;  %v1532_v16 = vpop.f32.mrb[51].mxu0  ;;  %v1667_v17 = vmul.f32 %v3578_v19, %v1538_v62 }
 0x15d   : > { %v2823_v4 = vadd.f32 %v2822_v48, %v2821_v9  ;;  %v1533_v21 = vadd.f32 %v1532_v16, %v3522_v51  ;;  %v1665_v12 = vmul.f32 %v3578_v19, %v1530_v7  ;;  %v3592_v50 = vadd.f32 %v2820_v0, %v3542_v45 }
 0x15e   : > { %v1668_v26 = vmul.f32 %v3578_v19, %v1541_v38  ;;  %v3596_v27 = vadd.f32 %v3585_v28, %v1667_v17 }
 0x15f   : > { %v3599_v5 = vadd.f32 %v3585_v28, %v1665_v12  ;;  %v3602_v29 = vadd.f32 %v2823_v4, %v3544_v54  ;;  %v1666_v31 = vmul.f32 %v3578_v19, %v1533_v21 }
 0x160   : > { %v1743_v51 = vsel %vm1736_vm1, %v3596_v27, -inf  ;;  %v3608_v34 = vadd.f32 %v3585_v28, %v1668_v26 }
 0x161   : > { %v2824_v45 = vpop.f32.mrb[52].mxu1  ;;  %v2900_v2 = vpop.f32.mrb[52].mxu0  ;;  %1744 = vmax.xlane.f32.xlu1 %v1743_v51  ;;  %v1737_v39 = vsel %vm1736_vm1, %v3599_v5, -inf  ;;  %v3619_v3 = vadd.f32 %v3585_v28, %v1666_v31 }
 0x162   : > { %v1554_v18 = vadd.f32 %v2900_v2, %v3538_v40  ;;  %v2825_v24 = vpop.f32.mrb[53].mxu1  ;;  %v1545_v44 = vpop.f32.mrb[53].mxu0  ;;  %1738 = vmax.xlane.f32.xlu0 %v1737_v39  ;;  %v1746_v62 = vsel %vm1736_vm1, %v3608_v34, -inf }
 0x163   : > { %v2826_v54 = vadd.f32 %v2825_v24, %v2824_v45  ;;  %v1546_v46 = vadd.f32 %v1545_v44, %v3532_v22  ;;  %v2827_v47 = vpop.f32.mrb[54].mxu1  ;;  %v2901_v49 = vpop.f32.mrb[54].mxu0  ;;  %v1740_v7 = vsel %vm1736_vm1, %v3619_v3, -inf }
 0x164   : > { %v1671_v52 = vmul.f32 %v3578_v19, %v1554_v18  ;;  %v1557_v55 = vadd.f32 %v2901_v49, %v3540_v41  ;;  %v2828_v59 = vpop.f32.mrb[55].mxu1  ;;  %v1548_v61 = vpop.f32.mrb[55].mxu0 }
 0x165   : > { %v2829_v40 = vadd.f32 %v2828_v59, %v2827_v47  ;;  %v1549_v58 = vadd.f32 %v1548_v61, %v3534_v23  ;;  %1747 = vmax.xlane.f32.xlu1 %v1746_v62  ;;  %v3623_v22 = vadd.f32 %v2826_v54, %v3551_v63  ;;  %v1669_v41 = vmul.f32 %v3578_v19, %v1546_v46 }
 0x166   : > { %v3632_v9 = vadd.f32 %v3585_v28, %v1671_v52  ;;  %v1672_v63 = vmul.f32 %v3578_v19, %v1557_v55 }
 0x167   : > { %v3626_v0 = vadd.f32 %v2829_v40, %v3553_v11 }
 0x168   : > { %v1755_v45 = vsel %vm1736_vm1, %v3632_v9, -inf }
 0x169   : > { %v2830_v14 = vpop.f32.mrb[56].mxu1  ;;  %v2904_v38 = vpop.f32.mrb[56].mxu0  ;;  %1741 = vmax.xlane.f32.xlu1 %v1740_v7 }
 0x16a   : > { %v1570_v23 = vadd.f32 %v2904_v38, %v3556_v15  ;;  %v2831_v48 = vpop.f32.mrb[57].mxu1  ;;  %v1561_v16 = vpop.f32.mrb[57].mxu0  ;;  %v3642_v15 = vadd.f32 %v3585_v28, %v1669_v41 }
 0x16b   : > { %v2832_v17 = vadd.f32 %v2831_v48, %v2830_v14  ;;  %v1562_v11 = vadd.f32 %v1561_v16, %v3547_v57  ;;  %v2833_v4 = vpop.f32.mrb[58].mxu1  ;;  %v2905_v21 = vpop.f32.mrb[58].mxu0 }
 0x16c   : > { %v1675_v12 = vmul.f32 %v3578_v19, %v1570_v23  ;;  %v1573_v26 = vadd.f32 %v2905_v21, %v3558_v42  ;;  %v2834_v31 = vpop.f32.mrb[59].mxu1  ;;  %v1564_v51 = vpop.f32.mrb[59].mxu0  ;;  %v1670_v42 = vmul.f32 %v3578_v19, %v1549_v58  ;;  %v1749_v44 = vsel %vm1736_vm1, %v3642_v15, -inf }
 0x16d   : > { %v2835_v2 = vadd.f32 %v2834_v31, %v2833_v4  ;;  %v1565_v39 = vadd.f32 %v1564_v51, %v3549_v30  ;;  %1756 = vmax.xlane.f32.xlu1 %v1755_v45  ;;  %v3646_v57 = vadd.f32 %v2832_v17, %v3560_v6  ;;  %v3660_v30 = vadd.f32 %v3585_v28, %v1672_v63 }
 0x16e   : > { %v3649_v18 = vadd.f32 %v3585_v28, %v1675_v12  ;;  %v3665_v62 = vadd.f32 %v3585_v28, %v1670_v42  ;;  %v1673_v40 = vmul.f32 %v3578_v19, %v1562_v11  ;;  %v1676_v63 = vmul.f32 %v3578_v19, %v1573_v26 }
 0x16f   : > { %v3653_v24 = vadd.f32 %v2835_v2, %v3562_v33  ;;  %v1674_v31 = vmul.f32 %v3578_v19, %v1565_v39 }
 0x170   : > { %v1767_v54 = vsel %vm1736_vm1, %v3649_v18, -inf  ;;  %v1752_v17 = vsel %vm1736_vm1, %v3665_v62, -inf  ;;  %v3685_v4 = vadd.f32 %v3585_v28, %v1673_v40 }
 0x171   : > { %v2836_v46 = vpop.f32.mrb[60].mxu1  ;;  %v2908_v6 = vpop.f32.mrb[60].mxu0  ;;  %1750 = vmax.xlane.f32.xlu1 %v1749_v44  ;;  %1768 = vmax.xlane.f32.xlu0 %v1767_v54  ;;  %v3694_v44 = vadd.f32 %v3585_v28, %v1676_v63 }
 0x172   : > { %v1586_v47 = vadd.f32 %v2908_v6, %v3574_v36  ;;  %v2837_v49 = vpop.f32.mrb[61].mxu1  ;;  %v1577_v52 = vpop.f32.mrb[61].mxu0  ;;  %v1758_v36 = vsel %vm1736_vm1, %v3660_v30, -inf }
 0x173   : > { %v2838_v55 = vadd.f32 %v2837_v49, %v2836_v46  ;;  %v1578_v33 = vadd.f32 %v1577_v52, %v3565_v35  ;;  %v2839_v59 = vpop.f32.mrb[62].mxu1  ;;  %v2909_v61 = vpop.f32.mrb[62].mxu0  ;;  %v1770_v40 = vsel %vm1736_vm1, %v3694_v44, -inf }
 0x174   : > { %v1679_v58 = vmul.f32 %v3578_v19, %v1586_v47  ;;  %v1589_v41 = vadd.f32 %v2909_v61, %v3576_v10  ;;  %v2840_v7 = vpop.f32.mrb[63].mxu1  ;;  %v1580_v14 = vpop.f32.mrb[63].mxu0 }
 0x175   : > { %v1677_v38 = vmul.f32 %v3578_v19, %v1578_v33  ;;  %v2841_v23 = vadd.f32 %v2840_v7, %v2839_v59  ;;  %v1581_v35 = vadd.f32 %v1580_v14, %v3567_v56  ;;  %1759 = vmax.xlane.f32.xlu1 %v1758_v36  ;;  %v1457_v48 = vadd.f32 %v2838_v55, %v3569_v43 }
 0x176   : > { %v3676_v16 = vadd.f32 %v3585_v28, %v1679_v58  ;;  %v3709_v33 = vadd.f32 %v3585_v28, %v1674_v31  ;;  %v1680_v61 = vmul.f32 %v3578_v19, %v1589_v41 }
 0x177   : > { %v1460_v10 = vadd.f32 %v2841_v23, %v3571_v53  ;;  %v3688_v56 = vadd.f32 %v3585_v28, %v1677_v38 }
 0x178   : > { %v1779_v11 = vsel %vm1736_vm1, %v3676_v16, -inf }
 0x179   : > { %v2842_v43 = vpop.f32.mrb[64].mxu1  ;;  %v2912_v21 = vpop.f32.mrb[64].mxu0  ;;  %1753 = vmax.xlane.f32.xlu1 %v1752_v17  ;;  %1780 = vmax.xlane.f32.xlu0 %v1779_v11  ;;  %v1773_v39 = vsel %vm1736_vm1, %v3688_v56, -inf  ;;  %v1764_v11 = vsel %vm1736_vm1, %v3709_v33, -inf }
 0x17a   : > { %v1602_v12 = vadd.f32 %v2912_v21, %v3623_v22  ;;  %v2843_v26 = vpop.f32.mrb[65].mxu1  ;;  %v1593_v53 = vpop.f32.mrb[65].mxu0  ;;  %v1761_v22 = vsel %vm1736_vm1, %v3685_v4, -inf }
 0x17b   : > { %v2844_v51 = vadd.f32 %v2843_v26, %v2842_v43  ;;  %v1594_v45 = vadd.f32 %v1593_v53, %v3592_v50  ;;  %v2845_v2 = vpop.f32.mrb[66].mxu1  ;;  %v2913_v42 = vpop.f32.mrb[66].mxu0  ;;  %v3728_v53 = vadd.f32 %v3585_v28, %v1680_v61 }
 0x17c   : > { %v1683_v54 = vmul.f32 %v3578_v19, %v1602_v12  ;;  %v1605_v46 = vadd.f32 %v2913_v42, %v3626_v0  ;;  %v2846_v6 = vpop.f32.mrb[67].mxu1  ;;  %v1596_v47 = vpop.f32.mrb[67].mxu0 }
 0x17d   : > { %v1681_v49 = vmul.f32 %v3578_v19, %v1594_v45  ;;  %v2847_v50 = vadd.f32 %v2846_v6, %v2845_v2  ;;  %v1597_v52 = vadd.f32 %v1596_v47, %v3602_v29  ;;  %1762 = vmax.xlane.f32.xlu1 %v1761_v22  ;;  %1774 = vmax.xlane.f32.xlu0 %v1773_v39  ;;  %v1782_v42 = vsel %vm1736_vm1, %v3728_v53, -inf }
 0x17e   : > { %v3705_v55 = vadd.f32 %v3585_v28, %v1683_v54  ;;  %v1465_v0 = vadd.f32 %v2844_v51, %v3502_v60 }
 0x17f   : > { %v1468_v59 = vadd.f32 %v2847_v50, %v3504_v1  ;;  %v3718_v58 = vadd.f32 %v3585_v28, %v1681_v49  ;;  %v1678_v1 = vmul.f32 %v3578_v19, %v1581_v35 }
 0x180   : > { %v1791_v29 = vsel %vm1736_vm1, %v3705_v55, -inf }
 0x181   : > { %v2848_v7 = vpop.f32.mrb[68].mxu1  ;;  %v2916_v14 = vpop.f32.mrb[68].mxu0  ;;  %1771 = vmax.xlane.f32.xlu1 %v1770_v40  ;;  %1792 = vmax.xlane.f32.xlu0 %v1791_v29  ;;  %v3743_v6 = vadd.f32 %v3585_v28, %v1678_v1 }
 0x182   : > { %v1618_v60 = vadd.f32 %v2916_v14, %v1457_v48  ;;  %v2849_v36 = vpop.f32.mrb[69].mxu1  ;;  %v1609_v38 = vpop.f32.mrb[69].mxu0  ;;  %v1785_v48 = vsel %vm1736_vm1, %v3718_v58, -inf }
 0x183   : > { %v2850_v23 = vadd.f32 %v2849_v36, %v2848_v7  ;;  %v1610_v41 = vadd.f32 %v1609_v38, %v3646_v57  ;;  %v2851_v63 = vpop.f32.mrb[70].mxu1  ;;  %v2917_v17 = vpop.f32.mrb[70].mxu0  ;;  %v1776_v38 = vsel %vm1736_vm1, %v3743_v6, -inf }
 0x184   : > { %v1687_v43 = vmul.f32 %v3578_v19, %v1618_v60  ;;  %v1621_v21 = vadd.f32 %v2917_v17, %v1460_v10  ;;  %v2852_v12 = vpop.f32.mrb[71].mxu1  ;;  %v1612_v26 = vpop.f32.mrb[71].mxu0  ;;  %v1684_v10 = vmul.f32 %v3578_v19, %v1605_v46 }
 0x185   : > { %v1685_v35 = vmul.f32 %v3578_v19, %v1610_v41  ;;  %v2853_v31 = vadd.f32 %v2852_v12, %v2851_v63  ;;  %v1613_v57 = vadd.f32 %v1612_v26, %v3653_v24  ;;  %1765 = vmax.xlane.f32.xlu1 %v1764_v11  ;;  %1786 = vmax.xlane.f32.xlu0 %v1785_v48 }
 0x186   : > { %v1473_v51 = vadd.f32 %v2850_v23, %v3506_v8  ;;  %v3734_v45 = vadd.f32 %v3585_v28, %v1687_v43  ;;  %v3750_v29 = vadd.f32 %v3585_v28, %v1684_v10 }
 0x187   : > { %v1476_v2 = vadd.f32 %v2853_v31, %v3508_v13  ;;  %v3746_v24 = vadd.f32 %v3585_v28, %v1685_v35  ;;  %v1682_v13 = vmul.f32 %v3578_v19, %v1597_v52 }
 0x188   : > { %v1803_v54 = vsel %vm1736_vm1, %v3734_v45, -inf  ;;  %v1794_v43 = vsel %vm1736_vm1, %v3750_v29, -inf }
 0x189   : > { %v2854_v8 = vpop.f32.mrb[72].mxu1  ;;  %v2920_v47 = vpop.f32.mrb[72].mxu0  ;;  %1783 = vmax.xlane.f32.xlu1 %v1782_v42  ;;  %1804 = vmax.xlane.f32.xlu0 %v1803_v54  ;;  %v1797_v1 = vsel %vm1736_vm1, %v3746_v24, -inf  ;;  %v3768_v26 = vadd.f32 %v3585_v28, %v1682_v13 }
 0x18a   : > { %v1634_v22 = vadd.f32 %v2920_v47, %v1473_v51  ;;  %v2855_v46 = vpop.f32.mrb[73].mxu1  ;;  %v1625_v39 = vpop.f32.mrb[73].mxu0  ;;  %v1686_v47 = vmul.f32 %v3578_v19, %v1613_v57 }
 0x18b   : > { %v2856_v49 = vadd.f32 %v2855_v46, %v2854_v8  ;;  %v1626_v50 = vadd.f32 %v1625_v39, %v1465_v0  ;;  %v2857_v61 = vpop.f32.mrb[74].mxu1  ;;  %v2921_v40 = vpop.f32.mrb[74].mxu0  ;;  %v1788_v39 = vsel %vm1736_vm1, %v3768_v26, -inf }
 0x18c   : > { %v1691_v7 = vmul.f32 %v3578_v19, %v1634_v22  ;;  %v1637_v14 = vadd.f32 %v2921_v40, %v1476_v2  ;;  %v2858_v60 = vpop.f32.mrb[75].mxu1  ;;  %v1628_v36 = vpop.f32.mrb[75].mxu0 }
 0x18d   : > { %v1689_v52 = vmul.f32 %v3578_v19, %v1626_v50  ;;  %v2859_v23 = vadd.f32 %v2858_v60, %v2857_v61  ;;  %v1629_v0 = vadd.f32 %v1628_v36, %v1468_v59  ;;  %1777 = vmax.xlane.f32.xlu1 %v1776_v38  ;;  %1798 = vmax.xlane.f32.xlu0 %v1797_v1 }
 0x18e   : > { %v1692_v41 = vmul.f32 %v3578_v19, %v1637_v14  ;;  %v3760_v63 = vadd.f32 %v3585_v28, %v1691_v7  ;;  %v1481_v17 = vadd.f32 %v2856_v49, %v3510_v20  ;;  %v1688_v59 = vmul.f32 %v3578_v19, %v1621_v21 }
 0x18f   : > { %v1690_v11 = vmul.f32 %v3578_v19, %v1629_v0  ;;  %v1484_v12 = vadd.f32 %v2859_v23, %v3512_v25  ;;  %v3774_v35 = vadd.f32 %v3585_v28, %v1689_v52  ;;  %v3800_v1 = vadd.f32 %v3585_v28, %v1686_v47 }
 0x190   : > { %v1815_v48 = vsel %vm1736_vm1, %v3760_v63, -inf  ;;  %v3777_v20 = vadd.f32 %v3585_v28, %v1692_v41  ;;  %v3788_v49 = vadd.f32 %v3585_v28, %v1688_v59 }
 0x191   : > { %v2860_v31 = vpop.f32.mrb[76].mxu1  ;;  %v2924_v51 = vpop.f32.mrb[76].mxu0  ;;  %1795 = vmax.xlane.f32.xlu1 %v1794_v43  ;;  %1816 = vmax.xlane.f32.xlu0 %v1815_v48  ;;  %v3780_v25 = vadd.f32 %v3585_v28, %v1690_v11  ;;  %v1809_v13 = vsel %vm1736_vm1, %v3774_v35, -inf }
 0x192   : > { %v2861_v10 = vpop.f32.mrb[77].mxu1  ;;  %v1641_v2 = vpop.f32.mrb[77].mxu0  ;;  %v1806_v38 = vsel %vm1736_vm1, %v3788_v49, -inf }
 0x193   : > { %v2862_v42 = vadd.f32 %v2861_v10, %v2860_v31  ;;  %v1642_v21 = vadd.f32 %v1641_v2, %v1481_v17  ;;  %v2863_v54 = vpop.f32.mrb[78].mxu1  ;;  %v2925_v8 = vpop.f32.mrb[78].mxu0  ;;  %v1800_v17 = vsel %vm1736_vm1, %v3800_v1, -inf  ;;  %v1812_v59 = vsel %vm1736_vm1, %v3780_v25, -inf }
 0x194   : > { %v2864_v22 = vpop.f32.mrb[79].mxu1  ;;  %v1644_v46 = vpop.f32.mrb[79].mxu0 }
 0x195   : > { %v1489_v50 = vadd.f32 %v2862_v42, %v3514_v32  ;;  %v1693_v61 = vmul.f32 %v3578_v19, %v1642_v21  ;;  %v2865_v40 = vadd.f32 %v2864_v22, %v2863_v54  ;;  %v1645_v7 = vadd.f32 %v1644_v46, %v1484_v12  ;;  %1789 = vmax.xlane.f32.xlu1 %v1788_v39 }
 0x196   : > { %1810 = vmax.xlane.f32.xlu0 %v1809_v13  ;;  %v1818_v12 = vsel %vm1736_vm1, %v3777_v20, -inf }
 0x197   : > { %v1650_v57 = vadd.f32 %v2924_v51, %v1489_v50  ;;  %v1492_v14 = vadd.f32 %v2865_v40, %v3516_v37  ;;  %v1694_v60 = vmul.f32 %v3578_v19, %v1645_v7  ;;  %v3795_v36 = vadd.f32 %v3585_v28, %v1693_v61 }
 0x199   : > { %v1653_v32 = vadd.f32 %v2925_v8, %v1492_v14  ;;  %1807 = vmax.xlane.f32.xlu1 %v1806_v38  ;;  %v1821_v52 = vsel %vm1736_vm1, %v3795_v36, -inf  ;;  %v1695_v23 = vmul.f32 %v3578_v19, %v1650_v57  ;;  %v3806_v37 = vadd.f32 %v3585_v28, %v1694_v60 }
 0x19a   : > { %1822 = vmax.xlane.f32.xlu0 %v1821_v52 }
 0x19b   : > { %v3809_v0 = vadd.f32 %v3585_v28, %v1695_v23  ;;  %v1696_v41 = vmul.f32 %v3578_v19, %v1653_v32  ;;  %v1824_v19 = vsel %vm1736_vm1, %v3806_v37, -inf }
 0x19d   : > { %1801 = vmax.xlane.f32.xlu1 %v1800_v17  ;;  %v1827_v11 = vsel %vm1736_vm1, %v3809_v0, -inf  ;;  %v3817_v43 = vadd.f32 %v3585_v28, %v1696_v41 }
 0x19e   : > { %1828 = vmax.xlane.f32.xlu0 %v1827_v11 }
 0x19f   : > { %v1830_v48 = vsel %vm1736_vm1, %v3817_v43, -inf }
 0x1a1   : > { %1819 = vmax.xlane.f32.xlu1 %v1818_v12 }
 0x1a5   : > { %1813 = vmax.xlane.f32.xlu1 %v1812_v59 }
 0x1a9   : > { %1825 = vmax.xlane.f32.xlu1 %v1824_v19 }
 0x1ad   : > { %1831 = vmax.xlane.f32.xlu1 %v1830_v48 }
 0x1ee   : > { %v1745_v31 = vpop.xlane.xlu1 %1744 }
 0x1ef   : > { %v1835_v28 = vsub.f32 %v3596_v27, %v1745_v31  ;;  %v1739_v51 = vpop.xlane.xlu0 %1738 }
 0x1f0   : > { %v1833_v10 = vsub.f32 %v3599_v5, %v1739_v51 }
 0x1f1   : > { %v1869_v2 = vmul.f32 1.442695, %v1835_v28 }
 0x1f2   : > { %v1865_v42 = vmul.f32 1.442695, %v1833_v10  ;;  %v1748_v21 = vpop.xlane.xlu1 %1747 }
 0x1f3   : > { %3101 = vpow2.f32 %v1869_v2  ;;  %v1836_v54 = vsub.f32 %v3608_v34, %v1748_v21 }
 0x1f4   : > { %3103 = vpow2.f32 %v1865_v42 }
 0x1f5   : > { %v1871_v8 = vmul.f32 1.442695, %v1836_v54 }
 0x1f6   : > { %v1742_v47 = vpop.xlane.xlu1 %1741 }
 0x1f7   : > { %3105 = vpow2.f32 %v1871_v8  ;;  %v1834_v22 = vsub.f32 %v3619_v3, %v1742_v47 }
 0x1f9   : > { %v1867_v46 = vmul.f32 1.442695, %v1834_v22 }
 0x1fa   : > { %v1757_v39 = vpop.xlane.xlu1 %1756 }
 0x1fb   : > { %3107 = vpow2.f32 %v1867_v46  ;;  %v1839_v27 = vsub.f32 %v3632_v9, %v1757_v39 }
 0x1fd   : > { %v3832_v13 = vpop.eup %3101  ;;  %v1877_v5 = vmul.f32 1.442695, %v1839_v27 }
 0x1fe   : > { %v1751_v50 = vpop.xlane.xlu1 %1750  ;;  %v1769_v61 = vpop.xlane.xlu0 %1768  ;;  %v1935_v40 = vsel %vm1736_vm1, %v3832_v13, 0.0 }
 0x1ff   : > { %v3836_v34 = vpop.eup %3103  ;;  %3109 = vpow2.f32 %v1877_v5  ;;  %v1837_v7 = vsub.f32 %v3642_v15, %v1751_v50  ;;  %v1843_v3 = vsub.f32 %v3649_v18, %v1769_v61  ;;  %1936 = vadd.xlane.f32.xlu0 %v1935_v40 }
 0x200   : > { %v1929_v32 = vsel %vm1736_vm1, %v3836_v34, 0.0 }
 0x201   : > { %v3840_v57 = vpop.eup %3105  ;;  %v1873_v14 = vmul.f32 1.442695, %v1837_v7  ;;  %v1885_v9 = vmul.f32 1.442695, %v1843_v3 }
 0x202   : > { %v1760_v60 = vpop.xlane.xlu1 %1759  ;;  %v1938_v38 = vsel %vm1736_vm1, %v3840_v57, 0.0 }
 0x203   : > { %3111 = vpow2.f32 %v1873_v14  ;;  %v1840_v52 = vsub.f32 %v3660_v30, %v1760_v60  ;;  %1939 = vadd.xlane.f32.xlu1 %v1938_v38  ;;  %1930 = vadd.xlane.f32.xlu0 %v1929_v32 }
 0x204   : > { %3113 = vpow2.f32 %v1885_v9 }
 0x205   : > { %v3847_v15 = vpop.eup %3107  ;;  %v1879_v18 = vmul.f32 1.442695, %v1840_v52 }
 0x206   : > { %v1754_v23 = vpop.xlane.xlu1 %1753  ;;  %v1781_v41 = vpop.xlane.xlu0 %1780  ;;  %v1932_v17 = vsel %vm1736_vm1, %v3847_v15, 0.0 }
 0x207   : > { %3115 = vpow2.f32 %v1879_v18  ;;  %v1838_v11 = vsub.f32 %v3665_v62, %v1754_v23  ;;  %1933 = vadd.xlane.f32.xlu1 %v1932_v17  ;;  %v1847_v30 = vsub.f32 %v3676_v16, %v1781_v41 }
 0x209   : > { %v3852_v12 = vpop.eup %3109  ;;  %v1875_v59 = vmul.f32 1.442695, %v1838_v11  ;;  %v1893_v10 = vmul.f32 1.442695, %v1847_v30 }
 0x20a   : > { %v1763_v19 = vpop.xlane.xlu1 %1762  ;;  %v1775_v48 = vpop.xlane.xlu0 %1774  ;;  %v1947_v31 = vsel %vm1736_vm1, %v3852_v12, 0.0 }
 0x20b   : > { %3117 = vpow2.f32 %v1875_v59  ;;  %v1841_v28 = vsub.f32 %v3685_v4, %v1763_v19  ;;  %1948 = vadd.xlane.f32.xlu0 %v1947_v31  ;;  %v1845_v62 = vsub.f32 %v3688_v56, %v1775_v48 }
 0x20d   : > { %v3858_v51 = vpop.eup %3111  ;;  %v1881_v2 = vmul.f32 1.442695, %v1841_v28  ;;  %v1889_v4 = vmul.f32 1.442695, %v1845_v62 }
 0x20e   : > { %v1772_v42 = vpop.xlane.xlu1 %1771  ;;  %v1793_v21 = vpop.xlane.xlu0 %1792  ;;  %v1941_v16 = vsel %vm1736_vm1, %v3858_v51, 0.0 }
 0x20f   : > { %v3863_v54 = vpop.eup %3113  ;;  %3119 = vpow2.f32 %v1881_v2  ;;  %v1844_v8 = vsub.f32 %v3694_v44, %v1772_v42  ;;  %1942 = vadd.xlane.f32.xlu0 %v1941_v16  ;;  %v1851_v46 = vsub.f32 %v3705_v55, %v1793_v21 }
 0x210   : > { %3121 = vpow2.f32 %v1893_v10  ;;  %v1959_v5 = vsel %vm1736_vm1, %v3863_v54, 0.0 }
 0x211   : > { %v3866_v47 = vpop.eup %3115  ;;  %v1887_v22 = vmul.f32 1.442695, %v1844_v8  ;;  %v1901_v61 = vmul.f32 1.442695, %v1851_v46 }
 0x212   : > { %v1766_v39 = vpop.xlane.xlu1 %1765  ;;  %v1787_v56 = vpop.xlane.xlu0 %1786  ;;  %v1950_v27 = vsel %vm1736_vm1, %v3866_v47, 0.0 }
 0x213   : > { %3123 = vpow2.f32 %v1887_v22  ;;  %v1842_v50 = vsub.f32 %v3709_v33, %v1766_v39  ;;  %1951 = vadd.xlane.f32.xlu1 %v1950_v27  ;;  %1960 = vadd.xlane.f32.xlu0 %v1959_v5  ;;  %v1849_v55 = vsub.f32 %v3718_v58, %v1787_v56 }
 0x214   : > { %3125 = vpow2.f32 %v1889_v4 }
 0x215   : > { %v3874_v44 = vpop.eup %3117  ;;  %v1883_v40 = vmul.f32 1.442695, %v1842_v50  ;;  %v1897_v33 = vmul.f32 1.442695, %v1849_v55 }
 0x216   : > { %v1784_v7 = vpop.xlane.xlu1 %1783  ;;  %v1805_v3 = vpop.xlane.xlu0 %1804  ;;  %v1944_v14 = vsel %vm1736_vm1, %v3874_v44, 0.0 }
 0x217   : > { %3127 = vpow2.f32 %v1883_v40  ;;  %v1848_v9 = vsub.f32 %v3728_v53, %v1784_v7  ;;  %1945 = vadd.xlane.f32.xlu1 %v1944_v14  ;;  %v1855_v32 = vsub.f32 %v3734_v45, %v1805_v3 }
 0x218   : > { %3129 = vpow2.f32 %v1901_v61 }
 0x219   : > { %v3880_v60 = vpop.eup %3119  ;;  %v1895_v38 = vmul.f32 1.442695, %v1848_v9  ;;  %v1909_v17 = vmul.f32 1.442695, %v1855_v32 }
 0x21a   : > { %v1778_v52 = vpop.xlane.xlu1 %1777  ;;  %v1799_v18 = vpop.xlane.xlu0 %1798  ;;  %v1953_v58 = vsel %vm1736_vm1, %v3880_v60, 0.0 }
 0x21b   : > { %v3885_v23 = vpop.eup %3121  ;;  %3131 = vpow2.f32 %v1895_v38  ;;  %v1846_v41 = vsub.f32 %v3743_v6, %v1778_v52  ;;  %1954 = vadd.xlane.f32.xlu0 %v1953_v58  ;;  %v1853_v59 = vsub.f32 %v3746_v24, %v1799_v18 }
 0x21c   : > { %3133 = vpow2.f32 %v1897_v33  ;;  %v1971_v48 = vsel %vm1736_vm1, %v3885_v23, 0.0 }
 0x21d   : > { %v3888_v53 = vpop.eup %3123  ;;  %v1891_v11 = vmul.f32 1.442695, %v1846_v41  ;;  %v1905_v10 = vmul.f32 1.442695, %v1853_v59 }
 0x21e   : > { %v1796_v30 = vpop.xlane.xlu1 %1795  ;;  %v1817_v45 = vpop.xlane.xlu0 %1816  ;;  %v1962_v19 = vsel %vm1736_vm1, %v3888_v53, 0.0 }
 0x21f   : > { %v3895_v31 = vpop.eup %3125  ;;  %3135 = vpow2.f32 %v1891_v11  ;;  %v1852_v6 = vsub.f32 %v3750_v29, %v1796_v30  ;;  %1963 = vadd.xlane.f32.xlu1 %v1962_v19  ;;  %1972 = vadd.xlane.f32.xlu0 %v1971_v48  ;;  %v1859_v2 = vsub.f32 %v3760_v63, %v1817_v45 }
 0x220   : > { %3137 = vpow2.f32 %v1909_v17  ;;  %v1965_v21 = vsel %vm1736_vm1, %v3895_v31, 0.0 }
 0x221   : > { %v3898_v28 = vpop.eup %3127  ;;  %v1903_v24 = vmul.f32 1.442695, %v1852_v6  ;;  %v1917_v22 = vmul.f32 1.442695, %v1859_v2 }
 0x222   : > { %v1790_v62 = vpop.xlane.xlu1 %1789  ;;  %v1956_v42 = vsel %vm1736_vm1, %v3898_v28, 0.0  ;;  %v3905_v16 = vpop.eup %3129 }
 0x223   : > { %3139 = vpow2.f32 %v1903_v24  ;;  %v1850_v29 = vsub.f32 %v3768_v26, %v1790_v62  ;;  %v1811_v8 = vpop.xlane.xlu0 %1810  ;;  %1957 = vadd.xlane.f32.xlu1 %v1956_v42  ;;  %1966 = vadd.xlane.f32.xlu0 %v1965_v21  ;;  %v1983_v27 = vsel %vm1736_vm1, %v3905_v16, 0.0 }
 0x224   : > { %3141 = vpow2.f32 %v1905_v10  ;;  %v1857_v46 = vsub.f32 %v3774_v35, %v1811_v8 }
 0x225   : > { %v3908_v4 = vpop.eup %3131  ;;  %v1899_v63 = vmul.f32 1.442695, %v1850_v29 }
 0x226   : > { %v1808_v39 = vpop.xlane.xlu1 %1807  ;;  %v1974_v56 = vsel %vm1736_vm1, %v3908_v4, 0.0  ;;  %v3915_v5 = vpop.eup %3133  ;;  %v1913_v40 = vmul.f32 1.442695, %v1857_v46 }
 0x227   : > { %3143 = vpow2.f32 %v1899_v63  ;;  %v1856_v26 = vsub.f32 %v3788_v49, %v1808_v39  ;;  %1975 = vadd.xlane.f32.xlu1 %v1974_v56  ;;  %1984 = vadd.xlane.f32.xlu0 %v1983_v27  ;;  %v1823_v50 = vpop.xlane.xlu0 %1822  ;;  %v1977_v14 = vsel %vm1736_vm1, %v3915_v5, 0.0 }
 0x228   : > { %3145 = vpow2.f32 %v1917_v22  ;;  %v1861_v55 = vsub.f32 %v3795_v36, %v1823_v50 }
 0x229   : > { %v3918_v61 = vpop.eup %3135  ;;  %v1911_v35 = vmul.f32 1.442695, %v1856_v26 }
 0x22a   : > { %v1802_v7 = vpop.xlane.xlu1 %1801  ;;  %v1968_v3 = vsel %vm1736_vm1, %v3918_v61, 0.0  ;;  %v3925_v9 = vpop.eup %3137  ;;  %v1921_v32 = vmul.f32 1.442695, %v1861_v55 }
 0x22b   : > { %3147 = vpow2.f32 %v1911_v35  ;;  %v1854_v49 = vsub.f32 %v3800_v1, %v1802_v7  ;;  %1969 = vadd.xlane.f32.xlu1 %v1968_v3  ;;  %1978 = vadd.xlane.f32.xlu0 %v1977_v14  ;;  %v1829_v33 = vpop.xlane.xlu0 %1828  ;;  %v1995_v41 = vsel %vm1736_vm1, %v3925_v9, 0.0 }
 0x22c   : > { %3149 = vpow2.f32 %v1913_v40  ;;  %v1863_v52 = vsub.f32 %v3809_v0, %v1829_v33 }
 0x22d   : > { %v3928_v38 = vpop.eup %3139  ;;  %v1907_v36 = vmul.f32 1.442695, %v1854_v49 }
 0x22e   : > { %v1820_v18 = vpop.xlane.xlu1 %1819  ;;  %v1986_v58 = vsel %vm1736_vm1, %v3928_v38, 0.0  ;;  %v3935_v17 = vpop.eup %3141  ;;  %v1925_v59 = vmul.f32 1.442695, %v1863_v52 }
 0x22f   : > { %3151 = vpow2.f32 %v1907_v36  ;;  %v1860_v1 = vsub.f32 %v3777_v20, %v1820_v18  ;;  %1987 = vadd.xlane.f32.xlu1 %v1986_v58  ;;  %1996 = vadd.xlane.f32.xlu0 %v1995_v41  ;;  %v1989_v19 = vsel %vm1736_vm1, %v3935_v17, 0.0 }
 0x230   : > { %3153 = vpow2.f32 %v1921_v32 }
 0x231   : > { %v3938_v11 = vpop.eup %3143  ;;  %v1919_v30 = vmul.f32 1.442695, %v1860_v1 }
 0x232   : > { %v1814_v0 = vpop.xlane.xlu1 %1813  ;;  %v1980_v45 = vsel %vm1736_vm1, %v3938_v11, 0.0  ;;  %v3944_v48 = vpop.eup %3145 }
 0x233   : > { %3155 = vpow2.f32 %v1919_v30  ;;  %v1858_v6 = vsub.f32 %v3780_v25, %v1814_v0  ;;  %1981 = vadd.xlane.f32.xlu1 %v1980_v45  ;;  %1990 = vadd.xlane.f32.xlu0 %v1989_v19  ;;  %v2007_v62 = vsel %vm1736_vm1, %v3944_v48, 0.0 }
 0x234   : > { %3157 = vpow2.f32 %v1925_v59 }
 0x235   : > { %v3947_v20 = vpop.eup %3147  ;;  %v1915_v10 = vmul.f32 1.442695, %v1858_v6 }
 0x236   : > { %v1826_v24 = vpop.xlane.xlu1 %1825  ;;  %v1998_v2 = vsel %vm1736_vm1, %v3947_v20, 0.0  ;;  %v3953_v42 = vpop.eup %3149 }
 0x237   : > { %3159 = vpow2.f32 %v1915_v10  ;;  %v1862_v21 = vsub.f32 %v3806_v37, %v1826_v24  ;;  %1999 = vadd.xlane.f32.xlu1 %v1998_v2  ;;  %2008 = vadd.xlane.f32.xlu0 %v2007_v62  ;;  %v2001_v63 = vsel %vm1736_vm1, %v3953_v42, 0.0 }
 0x239   : > { %v3956_v25 = vpop.eup %3151  ;;  %v1923_v29 = vmul.f32 1.442695, %v1862_v21 }
 0x23a   : > { %v1832_v8 = vpop.xlane.xlu1 %1831  ;;  %v1992_v22 = vsel %vm1736_vm1, %v3956_v25, 0.0  ;;  %v3962_v46 = vpop.eup %3153 }
 0x23b   : > { %3161 = vpow2.f32 %v1923_v29  ;;  %v1864_v39 = vsub.f32 %v3817_v43, %v1832_v8  ;;  %1993 = vadd.xlane.f32.xlu1 %v1992_v22  ;;  %2002 = vadd.xlane.f32.xlu0 %v2001_v63  ;;  %v2013_v26 = vsel %vm1736_vm1, %v3962_v46, 0.0 }
 0x23d   : > { %v3965_v37 = vpop.eup %3155  ;;  %v1927_v56 = vmul.f32 1.442695, %v1864_v39 }
 0x23e   : > { %v2010_v27 = vsel %vm1736_vm1, %v3965_v37, 0.0  ;;  %v3971_v50 = vpop.eup %3157 }
 0x23f   : > { %3163 = vpow2.f32 %v1927_v56  ;;  %2011 = vadd.xlane.f32.xlu1 %v2010_v27  ;;  %2014 = vadd.xlane.f32.xlu0 %v2013_v26  ;;  %v2019_v35 = vsel %vm1736_vm1, %v3971_v50, 0.0 }
 0x241   : > { %v3973_v40 = vpop.eup %3159 }
 0x242   : > { %v2004_v43 = vsel %vm1736_vm1, %v3973_v40, 0.0 }
 0x243   : > { %2005 = vadd.xlane.f32.xlu1 %v2004_v43  ;;  %2020 = vadd.xlane.f32.xlu0 %v2019_v35 }
 0x245   : > { %v3979_v55 = vpop.eup %3161 }
 0x246   : > { %v2016_v7 = vsel %vm1736_vm1, %v3979_v55, 0.0 }
 0x247   : > { %2017 = vadd.xlane.f32.xlu1 %v2016_v7 }
 0x249   : > { %v3983_v3 = vpop.eup %3163 }
 0x24a   : > { %v2022_v14 = vsel %vm1736_vm1, %v3983_v3, 0.0 }
 0x24b   : > { %2023 = vadd.xlane.f32.xlu1 %v2022_v14 }
 0x28c   : > { %v1937_v49 = vpop.xlane.xlu0 %1936 }
 0x28d   : > { %3165 = vrcp.f32 %v1937_v49 }
 0x290   : > { %v1940_v33 = vpop.xlane.xlu1 %1939  ;;  %v1931_v32 = vpop.xlane.xlu0 %1930 }
 0x291   : > { %3167 = vrcp.f32 %v1940_v33 }
 0x292   : > { %3169 = vrcp.f32 %v1931_v32 }
 0x294   : > { %v1934_v36 = vpop.xlane.xlu1 %1933 }
 0x295   : > { %3171 = vrcp.f32 %v1934_v36 }
 0x297   : > { %v3166_v52 = vpop.eup %3165 }
 0x298   : > { %v1949_v18 = vpop.xlane.xlu0 %1948  ;;  %v2030_v58 = vmul.f32 %v3166_v52, %v3832_v13 }
 0x299   : > { %3173 = vrcp.f32 %v1949_v18 }
 0x29a   : > { %v2127_v41 = vsel %vm1736_vm1, %v2030_v58, 0.0  ;;  %2091 = vst.msk [vmem:[%s3994_s28 + $0x10] sm:$0xff] %vm1736_vm1, %v2030_v58 }
 0x29b   : > { %v3168_v1 = vpop.eup %3167  ;;  %2128 = vadd.xlane.f32.xlu0 %v2127_v41 }
 0x29c   : > { %v3170_v59 = vpop.eup %3169  ;;  %v1943_v30 = vpop.xlane.xlu0 %1942  ;;  %v2032_v0 = vmul.f32 %v3168_v1, %v3840_v57 }
 0x29d   : > { %3175 = vrcp.f32 %v1943_v30  ;;  %v2026_v45 = vmul.f32 %v3170_v59, %v3836_v34 }
 0x29e   : > { %v2130_v19 = vsel %vm1736_vm1, %v2032_v0, 0.0  ;;  %2092 = vst.msk [vmem:[%s3994_s28 + $0x18] sm:$0xff] %vm1736_vm1, %v2032_v0 }
 0x29f   : > { %v3172_v13 = vpop.eup %3171  ;;  %2131 = vadd.xlane.f32.xlu1 %v2130_v19  ;;  %v2121_v6 = vsel %vm1736_vm1, %v2026_v45, 0.0  ;;  %2089 = vst.msk [vmem:[%s3994_s28] sm:$0xff] %vm1736_vm1, %v2026_v45 }
 0x2a0   : > { %2122 = vadd.xlane.f32.xlu0 %v2121_v6  ;;  %v1952_v10 = vpop.xlane.xlu1 %1951  ;;  %v1961_v24 = vpop.xlane.xlu0 %1960  ;;  %v2028_v57 = vmul.f32 %v3172_v13, %v3847_v15 }
 0x2a1   : > { %3177 = vrcp.f32 %v1952_v10 }
 0x2a2   : > { %3179 = vrcp.f32 %v1961_v24  ;;  %v2124_v34 = vsel %vm1736_vm1, %v2028_v57, 0.0  ;;  %2090 = vst.msk [vmem:[%s3994_s28 + $0x8] sm:$0xff] %vm1736_vm1, %v2028_v57 }
 0x2a3   : > { %v3174_v2 = vpop.eup %3173  ;;  %2125 = vadd.xlane.f32.xlu1 %v2124_v34 }
 0x2a4   : > { %v1946_v62 = vpop.xlane.xlu1 %1945  ;;  %v2038_v21 = vmul.f32 %v3174_v2, %v3852_v12 }
 0x2a5   : > { %3181 = vrcp.f32 %v1946_v62 }
 0x2a6   : > { %v2139_v29 = vsel %vm1736_vm1, %v2038_v21, 0.0  ;;  %2095 = vst.msk [vmem:[%s3994_s28 + $0x30] sm:$0xff] %vm1736_vm1, %v2038_v21 }
 0x2a7   : > { %v3176_v8 = vpop.eup %3175  ;;  %2140 = vadd.xlane.f32.xlu0 %v2139_v29 }
 0x2a8   : > { %v1955_v15 = vpop.xlane.xlu0 %1954  ;;  %v2034_v22 = vmul.f32 %v3176_v8, %v3858_v51 }
 0x2a9   : > { %3183 = vrcp.f32 %v1955_v15 }
 0x2aa   : > { %v2133_v63 = vsel %vm1736_vm1, %v2034_v22, 0.0  ;;  %2093 = vst.msk [vmem:[%s3994_s28 + $0x20] sm:$0xff] %vm1736_vm1, %v2034_v22 }
 0x2ab   : > { %v3178_v39 = vpop.eup %3177  ;;  %2134 = vadd.xlane.f32.xlu0 %v2133_v63 }
 0x2ac   : > { %v3180_v12 = vpop.eup %3179  ;;  %v1964_v56 = vpop.xlane.xlu1 %1963  ;;  %v2040_v26 = vmul.f32 %v3178_v39, %v3866_v47 }
 0x2ad   : > { %v1973_v27 = vpop.xlane.xlu0 %1972  ;;  %3185 = vrcp.f32 %v1964_v56  ;;  %v2046_v43 = vmul.f32 %v3180_v12, %v3863_v54 }
 0x2ae   : > { %3187 = vrcp.f32 %v1973_v27  ;;  %v2142_v51 = vsel %vm1736_vm1, %v2040_v26, 0.0  ;;  %2096 = vst.msk [vmem:[%s3994_s28 + $0x38] sm:$0xff] %vm1736_vm1, %v2040_v26 }
 0x2af   : > { %v3182_v35 = vpop.eup %3181  ;;  %2143 = vadd.xlane.f32.xlu1 %v2142_v51  ;;  %v2151_v7 = vsel %vm1736_vm1, %v2046_v43, 0.0  ;;  %2099 = vst.msk [vmem:[%s3994_s28 + $0x50] sm:$0xff] %vm1736_vm1, %v2046_v43 }
 0x2b0   : > { %2152 = vadd.xlane.f32.xlu0 %v2151_v7  ;;  %v1958_v14 = vpop.xlane.xlu1 %1957  ;;  %v2036_v47 = vmul.f32 %v3182_v35, %v3874_v44 }
 0x2b1   : > { %v1967_v49 = vpop.xlane.xlu0 %1966  ;;  %3189 = vrcp.f32 %v1958_v14 }
 0x2b2   : > { %3191 = vrcp.f32 %v1967_v49  ;;  %v2136_v54 = vsel %vm1736_vm1, %v2036_v47, 0.0  ;;  %2094 = vst.msk [vmem:[%s3994_s28 + $0x28] sm:$0xff] %vm1736_vm1, %v2036_v47 }
 0x2b3   : > { %v3184_v33 = vpop.eup %3183  ;;  %2137 = vadd.xlane.f32.xlu1 %v2136_v54 }
 0x2b4   : > { %v1976_v32 = vpop.xlane.xlu1 %1975  ;;  %v2042_v52 = vmul.f32 %v3184_v33, %v3880_v60 }
 0x2b5   : > { %v1985_v36 = vpop.xlane.xlu0 %1984  ;;  %3193 = vrcp.f32 %v1976_v32 }
 0x2b6   : > { %3195 = vrcp.f32 %v1985_v36  ;;  %v2145_v18 = vsel %vm1736_vm1, %v2042_v52, 0.0  ;;  %2097 = vst.msk [vmem:[%s3994_s28 + $0x40] sm:$0xff] %vm1736_vm1, %v2042_v52 }
 0x2b7   : > { %v3186_v44 = vpop.eup %3185  ;;  %2146 = vadd.xlane.f32.xlu0 %v2145_v18 }
 0x2b8   : > { %v3188_v58 = vpop.eup %3187  ;;  %v1970_v41 = vpop.xlane.xlu1 %1969  ;;  %v2048_v59 = vmul.f32 %v3186_v44, %v3888_v53 }
 0x2b9   : > { %v1979_v1 = vpop.xlane.xlu0 %1978  ;;  %3197 = vrcp.f32 %v1970_v41  ;;  %v2054_v30 = vmul.f32 %v3188_v58, %v3885_v23 }
 0x2ba   : > { %3199 = vrcp.f32 %v1979_v1  ;;  %v2154_v60 = vsel %vm1736_vm1, %v2048_v59, 0.0  ;;  %2100 = vst.msk [vmem:[%s3994_s28 + $0x58] sm:$0xff] %vm1736_vm1, %v2048_v59 }
 0x2bb   : > { %v3190_v0 = vpop.eup %3189  ;;  %2155 = vadd.xlane.f32.xlu1 %v2154_v60  ;;  %v2163_v45 = vsel %vm1736_vm1, %v2054_v30, 0.0  ;;  %2103 = vst.msk [vmem:[%s3994_s28 + $0x70] sm:$0xff] %vm1736_vm1, %v2054_v30 }
 0x2bc   : > { %v3192_v19 = vpop.eup %3191  ;;  %2164 = vadd.xlane.f32.xlu0 %v2163_v45  ;;  %v1988_v13 = vpop.xlane.xlu1 %1987  ;;  %v2044_v6 = vmul.f32 %v3190_v0, %v3898_v28 }
 0x2bd   : > { %v1997_v53 = vpop.xlane.xlu0 %1996  ;;  %3201 = vrcp.f32 %v1988_v13  ;;  %v2050_v23 = vmul.f32 %v3192_v19, %v3895_v31 }
 0x2be   : > { %3203 = vrcp.f32 %v1997_v53  ;;  %v2148_v10 = vsel %vm1736_vm1, %v2044_v6, 0.0  ;;  %2098 = vst.msk [vmem:[%s3994_s28 + $0x48] sm:$0xff] %vm1736_vm1, %v2044_v6 }
 0x2bf   : > { %v3194_v24 = vpop.eup %3193  ;;  %2149 = vadd.xlane.f32.xlu1 %v2148_v10  ;;  %v2157_v57 = vsel %vm1736_vm1, %v2050_v23, 0.0  ;;  %2101 = vst.msk [vmem:[%s3994_s28 + $0x60] sm:$0xff] %vm1736_vm1, %v2050_v23 }
 0x2c0   : > { %v3196_v34 = vpop.eup %3195  ;;  %2158 = vadd.xlane.f32.xlu0 %v2157_v57  ;;  %v1982_v2 = vpop.xlane.xlu1 %1981  ;;  %v2056_v62 = vmul.f32 %v3194_v24, %v3908_v4 }
 0x2c1   : > { %v1991_v28 = vpop.xlane.xlu0 %1990  ;;  %3205 = vrcp.f32 %v1982_v2  ;;  %v2062_v31 = vmul.f32 %v3196_v34, %v3905_v16 }
 0x2c2   : > { %3207 = vrcp.f32 %v1991_v28  ;;  %v2166_v21 = vsel %vm1736_vm1, %v2056_v62, 0.0  ;;  %2104 = vst.msk [vmem:[%s3994_s28 + $0x78] sm:$0xff] %vm1736_vm1, %v2056_v62 }
 0x2c3   : > { %v3198_v29 = vpop.eup %3197  ;;  %2167 = vadd.xlane.f32.xlu1 %v2166_v21  ;;  %v2175_v8 = vsel %vm1736_vm1, %v2062_v31, 0.0  ;;  %2107 = vst.msk [vmem:[%s3994_s28 + $0x90] sm:$0xff] %vm1736_vm1, %v2062_v31  ;;  %v2253_v31 = vld [vmem:[%s4128_s30 + $0x18] sm:$0xff]  ;;  %v2250_v21 = vld [vmem:[%s4128_s30] sm:$0xff] }
 0x2c4   : > { %v3200_v15 = vpop.eup %3199  ;;  %2176 = vadd.xlane.f32.xlu0 %v2175_v8  ;;  %v2000_v22 = vpop.xlane.xlu1 %1999  ;;  %v2052_v63 = vmul.f32 %v3198_v29, %v3918_v61 }
 0x2c5   : > { %v2009_v4 = vpop.xlane.xlu0 %2008  ;;  %3209 = vrcp.f32 %v2000_v22  ;;  %v2058_v16 = vmul.f32 %v3200_v15, %v3915_v5 }
 0x2c6   : > { %3211 = vrcp.f32 %v2009_v4  ;;  %v2160_v39 = vsel %vm1736_vm1, %v2052_v63, 0.0  ;;  %2102 = vst.msk [vmem:[%s3994_s28 + $0x68] sm:$0xff] %vm1736_vm1, %v2052_v63  ;;  %v2251_v4 = vld [vmem:[%s4128_s30 + $0x8] sm:$0xff] }
 0x2c7   : > { %v3202_v12 = vpop.eup %3201  ;;  %2161 = vadd.xlane.f32.xlu1 %v2160_v39  ;;  %v2169_v56 = vsel %vm1736_vm1, %v2058_v16, 0.0  ;;  %2105 = vst.msk [vmem:[%s3994_s28 + $0x80] sm:$0xff] %vm1736_vm1, %v2058_v16  ;;  %v2256_v39 = vld [vmem:[%s4128_s30 + $0x30] sm:$0xff] }
 0x2c8   : > { %v3204_v27 = vpop.eup %3203  ;;  %2170 = vadd.xlane.f32.xlu0 %v2169_v56  ;;  %v1994_v26 = vpop.xlane.xlu1 %1993  ;;  %v2064_v43 = vmul.f32 %v3202_v12, %v3928_v38 }
 0x2c9   : > { %v2003_v61 = vpop.xlane.xlu0 %2002  ;;  %3213 = vrcp.f32 %v1994_v26  ;;  %v2070_v5 = vmul.f32 %v3204_v27, %v3925_v9  ;;  %v2254_v27 = vld [vmem:[%s4128_s30 + $0x20] sm:$0xff] }
 0x2ca   : > { %3215 = vrcp.f32 %v2003_v61  ;;  %v2178_v51 = vsel %vm1736_vm1, %v2064_v43, 0.0  ;;  %2108 = vst.msk [vmem:[%s3994_s28 + $0x98] sm:$0xff] %vm1736_vm1, %v2064_v43  ;;  %v2257_v43 = vld [vmem:[%s4128_s30 + $0x38] sm:$0xff] }
 0x2cb   : > { %v3206_v35 = vpop.eup %3205  ;;  %2179 = vadd.xlane.f32.xlu1 %v2178_v51  ;;  %v2187_v7 = vsel %vm1736_vm1, %v2070_v5, 0.0  ;;  %2111 = vst.msk [vmem:[%s3994_s28 + $0xb0] sm:$0xff] %vm1736_vm1, %v2070_v5  ;;  %v2260_v5 = vld [vmem:[%s4128_s30 + $0x50] sm:$0xff] }
 0x2cc   : > { %v3208_v14 = vpop.eup %3207  ;;  %2188 = vadd.xlane.f32.xlu0 %v2187_v7  ;;  %v2012_v49 = vpop.xlane.xlu1 %2011  ;;  %v2060_v47 = vmul.f32 %v3206_v35, %v3938_v11 }
 0x2cd   : > { %v2015_v38 = vpop.xlane.xlu0 %2014  ;;  %3217 = vrcp.f32 %v2012_v49  ;;  %v2066_v9 = vmul.f32 %v3208_v14, %v3935_v17  ;;  %v2255_v49 = vld [vmem:[%s4128_s30 + $0x28] sm:$0xff] }
 0x2ce   : > { %3219 = vrcp.f32 %v2015_v38  ;;  %v2172_v54 = vsel %vm1736_vm1, %v2060_v47, 0.0  ;;  %2106 = vst.msk [vmem:[%s3994_s28 + $0x88] sm:$0xff] %vm1736_vm1, %v2060_v47 }
 0x2cf   : > { %v3210_v33 = vpop.eup %3209  ;;  %2173 = vadd.xlane.f32.xlu1 %v2172_v54  ;;  %v2181_v32 = vsel %vm1736_vm1, %v2066_v9, 0.0  ;;  %2109 = vst.msk [vmem:[%s3994_s28 + $0xa0] sm:$0xff] %vm1736_vm1, %v2066_v9  ;;  %v2258_v9 = vld [vmem:[%s4128_s30 + $0x40] sm:$0xff] }
 0x2d0   : > { %v3212_v36 = vpop.eup %3211  ;;  %2182 = vadd.xlane.f32.xlu0 %v2181_v32  ;;  %v2006_v52 = vpop.xlane.xlu1 %2005  ;;  %v2072_v18 = vmul.f32 %v3210_v33, %v3947_v20  ;;  %v2261_v32 = vld [vmem:[%s4128_s30 + $0x58] sm:$0xff] }
 0x2d1   : > { %v2021_v11 = vpop.xlane.xlu0 %2020  ;;  %3221 = vrcp.f32 %v2006_v52  ;;  %v2078_v17 = vmul.f32 %v3212_v36, %v3944_v48  ;;  %v2264_v36 = vld [vmem:[%s4128_s30 + $0x70] sm:$0xff] }
 0x2d2   : > { %3223 = vrcp.f32 %v2021_v11  ;;  %v2190_v44 = vsel %vm1736_vm1, %v2072_v18, 0.0  ;;  %2112 = vst.msk [vmem:[%s3994_s28 + $0xb8] sm:$0xff] %vm1736_vm1, %v2072_v18 }
 0x2d3   : > { %v3214_v58 = vpop.eup %3213  ;;  %2191 = vadd.xlane.f32.xlu1 %v2190_v44  ;;  %v2199_v41 = vsel %vm1736_vm1, %v2078_v17, 0.0  ;;  %2115 = vst.msk [vmem:[%s3994_s28 + $0xd0] sm:$0xff] %vm1736_vm1, %v2078_v17  ;;  %v2259_v44 = vld [vmem:[%s4128_s30 + $0x48] sm:$0xff] }
 0x2d4   : > { %v3216_v1 = vpop.eup %3215  ;;  %2200 = vadd.xlane.f32.xlu0 %v2199_v41  ;;  %v2018_v59 = vpop.xlane.xlu1 %2017  ;;  %v2068_v20 = vmul.f32 %v3214_v58, %v3956_v25  ;;  %v2262_v58 = vld [vmem:[%s4128_s30 + $0x60] sm:$0xff] }
 0x2d5   : > { %3225 = vrcp.f32 %v2018_v59  ;;  %v2074_v48 = vmul.f32 %v3216_v1, %v3953_v42 }
 0x2d6   : > { %v2184_v30 = vsel %vm1736_vm1, %v2068_v20, 0.0  ;;  %2110 = vst.msk [vmem:[%s3994_s28 + $0xa8] sm:$0xff] %vm1736_vm1, %v2068_v20 }
 0x2d7   : > { %v3218_v60 = vpop.eup %3217  ;;  %2185 = vadd.xlane.f32.xlu1 %v2184_v30  ;;  %v2193_v0 = vsel %vm1736_vm1, %v2074_v48, 0.0  ;;  %2113 = vst.msk [vmem:[%s3994_s28 + $0xc0] sm:$0xff] %vm1736_vm1, %v2074_v48  ;;  %v2265_v48 = vld [vmem:[%s4128_s30 + $0x78] sm:$0xff]  ;;  %v2268_v30 = vld [vmem:[%s4128_s30 + $0x90] sm:$0xff] }
 0x2d8   : > { %v3220_v45 = vpop.eup %3219  ;;  %2194 = vadd.xlane.f32.xlu0 %v2193_v0  ;;  %v2024_v19 = vpop.xlane.xlu1 %2023  ;;  %v2080_v25 = vmul.f32 %v3218_v60, %v3965_v37 }
 0x2d9   : > { %3227 = vrcp.f32 %v2024_v19  ;;  %v2082_v42 = vmul.f32 %v3220_v45, %v3962_v46 }
 0x2da   : > { %v2202_v13 = vsel %vm1736_vm1, %v2080_v25, 0.0  ;;  %2116 = vst.msk [vmem:[%s3994_s28 + $0xd8] sm:$0xff] %vm1736_vm1, %v2080_v25  ;;  %v2263_v25 = vld [vmem:[%s4128_s30 + $0x68] sm:$0xff] }
 0x2db   : > { %v3222_v53 = vpop.eup %3221  ;;  %2203 = vadd.xlane.f32.xlu1 %v2202_v13  ;;  %v2205_v6 = vsel %vm1736_vm1, %v2082_v42, 0.0  ;;  %2117 = vst.msk [vmem:[%s3994_s28 + $0xe0] sm:$0xff] %vm1736_vm1, %v2082_v42  ;;  %v2266_v42 = vld [vmem:[%s4128_s30 + $0x80] sm:$0xff] }
 0x2dc   : > { %v3224_v23 = vpop.eup %3223  ;;  %2206 = vadd.xlane.f32.xlu0 %v2205_v6  ;;  %v2076_v10 = vmul.f32 %v3222_v53, %v3973_v40 }
 0x2dd   : > { %v2086_v37 = vmul.f32 %v3224_v23, %v3971_v50 }
 0x2de   : > { %v2196_v46 = vsel %vm1736_vm1, %v2076_v10, 0.0  ;;  %2114 = vst.msk [vmem:[%s3994_s28 + $0xc8] sm:$0xff] %vm1736_vm1, %v2076_v10  ;;  %v2269_v10 = vld [vmem:[%s4128_s30 + $0x98] sm:$0xff] }
 0x2df   : > { %v3226_v24 = vpop.eup %3225  ;;  %2197 = vadd.xlane.f32.xlu1 %v2196_v46  ;;  %v2211_v57 = vsel %vm1736_vm1, %v2086_v37, 0.0  ;;  %2119 = vst.msk [vmem:[%s3994_s28 + $0xf0] sm:$0xff] %vm1736_vm1, %v2086_v37  ;;  %v2272_v37 = vld [vmem:[%s4128_s30 + $0xb0] sm:$0xff] }
 0x2e0   : > { %2212 = vadd.xlane.f32.xlu0 %v2211_v57  ;;  %v2084_v34 = vmul.f32 %v3226_v24, %v3979_v55  ;;  %v2252_v55 = vld [vmem:[%s4128_s30 + $0x10] sm:$0xff] }
 0x2e2   : > { %v2208_v40 = vsel %vm1736_vm1, %v2084_v34, 0.0  ;;  %2118 = vst.msk [vmem:[%s3994_s28 + $0xe8] sm:$0xff] %vm1736_vm1, %v2084_v34 }
 0x2e3   : > { %v3228_v50 = vpop.eup %3227  ;;  %2209 = vadd.xlane.f32.xlu1 %v2208_v40  ;;  %v2267_v40 = vld [vmem:[%s4128_s30 + $0x88] sm:$0xff] }
 0x2e4   : > { %v2088_v2 = vmul.f32 %v3228_v50, %v3983_v3  ;;  %v2270_v50 = vld [vmem:[%s4128_s30 + $0xa0] sm:$0xff] }
 0x2e6   : > { %v2214_v28 = vsel %vm1736_vm1, %v2088_v2, 0.0  ;;  %2120 = vst.msk [vmem:[%s3994_s28 + $0xf8] sm:$0xff] %vm1736_vm1, %v2088_v2 }
 0x2e7   : > { %2215 = vadd.xlane.f32.xlu1 %v2214_v28 }
 0x328   : > { %v2129_v3 = vpop.xlane.xlu0 %2128 }
 0x329   : > { %2220 = vst.msk [vmem:[%s4134_s10 + $0x10] sm:$0xff] %vm2217_vm2, %v2129_v3  ;;  %v2284_v62 = vmul.f32 %v2252_v55, %v2129_v3 }
 0x32b   : > { %2316 = vst.msk [vmem:[%s4141_s13 + $0x10] sm:$0xff] %vm1124_vm0, %v2284_v62  ;;  %v2273_v62 = vld [vmem:[%s4128_s30 + $0xb8] sm:$0xff] }
 0x32c   : > { %v2132_v29 = vpop.xlane.xlu1 %2131 }
 0x32d   : > { %2221 = vst.msk [vmem:[%s4134_s10 + $0x18] sm:$0xff] %vm2217_vm2, %v2132_v29  ;;  %v2285_v8 = vmul.f32 %v2253_v31, %v2132_v29  ;;  %v2123_v15 = vpop.xlane.xlu0 %2122  ;;  %v2276_v31 = vld [vmem:[%s4128_s30 + $0xd0] sm:$0xff] }
 0x32e   : > { %2218 = vst.msk [vmem:[%s4134_s10] sm:$0xff] %vm2217_vm2, %v2123_v15  ;;  %v2282_v22 = vmul.f32 %v2250_v21, %v2123_v15 }
 0x32f   : > { %2317 = vst.msk [vmem:[%s4141_s13 + $0x18] sm:$0xff] %vm1124_vm0, %v2285_v8 }
 0x330   : > { %2314 = vst.msk [vmem:[%s4141_s13] sm:$0xff] %vm1124_vm0, %v2282_v22  ;;  %v2126_v63 = vpop.xlane.xlu1 %2125  ;;  %v2271_v22 = vld [vmem:[%s4128_s30 + $0xa8] sm:$0xff] }
 0x331   : > { %2219 = vst.msk [vmem:[%s4134_s10 + $0x8] sm:$0xff] %vm2217_vm2, %v2126_v63  ;;  %v2283_v16 = vmul.f32 %v2251_v4, %v2126_v63  ;;  %v2274_v4 = vld [vmem:[%s4128_s30 + $0xc0] sm:$0xff] }
 0x333   : > { %2315 = vst.msk [vmem:[%s4141_s13 + $0x8] sm:$0xff] %vm1124_vm0, %v2283_v16 }
 0x334   : > { %v2141_v12 = vpop.xlane.xlu0 %2140 }
 0x335   : > { %2224 = vst.msk [vmem:[%s4134_s10 + $0x30] sm:$0xff] %vm2217_vm2, %v2141_v12  ;;  %v2288_v56 = vmul.f32 %v2256_v39, %v2141_v12 }
 0x337   : > { %2320 = vst.msk [vmem:[%s4141_s13 + $0x30] sm:$0xff] %vm1124_vm0, %v2288_v56  ;;  %v2277_v56 = vld [vmem:[%s4128_s30 + $0xd8] sm:$0xff] }
 0x338   : > { %v2135_v26 = vpop.xlane.xlu0 %2134 }
 0x339   : > { %2222 = vst.msk [vmem:[%s4134_s10 + $0x20] sm:$0xff] %vm2217_vm2, %v2135_v26  ;;  %v2286_v61 = vmul.f32 %v2254_v27, %v2135_v26  ;;  %v2278_v27 = vld [vmem:[%s4128_s30 + $0xe0] sm:$0xff] }
 0x33b   : > { %2318 = vst.msk [vmem:[%s4141_s13 + $0x20] sm:$0xff] %vm1124_vm0, %v2286_v61 }
 0x33c   : > { %v2144_v51 = vpop.xlane.xlu1 %2143 }
 0x33d   : > { %2225 = vst.msk [vmem:[%s4134_s10 + $0x38] sm:$0xff] %vm2217_vm2, %v2144_v51  ;;  %v2289_v35 = vmul.f32 %v2257_v43, %v2144_v51  ;;  %v2153_v7 = vpop.xlane.xlu0 %2152  ;;  %v2275_v51 = vld [vmem:[%s4128_s30 + $0xc8] sm:$0xff] }
 0x33e   : > { %2228 = vst.msk [vmem:[%s4134_s10 + $0x50] sm:$0xff] %vm2217_vm2, %v2153_v7  ;;  %v2292_v14 = vmul.f32 %v2260_v5, %v2153_v7 }
 0x33f   : > { %2321 = vst.msk [vmem:[%s4141_s13 + $0x38] sm:$0xff] %vm1124_vm0, %v2289_v35  ;;  %v2280_v35 = vld [vmem:[%s4128_s30 + $0xf0] sm:$0xff] }
 0x340   : > { %2324 = vst.msk [vmem:[%s4141_s13 + $0x50] sm:$0xff] %vm1124_vm0, %v2292_v14  ;;  %v2138_v38 = vpop.xlane.xlu1 %2137 }
 0x341   : > { %2223 = vst.msk [vmem:[%s4134_s10 + $0x28] sm:$0xff] %vm2217_vm2, %v2138_v38  ;;  %v2287_v47 = vmul.f32 %v2255_v49, %v2138_v38 }
 0x343   : > { %2319 = vst.msk [vmem:[%s4141_s13 + $0x28] sm:$0xff] %vm1124_vm0, %v2287_v47  ;;  %v2279_v47 = vld [vmem:[%s4128_s30 + $0xe8] sm:$0xff] }
 0x344   : > { %v2147_v54 = vpop.xlane.xlu0 %2146 }
 0x345   : > { %2226 = vst.msk [vmem:[%s4134_s10 + $0x40] sm:$0xff] %vm2217_vm2, %v2147_v54  ;;  %v2290_v33 = vmul.f32 %v2258_v9, %v2147_v54 }
 0x347   : > { %2322 = vst.msk [vmem:[%s4141_s13 + $0x40] sm:$0xff] %vm1124_vm0, %v2290_v33  ;;  %v2281_v33 = vld [vmem:[%s4128_s30 + $0xf8] sm:$0xff] }
 0x348   : > { %v2156_v52 = vpop.xlane.xlu1 %2155 }
 0x349   : > { %2229 = vst.msk [vmem:[%s4134_s10 + $0x58] sm:$0xff] %vm2217_vm2, %v2156_v52  ;;  %v2293_v11 = vmul.f32 %v2261_v32, %v2156_v52  ;;  %v2165_v18 = vpop.xlane.xlu0 %2164 }
 0x34a   : > { %2232 = vst.msk [vmem:[%s4134_s10 + $0x70] sm:$0xff] %vm2217_vm2, %v2165_v18  ;;  %v2296_v17 = vmul.f32 %v2264_v36, %v2165_v18 }
 0x34b   : > { %2325 = vst.msk [vmem:[%s4141_s13 + $0x58] sm:$0xff] %vm1124_vm0, %v2293_v11 }
 0x34c   : > { %2328 = vst.msk [vmem:[%s4141_s13 + $0x70] sm:$0xff] %vm1124_vm0, %v2296_v17  ;;  %v2150_v41 = vpop.xlane.xlu1 %2149 }
 0x34d   : > { %2227 = vst.msk [vmem:[%s4134_s10 + $0x48] sm:$0xff] %vm2217_vm2, %v2150_v41  ;;  %v2291_v1 = vmul.f32 %v2259_v44, %v2150_v41  ;;  %v2159_v59 = vpop.xlane.xlu0 %2158 }
 0x34e   : > { %2230 = vst.msk [vmem:[%s4134_s10 + $0x60] sm:$0xff] %vm2217_vm2, %v2159_v59  ;;  %v2294_v20 = vmul.f32 %v2262_v58, %v2159_v59 }
 0x34f   : > { %2323 = vst.msk [vmem:[%s4141_s13 + $0x48] sm:$0xff] %vm1124_vm0, %v2291_v1 }
 0x350   : > { %2326 = vst.msk [vmem:[%s4141_s13 + $0x60] sm:$0xff] %vm1124_vm0, %v2294_v20  ;;  %v2168_v60 = vpop.xlane.xlu1 %2167 }
 0x351   : > { %2233 = vst.msk [vmem:[%s4134_s10 + $0x78] sm:$0xff] %vm2217_vm2, %v2168_v60  ;;  %v2297_v0 = vmul.f32 %v2265_v48, %v2168_v60  ;;  %v2177_v45 = vpop.xlane.xlu0 %2176 }
 0x352   : > { %2236 = vst.msk [vmem:[%s4134_s10 + $0x90] sm:$0xff] %vm2217_vm2, %v2177_v45  ;;  %v2300_v19 = vmul.f32 %v2268_v30, %v2177_v45 }
 0x353   : > { %2329 = vst.msk [vmem:[%s4141_s13 + $0x78] sm:$0xff] %vm1124_vm0, %v2297_v0 }
 0x354   : > { %2332 = vst.msk [vmem:[%s4141_s13 + $0x90] sm:$0xff] %vm1124_vm0, %v2300_v19  ;;  %v2162_v13 = vpop.xlane.xlu1 %2161 }
 0x355   : > { %2231 = vst.msk [vmem:[%s4134_s10 + $0x68] sm:$0xff] %vm2217_vm2, %v2162_v13  ;;  %v2295_v53 = vmul.f32 %v2263_v25, %v2162_v13  ;;  %v2171_v6 = vpop.xlane.xlu0 %2170 }
 0x356   : > { %2234 = vst.msk [vmem:[%s4134_s10 + $0x80] sm:$0xff] %vm2217_vm2, %v2171_v6  ;;  %v2298_v23 = vmul.f32 %v2266_v42, %v2171_v6 }
 0x357   : > { %2327 = vst.msk [vmem:[%s4141_s13 + $0x68] sm:$0xff] %vm1124_vm0, %v2295_v53 }
 0x358   : > { %2330 = vst.msk [vmem:[%s4141_s13 + $0x80] sm:$0xff] %vm1124_vm0, %v2298_v23  ;;  %v2180_v46 = vpop.xlane.xlu1 %2179 }
 0x359   : > { %2237 = vst.msk [vmem:[%s4134_s10 + $0x98] sm:$0xff] %vm2217_vm2, %v2180_v46  ;;  %v2301_v24 = vmul.f32 %v2269_v10, %v2180_v46  ;;  %v2189_v57 = vpop.xlane.xlu0 %2188 }
 0x35a   : > { %2240 = vst.msk [vmem:[%s4134_s10 + $0xb0] sm:$0xff] %vm2217_vm2, %v2189_v57  ;;  %v2304_v34 = vmul.f32 %v2272_v37, %v2189_v57 }
 0x35b   : > { %2333 = vst.msk [vmem:[%s4141_s13 + $0x98] sm:$0xff] %vm1124_vm0, %v2301_v24 }
 0x35c   : > { %2336 = vst.msk [vmem:[%s4141_s13 + $0xb0] sm:$0xff] %vm1124_vm0, %v2304_v34  ;;  %v2174_v2 = vpop.xlane.xlu1 %2173 }
 0x35d   : > { %2235 = vst.msk [vmem:[%s4134_s10 + $0x88] sm:$0xff] %vm2217_vm2, %v2174_v2  ;;  %v2299_v28 = vmul.f32 %v2267_v40, %v2174_v2  ;;  %v2183_v55 = vpop.xlane.xlu0 %2182 }
 0x35e   : > { %2238 = vst.msk [vmem:[%s4134_s10 + $0xa0] sm:$0xff] %vm2217_vm2, %v2183_v55  ;;  %v2302_v3 = vmul.f32 %v2270_v50, %v2183_v55 }
 0x35f   : > { %2331 = vst.msk [vmem:[%s4141_s13 + $0x88] sm:$0xff] %vm1124_vm0, %v2299_v28 }
 0x360   : > { %2334 = vst.msk [vmem:[%s4141_s13 + $0xa0] sm:$0xff] %vm1124_vm0, %v2302_v3  ;;  %v2192_v21 = vpop.xlane.xlu1 %2191 }
 0x361   : > { %2241 = vst.msk [vmem:[%s4134_s10 + $0xb8] sm:$0xff] %vm2217_vm2, %v2192_v21  ;;  %v2305_v29 = vmul.f32 %v2273_v62, %v2192_v21  ;;  %v2201_v8 = vpop.xlane.xlu0 %2200 }
 0x362   : > { %2244 = vst.msk [vmem:[%s4134_s10 + $0xd0] sm:$0xff] %vm2217_vm2, %v2201_v8  ;;  %v2308_v15 = vmul.f32 %v2276_v31, %v2201_v8 }
 0x363   : > { %2337 = vst.msk [vmem:[%s4141_s13 + $0xb8] sm:$0xff] %vm1124_vm0, %v2305_v29 }
 0x364   : > { %2340 = vst.msk [vmem:[%s4141_s13 + $0xd0] sm:$0xff] %vm1124_vm0, %v2308_v15  ;;  %v2186_v63 = vpop.xlane.xlu1 %2185 }
 0x365   : > { %2239 = vst.msk [vmem:[%s4134_s10 + $0xa8] sm:$0xff] %vm2217_vm2, %v2186_v63  ;;  %v2303_v16 = vmul.f32 %v2271_v22, %v2186_v63  ;;  %v2195_v39 = vpop.xlane.xlu0 %2194 }
 0x366   : > { %2242 = vst.msk [vmem:[%s4134_s10 + $0xc0] sm:$0xff] %vm2217_vm2, %v2195_v39  ;;  %v2306_v12 = vmul.f32 %v2274_v4, %v2195_v39 }
 0x367   : > { %2335 = vst.msk [vmem:[%s4141_s13 + $0xa8] sm:$0xff] %vm1124_vm0, %v2303_v16 }
 0x368   : > { %2338 = vst.msk [vmem:[%s4141_s13 + $0xc0] sm:$0xff] %vm1124_vm0, %v2306_v12  ;;  %v2204_v26 = vpop.xlane.xlu1 %2203 }
 0x369   : > { %2245 = vst.msk [vmem:[%s4134_s10 + $0xd8] sm:$0xff] %vm2217_vm2, %v2204_v26  ;;  %v2309_v61 = vmul.f32 %v2277_v56, %v2204_v26  ;;  %v2207_v43 = vpop.xlane.xlu0 %2206 }
 0x36a   : > { %2246 = vst.msk [vmem:[%s4134_s10 + $0xe0] sm:$0xff] %vm2217_vm2, %v2207_v43  ;;  %v2310_v5 = vmul.f32 %v2278_v27, %v2207_v43 }
 0x36b   : > { %2341 = vst.msk [vmem:[%s4141_s13 + $0xd8] sm:$0xff] %vm1124_vm0, %v2309_v61 }
 0x36c   : > { %2342 = vst.msk [vmem:[%s4141_s13 + $0xe0] sm:$0xff] %vm1124_vm0, %v2310_v5  ;;  %v2198_v7 = vpop.xlane.xlu1 %2197 }
 0x36d   : > { %2243 = vst.msk [vmem:[%s4134_s10 + $0xc8] sm:$0xff] %vm2217_vm2, %v2198_v7  ;;  %v2307_v14 = vmul.f32 %v2275_v51, %v2198_v7  ;;  %v2213_v49 = vpop.xlane.xlu0 %2212 }
 0x36e   : > { %2248 = vst.msk [vmem:[%s4134_s10 + $0xf0] sm:$0xff] %vm2217_vm2, %v2213_v49  ;;  %v2312_v38 = vmul.f32 %v2280_v35, %v2213_v49 }
 0x36f   : > { %2339 = vst.msk [vmem:[%s4141_s13 + $0xc8] sm:$0xff] %vm1124_vm0, %v2307_v14 }
 0x370   : > { %2344 = vst.msk [vmem:[%s4141_s13 + $0xf0] sm:$0xff] %vm1124_vm0, %v2312_v38  ;;  %v2210_v9 = vpop.xlane.xlu1 %2209 }
 0x371   : > { %2247 = vst.msk [vmem:[%s4134_s10 + $0xe8] sm:$0xff] %vm2217_vm2, %v2210_v9  ;;  %v2311_v54 = vmul.f32 %v2279_v47, %v2210_v9 }
 0x373   : > { %2343 = vst.msk [vmem:[%s4141_s13 + $0xe8] sm:$0xff] %vm1124_vm0, %v2311_v54 }
 0x374   : > { %v2216_v32 = vpop.xlane.xlu1 %2215 }
 0x375   : > { %2249 = vst.msk [vmem:[%s4134_s10 + $0xf8] sm:$0xff] %vm2217_vm2, %v2216_v32  ;;  %v2313_v36 = vmul.f32 %v2281_v33, %v2216_v32 }
 0x377   : > { %2345 = vst.msk [vmem:[%s4141_s13 + $0xf8] sm:$0xff] %vm1124_vm0, %v2313_v36 }
 0x378 PF: > { %s18_s24 = sadd.s32 1, %s3235_s24  }
 0x379   : > { %p15_p4 = scmp.ge.s32.totalorder %s18_s24, 4  }
 0x37b   :  { %17 = sbr.rel (!%p15_p4) target bundleno = 1 (0x1), region = 100 }

// kernel: forward.7
= control target key start
LH: loop header
LB: loop body
LE: loop exit
PB: predicated region body
PF: predicated region fallthrough
CT: control target
= control target key end

     0   :  { %s4426_s30 = smov 0   ;;  %s5429_s0 = inlined_call_operand.vmem [shape: bf16[2,256,1152], index: 0, kind: input, shape index: {}]   ;;  %s5430_s1 = inlined_call_operand.vmem [shape: bf16[1152,3], index: 1, kind: input, shape index: {}]   ;;  %s5431_s2 = inlined_call_operand.vmem [shape: f32[1,3], index: 2, kind: input, shape index: {}]   ;;  %s5432_s3 = inlined_call_operand.vmem [shape: f32[2,256,1], index: 3, kind: input, shape index: {}]   ;;  %s5433_s4 = inlined_call_operand.vmem [shape: f32[2,1,10], index: 4, kind: input, shape index: {}]   ;;  %s5434_s5 = inlined_call_operand.vmem [shape: bf16[3,512], index: 5, kind: input, shape index: {}]   ;;  %s5435_s6 = inlined_call_operand.vmem [shape: f32[1,512], index: 6, kind: input, shape index: {}]   ;;  %s5436_s7 = inlined_call_operand.vmem [shape: f32[2,1,3], index: 7, kind: output, shape index: {0}]   ;;  %s5437_s8 = inlined_call_operand.vmem [shape: f32[2,1,3], index: 8, kind: output, shape index: {1}]   ;;  %s5438_s9 = inlined_call_operand.vmem [shape: f32[2,1,128], index: 9, kind: output, shape index: {2}]  }
   0x1 LB: > { %s3278_s10 = sadd.s32 4294967295, %s4368_s30   ;;  %p3282_p0 = scmp.ge.s32.totalorder %s4368_s30, 1  ;;  %s4368_s30 = sphi %s4426_s30, %s20_s30  }
   0x2   : > { %p310_p1 = scmp.lt.s32.totalorder %s4368_s30, 3 }
   0x4   : > { %p311_p2 = pnand %p3282_p0, %p310_p1 }
   0x6   : > { %314 = sbr.rel (%p311_p2) target bundleno = 750 (0x2ee), region = 48 }
   0xd   : > { %v4070_v0 = vld [vmem:[%s5430_s1 + $0x40] sm:$0xff]   ;;  %v4072_v2 = vld [vmem:[%s5430_s1 + $0x48] sm:$0xff]   ;;  %p358_p3 = scmp.lt.s32.totalorder %s3278_s10, 1  ;;  %v4074_v4 = vld [vmem:[%s5430_s1 + $0x50] sm:$0xff]   ;;  %vm2931_vm0 = vcmask 23552   ;;  %vm3001_vm1 = vcmask 16384  }
   0xe   : > { %v4071_v1 = vld [vmem:[%s5430_s1] sm:$0xff]   ;;  %3513 = vmatprep.subr.bf16.mxu0 %v4070_v0  ;;  %4033 = vmatprep.subr.bf16.mxu1 %v4070_v0  ;;  %v4073_v3 = vld [vmem:[%s5430_s1 + $0x8] sm:$0xff]   ;;  %v4075_v5 = vld [vmem:[%s5430_s1 + $0x10] sm:$0xff]  }
   0xf   : > { %3514 = vmatpush3.bf16.msra.mxu0 %v4071_v1  ;;  %4041 = vmatpush3.bf16.msra.mxu1 %v4071_v1  ;;  %s5444_s10 = smov (!%p358_p3, %s3278_s10), 1  ;;  %v4076_v6 = vld [vmem:[%s5430_s1 + $0x58] sm:$0xff]   ;;  %v4078_v8 = vld [vmem:[%s5430_s1 + $0x60] sm:$0xff]   ;;  %v4080_v10 = vld [vmem:[%s5430_s1 + $0x68] sm:$0xff]  }
  0x10   : > { %3515 = vmatprep.subr.bf16.mxu0 %v4072_v2  ;;  %4034 = vmatprep.subr.bf16.mxu1 %v4072_v2  ;;  %s4049_s25 = smul.u32 1152, %s5444_s10  ;;  %v4077_v7 = vld [vmem:[%s5430_s1 + $0x18] sm:$0xff]   ;;  %v4079_v9 = vld [vmem:[%s5430_s1 + $0x20] sm:$0xff]   ;;  %v4081_v13 = vld [vmem:[%s5430_s1 + $0x28] sm:$0xff]   ;;  %s3512_s14 = sshll.u32 %s5444_s10, 8 }
  0x11   : > { %v4082_v14 = vld [vmem:[%s5430_s1 + $0x70] sm:$0xff]   ;;  %v4084_v16 = vld [vmem:[%s5430_s1 + $0x78] sm:$0xff]   ;;  %v4092_v18 = vld [vmem:[%s5430_s1 + $0xc0] sm:$0xff]   ;;  %s4729_s17 = scalar_lea.vmem %s5432_s3, %s3512_s14  ;;  %s370_s20 = scalar_lea.vmem %s5433_s4, %s5444_s10 }
  0x12   : > { %s4467_s13 = scalar_lea.vmem %s5429_s0, %s4049_s25  ;;  %v4083_v15 = vld [vmem:[%s5430_s1 + $0x30] sm:$0xff]   ;;  %v4085_v17 = vld [vmem:[%s5430_s1 + $0x38] sm:$0xff]   ;;  %v4093_v21 = vld [vmem:[%s5430_s1 + $0x140] sm:$0xff]   ;;  %s373_s24 = scalar_lea.vmem %s5436_s7, %s5444_s10 }
  0x13   : > { %3516 = vmatpush3.bf16.msra.mxu0 %v4073_v3  ;;  %4042 = vmatpush3.bf16.msra.mxu1 %v4073_v3  ;;  %v4088_v11 = vld [vmem:[%s4467_s13 + $0x4] ss:$36 sps:$4 sm:$0xff]   ;;  %v4098_v25 = vld [vmem:[%s4467_s13 + $0x4c] ss:$36 sps:$4 sm:$0xff]   ;;  %v4106_v34 = vld [vmem:[%s5430_s1 + $0xd8] sm:$0xff]   ;;  %s376_s27 = scalar_lea.vmem %s5437_s8, %s5444_s10  ;;  %s379_s18 = scalar_lea.vmem %s5438_s9, %s5444_s10 }
  0x14   : > { %3517 = vmatprep.subr.bf16.mxu0 %v4074_v4  ;;  %4035 = vmatprep.subr.bf16.mxu1 %v4074_v4  ;;  %v4091_v12 = vld [vmem:[%s4467_s13 + $0x364] ss:$36 sps:$4 sm:$0xff]   ;;  %v4100_v26 = vld [vmem:[%s4467_s13 + $0x3ac] ss:$36 sps:$4 sm:$0xff]   ;;  %v4110_v35 = vld [vmem:[%s4467_s13 + $0x94] ss:$36 sps:$4 sm:$0xff]  }
  0x15   : > { %1893 = vmatprep.mubr.bf16.mxu0 %v4088_v11  ;;  %1989 = vmatprep.mubr.bf16.mxu1 %v4091_v12  ;;  %v4086_v19 = vld [vmem:[%s4467_s13] ss:$36 sps:$4 sm:$0xff]   ;;  %v4096_v24 = vld [vmem:[%s5430_s1 + $0xc8] sm:$0xff]   ;;  %v4104_v32 = vld [vmem:[%s5430_s1 + $0xd0] sm:$0xff]  }
  0x16   : > { %v4089_v20 = vld [vmem:[%s4467_s13 + $0x360] ss:$36 sps:$4 sm:$0xff]   ;;  %v4107_v27 = vld [vmem:[%s5430_s1 + $0x148] sm:$0xff]   ;;  %v4105_v33 = vld [vmem:[%s5430_s1 + $0x90] sm:$0xff]  }
  0x17   : > { %3518 = vmatpush3.bf16.msra.mxu0 %v4075_v5  ;;  %4043 = vmatpush3.bf16.msra.mxu1 %v4075_v5  ;;  %v4094_v22 = vld [vmem:[%s5430_s1 + $0x80] sm:$0xff]   ;;  %v4097_v28 = vld [vmem:[%s5430_s1 + $0x88] sm:$0xff]   ;;  %v4112_v36 = vld [vmem:[%s4467_s13 + $0x3f4] ss:$36 sps:$4 sm:$0xff]  }
  0x18   : > { %3519 = vmatprep.subr.bf16.mxu0 %v4076_v6  ;;  %4036 = vmatprep.subr.bf16.mxu1 %v4076_v6  ;;  %v4095_v23 = vld [vmem:[%s5430_s1 + $0x100] sm:$0xff]   ;;  %v4109_v29 = vld [vmem:[%s5430_s1 + $0x108] sm:$0xff]   ;;  %v4108_v37 = vld [vmem:[%s5430_s1 + $0x98] sm:$0xff]  }
  0x19   : > { %v4102_v30 = vld [vmem:[%s4467_s13 + $0x48] ss:$36 sps:$4 sm:$0xff]   ;;  %v4116_v38 = vld [vmem:[%s5430_s1 + $0xe0] sm:$0xff]   ;;  %v4114_v39 = vld [vmem:[%s4467_s13 + $0x90] ss:$36 sps:$4 sm:$0xff]  }
  0x1a   : > { %v4103_v31 = vld [vmem:[%s4467_s13 + $0x3a8] ss:$36 sps:$4 sm:$0xff]   ;;  %v4115_v40 = vld [vmem:[%s4467_s13 + $0x3f0] ss:$36 sps:$4 sm:$0xff]   ;;  %v4117_v42 = vld [vmem:[%s5430_s1 + $0xa0] sm:$0xff]  }
  0x1b   : > { %3520 = vmatpush3.bf16.msra.mxu0 %v4077_v7  ;;  %4044 = vmatpush3.bf16.msra.mxu1 %v4077_v7  ;;  %v4127_v41 = vld [vmem:[%s5430_s1 + $0x150] sm:$0xff]   ;;  %v4118_v43 = vld [vmem:[%s5430_s1 + $0xe8] sm:$0xff]   ;;  %v4120_v45 = vld [vmem:[%s4467_s13 + $0xdc] ss:$36 sps:$4 sm:$0xff]  }
  0x1c   : > { %3521 = vmatprep.subr.bf16.mxu0 %v4078_v8  ;;  %4037 = vmatprep.subr.bf16.mxu1 %v4078_v8  ;;  %v4129_v44 = vld [vmem:[%s5430_s1 + $0x110] sm:$0xff]   ;;  %v4122_v46 = vld [vmem:[%s4467_s13 + $0x43c] ss:$36 sps:$4 sm:$0xff]   ;;  %v4119_v47 = vld [vmem:[%s5430_s1 + $0xa8] sm:$0xff]  }
  0x1d   : > { %v4124_v48 = vld [vmem:[%s4467_s13 + $0xd8] ss:$36 sps:$4 sm:$0xff]   ;;  %v4126_v50 = vld [vmem:[%s5430_s1 + $0xf0] sm:$0xff]   ;;  %v4132_v52 = vld [vmem:[%s4467_s13 + $0x124] ss:$36 sps:$4 sm:$0xff]  }
  0x1e   : > { %v4125_v49 = vld [vmem:[%s4467_s13 + $0x438] ss:$36 sps:$4 sm:$0xff]   ;;  %v4128_v51 = vld [vmem:[%s5430_s1 + $0xb0] sm:$0xff]   ;;  %v4134_v58 = vld [vmem:[%s4467_s13 + $0x8] ss:$36 sps:$4 sm:$0xff]  }
  0x1f   : > { %3522 = vmatpush3.bf16.msra.mxu0 %v4079_v9  ;;  %4045 = vmatpush3.bf16.msra.mxu1 %v4079_v9  ;;  %v4130_v53 = vld [vmem:[%s5430_s1 + $0xf8] sm:$0xff]   ;;  %v4136_v56 = vld [vmem:[%s4467_s13 + $0xc] ss:$36 sps:$4 sm:$0xff]   ;;  %v4137_v59 = vld [vmem:[%s4467_s13 + $0x120] ss:$36 sps:$4 sm:$0xff]  }
  0x20   : > { %3523 = vmatprep.subr.bf16.mxu0 %v4080_v10  ;;  %4038 = vmatprep.subr.bf16.mxu1 %v4080_v10  ;;  %v4140_v54 = vld [vmem:[%s5430_s1 + $0x158] sm:$0xff]   ;;  %v4138_v60 = vld [vmem:[%s5430_s1 + $0x1c0] sm:$0xff]   ;;  %v4142_v62 = vld [vmem:[%s4467_s13 + $0x16c] ss:$36 sps:$4 sm:$0xff]  }
  0x21   : > { %v4141_v55 = vld [vmem:[%s5430_s1 + $0x118] sm:$0xff]   ;;  %v4139_v61 = vld [vmem:[%s5430_s1 + $0x180] sm:$0xff]   ;;  %v4155_v2 = vld [vmem:[%s5430_s1 + $0x1c8] sm:$0xff]  }
  0x22   : > { %v4131_v57 = vld [vmem:[%s5430_s1 + $0xb8] sm:$0xff]   ;;  %v4154_v63 = vld [vmem:[%s5430_s1 + $0x160] sm:$0xff]   ;;  %v4157_v3 = vld [vmem:[%s5430_s1 + $0x188] sm:$0xff]  }
  0x23   : > { %3524 = vmatpush3.bf16.msra.mxu0 %v4081_v13  ;;  %4046 = vmatpush3.bf16.msra.mxu1 %v4081_v13  ;;  %v4144_v0 = vld [vmem:[%s4467_s13 + $0x54] ss:$36 sps:$4 sm:$0xff]   ;;  %v4156_v1 = vld [vmem:[%s5430_s1 + $0x120] sm:$0xff]   ;;  %v4146_v4 = vld [vmem:[%s4467_s13 + $0x168] ss:$36 sps:$4 sm:$0xff]  }
  0x24   : > { %3525 = vmatprep.subr.bf16.mxu0 %v4082_v14  ;;  %4039 = vmatprep.subr.bf16.mxu1 %v4082_v14  ;;  %v4164_v5 = vld [vmem:[%s5430_s1 + $0x168] sm:$0xff]   ;;  %v4147_v7 = vld [vmem:[%s4467_s13 + $0x50] ss:$36 sps:$4 sm:$0xff]   ;;  %v4150_v9 = vld [vmem:[%s4467_s13 + $0x9c] ss:$36 sps:$4 sm:$0xff]  }
  0x25   : > { %v4165_v6 = vld [vmem:[%s5430_s1 + $0x128] sm:$0xff]   ;;  %v4148_v8 = vld [vmem:[%s4467_s13 + $0x1b4] ss:$36 sps:$4 sm:$0xff]   ;;  %v4158_v14 = vld [vmem:[%s4467_s13 + $0x1fc] ss:$36 sps:$4 sm:$0xff]  }
  0x26   : > { %v4172_v10 = vld [vmem:[%s5430_s1 + $0x1d0] sm:$0xff]   ;;  %v4153_v13 = vld [vmem:[%s4467_s13 + $0x98] ss:$36 sps:$4 sm:$0xff]  }
  0x27   : > { %3526 = vmatpush3.bf16.msra.mxu0 %v4083_v15  ;;  %4047 = vmatpush3.bf16.msra.mxu1 %v4083_v15  ;;  %v4173_v11 = vld [vmem:[%s5430_s1 + $0x190] sm:$0xff]  }
  0x28   : > { %3527 = vmatprep.subr.bf16.mxu0 %v4084_v16  ;;  %4040 = vmatprep.subr.bf16.mxu1 %v4084_v16  ;;  %v4152_v12 = vld [vmem:[%s4467_s13 + $0x1b0] ss:$36 sps:$4 sm:$0xff]  }
  0x29   : > { %v4180_v15 = vld [vmem:[%s5430_s1 + $0x170] sm:$0xff]  }
  0x2a   : > { %v4181_v16 = vld [vmem:[%s5430_s1 + $0x130] sm:$0xff]  }
  0x2b   : > { %3528 = vmatpush3.bf16.msra.mxu0 %v4085_v17  ;;  %4048 = vmatpush3.bf16.msra.mxu1 %v4085_v17  ;;  %v4160_v17 = vld [vmem:[%s4467_s13 + $0xe4] ss:$36 sps:$4 sm:$0xff]  }
  0x2c   : > { %3625 = vmatprep.subr.bf16.mxu1 %v4092_v18  ;;  %3737 = vmatprep.subr.bf16.mxu0 %v4093_v21  ;;  %v4188_v18 = vld [vmem:[%s5430_s1 + $0x1d8] sm:$0xff]  }
  0x2d   : > { %v4190_v21 = vld [vmem:[%s5430_s1 + $0x178] sm:$0xff]  }
  0x2e   : > { %1894 = vmatmul.mubr.bf16.vlgmr.msra.gmra.mrb[0].mxu0 %v4086_v19  ;;  %1990 = vmatmul.mubr.bf16.vlgmr.msra.gmra.mrb[0].mxu1 %v4089_v20  ;;  %v4189_v19 = vld [vmem:[%s5430_s1 + $0x198] sm:$0xff]  }
  0x2f   : > { %3626 = vmatpush3.bf16.msra.mxu1 %v4094_v22  ;;  %3738 = vmatpush3.bf16.msra.mxu0 %v4095_v23  ;;  %v4162_v20 = vld [vmem:[%s4467_s13 + $0x1f8] ss:$36 sps:$4 sm:$0xff]   ;;  %v4163_v23 = vld [vmem:[%s4467_s13 + $0xe0] ss:$36 sps:$4 sm:$0xff]  }
  0x30   : > { %3627 = vmatprep.subr.bf16.mxu1 %v4096_v24  ;;  %1901 = vmatprep.mubr.bf16.mxu0 %v4098_v25  ;;  %v4191_v22 = vld [vmem:[%s5430_s1 + $0x138] sm:$0xff]   ;;  %v4166_v24 = vld [vmem:[%s4467_s13 + $0x244] ss:$36 sps:$4 sm:$0xff]   ;;  %v4168_v25 = vld [vmem:[%s4467_s13 + $0x12c] ss:$36 sps:$4 sm:$0xff]  }
  0x31   : > { %1997 = vmatprep.mubr.bf16.mxu1 %v4100_v26  ;;  %3739 = vmatprep.subr.bf16.mxu0 %v4107_v27  ;;  %v4204_v26 = vld [vmem:[%s5430_s1 + $0x1e0] sm:$0xff]  }
  0x32   : > { %v4170_v27 = vld [vmem:[%s4467_s13 + $0x240] ss:$36 sps:$4 sm:$0xff]  }
  0x33   : > { %3628 = vmatpush3.bf16.msra.mxu1 %v4097_v28  ;;  %3740 = vmatpush3.bf16.msra.mxu0 %v4109_v29  ;;  %v4205_v28 = vld [vmem:[%s5430_s1 + $0x200] sm:$0xff]  }
  0x34   : > { %3629 = vmatprep.subr.bf16.mxu1 %v4104_v32  ;;  %3741 = vmatprep.subr.bf16.mxu0 %v4127_v41  ;;  %v4206_v29 = vld [vmem:[%s5430_s1 + $0x1a0] sm:$0xff]   ;;  %v4176_v32 = vld [vmem:[%s4467_s13 + $0x174] ss:$36 sps:$4 sm:$0xff]  }
  0x35   : > { %v4234_v41 = vld [vmem:[%s5430_s1 + $0x1f0] sm:$0xff]  }
  0x36   : > { %1902 = vmatmul.mubr.bf16.gmra.mrb[4].mxu0 %v4102_v30  ;;  %1998 = vmatmul.mubr.bf16.gmra.mrb[4].mxu1 %v4103_v31  ;;  %v4171_v30 = vld [vmem:[%s4467_s13 + $0x128] ss:$36 sps:$4 sm:$0xff]  }
  0x37   : > { %3630 = vmatpush3.bf16.msra.mxu1 %v4105_v33  ;;  %1909 = vmatprep.mubr.bf16.mxu0 %v4110_v35  ;;  %v4174_v31 = vld [vmem:[%s4467_s13 + $0x28c] ss:$36 sps:$4 sm:$0xff]  }
  0x38   : > { %3631 = vmatprep.subr.bf16.mxu1 %v4106_v34  ;;  %2005 = vmatprep.mubr.bf16.mxu1 %v4112_v36  ;;  %v4219_v33 = vld [vmem:[%s5430_s1 + $0x1e8] sm:$0xff]   ;;  %v4179_v35 = vld [vmem:[%s4467_s13 + $0x170] ss:$36 sps:$4 sm:$0xff]  }
  0x39   : > { %3742 = vmatpush3.bf16.msra.mxu0 %v4129_v44  ;;  %v4178_v34 = vld [vmem:[%s4467_s13 + $0x288] ss:$36 sps:$4 sm:$0xff]  }
  0x3a   : > { %3743 = vmatprep.subr.bf16.mxu0 %v4140_v54  ;;  %v4221_v36 = vld [vmem:[%s5430_s1 + $0x1a8] sm:$0xff]   ;;  %v4209_v54 = vld [vmem:[%s4467_s13 + $0x5c] ss:$36 sps:$4 sm:$0xff]  }
  0x3b   : > { %3632 = vmatpush3.bf16.msra.mxu1 %v4108_v37  ;;  %v4182_v37 = vld [vmem:[%s4467_s13 + $0x2d4] ss:$36 sps:$4 sm:$0xff]   ;;  %v4194_v44 = vld [vmem:[%s4467_s13 + $0x204] ss:$36 sps:$4 sm:$0xff]  }
  0x3c   : > { %3633 = vmatprep.subr.bf16.mxu1 %v4116_v38  ;;  %v4184_v38 = vld [vmem:[%s4467_s13 + $0x1bc] ss:$36 sps:$4 sm:$0xff]  }
  0x3d   : > { %3744 = vmatpush3.bf16.msra.mxu0 %v4141_v55  ;;  %v4220_v55 = vld [vmem:[%s5430_s1 + $0x208] sm:$0xff]  }
  0x3e   : > { %1910 = vmatmul.mubr.bf16.gmra.mrb[8].mxu0 %v4114_v39  ;;  %2006 = vmatmul.mubr.bf16.gmra.mrb[8].mxu1 %v4115_v40  ;;  %v4186_v39 = vld [vmem:[%s4467_s13 + $0x2d0] ss:$36 sps:$4 sm:$0xff]   ;;  %v4187_v40 = vld [vmem:[%s4467_s13 + $0x1b8] ss:$36 sps:$4 sm:$0xff]  }
  0x3f   : > { %3634 = vmatpush3.bf16.msra.mxu1 %v4117_v42  ;;  %1917 = vmatprep.mubr.bf16.mxu0 %v4120_v45  ;;  %v4192_v42 = vld [vmem:[%s4467_s13 + $0x31c] ss:$36 sps:$4 sm:$0xff]  }
  0x40   : > { %3635 = vmatprep.subr.bf16.mxu1 %v4118_v43  ;;  %2013 = vmatprep.mubr.bf16.mxu1 %v4122_v46  ;;  %v4236_v43 = vld [vmem:[%s5430_s1 + $0x1b0] sm:$0xff]   ;;  %v4196_v45 = vld [vmem:[%s4467_s13 + $0x318] ss:$36 sps:$4 sm:$0xff]   ;;  %v4197_v46 = vld [vmem:[%s4467_s13 + $0x200] ss:$36 sps:$4 sm:$0xff]  }
  0x41   : > { %3745 = vmatprep.subr.bf16.mxu0 %v4154_v63  ;;  %v4217_v63 = vld [vmem:[%s4467_s13 + $0x2d8] ss:$36 sps:$4 sm:$0xff]  }
  0x42   : > { %3746 = vmatpush3.bf16.msra.mxu0 %v4156_v1  ;;  %v4222_v1 = vld [vmem:[%s4467_s13 + $0x324] ss:$36 sps:$4 sm:$0xff]  }
  0x43   : > { %3636 = vmatpush3.bf16.msra.mxu1 %v4119_v47  ;;  %3747 = vmatprep.subr.bf16.mxu0 %v4164_v5  ;;  %v4249_v47 = vld [vmem:[%s5430_s1 + $0x1f8] sm:$0xff]   ;;  %v4227_v5 = vld [vmem:[%s4467_s13 + $0xe8] ss:$36 sps:$4 sm:$0xff]  }
  0x44   : > { %3637 = vmatprep.subr.bf16.mxu1 %v4126_v50  ;;  %v4202_v50 = vld [vmem:[%s4467_s13 + $0x14] ss:$36 sps:$4 sm:$0xff]  }
  0x46   : > { %1918 = vmatmul.mubr.bf16.gmra.mrb[12].mxu0 %v4124_v48  ;;  %2014 = vmatmul.mubr.bf16.gmra.mrb[12].mxu1 %v4125_v49  ;;  %v4198_v48 = vld [vmem:[%s4467_s13 + $0x24c] ss:$36 sps:$4 sm:$0xff]   ;;  %v4251_v49 = vld [vmem:[%s5430_s1 + $0x1b8] sm:$0xff]  }
  0x47   : > { %3638 = vmatpush3.bf16.msra.mxu1 %v4128_v51  ;;  %1925 = vmatprep.mubr.bf16.mxu0 %v4132_v52  ;;  %v4200_v51 = vld [vmem:[%s4467_s13 + $0x10] ss:$36 sps:$4 sm:$0xff]   ;;  %v4203_v52 = vld [vmem:[%s4467_s13 + $0x248] ss:$36 sps:$4 sm:$0xff]  }
  0x48   : > { %3639 = vmatprep.subr.bf16.mxu1 %v4130_v53  ;;  %2054 = vmatprep.mubr.bf16.mxu1 %v4136_v56  ;;  %v4207_v53 = vld [vmem:[%s4467_s13 + $0x294] ss:$36 sps:$4 sm:$0xff]  }
  0x49   : > { %3748 = vmatpush3.bf16.msra.mxu0 %v4165_v6  ;;  %v4235_v56 = vld [vmem:[%s5430_s1 + $0x210] sm:$0xff]  }
  0x4a   : > { %3749 = vmatprep.subr.bf16.mxu0 %v4180_v15  ;;  %v4290_v6 = vld [vmem:[%s5430_s1 + $0x230] sm:$0xff]   ;;  %v2708_v15 = vld [vmem:[%s4729_s17 + $0x8] sm:$0xff] }
  0x4b   : > { %3640 = vmatpush3.bf16.msra.mxu1 %v4131_v57  ;;  %v4211_v57 = vld [vmem:[%s4467_s13 + $0x290] ss:$36 sps:$4 sm:$0xff]  }
  0x4c   : > { %3849 = vmatprep.subr.bf16.mxu1 %v4138_v60  ;;  %v4215_v60 = vld [vmem:[%s4467_s13 + $0xa4] ss:$36 sps:$4 sm:$0xff]  }
  0x4d   : > { %3750 = vmatpush3.bf16.msra.mxu0 %v4181_v16  ;;  %v2709_v16 = vld [vmem:[%s4729_s17 + $0x10] sm:$0xff] }
  0x4e   : > { %1926 = vmatmul.mubr.bf16.gmra.mrb[16].mxu0 %v4137_v59  ;;  %2055 = vmatmul.mubr.bf16.vlgmr.msra.gmra.mrb[16].mxu1 %v4134_v58  ;;  %v4212_v58 = vld [vmem:[%s4467_s13 + $0x58] ss:$36 sps:$4 sm:$0xff]  }
  0x4f   : > { %3850 = vmatpush3.bf16.msra.mxu1 %v4139_v61  ;;  %1933 = vmatprep.mubr.bf16.mxu0 %v4142_v62  ;;  %v4213_v59 = vld [vmem:[%s4467_s13 + $0x2dc] ss:$36 sps:$4 sm:$0xff]  }
  0x50   : > { %2062 = vmatprep.mubr.bf16.mxu1 %v4144_v0  ;;  %3851 = vmatprep.subr.bf16.mxu1 %v4155_v2  ;;  %v4250_v61 = vld [vmem:[%s5430_s1 + $0x218] sm:$0xff]   ;;  %v4264_v62 = vld [vmem:[%s5430_s1 + $0x220] sm:$0xff]   ;;  %v4224_v2 = vld [vmem:[%s4467_s13 + $0xec] ss:$36 sps:$4 sm:$0xff]  }
  0x51   : > { %3751 = vmatprep.subr.bf16.mxu0 %v4190_v21  ;;  %v4218_v0 = vld [vmem:[%s4467_s13 + $0xa0] ss:$36 sps:$4 sm:$0xff]   ;;  %v2710_v21 = vld [vmem:[%s4729_s17 + $0x18] sm:$0xff] }
  0x52   : > { %3752 = vmatpush3.bf16.msra.mxu0 %v4191_v22  ;;  %v2707_v22 = vld [vmem:[%s4729_s17] sm:$0xff] }
  0x53   : > { %3852 = vmatpush3.bf16.msra.mxu1 %v4157_v3  ;;  %3985 = vmatprep.subr.bf16.mxu0 %v4205_v28  ;;  %v4277_v3 = vld [vmem:[%s5430_s1 + $0x228] sm:$0xff]  }
  0x54   : > { %3853 = vmatprep.subr.bf16.mxu1 %v4172_v10  ;;  %v4232_v10 = vld [vmem:[%s4467_s13 + $0x368] ss:$36 sps:$4 sm:$0xff]  }
  0x56   : > { %1934 = vmatmul.mubr.bf16.gmra.mrb[20].mxu0 %v4146_v4  ;;  %2063 = vmatmul.mubr.bf16.gmra.mrb[20].mxu1 %v4147_v7  ;;  %v4226_v4 = vld [vmem:[%s4467_s13 + $0x320] ss:$36 sps:$4 sm:$0xff]   ;;  %v4228_v7 = vld [vmem:[%s4467_s13 + $0x36c] ss:$36 sps:$4 sm:$0xff]  }
  0x57   : > { %1941 = vmatprep.mubr.bf16.mxu0 %v4148_v8  ;;  %2070 = vmatprep.mubr.bf16.mxu1 %v4150_v9  ;;  %v4230_v8 = vld [vmem:[%s4467_s13 + $0x134] ss:$36 sps:$4 sm:$0xff]  }
  0x58   : > { %3854 = vmatpush3.bf16.msra.mxu1 %v4173_v11  ;;  %v4303_v9 = vld [vmem:[%s5430_s1 + $0x238] sm:$0xff]   ;;  %v4370_v11 = vmov 0  }
  0x59   : > { %3855 = vmatprep.subr.bf16.mxu1 %v4188_v18  ;;  %4066 = vset.pattern.permute.xlu1 %v4370_v11  ;;  %v3503_v18 = vld [vmem:[%s370_s20] ss:$0 sm:$0xff] }
  0x5a   : > { %2746 = vperm.xlu1 %4066, %v2708_v15   ;;  %v4291_v15 = vld [vmem:[%s4467_s13 + $0x3bc] ss:$36 sps:$4 sm:$0xff]  }
  0x5c   : > { %3856 = vmatpush3.bf16.msra.mxu1 %v4189_v19  ;;  %v4241_v19 = vld [vmem:[%s4467_s13 + $0x3b0] ss:$36 sps:$4 sm:$0xff]  }
  0x5d   : > { %3857 = vmatprep.subr.bf16.mxu1 %v4204_v26  ;;  %v2711_v26 = vld [vmem:[%s4729_s17 + $0x20] sm:$0xff] }
  0x5e   : > { %1942 = vmatmul.mubr.bf16.gmra.mrb[24].mxu0 %v4152_v12  ;;  %2071 = vmatmul.mubr.bf16.gmra.mrb[24].mxu1 %v4153_v13  ;;  %v4233_v12 = vld [vmem:[%s4467_s13 + $0x130] ss:$36 sps:$4 sm:$0xff]  }
  0x5f   : > { %1949 = vmatprep.mubr.bf16.mxu0 %v4158_v14  ;;  %2078 = vmatprep.mubr.bf16.mxu1 %v4160_v17  ;;  %v4237_v13 = vld [vmem:[%s4467_s13 + $0x3b4] ss:$36 sps:$4 sm:$0xff]   ;;  %v4239_v14 = vld [vmem:[%s4467_s13 + $0x17c] ss:$36 sps:$4 sm:$0xff]   ;;  %v4371_v17 = vmov 5  }
  0x60   : > { %3858 = vmatpush3.bf16.msra.mxu1 %v4206_v29  ;;  %4064 = vset.pattern.permute.xlu0 %v4371_v17  ;;  %v4248_v29 = vld [vmem:[%s4467_s13 + $0x1c0] ss:$36 sps:$4 sm:$0xff]   ;;  %v4295_v17 = vld [vmem:[%s4467_s13 + $0x3b8] ss:$36 sps:$4 sm:$0xff]  }
  0x61   : > { %3859 = vmatprep.subr.bf16.mxu1 %v4219_v33  ;;  %2751 = vperm.xlu1 %4066, %v2709_v16   ;;  %v2716_v33 = vld [vmem:[%s4729_s17 + $0x48] sm:$0xff] }
  0x62   : > { %2672 = vperm.xlu0 %4064, %v3503_v18   ;;  %v4293_v16 = vld [vmem:[%s4467_s13 + $0x184] ss:$36 sps:$4 sm:$0xff]  }
  0x63   : > { %v4296_v18 = vld [vmem:[%s4467_s13 + $0x180] ss:$36 sps:$4 sm:$0xff]  }
  0x64   : > { %3860 = vmatpush3.bf16.msra.mxu1 %v4221_v36  ;;  %v4256_v36 = vld [vmem:[%s4467_s13 + $0x440] ss:$36 sps:$4 sm:$0xff]  }
  0x65   : > { %3861 = vmatprep.subr.bf16.mxu1 %v4234_v41  ;;  %2756 = vperm.xlu1 %4066, %v2710_v21   ;;  %v2720_v41 = vld [vmem:[%s4729_s17 + $0x68] sm:$0xff]  ;;  %v4301_v21 = vld [vmem:[%s4467_s13 + $0x400] ss:$36 sps:$4 sm:$0xff]  }
  0x66   : > { %1950 = vmatmul.mubr.bf16.gmra.mrb[28].mxu0 %v4162_v20  ;;  %2079 = vmatmul.mubr.bf16.gmra.mrb[28].mxu1 %v4163_v23  ;;  %v4242_v20 = vld [vmem:[%s4467_s13 + $0x178] ss:$36 sps:$4 sm:$0xff]  }
  0x67   : > { %1957 = vmatprep.mubr.bf16.mxu0 %v4166_v24  ;;  %2086 = vmatprep.mubr.bf16.mxu1 %v4168_v25  ;;  %v4243_v23 = vld [vmem:[%s4467_s13 + $0x3fc] ss:$36 sps:$4 sm:$0xff]   ;;  %v4245_v24 = vld [vmem:[%s4467_s13 + $0x1c4] ss:$36 sps:$4 sm:$0xff]  }
  0x68   : > { %3862 = vmatpush3.bf16.msra.mxu1 %v4236_v43  ;;  %4065 = vset.pattern.permute.xlu0 %v4370_v11  ;;  %v2712_v25 = vld [vmem:[%s4729_s17 + $0x28] sm:$0xff]  ;;  %v2722_v43 = vld [vmem:[%s4729_s17 + $0x78] sm:$0xff] }
  0x69   : > { %3863 = vmatprep.subr.bf16.mxu1 %v4249_v47  ;;  %2741 = vperm.xlu0 %4065, %v2707_v22   ;;  %v4265_v47 = vld [vmem:[%s4467_s13 + $0x29c] ss:$36 sps:$4 sm:$0xff]   ;;  %v4302_v22 = vld [vmem:[%s4467_s13 + $0x1c8] ss:$36 sps:$4 sm:$0xff]  }
  0x6a   : > { %2766 = vperm.xlu1 %4066, %v2712_v25   ;;  %v2738_v11 = vld [vmem:[%s4729_s17 + $0xf8] sm:$0xff] }
  0x6c   : > { %3864 = vmatpush3.bf16.msra.mxu1 %v4251_v49  ;;  %v2724_v49 = vld [vmem:[%s4729_s17 + $0x88] sm:$0xff] }
  0x6d   : > { %2761 = vperm.xlu0 %4065, %v2711_v26  }
  0x6e   : > { %1958 = vmatmul.mubr.bf16.gmra.mrb[32].mxu0 %v4170_v27  ;;  %2087 = vmatmul.mubr.bf16.gmra.mrb[32].mxu1 %v4171_v30  ;;  %v4247_v27 = vld [vmem:[%s4467_s13 + $0x3f8] ss:$36 sps:$4 sm:$0xff]   ;;  %v2713_v30 = vld [vmem:[%s4729_s17 + $0x30] sm:$0xff] }
  0x6f   : > { %1965 = vmatprep.mubr.bf16.mxu0 %v4174_v31  ;;  %2094 = vmatprep.mubr.bf16.mxu1 %v4176_v32  ;;  %v4252_v31 = vld [vmem:[%s4467_s13 + $0x444] ss:$36 sps:$4 sm:$0xff]   ;;  %v4254_v32 = vld [vmem:[%s4467_s13 + $0x20c] ss:$36 sps:$4 sm:$0xff]  }
  0x71   : > { %2771 = vperm.xlu0 %4065, %v2713_v30   ;;  %v4309_v30 = vld [vmem:[%s4467_s13 + $0x210] ss:$36 sps:$4 sm:$0xff]  }
  0x76   : > { %1966 = vmatmul.mubr.bf16.gmra.mrb[36].mxu0 %v4178_v34  ;;  %2095 = vmatmul.mubr.bf16.gmra.mrb[36].mxu1 %v4179_v35  ;;  %v2715_v34 = vld [vmem:[%s4729_s17 + $0x40] sm:$0xff]  ;;  %v2718_v35 = vld [vmem:[%s4729_s17 + $0x58] sm:$0xff] }
  0x77   : > { %1973 = vmatprep.mubr.bf16.mxu0 %v4182_v37  ;;  %2102 = vmatprep.mubr.bf16.mxu1 %v4184_v38  ;;  %v4257_v37 = vld [vmem:[%s4467_s13 + $0x208] ss:$36 sps:$4 sm:$0xff]   ;;  %v2717_v38 = vld [vmem:[%s4729_s17 + $0x50] sm:$0xff] }
  0x78   : > { %2781 = vperm.xlu0 %4065, %v2715_v34  }
  0x7c   : > { %2791 = vperm.xlu0 %4065, %v2717_v38  }
  0x7e   : > { %1974 = vmatmul.mubr.bf16.gmra.mrb[40].mxu0 %v4186_v39  ;;  %2103 = vmatmul.mubr.bf16.gmra.mrb[40].mxu1 %v4187_v40  ;;  %v4258_v39 = vld [vmem:[%s4467_s13 + $0x254] ss:$36 sps:$4 sm:$0xff]   ;;  %v4262_v40 = vld [vmem:[%s4467_s13 + $0x1c] ss:$36 sps:$4 sm:$0xff]  }
  0x7f   : > { %1981 = vmatprep.mubr.bf16.mxu0 %v4192_v42  ;;  %2110 = vmatprep.mubr.bf16.mxu1 %v4194_v44  ;;  %v2719_v42 = vld [vmem:[%s4729_s17 + $0x60] sm:$0xff]  ;;  %v4260_v44 = vld [vmem:[%s4467_s13 + $0x18] ss:$36 sps:$4 sm:$0xff]  }
  0x80   : > { %2801 = vperm.xlu0 %4065, %v2719_v42  }
  0x86   : > { %1982 = vmatmul.mubr.bf16.gmra.mrb[44].mxu0 %v4196_v45  ;;  %2111 = vmatmul.mubr.bf16.gmra.mrb[44].mxu1 %v4197_v46  ;;  %v4263_v45 = vld [vmem:[%s4467_s13 + $0x250] ss:$36 sps:$4 sm:$0xff]  }
  0x87   : > { %2118 = vmatprep.mubr.bf16.mxu1 %v4198_v48  ;;  %2215 = vmatprep.mubr.bf16.mxu0 %v4202_v50  ;;  %v2721_v46 = vld [vmem:[%s4729_s17 + $0x70] sm:$0xff]  ;;  %v4267_v48 = vld [vmem:[%s4467_s13 + $0x64] ss:$36 sps:$4 sm:$0xff]  }
  0x88   : > { %2811 = vperm.xlu0 %4065, %v2721_v46   ;;  %v2723_v50 = vld [vmem:[%s4729_s17 + $0x80] sm:$0xff]  ;;  %v4314_v46 = vld [vmem:[%s4467_s13 + $0x68] ss:$36 sps:$4 sm:$0xff]  }
  0x8c   : > { %2821 = vperm.xlu0 %4065, %v2723_v50  }
  0x8e   : > { %2119 = vmatmul.mubr.bf16.gmra.mrb[48].mxu1 %v4203_v52  ;;  %2216 = vmatmul.mubr.bf16.vlgmr.msra.gmra.mrb[48].mxu0 %v4200_v51  ;;  %v2726_v51 = vld [vmem:[%s4729_s17 + $0x98] sm:$0xff] }
  0x8f   : > { %3986 = vmatpush3.bf16.msra.mxu0 %v4205_v28  ;;  %2126 = vmatprep.mubr.bf16.mxu1 %v4207_v53  ;;  %v2714_v28 = vld [vmem:[%s4729_s17 + $0x38] sm:$0xff]  ;;  %v4270_v53 = vld [vmem:[%s4467_s13 + $0x60] ss:$36 sps:$4 sm:$0xff]  }
  0x90   : > { %2223 = vmatprep.mubr.bf16.mxu0 %v4209_v54  ;;  %3987 = vmatprep.subr.bf16.mxu0 %v4220_v55  ;;  %v4269_v52 = vld [vmem:[%s4467_s13 + $0x298] ss:$36 sps:$4 sm:$0xff]   ;;  %v2725_v54 = vld [vmem:[%s4729_s17 + $0x90] sm:$0xff] }
  0x91   : > { %2776 = vperm.xlu1 %4066, %v2714_v28   ;;  %2831 = vperm.xlu0 %4065, %v2725_v54  }
  0x93   : > { %3988 = vmatpush3.bf16.msra.mxu0 %v4220_v55  ;;  %v4271_v55 = vld [vmem:[%s4467_s13 + $0x2e4] ss:$36 sps:$4 sm:$0xff]  }
  0x94   : > { %3989 = vmatprep.subr.bf16.mxu0 %v4235_v56 }
  0x95   : > { %2786 = vperm.xlu1 %4066, %v2716_v33  }
  0x96   : > { %2127 = vmatmul.mubr.bf16.gmra.mrb[52].mxu1 %v4211_v57  ;;  %2224 = vmatmul.mubr.bf16.gmra.mrb[52].mxu0 %v4212_v58  ;;  %v2728_v57 = vld [vmem:[%s4729_s17 + $0xa8] sm:$0xff]  ;;  %v2727_v58 = vld [vmem:[%s4729_s17 + $0xa0] sm:$0xff] }
  0x97   : > { %2134 = vmatprep.mubr.bf16.mxu1 %v4213_v59  ;;  %2231 = vmatprep.mubr.bf16.mxu0 %v4215_v60  ;;  %v2730_v59 = vld [vmem:[%s4729_s17 + $0xb8] sm:$0xff]  ;;  %v4275_v60 = vld [vmem:[%s4467_s13 + $0x2e0] ss:$36 sps:$4 sm:$0xff]  }
  0x98   : > { %3990 = vmatpush3.bf16.msra.mxu0 %v4235_v56  ;;  %v4273_v56 = vld [vmem:[%s4467_s13 + $0xac] ss:$36 sps:$4 sm:$0xff]   ;;  %2841 = vperm.xlu0 %4065, %v2727_v58  }
  0x99   : > { %3991 = vmatprep.subr.bf16.mxu0 %v4250_v61  ;;  %2796 = vperm.xlu1 %4066, %v2718_v35   ;;  %v4310_v35 = vld [vmem:[%s4467_s13 + $0x25c] ss:$36 sps:$4 sm:$0xff]  }
  0x9c   : > { %3992 = vmatpush3.bf16.msra.mxu0 %v4250_v61  ;;  %v4276_v61 = vld [vmem:[%s4467_s13 + $0xa8] ss:$36 sps:$4 sm:$0xff]  }
  0x9d   : > { %3993 = vmatprep.subr.bf16.mxu0 %v4264_v62  ;;  %2806 = vperm.xlu1 %4066, %v2720_v41  }
  0x9e   : > { %2135 = vmatmul.mubr.bf16.gmra.mrb[56].mxu1 %v4217_v63  ;;  %2232 = vmatmul.mubr.bf16.gmra.mrb[56].mxu0 %v4218_v0  ;;  %v4278_v63 = vld [vmem:[%s4467_s13 + $0x32c] ss:$36 sps:$4 sm:$0xff]   ;;  %v4280_v0 = vld [vmem:[%s4467_s13 + $0xf4] ss:$36 sps:$4 sm:$0xff]  }
  0x9f   : > { %2142 = vmatprep.mubr.bf16.mxu1 %v4222_v1  ;;  %2239 = vmatprep.mubr.bf16.mxu0 %v4224_v2  ;;  %v2732_v1 = vld [vmem:[%s4729_s17 + $0xc8] sm:$0xff]  ;;  %v2731_v2 = vld [vmem:[%s4729_s17 + $0xc0] sm:$0xff] }
  0xa0   : > { %3994 = vmatpush3.bf16.msra.mxu0 %v4264_v62  ;;  %v2729_v62 = vld [vmem:[%s4729_s17 + $0xb0] sm:$0xff] }
  0xa1   : > { %3995 = vmatprep.subr.bf16.mxu0 %v4277_v3  ;;  %2816 = vperm.xlu1 %4066, %v2722_v43  }
  0xa2   : > { %2851 = vperm.xlu0 %4065, %v2729_v62   ;;  %v4319_v62 = vld [vmem:[%s4467_s13 + $0xf8] ss:$36 sps:$4 sm:$0xff]  }
  0xa4   : > { %3996 = vmatpush3.bf16.msra.mxu0 %v4277_v3  ;;  %v2734_v3 = vld [vmem:[%s4729_s17 + $0xd8] sm:$0xff] }
  0xa5   : > { %3997 = vmatprep.subr.bf16.mxu0 %v4290_v6  ;;  %2826 = vperm.xlu1 %4066, %v2724_v49  }
  0xa6   : > { %2143 = vmatmul.mubr.bf16.gmra.mrb[60].mxu1 %v4226_v4  ;;  %2240 = vmatmul.mubr.bf16.gmra.mrb[60].mxu0 %v4227_v5  ;;  %v4282_v4 = vld [vmem:[%s4467_s13 + $0x328] ss:$36 sps:$4 sm:$0xff]   ;;  %v4283_v5 = vld [vmem:[%s4467_s13 + $0xf0] ss:$36 sps:$4 sm:$0xff]  }
  0xa7   : > { %2150 = vmatprep.mubr.bf16.mxu1 %v4228_v7  ;;  %2247 = vmatprep.mubr.bf16.mxu0 %v4230_v8  ;;  %v4284_v7 = vld [vmem:[%s4467_s13 + $0x374] ss:$36 sps:$4 sm:$0xff]   ;;  %v4286_v8 = vld [vmem:[%s4467_s13 + $0x13c] ss:$36 sps:$4 sm:$0xff]  }
  0xa8   : > { %3998 = vmatpush3.bf16.msra.mxu0 %v4290_v6  ;;  %2861 = vperm.xlu0 %4065, %v2731_v2   ;;  %v2733_v6 = vld [vmem:[%s4729_s17 + $0xd0] sm:$0xff] }
  0xa9   : > { %3999 = vmatprep.subr.bf16.mxu0 %v4303_v9  ;;  %2836 = vperm.xlu1 %4066, %v2726_v51   ;;  %v4315_v51 = vld [vmem:[%s4467_s13 + $0x2a4] ss:$36 sps:$4 sm:$0xff]  }
  0xac   : > { %4000 = vmatpush3.bf16.msra.mxu0 %v4303_v9  ;;  %v2736_v9 = vld [vmem:[%s4729_s17 + $0xe8] sm:$0xff]  ;;  %2871 = vperm.xlu0 %4065, %v2733_v6  }
  0xad   : > { %2846 = vperm.xlu1 %4066, %v2728_v57  }
  0xae   : > { %2151 = vmatmul.mubr.bf16.gmra.mrb[64].mxu1 %v4232_v10  ;;  %2248 = vmatmul.mubr.bf16.gmra.mrb[64].mxu0 %v4233_v12  ;;  %v2735_v10 = vld [vmem:[%s4729_s17 + $0xe0] sm:$0xff]  ;;  %v4288_v12 = vld [vmem:[%s4467_s13 + $0x370] ss:$36 sps:$4 sm:$0xff]  }
  0xaf   : > { %2158 = vmatprep.mubr.bf16.mxu1 %v4237_v13  ;;  %2255 = vmatprep.mubr.bf16.mxu0 %v4239_v14  ;;  %v4289_v13 = vld [vmem:[%s4467_s13 + $0x138] ss:$36 sps:$4 sm:$0xff]   ;;  %v2737_v14 = vld [vmem:[%s4729_s17 + $0xf0] sm:$0xff] }
  0xb0   : > { %2881 = vperm.xlu0 %4065, %v2735_v10  }
  0xb1   : > { %2856 = vperm.xlu1 %4066, %v2730_v59  }
  0xb4   : > { %2891 = vperm.xlu0 %4065, %v2737_v14   ;;  %v4324_v14 = vld [vmem:[%s4467_s13 + $0x188] ss:$36 sps:$4 sm:$0xff]  }
  0xb5   : > { %2866 = vperm.xlu1 %4066, %v2732_v1  }
  0xb6   : > { %2159 = vmatmul.mubr.bf16.gmra.mrb[68].mxu1 %v4241_v19  ;;  %2256 = vmatmul.mubr.bf16.gmra.mrb[68].mxu0 %v4242_v20  ;;  %v4297_v19 = vld [vmem:[%s4467_s13 + $0x404] ss:$36 sps:$4 sm:$0xff]   ;;  %v4299_v20 = vld [vmem:[%s4467_s13 + $0x1cc] ss:$36 sps:$4 sm:$0xff]  }
  0xb7   : > { %2166 = vmatprep.mubr.bf16.mxu1 %v4243_v23  ;;  %2263 = vmatprep.mubr.bf16.mxu0 %v4245_v24  ;;  %v4304_v23 = vld [vmem:[%s4467_s13 + $0x44c] ss:$36 sps:$4 sm:$0xff]   ;;  %v4306_v24 = vld [vmem:[%s4467_s13 + $0x214] ss:$36 sps:$4 sm:$0xff]  }
  0xb9   : > { %2876 = vperm.xlu1 %4066, %v2734_v3   ;;  %v4320_v3 = vld [vmem:[%s4467_s13 + $0x2ec] ss:$36 sps:$4 sm:$0xff]  }
  0xbd   : > { %2886 = vperm.xlu1 %4066, %v2736_v9  }
  0xbe   : > { %2167 = vmatmul.mubr.bf16.gmra.mrb[72].mxu1 %v4247_v27  ;;  %2264 = vmatmul.mubr.bf16.gmra.mrb[72].mxu0 %v4248_v29  ;;  %v4308_v29 = vld [vmem:[%s4467_s13 + $0x448] ss:$36 sps:$4 sm:$0xff]  }
  0xbf   : > { %2174 = vmatprep.mubr.bf16.mxu1 %v4252_v31  ;;  %2271 = vmatprep.mubr.bf16.mxu0 %v4254_v32 }
  0xc1   : > { %2896 = vperm.xlu1 %4066, %v2738_v11  }
  0xc6   : > { %2175 = vmatmul.mubr.bf16.gmra.mrb[76].mxu1 %v4256_v36  ;;  %2272 = vmatmul.mubr.bf16.gmra.mrb[76].mxu0 %v4257_v37  ;;  %v4312_v36 = vld [vmem:[%s4467_s13 + $0x20] ss:$36 sps:$4 sm:$0xff]  }
  0xc7   : > { %2279 = vmatprep.mubr.bf16.mxu0 %v4258_v39  ;;  %2376 = vmatprep.mubr.bf16.mxu1 %v4262_v40 }
  0xce   : > { %2280 = vmatmul.mubr.bf16.gmra.mrb[80].mxu0 %v4263_v45  ;;  %2377 = vmatmul.mubr.bf16.vlgmr.msra.gmra.mrb[80].mxu1 %v4260_v44  ;;  %v4313_v45 = vld [vmem:[%s4467_s13 + $0x258] ss:$36 sps:$4 sm:$0xff]  }
  0xcf   : > { %2287 = vmatprep.mubr.bf16.mxu0 %v4265_v47  ;;  %2384 = vmatprep.mubr.bf16.mxu1 %v4267_v48 }
  0xd6   : > { %2288 = vmatmul.mubr.bf16.gmra.mrb[84].mxu0 %v4269_v52  ;;  %2385 = vmatmul.mubr.bf16.gmra.mrb[84].mxu1 %v4270_v53  ;;  %v4317_v52 = vld [vmem:[%s4467_s13 + $0xb0] ss:$36 sps:$4 sm:$0xff]  }
  0xd7   : > { %2295 = vmatprep.mubr.bf16.mxu0 %v4271_v55  ;;  %2392 = vmatprep.mubr.bf16.mxu1 %v4273_v56 }
  0xde   : > { %2296 = vmatmul.mubr.bf16.gmra.mrb[88].mxu0 %v4275_v60  ;;  %2393 = vmatmul.mubr.bf16.gmra.mrb[88].mxu1 %v4276_v61  ;;  %v4318_v61 = vld [vmem:[%s4467_s13 + $0x2a0] ss:$36 sps:$4 sm:$0xff]  }
  0xdf   : > { %2303 = vmatprep.mubr.bf16.mxu0 %v4278_v63  ;;  %2400 = vmatprep.mubr.bf16.mxu1 %v4280_v0 }
  0xe6   : > { %2304 = vmatmul.mubr.bf16.gmra.mrb[92].mxu0 %v4282_v4  ;;  %2401 = vmatmul.mubr.bf16.gmra.mrb[92].mxu1 %v4283_v5  ;;  %v4322_v4 = vld [vmem:[%s4467_s13 + $0x140] ss:$36 sps:$4 sm:$0xff]  }
  0xe7   : > { %2311 = vmatprep.mubr.bf16.mxu0 %v4284_v7  ;;  %2408 = vmatprep.mubr.bf16.mxu1 %v4286_v8 }
  0xee   : > { %2312 = vmatmul.mubr.bf16.gmra.mrb[96].mxu0 %v4288_v12  ;;  %2409 = vmatmul.mubr.bf16.gmra.mrb[96].mxu1 %v4289_v13  ;;  %v4323_v13 = vld [vmem:[%s4467_s13 + $0x2e8] ss:$36 sps:$4 sm:$0xff]  }
  0xef   : > { %2319 = vmatprep.mubr.bf16.mxu0 %v4291_v15  ;;  %2416 = vmatprep.mubr.bf16.mxu1 %v4293_v16 }
  0xf6   : > { %2320 = vmatmul.mubr.bf16.gmra.mrb[100].mxu0 %v4295_v17  ;;  %2417 = vmatmul.mubr.bf16.gmra.mrb[100].mxu1 %v4296_v18 }
  0xf7   : > { %2327 = vmatprep.mubr.bf16.mxu0 %v4297_v19  ;;  %2424 = vmatprep.mubr.bf16.mxu1 %v4299_v20  ;;  %v4325_v19 = vld [vmem:[%s4467_s13 + $0x334] ss:$36 sps:$4 sm:$0xff]  }
  0xf8   : > { %v4327_v20 = vld [vmem:[%s4467_s13 + $0x1d0] ss:$36 sps:$4 sm:$0xff]  }
  0xfe   : > { %2328 = vmatmul.mubr.bf16.gmra.mrb[104].mxu0 %v4301_v21  ;;  %2425 = vmatmul.mubr.bf16.gmra.mrb[104].mxu1 %v4302_v22 }
  0xff   : > { %2335 = vmatprep.mubr.bf16.mxu0 %v4304_v23  ;;  %2432 = vmatprep.mubr.bf16.mxu1 %v4306_v24 }
 0x101   : > { %v3529_v25 = vpop.f32.mrb[0].mxu0  ;;  %v3601_v26 = vpop.f32.mrb[0].mxu1 }
 0x102   : > { %v3530_v27 = vpop.f32.mrb[1].mxu0  ;;  %v3602_v28 = vpop.f32.mrb[1].mxu1 }
 0x103   : > { %v4812_v31 = vadd.f32 %v3530_v27, %v3529_v25  ;;  %v4814_v32 = vadd.f32 %v3602_v28, %v3601_v26  ;;  %v3532_v33 = vpop.f32.mrb[2].mxu0  ;;  %v3604_v34 = vpop.f32.mrb[2].mxu1  ;;  %v4861_v25 = vld [vmem:[%s5431_s2] ss:$0 sm:$0xff] }
 0x104   : > { %v3533_v37 = vpop.f32.mrb[3].mxu0  ;;  %v3605_v38 = vpop.f32.mrb[3].mxu1 }
 0x105   : > { %v4818_v39 = vadd.f32 %v3533_v37, %v3532_v33  ;;  %v4820_v40 = vadd.f32 %v3605_v38, %v3604_v34  ;;  %v4329_v33 = vld [vmem:[%s4467_s13 + $0x218] ss:$36 sps:$4 sm:$0xff]   ;;  %v1896_v34 = vadd.f32 %v4812_v31, %v4861_v25 }
 0x106   : > { %2336 = vmatmul.mubr.bf16.gmra.mrb[108].mxu0 %v4308_v29  ;;  %2433 = vmatmul.mubr.bf16.gmra.mrb[108].mxu1 %v4309_v30  ;;  %v4328_v30 = vld [vmem:[%s4467_s13 + $0x330] ss:$36 sps:$4 sm:$0xff]  }
 0x107   : > { %2440 = vmatprep.mubr.bf16.mxu1 %v4310_v35  ;;  %4001 = vmatprep.mubr.bf16.mxu0 %v4312_v36 }
 0x109   : > { %v3535_v41 = vpop.f32.mrb[4].mxu0  ;;  %v3607_v42 = vpop.f32.mrb[4].mxu1 }
 0x10a   : > { %v3536_v43 = vpop.f32.mrb[5].mxu0  ;;  %v3608_v44 = vpop.f32.mrb[5].mxu1 }
 0x10b   : > { %v4824_v47 = vadd.f32 %v3536_v43, %v3535_v41  ;;  %v4826_v48 = vadd.f32 %v3608_v44, %v3607_v42  ;;  %v3538_v49 = vpop.f32.mrb[6].mxu0  ;;  %v3610_v50 = vpop.f32.mrb[6].mxu1  ;;  %v4330_v41 = vld [vmem:[%s4467_s13 + $0x37c] ss:$36 sps:$4 sm:$0xff]  }
 0x10c   : > { %v3539_v53 = vpop.f32.mrb[7].mxu0  ;;  %v3611_v54 = vpop.f32.mrb[7].mxu1  ;;  %v4332_v42 = vld [vmem:[%s4467_s13 + $0x260] ss:$36 sps:$4 sm:$0xff]  }
 0x10d   : > { %v4830_v55 = vadd.f32 %v3539_v53, %v3538_v49  ;;  %v4832_v56 = vadd.f32 %v3611_v54, %v3610_v50 }
 0x10e   : > { %2441 = vmatmul.mubr.bf16.gmra.mrb[112].mxu1 %v4313_v45  ;;  %4002 = vmatmul.mubr.bf16.vlgmr.msra.gmra.mrb[112].mxu0 %v4314_v46  ;;  %v1899_v45 = vadd.f32 %v4818_v39, %v4861_v25  ;;  %v1904_v39 = vadd.f32 %v4824_v47, %v4861_v25 }
 0x10f   : > { %2448 = vmatprep.mubr.bf16.mxu1 %v4315_v51  ;;  %4005 = vmatprep.mubr.bf16.mxu0 %v4317_v52 }
 0x111   : > { %v3541_v57 = vpop.f32.mrb[8].mxu0  ;;  %v3613_v58 = vpop.f32.mrb[8].mxu1 }
 0x112   : > { %v3542_v59 = vpop.f32.mrb[9].mxu0  ;;  %v3614_v60 = vpop.f32.mrb[9].mxu1 }
 0x113   : > { %v4836_v63 = vadd.f32 %v3542_v59, %v3541_v57  ;;  %v4838_v0 = vadd.f32 %v3614_v60, %v3613_v58  ;;  %v3544_v1 = vpop.f32.mrb[10].mxu0  ;;  %v3616_v2 = vpop.f32.mrb[10].mxu1  ;;  %v4333_v57 = vld [vmem:[%s4467_s13 + $0x378] ss:$36 sps:$4 sm:$0xff]   ;;  %v4334_v58 = vld [vmem:[%s4467_s13 + $0x2a8] ss:$36 sps:$4 sm:$0xff]  }
 0x114   : > { %v3545_v5 = vpop.f32.mrb[11].mxu0  ;;  %v3617_v6 = vpop.f32.mrb[11].mxu1 }
 0x115   : > { %v4842_v7 = vadd.f32 %v3545_v5, %v3544_v1  ;;  %v4844_v8 = vadd.f32 %v3617_v6, %v3616_v2  ;;  %v4335_v1 = vld [vmem:[%s4467_s13 + $0x3c4] ss:$36 sps:$4 sm:$0xff]   ;;  %v4337_v2 = vld [vmem:[%s4467_s13 + $0x2f0] ss:$36 sps:$4 sm:$0xff]   ;;  %v1907_v5 = vadd.f32 %v4830_v55, %v4861_v25  ;;  %v1912_v55 = vadd.f32 %v4836_v63, %v4861_v25 }
 0x116   : > { %2449 = vmatmul.mubr.bf16.gmra.mrb[116].mxu1 %v4318_v61  ;;  %4006 = vmatmul.mubr.bf16.gmra.mrb[116].mxu0 %v4319_v62 }
 0x117   : > { %2456 = vmatprep.mubr.bf16.mxu1 %v4320_v3  ;;  %4009 = vmatprep.mubr.bf16.mxu0 %v4322_v4 }
 0x119   : > { %v3547_v9 = vpop.f32.mrb[12].mxu0  ;;  %v3619_v10 = vpop.f32.mrb[12].mxu1 }
 0x11a   : > { %v3548_v11 = vpop.f32.mrb[13].mxu0  ;;  %v3620_v12 = vpop.f32.mrb[13].mxu1 }
 0x11b   : > { %v4848_v15 = vadd.f32 %v3548_v11, %v3547_v9  ;;  %v4850_v16 = vadd.f32 %v3620_v12, %v3619_v10  ;;  %v3550_v17 = vpop.f32.mrb[14].mxu0  ;;  %v3622_v18 = vpop.f32.mrb[14].mxu1 }
 0x11c   : > { %v3551_v21 = vpop.f32.mrb[15].mxu0  ;;  %v3623_v22 = vpop.f32.mrb[15].mxu1 }
 0x11d   : > { %v4854_v23 = vadd.f32 %v3551_v21, %v3550_v17  ;;  %v4856_v24 = vadd.f32 %v3623_v22, %v3622_v18  ;;  %v4338_v17 = vld [vmem:[%s4467_s13 + $0x3c0] ss:$36 sps:$4 sm:$0xff]   ;;  %v4339_v18 = vld [vmem:[%s4467_s13 + $0x338] ss:$36 sps:$4 sm:$0xff]  }
 0x11e   : > { %2457 = vmatmul.mubr.bf16.gmra.mrb[120].mxu1 %v4323_v13  ;;  %4010 = vmatmul.mubr.bf16.gmra.mrb[120].mxu0 %v4324_v14 }
 0x11f   : > { %2464 = vmatprep.mubr.bf16.mxu1 %v4325_v19  ;;  %4013 = vmatprep.mubr.bf16.mxu0 %v4327_v20 }
 0x121   : > { %v3553_v26 = vpop.f32.mrb[16].mxu0  ;;  %v3641_v27 = vpop.f32.mrb[16].mxu1 }
 0x122   : > { %v3554_v28 = vpop.f32.mrb[17].mxu0  ;;  %v3642_v29 = vpop.f32.mrb[17].mxu1 }
 0x123   : > { %v4867_v35 = vadd.f32 %v3554_v28, %v3553_v26  ;;  %v3643_v36 = vadd.f32 %v3642_v29, %v3641_v27  ;;  %v3556_v37 = vpop.f32.mrb[18].mxu0  ;;  %v3644_v38 = vpop.f32.mrb[18].mxu1  ;;  %v4340_v26 = vld [vmem:[%s4467_s13 + $0x40c] ss:$36 sps:$4 sm:$0xff]   ;;  %v4342_v27 = vld [vmem:[%s4467_s13 + $0x380] ss:$36 sps:$4 sm:$0xff]  }
 0x124   : > { %v3557_v43 = vpop.f32.mrb[19].mxu0  ;;  %v3645_v44 = vpop.f32.mrb[19].mxu1 }
 0x125   : > { %v4873_v46 = vadd.f32 %v3643_v36, %v1896_v34  ;;  %v4875_v49 = vadd.f32 %v3557_v43, %v3556_v37  ;;  %v3646_v50 = vadd.f32 %v3645_v44, %v3644_v38  ;;  %v4343_v43 = vld [vmem:[%s4467_s13 + $0x408] ss:$36 sps:$4 sm:$0xff]  }
 0x126   : > { %2465 = vmatmul.mubr.bf16.gmra.mrb[124].mxu1 %v4328_v30  ;;  %4014 = vmatmul.mubr.bf16.gmra.mrb[124].mxu0 %v4329_v33  ;;  %v1915_v30 = vadd.f32 %v4842_v7, %v4861_v25  ;;  %v4344_v44 = vld [vmem:[%s4467_s13 + $0x3c8] ss:$36 sps:$4 sm:$0xff]   ;;  %v1920_v7 = vadd.f32 %v4848_v15, %v4861_v25 }
 0x127   : > { %v4877_v31 = vadd.f32 %v3646_v50, %v1899_v45  ;;  %2472 = vmatprep.mubr.bf16.mxu1 %v4330_v41  ;;  %4017 = vmatprep.mubr.bf16.mxu0 %v4332_v42 }
 0x129   : > { %v3559_v51 = vpop.f32.mrb[20].mxu0  ;;  %v3647_v52 = vpop.f32.mrb[20].mxu1 }
 0x12a   : > { %v3560_v53 = vpop.f32.mrb[21].mxu0  ;;  %v3648_v54 = vpop.f32.mrb[21].mxu1 }
 0x12b   : > { %v4883_v59 = vadd.f32 %v3560_v53, %v3559_v51  ;;  %v3649_v60 = vadd.f32 %v3648_v54, %v3647_v52  ;;  %v3562_v61 = vpop.f32.mrb[22].mxu0  ;;  %v3650_v62 = vpop.f32.mrb[22].mxu1  ;;  %v4345_v53 = vld [vmem:[%s4467_s13 + $0x454] ss:$36 sps:$4 sm:$0xff]  }
 0x12c   : > { %v3563_v3 = vpop.f32.mrb[23].mxu0  ;;  %v3651_v4 = vpop.f32.mrb[23].mxu1  ;;  %v4347_v54 = vld [vmem:[%s4467_s13 + $0x410] ss:$36 sps:$4 sm:$0xff]  }
 0x12d   : > { %v4889_v6 = vadd.f32 %v3649_v60, %v1904_v39  ;;  %v4891_v9 = vadd.f32 %v3563_v3, %v3562_v61  ;;  %v3652_v10 = vadd.f32 %v3651_v4, %v3650_v62  ;;  %v1923_v39 = vadd.f32 %v4854_v23, %v4861_v25 }
 0x12e   : > { %2473 = vmatmul.mubr.bf16.gmra.mrb[128].mxu1 %v4333_v57  ;;  %4018 = vmatmul.mubr.bf16.gmra.mrb[128].mxu0 %v4334_v58  ;;  %v1928_v23 = vadd.f32 %v4867_v35, %v4861_v25 }
 0x12f   : > { %v4893_v47 = vadd.f32 %v3652_v10, %v1907_v5  ;;  %2480 = vmatprep.mubr.bf16.mxu1 %v4335_v1  ;;  %4021 = vmatprep.mubr.bf16.mxu0 %v4337_v2  ;;  %v4348_v5 = vld [vmem:[%s4467_s13 + $0x450] ss:$36 sps:$4 sm:$0xff]   ;;  %v4349_v10 = vld [vmem:[%s4467_s13 + $0x458] ss:$36 sps:$4 sm:$0xff]  }
 0x131   : > { %v3565_v11 = vpop.f32.mrb[24].mxu0  ;;  %v3653_v12 = vpop.f32.mrb[24].mxu1 }
 0x132   : > { %v3566_v13 = vpop.f32.mrb[25].mxu0  ;;  %v3654_v14 = vpop.f32.mrb[25].mxu1 }
 0x133   : > { %v4899_v19 = vadd.f32 %v3566_v13, %v3565_v11  ;;  %v3655_v20 = vadd.f32 %v3654_v14, %v3653_v12  ;;  %v3568_v21 = vpop.f32.mrb[26].mxu0  ;;  %v3656_v22 = vpop.f32.mrb[26].mxu1 }
 0x134   : > { %v3569_v28 = vpop.f32.mrb[27].mxu0  ;;  %v3657_v29 = vpop.f32.mrb[27].mxu1 }
 0x135   : > { %v4905_v33 = vadd.f32 %v3655_v20, %v1912_v55  ;;  %v4907_v34 = vadd.f32 %v3569_v28, %v3568_v21  ;;  %v3658_v36 = vadd.f32 %v3657_v29, %v3656_v22  ;;  %v1931_v55 = vadd.f32 %v4875_v49, %v4861_v25 }
 0x136   : > { %2481 = vmatmul.mubr.bf16.gmra.mrb[132].mxu1 %v4338_v17  ;;  %4022 = vmatmul.mubr.bf16.gmra.mrb[132].mxu0 %v4339_v18 }
 0x137   : > { %v4909_v63 = vadd.f32 %v3658_v36, %v1915_v30  ;;  %2488 = vmatprep.mubr.bf16.mxu1 %v4340_v26  ;;  %4025 = vmatprep.mubr.bf16.mxu0 %v4342_v27  ;;  %v1936_v30 = vadd.f32 %v4883_v59, %v4861_v25 }
 0x139   : > { %v3571_v37 = vpop.f32.mrb[28].mxu0  ;;  %v3659_v38 = vpop.f32.mrb[28].mxu1 }
 0x13a   : > { %v3572_v41 = vpop.f32.mrb[29].mxu0  ;;  %v3660_v42 = vpop.f32.mrb[29].mxu1 }
 0x13b   : > { %v4915_v45 = vadd.f32 %v3572_v41, %v3571_v37  ;;  %v3661_v50 = vadd.f32 %v3660_v42, %v3659_v38  ;;  %v3574_v51 = vpop.f32.mrb[30].mxu0  ;;  %v3662_v52 = vpop.f32.mrb[30].mxu1 }
 0x13c   : > { %v3575_v57 = vpop.f32.mrb[31].mxu0  ;;  %v3663_v58 = vpop.f32.mrb[31].mxu1 }
 0x13d   : > { %v4921_v60 = vadd.f32 %v3661_v50, %v1920_v7  ;;  %v4923_v61 = vadd.f32 %v3575_v57, %v3574_v51  ;;  %v3664_v62 = vadd.f32 %v3663_v58, %v3662_v52  ;;  %v1944_v57 = vadd.f32 %v4899_v19, %v4861_v25 }
 0x13e   : > { %2489 = vmatmul.mubr.bf16.gmra.mrb[136].mxu1 %v4343_v43  ;;  %4026 = vmatmul.mubr.bf16.gmra.mrb[136].mxu0 %v4344_v44  ;;  %v1939_v43 = vadd.f32 %v4891_v9, %v4861_v25 }
 0x13f   : > { %v4925_v15 = vadd.f32 %v3664_v62, %v1923_v39  ;;  %2496 = vmatprep.mubr.bf16.mxu1 %v4345_v53  ;;  %4029 = vmatprep.mubr.bf16.mxu0 %v4347_v54 }
 0x141   : > { %v3577_v1 = vpop.f32.mrb[32].mxu0  ;;  %v3665_v2 = vpop.f32.mrb[32].mxu1 }
 0x142   : > { %v3578_v3 = vpop.f32.mrb[33].mxu0  ;;  %v3666_v4 = vpop.f32.mrb[33].mxu1 }
 0x143   : > { %v4931_v11 = vadd.f32 %v3578_v3, %v3577_v1  ;;  %v3667_v12 = vadd.f32 %v3666_v4, %v3665_v2  ;;  %v3580_v13 = vpop.f32.mrb[34].mxu0  ;;  %v3668_v14 = vpop.f32.mrb[34].mxu1  ;;  %v1947_v3 = vadd.f32 %v4907_v34, %v4861_v25 }
 0x144   : > { %v3581_v17 = vpop.f32.mrb[35].mxu0  ;;  %v3669_v18 = vpop.f32.mrb[35].mxu1 }
 0x145   : > { %v4935_v20 = vadd.f32 %v3667_v12, %v1928_v23  ;;  %v3582_v21 = vadd.f32 %v3581_v17, %v3580_v13  ;;  %v3670_v22 = vadd.f32 %v3669_v18, %v3668_v14  ;;  %v1952_v17 = vadd.f32 %v4915_v45, %v4861_v25 }
 0x146   : > { %2497 = vmatmul.mubr.bf16.gmra.mrb[140].mxu1 %v4348_v5  ;;  %4030 = vmatmul.mubr.bf16.gmra.mrb[140].mxu0 %v4349_v10 }
 0x147   : > { %v4937_v26 = vadd.f32 %v3670_v22, %v1931_v55 }
 0x149   : > { %v3583_v27 = vpop.f32.mrb[36].mxu0  ;;  %v3671_v35 = vpop.f32.mrb[36].mxu1 }
 0x14a   : > { %v3584_v28 = vpop.f32.mrb[37].mxu0  ;;  %v3672_v29 = vpop.f32.mrb[37].mxu1 }
 0x14b   : > { %v4941_v36 = vadd.f32 %v3584_v28, %v3583_v27  ;;  %v3673_v37 = vadd.f32 %v3672_v29, %v3671_v35  ;;  %v3586_v38 = vpop.f32.mrb[38].mxu0  ;;  %v3674_v49 = vpop.f32.mrb[38].mxu1  ;;  %v1955_v28 = vadd.f32 %v4923_v61, %v4861_v25  ;;  %v1963_v61 = vadd.f32 %v3582_v21, %v4861_v25 }
 0x14c   : > { %v3587_v41 = vpop.f32.mrb[39].mxu0  ;;  %v3675_v42 = vpop.f32.mrb[39].mxu1 }
 0x14d   : > { %v4945_v44 = vadd.f32 %v3673_v37, %v1936_v30  ;;  %v3588_v7 = vadd.f32 %v3587_v41, %v3586_v38  ;;  %v3676_v50 = vadd.f32 %v3675_v42, %v3674_v49  ;;  %v1968_v21 = vadd.f32 %v4941_v36, %v4861_v25 }
 0x14f   : > { %v4947_v51 = vadd.f32 %v3676_v50, %v1939_v43  ;;  %v1960_v43 = vadd.f32 %v4931_v11, %v4861_v25 }
 0x151   : > { %v3589_v52 = vpop.f32.mrb[40].mxu0  ;;  %v3677_v53 = vpop.f32.mrb[40].mxu1 }
 0x152   : > { %v3590_v54 = vpop.f32.mrb[41].mxu0  ;;  %v3678_v59 = vpop.f32.mrb[41].mxu1 }
 0x153   : > { %v4951_v58 = vadd.f32 %v3590_v54, %v3589_v52  ;;  %v3679_v39 = vadd.f32 %v3678_v59, %v3677_v53  ;;  %v3592_v62 = vpop.f32.mrb[42].mxu0  ;;  %v3680_v1 = vpop.f32.mrb[42].mxu1 }
 0x154   : > { %v3593_v2 = vpop.f32.mrb[43].mxu0  ;;  %v3681_v9 = vpop.f32.mrb[43].mxu1 }
 0x155   : > { %v4955_v4 = vadd.f32 %v3679_v39, %v1944_v57  ;;  %v4957_v5 = vadd.f32 %v3593_v2, %v3592_v62  ;;  %v3682_v10 = vadd.f32 %v3681_v9, %v3680_v1 }
 0x157   : > { %v4959_v23 = vadd.f32 %v3682_v10, %v1947_v3 }
 0x159   : > { %v3595_v12 = vpop.f32.mrb[44].mxu0  ;;  %v3683_v13 = vpop.f32.mrb[44].mxu1 }
 0x15a   : > { %v3596_v19 = vpop.f32.mrb[45].mxu0  ;;  %v3684_v14 = vpop.f32.mrb[45].mxu1 }
 0x15b   : > { %v4963_v18 = vadd.f32 %v3596_v19, %v3595_v12  ;;  %v3685_v55 = vadd.f32 %v3684_v14, %v3683_v13  ;;  %v3598_v22 = vpop.f32.mrb[46].mxu0  ;;  %v3686_v27 = vpop.f32.mrb[46].mxu1 }
 0x15c   : > { %v3599_v34 = vpop.f32.mrb[47].mxu0  ;;  %v3687_v35 = vpop.f32.mrb[47].mxu1 }
 0x15d   : > { %v4967_v29 = vadd.f32 %v3685_v55, %v1952_v17  ;;  %v4969_v30 = vadd.f32 %v3599_v34, %v3598_v22  ;;  %v3688_v37 = vadd.f32 %v3687_v35, %v3686_v27 }
 0x15f   : > { %v4971_v38 = vadd.f32 %v3688_v37, %v1955_v28 }
 0x161   : > { %v3689_v49 = vpop.f32.mrb[48].mxu1  ;;  %v3753_v41 = vpop.f32.mrb[48].mxu0 }
 0x162   : > { %v3690_v45 = vpop.f32.mrb[49].mxu1  ;;  %v3754_v42 = vpop.f32.mrb[49].mxu0 }
 0x163   : > { %v3691_v50 = vadd.f32 %v3690_v45, %v3689_v49  ;;  %v3755_v52 = vadd.f32 %v3754_v42, %v3753_v41  ;;  %v3692_v53 = vpop.f32.mrb[50].mxu1  ;;  %v3756_v54 = vpop.f32.mrb[50].mxu0 }
 0x164   : > { %v3693_v59 = vpop.f32.mrb[51].mxu1  ;;  %v3757_v57 = vpop.f32.mrb[51].mxu0 }
 0x165   : > { %v4976_v39 = vadd.f32 %v3691_v50, %v1960_v43  ;;  %v4979_v62 = vadd.f32 %v3755_v52, %v4873_v46  ;;  %v3694_v1 = vadd.f32 %v3693_v59, %v3692_v53  ;;  %v3758_v2 = vadd.f32 %v3757_v57, %v3756_v54 }
 0x166   : > { %v1971_v46 = vadd.f32 %v3588_v7, %v4861_v25  ;;  %v1976_v7 = vadd.f32 %v4951_v58, %v4861_v25 }
 0x167   : > { %v4981_v9 = vadd.f32 %v3694_v1, %v1963_v61  ;;  %v4984_v3 = vadd.f32 %v3758_v2, %v4877_v31 }
 0x169   : > { %v3695_v11 = vpop.f32.mrb[52].mxu1  ;;  %v3759_v10 = vpop.f32.mrb[52].mxu0 }
 0x16a   : > { %v3696_v12 = vpop.f32.mrb[53].mxu1  ;;  %v3760_v13 = vpop.f32.mrb[53].mxu0 }
 0x16b   : > { %v3697_v19 = vadd.f32 %v3696_v12, %v3695_v11  ;;  %v3761_v14 = vadd.f32 %v3760_v13, %v3759_v10  ;;  %v3698_v17 = vpop.f32.mrb[54].mxu1  ;;  %v3762_v55 = vpop.f32.mrb[54].mxu0 }
 0x16c   : > { %v3699_v22 = vpop.f32.mrb[55].mxu1  ;;  %v3763_v27 = vpop.f32.mrb[55].mxu0 }
 0x16d   : > { %v4989_v34 = vadd.f32 %v3697_v19, %v1968_v21  ;;  %v4992_v31 = vadd.f32 %v3761_v14, %v4889_v6  ;;  %v3700_v35 = vadd.f32 %v3699_v22, %v3698_v17  ;;  %v3764_v28 = vadd.f32 %v3763_v27, %v3762_v55 }
 0x16e   : > { %v1979_v6 = vadd.f32 %v4957_v5, %v4861_v25  ;;  %v1984_v5 = vadd.f32 %v4963_v18, %v4861_v25 }
 0x16f   : > { %v4994_v37 = vadd.f32 %v3700_v35, %v1971_v46  ;;  %v4997_v49 = vadd.f32 %v3764_v28, %v4893_v47 }
 0x171   : > { %v3701_v36 = vpop.f32.mrb[56].mxu1  ;;  %v3765_v41 = vpop.f32.mrb[56].mxu0 }
 0x172   : > { %v3702_v45 = vpop.f32.mrb[57].mxu1  ;;  %v3766_v42 = vpop.f32.mrb[57].mxu0 }
 0x173   : > { %v3703_v43 = vadd.f32 %v3702_v45, %v3701_v36  ;;  %v3767_v50 = vadd.f32 %v3766_v42, %v3765_v41  ;;  %v3704_v52 = vpop.f32.mrb[58].mxu1  ;;  %v3768_v53 = vpop.f32.mrb[58].mxu0 }
 0x174   : > { %v3705_v54 = vpop.f32.mrb[59].mxu1  ;;  %v3769_v61 = vpop.f32.mrb[59].mxu0 }
 0x175   : > { %v5003_v59 = vadd.f32 %v3703_v43, %v1976_v7  ;;  %v5006_v47 = vadd.f32 %v3767_v50, %v4905_v33  ;;  %v3706_v57 = vadd.f32 %v3705_v54, %v3704_v52  ;;  %v3770_v1 = vadd.f32 %v3769_v61, %v3768_v53 }
 0x176   : > { %v1987_v33 = vadd.f32 %v4969_v30, %v4861_v25  ;;  %v1992_v30 = vadd.f32 %v4814_v32, %v4861_v25 }
 0x177   : > { %v5008_v2 = vadd.f32 %v3706_v57, %v1979_v6  ;;  %v5011_v58 = vadd.f32 %v3770_v1, %v4909_v63 }
 0x179   : > { %v3707_v11 = vpop.f32.mrb[60].mxu1  ;;  %v3771_v10 = vpop.f32.mrb[60].mxu0 }
 0x17a   : > { %v3708_v12 = vpop.f32.mrb[61].mxu1  ;;  %v3772_v13 = vpop.f32.mrb[61].mxu0 }
 0x17b   : > { %v3709_v21 = vadd.f32 %v3708_v12, %v3707_v11  ;;  %v3773_v19 = vadd.f32 %v3772_v13, %v3771_v10  ;;  %v3710_v14 = vpop.f32.mrb[62].mxu1  ;;  %v3774_v17 = vpop.f32.mrb[62].mxu0 }
 0x17c   : > { %v3711_v55 = vpop.f32.mrb[63].mxu1  ;;  %v3775_v46 = vpop.f32.mrb[63].mxu0 }
 0x17d   : > { %v5017_v22 = vadd.f32 %v3709_v21, %v1984_v5  ;;  %v5020_v63 = vadd.f32 %v3773_v19, %v4921_v60  ;;  %v3712_v27 = vadd.f32 %v3711_v55, %v3710_v14  ;;  %v3776_v35 = vadd.f32 %v3775_v46, %v3774_v17 }
 0x17e   : > { %v1995_v60 = vadd.f32 %v4820_v40, %v4861_v25  ;;  %v2000_v40 = vadd.f32 %v4826_v48, %v4861_v25 }
 0x17f   : > { %v5022_v28 = vadd.f32 %v3712_v27, %v1987_v33  ;;  %v5025_v18 = vadd.f32 %v3776_v35, %v4925_v15 }
 0x181   : > { %v3713_v36 = vpop.f32.mrb[64].mxu1  ;;  %v3777_v41 = vpop.f32.mrb[64].mxu0 }
 0x182   : > { %v3714_v45 = vpop.f32.mrb[65].mxu1  ;;  %v3778_v42 = vpop.f32.mrb[65].mxu0 }
 0x183   : > { %v3715_v7 = vadd.f32 %v3714_v45, %v3713_v36  ;;  %v3779_v43 = vadd.f32 %v3778_v42, %v3777_v41  ;;  %v3716_v50 = vpop.f32.mrb[66].mxu1  ;;  %v3780_v52 = vpop.f32.mrb[66].mxu0 }
 0x184   : > { %v3717_v53 = vpop.f32.mrb[67].mxu1  ;;  %v3781_v6 = vpop.f32.mrb[67].mxu0 }
 0x185   : > { %v5031_v54 = vadd.f32 %v3715_v7, %v1992_v30  ;;  %v5034_v15 = vadd.f32 %v3779_v43, %v4935_v20  ;;  %v3718_v61 = vadd.f32 %v3717_v53, %v3716_v50  ;;  %v3782_v57 = vadd.f32 %v3781_v6, %v3780_v52 }
 0x186   : > { %v2003_v20 = vadd.f32 %v4832_v56, %v4861_v25  ;;  %v2008_v56 = vadd.f32 %v4838_v0, %v4861_v25 }
 0x187   : > { %v5036_v1 = vadd.f32 %v3718_v61, %v1995_v60  ;;  %v5039_v32 = vadd.f32 %v3782_v57, %v4937_v26 }
 0x189   : > { %v3719_v11 = vpop.f32.mrb[68].mxu1  ;;  %v3783_v10 = vpop.f32.mrb[68].mxu0 }
 0x18a   : > { %v3720_v12 = vpop.f32.mrb[69].mxu1  ;;  %v3784_v13 = vpop.f32.mrb[69].mxu0 }
 0x18b   : > { %v3721_v5 = vadd.f32 %v3720_v12, %v3719_v11  ;;  %v3785_v21 = vadd.f32 %v3784_v13, %v3783_v10  ;;  %v3722_v19 = vpop.f32.mrb[70].mxu1  ;;  %v3786_v14 = vpop.f32.mrb[70].mxu0 }
 0x18c   : > { %v3723_v17 = vpop.f32.mrb[71].mxu1  ;;  %v3787_v33 = vpop.f32.mrb[71].mxu0 }
 0x18d   : > { %v5045_v55 = vadd.f32 %v3721_v5, %v2000_v40  ;;  %v5048_v26 = vadd.f32 %v3785_v21, %v4945_v44  ;;  %v3724_v46 = vadd.f32 %v3723_v17, %v3722_v19  ;;  %v3788_v27 = vadd.f32 %v3787_v33, %v3786_v14 }
 0x18e   : > { %v2011_v44 = vadd.f32 %v4844_v8, %v4861_v25  ;;  %v2016_v8 = vadd.f32 %v4850_v16, %v4861_v25 }
 0x18f   : > { %v5050_v35 = vadd.f32 %v3724_v46, %v2003_v20  ;;  %v5053_v48 = vadd.f32 %v3788_v27, %v4947_v51 }
 0x191   : > { %v3725_v36 = vpop.f32.mrb[72].mxu1  ;;  %v3789_v41 = vpop.f32.mrb[72].mxu0 }
 0x192   : > { %v3726_v45 = vpop.f32.mrb[73].mxu1  ;;  %v3790_v42 = vpop.f32.mrb[73].mxu0 }
 0x193   : > { %v3727_v30 = vadd.f32 %v3726_v45, %v3725_v36  ;;  %v3791_v7 = vadd.f32 %v3790_v42, %v3789_v41  ;;  %v3728_v43 = vpop.f32.mrb[74].mxu1  ;;  %v3792_v50 = vpop.f32.mrb[74].mxu0 }
 0x194   : > { %v3729_v52 = vpop.f32.mrb[75].mxu1  ;;  %v3793_v60 = vpop.f32.mrb[75].mxu0 }
 0x195   : > { %v5059_v53 = vadd.f32 %v3727_v30, %v2008_v56  ;;  %v5062_v51 = vadd.f32 %v3791_v7, %v4955_v4  ;;  %v3730_v6 = vadd.f32 %v3729_v52, %v3728_v43  ;;  %v3794_v61 = vadd.f32 %v3793_v60, %v3792_v50 }
 0x196   : > { %v2019_v4 = vadd.f32 %v4856_v24, %v4861_v25 }
 0x197   : > { %v5064_v57 = vadd.f32 %v3730_v6, %v2011_v44  ;;  %v5067_v0 = vadd.f32 %v3794_v61, %v4959_v23  ;;  %v5095_v6 = vpop.permute.xlu1 %2746  ;;  %v5097_v61 = vpop.permute.xlu0 %2672 }
 0x199   : > { %v3731_v11 = vpop.f32.mrb[76].mxu1  ;;  %v3795_v10 = vpop.f32.mrb[76].mxu0 }
 0x19a   : > { %v3732_v12 = vpop.f32.mrb[77].mxu1  ;;  %v3796_v13 = vpop.f32.mrb[77].mxu0 }
 0x19b   : > { %v3733_v40 = vadd.f32 %v3732_v12, %v3731_v11  ;;  %v3797_v5 = vadd.f32 %v3796_v13, %v3795_v10  ;;  %v3734_v21 = vpop.f32.mrb[78].mxu1  ;;  %v3798_v19 = vpop.f32.mrb[78].mxu0 }
 0x19c   : > { %v3735_v14 = vpop.f32.mrb[79].mxu1  ;;  %v3799_v20 = vpop.f32.mrb[79].mxu0 }
 0x19d   : > { %v5073_v17 = vadd.f32 %v3733_v40, %v2016_v8  ;;  %v5076_v23 = vadd.f32 %v3797_v5, %v4967_v29  ;;  %v3736_v33 = vadd.f32 %v3735_v14, %v3734_v21  ;;  %v3800_v46 = vadd.f32 %v3799_v20, %v3798_v19 }
 0x19f   : > { %v5078_v27 = vadd.f32 %v3736_v33, %v2019_v4  ;;  %v5081_v16 = vadd.f32 %v3800_v46, %v4971_v38  ;;  %v5111_v33 = vpop.permute.xlu1 %2751  ;;  %v5113_v46 = vpop.permute.xlu0 %2741 }
 0x1a1   : > { %v3801_v36 = vpop.f32.mrb[80].mxu0  ;;  %v3865_v41 = vpop.f32.mrb[80].mxu1 }
 0x1a2   : > { %v3802_v45 = vpop.f32.mrb[81].mxu0  ;;  %v3866_v42 = vpop.f32.mrb[81].mxu1 }
 0x1a3   : > { %v3803_v56 = vadd.f32 %v3802_v45, %v3801_v36  ;;  %v3867_v24 = vadd.f32 %v3866_v42, %v3865_v41  ;;  %v3804_v25 = vpop.f32.mrb[82].mxu0  ;;  %v3868_v30 = vpop.f32.mrb[82].mxu1 }
 0x1a4   : > { %v3805_v7 = vpop.f32.mrb[83].mxu0  ;;  %v3869_v43 = vpop.f32.mrb[83].mxu1 }
 0x1a5   : > { %v5084_v29 = vadd.f32 %v3803_v56, %v4976_v39  ;;  %v3806_v50 = vadd.f32 %v3805_v7, %v3804_v25  ;;  %v3870_v44 = vadd.f32 %v3869_v43, %v3868_v30  ;;  %v5087_v52 = vadd.f32 %v3867_v24, %v4979_v62 }
 0x1a7   : > { %v5090_v38 = vadd.f32 %v3806_v50, %v4981_v9  ;;  %v5093_v60 = vadd.f32 %v3870_v44, %v4984_v3 }
 0x1a9   : > { %v3807_v11 = vpop.f32.mrb[84].mxu0  ;;  %v3871_v10 = vpop.f32.mrb[84].mxu1 }
 0x1aa   : > { %v3808_v12 = vpop.f32.mrb[85].mxu0  ;;  %v3872_v39 = vpop.f32.mrb[85].mxu1 }
 0x1ab   : > { %v3809_v13 = vadd.f32 %v3808_v12, %v3807_v11  ;;  %v3873_v8 = vadd.f32 %v3872_v39, %v3871_v10  ;;  %v3810_v40 = vpop.f32.mrb[86].mxu0  ;;  %v3874_v5 = vpop.f32.mrb[86].mxu1  ;;  %v4372_v11 = vmov 1  }
 0x1ac   : > { %v3811_v62 = vpop.f32.mrb[87].mxu0  ;;  %v3875_v21 = vpop.f32.mrb[87].mxu1  ;;  %4067 = vset.pattern.permute.xlu0 %v4372_v11 }
 0x1ad   : > { %v5100_v9 = vadd.f32 %v3809_v13, %v4989_v34  ;;  %v3812_v19 = vadd.f32 %v3811_v62, %v3810_v40  ;;  %v3876_v3 = vadd.f32 %v3875_v21, %v3874_v5  ;;  %v5103_v4 = vadd.f32 %v3873_v8, %v4992_v31  ;;  %v5127_v10 = vpop.permute.xlu1 %2756  ;;  %v5129_v12 = vpop.permute.xlu0 %2761 }
 0x1af   : > { %v5106_v14 = vadd.f32 %v3812_v19, %v4994_v37  ;;  %v5109_v20 = vadd.f32 %v3876_v3, %v4997_v49 }
 0x1b1   : > { %v3813_v36 = vpop.f32.mrb[88].mxu0  ;;  %v3877_v41 = vpop.f32.mrb[88].mxu1 }
 0x1b2   : > { %v3814_v45 = vpop.f32.mrb[89].mxu0  ;;  %v3878_v34 = vpop.f32.mrb[89].mxu1 }
 0x1b3   : > { %v3815_v42 = vadd.f32 %v3814_v45, %v3813_v36  ;;  %v3879_v56 = vadd.f32 %v3878_v34, %v3877_v41  ;;  %v3816_v24 = vpop.f32.mrb[90].mxu0  ;;  %v3880_v25 = vpop.f32.mrb[90].mxu1 }
 0x1b4   : > { %v3817_v31 = vpop.f32.mrb[91].mxu0  ;;  %v3881_v30 = vpop.f32.mrb[91].mxu1 }
 0x1b5   : > { %v5116_v37 = vadd.f32 %v3815_v42, %v5003_v59  ;;  %v3818_v7 = vadd.f32 %v3817_v31, %v3816_v24  ;;  %v3882_v49 = vadd.f32 %v3881_v30, %v3880_v25  ;;  %v5119_v43 = vadd.f32 %v3879_v56, %v5006_v47  ;;  %v5143_v34 = vpop.permute.xlu1 %2766  ;;  %v5145_v42 = vpop.permute.xlu0 %2771 }
 0x1b7   : > { %v5122_v50 = vadd.f32 %v3818_v7, %v5008_v2  ;;  %v5125_v44 = vadd.f32 %v3882_v49, %v5011_v58 }
 0x1b9   : > { %v3819_v39 = vpop.f32.mrb[92].mxu0  ;;  %v3883_v59 = vpop.f32.mrb[92].mxu1 }
 0x1ba   : > { %v3820_v13 = vpop.f32.mrb[93].mxu0  ;;  %v3884_v8 = vpop.f32.mrb[93].mxu1 }
 0x1bb   : > { %v3821_v40 = vadd.f32 %v3820_v13, %v3819_v39  ;;  %v3885_v5 = vadd.f32 %v3884_v8, %v3883_v59  ;;  %v3822_v47 = vpop.f32.mrb[94].mxu0  ;;  %v3886_v62 = vpop.f32.mrb[94].mxu1 }
 0x1bc   : > { %v3823_v21 = vpop.f32.mrb[95].mxu0  ;;  %v3887_v2 = vpop.f32.mrb[95].mxu1 }
 0x1bd   : > { %v5132_v19 = vadd.f32 %v3821_v40, %v5017_v22  ;;  %v3824_v58 = vadd.f32 %v3823_v21, %v3822_v47  ;;  %v3888_v3 = vadd.f32 %v3887_v2, %v3886_v62  ;;  %v5135_v36 = vadd.f32 %v3885_v5, %v5020_v63  ;;  %v5159_v40 = vpop.permute.xlu1 %2776  ;;  %v5161_v5 = vpop.permute.xlu0 %2781 }
 0x1bf   : > { %v5138_v41 = vadd.f32 %v3824_v58, %v5022_v28  ;;  %v5141_v45 = vadd.f32 %v3888_v3, %v5025_v18 }
 0x1c1   : > { %v3825_v56 = vpop.f32.mrb[96].mxu0  ;;  %v3889_v24 = vpop.f32.mrb[96].mxu1 }
 0x1c2   : > { %v3826_v25 = vpop.f32.mrb[97].mxu0  ;;  %v3890_v22 = vpop.f32.mrb[97].mxu1 }
 0x1c3   : > { %v3827_v31 = vadd.f32 %v3826_v25, %v3825_v56  ;;  %v3891_v30 = vadd.f32 %v3890_v22, %v3889_v24  ;;  %v3828_v7 = vpop.f32.mrb[98].mxu0  ;;  %v3892_v49 = vpop.f32.mrb[98].mxu1 }
 0x1c4   : > { %v3829_v63 = vpop.f32.mrb[99].mxu0  ;;  %v3893_v11 = vpop.f32.mrb[99].mxu1 }
 0x1c5   : > { %v5148_v28 = vadd.f32 %v3827_v31, %v5031_v54  ;;  %v3830_v39 = vadd.f32 %v3829_v63, %v3828_v7  ;;  %v3894_v18 = vadd.f32 %v3893_v11, %v3892_v49  ;;  %v5151_v59 = vadd.f32 %v3891_v30, %v5034_v15  ;;  %v5175_v7 = vpop.permute.xlu1 %2786  ;;  %v5177_v49 = vpop.permute.xlu0 %2791 }
 0x1c7   : > { %v5154_v13 = vadd.f32 %v3830_v39, %v5036_v1  ;;  %v5157_v8 = vadd.f32 %v3894_v18, %v5039_v32 }
 0x1c9   : > { %v3831_v47 = vpop.f32.mrb[100].mxu0  ;;  %v3895_v62 = vpop.f32.mrb[100].mxu1 }
 0x1ca   : > { %v3832_v21 = vpop.f32.mrb[101].mxu0  ;;  %v3896_v54 = vpop.f32.mrb[101].mxu1 }
 0x1cb   : > { %v3833_v2 = vadd.f32 %v3832_v21, %v3831_v47  ;;  %v3897_v58 = vadd.f32 %v3896_v54, %v3895_v62  ;;  %v3834_v3 = vpop.f32.mrb[102].mxu0  ;;  %v3898_v56 = vpop.f32.mrb[102].mxu1 }
 0x1cc   : > { %v3835_v15 = vpop.f32.mrb[103].mxu0  ;;  %v3899_v24 = vpop.f32.mrb[103].mxu1 }
 0x1cd   : > { %v5164_v1 = vadd.f32 %v3833_v2, %v5045_v55  ;;  %v3836_v25 = vadd.f32 %v3835_v15, %v3834_v3  ;;  %v3900_v32 = vadd.f32 %v3899_v24, %v3898_v56  ;;  %v5167_v22 = vadd.f32 %v3897_v58, %v5048_v26  ;;  %v5191_v15 = vpop.permute.xlu1 %2796  ;;  %v5193_v24 = vpop.permute.xlu0 %2801 }
 0x1cf   : > { %v5170_v31 = vadd.f32 %v3836_v25, %v5050_v35  ;;  %v5173_v30 = vadd.f32 %v3900_v32, %v5053_v48 }
 0x1d1   : > { %v3837_v63 = vpop.f32.mrb[104].mxu0  ;;  %v3901_v11 = vpop.f32.mrb[104].mxu1 }
 0x1d2   : > { %v3838_v39 = vpop.f32.mrb[105].mxu0  ;;  %v3902_v55 = vpop.f32.mrb[105].mxu1 }
 0x1d3   : > { %v3839_v18 = vadd.f32 %v3838_v39, %v3837_v63  ;;  %v3903_v47 = vadd.f32 %v3902_v55, %v3901_v11  ;;  %v3840_v62 = vpop.f32.mrb[106].mxu0  ;;  %v3904_v21 = vpop.f32.mrb[106].mxu1 }
 0x1d4   : > { %v3841_v26 = vpop.f32.mrb[107].mxu0  ;;  %v3905_v54 = vpop.f32.mrb[107].mxu1 }
 0x1d5   : > { %v5180_v35 = vadd.f32 %v3839_v18, %v5059_v53  ;;  %v3842_v2 = vadd.f32 %v3841_v26, %v3840_v62  ;;  %v3906_v48 = vadd.f32 %v3905_v54, %v3904_v21  ;;  %v5183_v58 = vadd.f32 %v3903_v47, %v5062_v51 }
 0x1d7   : > { %v5186_v3 = vadd.f32 %v3842_v2, %v5064_v57  ;;  %v5189_v56 = vadd.f32 %v3906_v48, %v5067_v0  ;;  %v5207_v2 = vpop.permute.xlu1 %2806  ;;  %v5209_v48 = vpop.permute.xlu0 %2811 }
 0x1d9   : > { %v3843_v25 = vpop.f32.mrb[108].mxu0  ;;  %v3907_v32 = vpop.f32.mrb[108].mxu1 }
 0x1da   : > { %v3844_v63 = vpop.f32.mrb[109].mxu0  ;;  %v3908_v53 = vpop.f32.mrb[109].mxu1 }
 0x1db   : > { %v3845_v11 = vadd.f32 %v3844_v63, %v3843_v25  ;;  %v3909_v39 = vadd.f32 %v3908_v53, %v3907_v32  ;;  %v3846_v55 = vpop.f32.mrb[110].mxu0  ;;  %v3910_v18 = vpop.f32.mrb[110].mxu1 }
 0x1dc   : > { %v3847_v51 = vpop.f32.mrb[111].mxu0  ;;  %v3911_v47 = vpop.f32.mrb[111].mxu1 }
 0x1dd   : > { %v5196_v57 = vadd.f32 %v3845_v11, %v5073_v17  ;;  %v3848_v62 = vadd.f32 %v3847_v51, %v3846_v55  ;;  %v3912_v0 = vadd.f32 %v3911_v47, %v3910_v18  ;;  %v5199_v21 = vadd.f32 %v3909_v39, %v5076_v23 }
 0x1df   : > { %5439 = vst [vmem:[#allocation2_spill] sm:$0xff] %v5196_v57  ;;  %v5202_v26 = vadd.f32 %v3848_v62, %v5078_v27  ;;  %v5205_v54 = vadd.f32 %v3912_v0, %v5081_v16 }
 0x1e1   : > { %5440 = vst [vmem:[#allocation3_spill] sm:$0xff] %v5202_v26  ;;  %v3913_v25 = vpop.f32.mrb[112].mxu1  ;;  %v4003_v32 = vpop.f32.mrb[112].mxu0 }
 0x1e2   : > { %v2548_v17 = vadd.f32 %v4003_v32, %v5103_v4  ;;  %v3914_v63 = vpop.f32.mrb[113].mxu1  ;;  %v2539_v53 = vpop.f32.mrb[113].mxu0 }
 0x1e3   : > { %v3915_v11 = vadd.f32 %v3914_v63, %v3913_v25  ;;  %v2540_v23 = vadd.f32 %v2539_v53, %v5087_v52  ;;  %v3916_v39 = vpop.f32.mrb[114].mxu1  ;;  %v4004_v55 = vpop.f32.mrb[114].mxu0 }
 0x1e4   : > { %v2677_v27 = vmul.f32 %v5097_v61, %v2548_v17  ;;  %v2551_v16 = vadd.f32 %v4004_v55, %v5109_v20  ;;  %v3917_v18 = vpop.f32.mrb[115].mxu1  ;;  %v2542_v51 = vpop.f32.mrb[115].mxu0 }
 0x1e5   : > { %v2675_v47 = vmul.f32 %v5097_v61, %v2540_v23  ;;  %v3918_v62 = vadd.f32 %v3917_v18, %v3916_v39  ;;  %v2543_v0 = vadd.f32 %v2542_v51, %v5093_v60  ;;  %v5218_v4 = vadd.f32 %v3915_v11, %v5084_v29  ;;  %v5227_v63 = vpop.permute.xlu1 %2816  ;;  %v5229_v53 = vpop.permute.xlu0 %2821 }
 0x1e6   : > { %v2901_v25 = vmul.f32 %v5111_v33, %v2677_v27  ;;  %v2678_v52 = vmul.f32 %v5097_v61, %v2551_v16  ;;  %v3006_v60 = vsel %vm2931_vm0, %v2677_v27, 0.0 }
 0x1e7   : > { %v2899_v32 = vmul.f32 %v5113_v46, %v2675_v47  ;;  %v2676_v17 = vmul.f32 %v5097_v61, %v2543_v0  ;;  %v5225_v20 = vadd.f32 %v3918_v62, %v5090_v38  ;;  %v3003_v11 = vsel %vm2931_vm0, %v2675_v47, 0.0 }
 0x1e8   : > { %v2935_v29 = vsel %vm2931_vm0, %v2901_v25, 0.0  ;;  %v2902_v55 = vmul.f32 %v5127_v10, %v2678_v52  ;;  %v3008_v38 = vsel %vm2931_vm0, %v2678_v52, 0.0 }
 0x1e9   : > { %v2900_v33 = vmul.f32 %v5095_v6, %v2676_v17  ;;  %v3004_v23 = vsel %vm2931_vm0, %v2676_v17, 0.0  ;;  %v3919_v46 = vpop.f32.mrb[116].mxu1  ;;  %v4007_v39 = vpop.f32.mrb[116].mxu0  ;;  %v2932_v27 = vsel %vm2931_vm0, %v2899_v32, 0.0 }
 0x1ea   : > { %v3005_v16 = vadd.f32 %v3004_v23, %v3003_v11  ;;  %v2564_v18 = vadd.f32 %v4007_v39, %v5135_v36  ;;  %v3920_v51 = vpop.f32.mrb[117].mxu1  ;;  %v2555_v62 = vpop.f32.mrb[117].mxu0 }
 0x1eb   : > { %v2933_v0 = vsel %vm2931_vm0, %v2900_v33, 0.0  ;;  %v3921_v47 = vadd.f32 %v3920_v51, %v3919_v46  ;;  %v2556_v6 = vadd.f32 %v2555_v62, %v5119_v43  ;;  %v3922_v25 = vpop.f32.mrb[118].mxu1  ;;  %v4008_v17 = vpop.f32.mrb[118].mxu0  ;;  %v2937_v43 = vsel %vm2931_vm0, %v2902_v55, 0.0 }
 0x1ec   : > { %v2934_v26 = vadd.f32 %v2933_v0, %v2932_v27  ;;  %v3007_v57 = vadd.f32 %v3006_v60, %v3005_v16  ;;  %v2681_v10 = vmul.f32 %v5097_v61, %v2564_v18  ;;  %v2567_v52 = vadd.f32 %v4008_v17, %v5141_v45  ;;  %v3923_v11 = vpop.f32.mrb[119].mxu1  ;;  %v2558_v23 = vpop.f32.mrb[119].mxu0 }
 0x1ed   : > { %v2679_v36 = vmul.f32 %v5097_v61, %v2556_v6  ;;  %v3924_v39 = vadd.f32 %v3923_v11, %v3922_v25  ;;  %v2559_v32 = vadd.f32 %v2558_v23, %v5125_v44  ;;  %v5247_v33 = vadd.f32 %v3921_v47, %v5100_v9  ;;  %v5255_v27 = vpop.permute.xlu1 %2826  ;;  %v5257_v44 = vpop.permute.xlu0 %2831 }
 0x1ee   : > { %v2936_v46 = vadd.f32 %v2935_v29, %v2934_v26  ;;  %v2905_v51 = vmul.f32 %v5145_v42, %v2681_v10  ;;  %v3009_v60 = vadd.f32 %v3008_v38, %v3007_v57  ;;  %v2682_v18 = vmul.f32 %v5097_v61, %v2567_v52 }
 0x1ef   : > { %v2903_v16 = vmul.f32 %v5129_v12, %v2679_v36  ;;  %v3010_v45 = vsel %vm2931_vm0, %v2679_v36, 0.0  ;;  %v2680_v62 = vmul.f32 %v5097_v61, %v2559_v32  ;;  %v5260_v55 = vadd.f32 %v3924_v39, %v5106_v14 }
 0x1f0   : > { %v2938_v9 = vadd.f32 %v2937_v43, %v2936_v46  ;;  %v3011_v0 = vadd.f32 %v3010_v45, %v3009_v60  ;;  %v3014_v42 = vsel %vm2931_vm0, %v2681_v10, 0.0  ;;  %v2906_v47 = vmul.f32 %v5159_v40, %v2682_v18 }
 0x1f1   : > { %v2939_v57 = vsel %vm2931_vm0, %v2903_v16, 0.0  ;;  %v2904_v12 = vmul.f32 %v5143_v34, %v2680_v62  ;;  %v3925_v26 = vpop.f32.mrb[120].mxu1  ;;  %v4011_v29 = vpop.f32.mrb[120].mxu0  ;;  %v3012_v6 = vsel %vm2931_vm0, %v2680_v62, 0.0  ;;  %v2943_v14 = vsel %vm2931_vm0, %v2905_v51, 0.0 }
 0x1f2   : > { %v2940_v38 = vadd.f32 %v2939_v57, %v2938_v9  ;;  %v2580_v25 = vadd.f32 %v4011_v29, %v5167_v22  ;;  %v3926_v17 = vpop.f32.mrb[121].mxu1  ;;  %v2571_v52 = vpop.f32.mrb[121].mxu0  ;;  %v3013_v10 = vadd.f32 %v3012_v6, %v3011_v0  ;;  %v2945_v62 = vsel %vm2931_vm0, %v2906_v47, 0.0 }
 0x1f3   : > { %v2941_v11 = vsel %vm2931_vm0, %v2904_v12, 0.0  ;;  %v3927_v23 = vadd.f32 %v3926_v17, %v3925_v26  ;;  %v3928_v36 = vpop.f32.mrb[122].mxu1  ;;  %v4012_v39 = vpop.f32.mrb[122].mxu0  ;;  %v2572_v43 = vadd.f32 %v2571_v52, %v5151_v59  ;;  %v3016_v9 = vsel %vm2931_vm0, %v2682_v18, 0.0 }
 0x1f4   : > { %v2942_v34 = vadd.f32 %v2941_v11, %v2940_v38  ;;  %v2685_v32 = vmul.f32 %v5097_v61, %v2580_v25  ;;  %v2583_v40 = vadd.f32 %v4012_v39, %v5173_v30  ;;  %v3929_v46 = vpop.f32.mrb[123].mxu1  ;;  %v2574_v60 = vpop.f32.mrb[123].mxu0  ;;  %v3015_v22 = vadd.f32 %v3014_v42, %v3013_v10 }
 0x1f5   : > { %v3930_v16 = vadd.f32 %v3929_v46, %v3928_v36  ;;  %v2575_v45 = vadd.f32 %v2574_v60, %v5157_v8  ;;  %v5275_v51 = vadd.f32 %v3927_v23, %v5116_v37  ;;  %v2683_v57 = vmul.f32 %v5097_v61, %v2572_v43  ;;  %v5285_v26 = vpop.permute.xlu1 %2836  ;;  %v5287_v8 = vpop.permute.xlu0 %2841 }
 0x1f6   : > { %v2944_v0 = vadd.f32 %v2943_v14, %v2942_v34  ;;  %v3017_v12 = vadd.f32 %v3016_v9, %v3015_v22  ;;  %v2686_v59 = vmul.f32 %v5097_v61, %v2583_v40  ;;  %v2909_v38 = vmul.f32 %v5177_v49, %v2685_v32 }
 0x1f7   : > { %v2684_v30 = vmul.f32 %v5097_v61, %v2575_v45  ;;  %v5283_v42 = vadd.f32 %v3930_v16, %v5122_v50  ;;  %v2907_v37 = vmul.f32 %v5161_v5, %v2683_v57  ;;  %v3018_v18 = vsel %vm2931_vm0, %v2683_v57, 0.0 }
 0x1f8   : > { %v2946_v29 = vadd.f32 %v2945_v62, %v2944_v0  ;;  %v3019_v47 = vadd.f32 %v3018_v18, %v3017_v12  ;;  %v3022_v52 = vsel %vm2931_vm0, %v2685_v32, 0.0  ;;  %v2910_v36 = vmul.f32 %v5191_v15, %v2686_v59 }
 0x1f9   : > { %v2908_v6 = vmul.f32 %v5175_v7, %v2684_v30  ;;  %v3931_v25 = vpop.f32.mrb[124].mxu1  ;;  %v4015_v17 = vpop.f32.mrb[124].mxu0  ;;  %v2947_v50 = vsel %vm2931_vm0, %v2907_v37, 0.0  ;;  %v3020_v14 = vsel %vm2931_vm0, %v2684_v30, 0.0  ;;  %v2951_v15 = vsel %vm2931_vm0, %v2909_v38, 0.0 }
 0x1fa   : > { %v2596_v11 = vadd.f32 %v4015_v17, %v5199_v21  ;;  %v3932_v10 = vpop.f32.mrb[125].mxu1  ;;  %v2587_v5 = vpop.f32.mrb[125].mxu0  ;;  %v2948_v23 = vadd.f32 %v2947_v50, %v2946_v29  ;;  %v3021_v39 = vadd.f32 %v3020_v14, %v3019_v47  ;;  %v3024_v9 = vsel %vm2931_vm0, %v2686_v59, 0.0 }
 0x1fb   : > { %v2949_v49 = vsel %vm2931_vm0, %v2908_v6, 0.0  ;;  %v3934_v34 = vpop.f32.mrb[126].mxu1  ;;  %v4016_v7 = vpop.f32.mrb[126].mxu0  ;;  %v3933_v40 = vadd.f32 %v3932_v10, %v3931_v25  ;;  %v2588_v32 = vadd.f32 %v2587_v5, %v5183_v58 }
 0x1fc   : > { %v2689_v43 = vmul.f32 %v5097_v61, %v2596_v11  ;;  %v2599_v46 = vadd.f32 %v4016_v7, %v5205_v54  ;;  %v3935_v60 = vpop.f32.mrb[127].mxu1  ;;  %v2590_v22 = vpop.f32.mrb[127].mxu0  ;;  %v2950_v21 = vadd.f32 %v2949_v49, %v2948_v23  ;;  %v3023_v16 = vadd.f32 %v3022_v52, %v3021_v39 }
 0x1fd   : > { %v3936_v45 = vadd.f32 %v3935_v60, %v3934_v34  ;;  %v2591_v62 = vadd.f32 %v2590_v22, %v5189_v56  ;;  %v2687_v0 = vmul.f32 %v5097_v61, %v2588_v32  ;;  %v2467_v54 = vadd.f32 %v3933_v40, %v5132_v19  ;;  %v5309_v37 = vpop.permute.xlu1 %2846  ;;  %v5311_v29 = vpop.permute.xlu0 %2851 }
 0x1fe   : > { %v2690_v57 = vmul.f32 %v5097_v61, %v2599_v46  ;;  %v2952_v12 = vadd.f32 %v2951_v15, %v2950_v21  ;;  %v3025_v30 = vadd.f32 %v3024_v9, %v3023_v16  ;;  %v2953_v56 = vsel %vm2931_vm0, %v2910_v36, 0.0 }
 0x1ff   : > { %v2688_v58 = vmul.f32 %v5097_v61, %v2591_v62  ;;  %v2913_v18 = vmul.f32 %v5209_v48, %v2689_v43  ;;  %v2911_v59 = vmul.f32 %v5193_v24, %v2687_v0  ;;  %v3026_v38 = vsel %vm2931_vm0, %v2687_v0, 0.0 }
 0x200   : > { %v3030_v47 = vsel %vm2931_vm0, %v2689_v43, 0.0  ;;  %v2954_v6 = vadd.f32 %v2953_v56, %v2952_v12  ;;  %v3027_v25 = vadd.f32 %v3026_v38, %v3025_v30  ;;  %v2914_v14 = vmul.f32 %v5227_v63, %v2690_v57 }
 0x201   : > { %v2912_v17 = vmul.f32 %v5207_v2, %v2688_v58  ;;  %v3937_v52 = vpop.f32.mrb[128].mxu1  ;;  %v4019_v19 = vpop.f32.mrb[128].mxu0  ;;  %v2955_v50 = vsel %vm2931_vm0, %v2911_v59, 0.0  ;;  %v3028_v11 = vsel %vm2931_vm0, %v2688_v58, 0.0  ;;  %v2470_v32 = vadd.f32 %v3936_v45, %v5138_v41 }
 0x202   : > { %v2612_v48 = vadd.f32 %v4019_v19, %v5247_v33  ;;  %v3938_v10 = vpop.f32.mrb[129].mxu1  ;;  %v2603_v24 = vpop.f32.mrb[129].mxu0  ;;  %v2956_v5 = vadd.f32 %v2955_v50, %v2954_v6  ;;  %v3029_v36 = vadd.f32 %v3028_v11, %v3027_v25  ;;  %v2959_v21 = vsel %vm2931_vm0, %v2913_v18, 0.0 }
 0x203   : > { %v2957_v23 = vsel %vm2931_vm0, %v2912_v17, 0.0  ;;  %v3939_v49 = vadd.f32 %v3938_v10, %v3937_v52  ;;  %v3940_v39 = vpop.f32.mrb[130].mxu1  ;;  %v4020_v34 = vpop.f32.mrb[130].mxu0  ;;  %v2604_v7 = vadd.f32 %v2603_v24, %v5218_v4  ;;  %v3032_v16 = vsel %vm2931_vm0, %v2690_v57, 0.0 }
 0x204   : > { %v2693_v2 = vmul.f32 %v5097_v61, %v2612_v48  ;;  %v2615_v43 = vadd.f32 %v4020_v34, %v5260_v55  ;;  %v3941_v63 = vpop.f32.mrb[131].mxu1  ;;  %v2606_v40 = vpop.f32.mrb[131].mxu0  ;;  %v2958_v33 = vadd.f32 %v2957_v23, %v2956_v5  ;;  %v3031_v46 = vadd.f32 %v3030_v47, %v3029_v36 }
 0x205   : > { %v3942_v60 = vadd.f32 %v3941_v63, %v3940_v39  ;;  %v2607_v22 = vadd.f32 %v2606_v40, %v5225_v20  ;;  %v2691_v62 = vmul.f32 %v5097_v61, %v2604_v7  ;;  %v5335_v0 = vadd.f32 %v3939_v49, %v5148_v28  ;;  %v5337_v41 = vpop.permute.xlu1 %2856  ;;  %v5339_v45 = vpop.permute.xlu0 %2861 }
 0x206   : > { %v2694_v15 = vmul.f32 %v5097_v61, %v2615_v43  ;;  %v2960_v4 = vadd.f32 %v2959_v21, %v2958_v33  ;;  %v3033_v9 = vadd.f32 %v3032_v16, %v3031_v46  ;;  %v2961_v20 = vsel %vm2931_vm0, %v2914_v14, 0.0 }
 0x207   : > { %v2692_v55 = vmul.f32 %v5097_v61, %v2607_v22  ;;  %v2917_v12 = vmul.f32 %v5257_v44, %v2693_v2  ;;  %v2915_v57 = vmul.f32 %v5229_v53, %v2691_v62  ;;  %v3034_v30 = vsel %vm2931_vm0, %v2691_v62, 0.0 }
 0x208   : > { %v3038_v58 = vsel %vm2931_vm0, %v2693_v2, 0.0  ;;  %v2962_v56 = vadd.f32 %v2961_v20, %v2960_v4  ;;  %v3035_v18 = vadd.f32 %v3034_v30, %v3033_v9  ;;  %v2918_v6 = vmul.f32 %v5285_v26, %v2694_v15 }
 0x209   : > { %v2916_v59 = vmul.f32 %v5255_v27, %v2692_v55  ;;  %v3943_v28 = vpop.f32.mrb[132].mxu1  ;;  %v4023_v38 = vpop.f32.mrb[132].mxu0  ;;  %v2963_v47 = vsel %vm2931_vm0, %v2915_v57, 0.0  ;;  %v3036_v25 = vsel %vm2931_vm0, %v2692_v55, 0.0  ;;  %v2478_v26 = vadd.f32 %v3942_v60, %v5154_v13 }
 0x20a   : > { %v2628_v17 = vadd.f32 %v4023_v38, %v2467_v54  ;;  %v3944_v44 = vpop.f32.mrb[133].mxu1  ;;  %v2619_v52 = vpop.f32.mrb[133].mxu0  ;;  %v2964_v53 = vadd.f32 %v2963_v47, %v2962_v56  ;;  %v3037_v50 = vadd.f32 %v3036_v25, %v3035_v18  ;;  %v2967_v34 = vsel %vm2931_vm0, %v2917_v12, 0.0 }
 0x20b   : > { %v2965_v19 = vsel %vm2931_vm0, %v2916_v59, 0.0  ;;  %v3945_v14 = vadd.f32 %v3944_v44, %v3943_v28  ;;  %v3946_v11 = vpop.f32.mrb[134].mxu1  ;;  %v4024_v48 = vpop.f32.mrb[134].mxu0  ;;  %v2620_v10 = vadd.f32 %v2619_v52, %v5275_v51  ;;  %v2969_v2 = vsel %vm2931_vm0, %v2918_v6, 0.0 }
 0x20c   : > { %v2697_v27 = vmul.f32 %v5097_v61, %v2628_v17  ;;  %v2631_v24 = vadd.f32 %v4024_v48, %v2470_v32  ;;  %v3947_v5 = vpop.f32.mrb[135].mxu1  ;;  %v2622_v23 = vpop.f32.mrb[135].mxu0  ;;  %v2966_v36 = vadd.f32 %v2965_v19, %v2964_v53  ;;  %v3039_v54 = vadd.f32 %v3038_v58, %v3037_v50 }
 0x20d   : > { %v3948_v49 = vadd.f32 %v3947_v5, %v3946_v11  ;;  %v2623_v39 = vadd.f32 %v2622_v23, %v5283_v42  ;;  %v3040_v7 = vsel %vm2931_vm0, %v2694_v15, 0.0  ;;  %v2695_v43 = vmul.f32 %v5097_v61, %v2620_v10  ;;  %v2867_v13 = vpop.permute.xlu1 %2866  ;;  %v2872_v33 = vpop.permute.xlu0 %2871 }
 0x20e   : > { %v2968_v63 = vadd.f32 %v2967_v34, %v2966_v36  ;;  %v3041_v51 = vadd.f32 %v3040_v7, %v3039_v54  ;;  %v2483_v32 = vadd.f32 %v3945_v14, %v5164_v1  ;;  %v2921_v46 = vmul.f32 %v5311_v29, %v2697_v27 }
 0x20f   : > { %v2696_v40 = vmul.f32 %v5097_v61, %v2623_v39  ;;  %v2919_v42 = vmul.f32 %v5287_v8, %v2695_v43  ;;  %v3042_v60 = vsel %vm2931_vm0, %v2695_v43, 0.0  ;;  %v2698_v22 = vmul.f32 %v5097_v61, %v2631_v24 }
 0x210   : > { %v2970_v21 = vadd.f32 %v2969_v2, %v2968_v63  ;;  %v3043_v16 = vadd.f32 %v3042_v60, %v3041_v51  ;;  %v3046_v9 = vsel %vm2931_vm0, %v2697_v27, 0.0  ;;  %v2486_v38 = vadd.f32 %v3948_v49, %v5170_v31 }
 0x211   : > { %v2920_v62 = vmul.f32 %v5309_v37, %v2696_v40  ;;  %v3949_v15 = vpop.f32.mrb[136].mxu1  ;;  %v4027_v4 = vpop.f32.mrb[136].mxu0  ;;  %v2971_v1 = vsel %vm2931_vm0, %v2919_v42, 0.0  ;;  %v3044_v55 = vsel %vm2931_vm0, %v2696_v40, 0.0  ;;  %v2975_v37 = vsel %vm2931_vm0, %v2921_v46, 0.0 }
 0x212   : > { %v2644_v20 = vadd.f32 %v4027_v4, %v2483_v32  ;;  %v3950_v29 = vpop.f32.mrb[137].mxu1  ;;  %v2635_v12 = vpop.f32.mrb[137].mxu0  ;;  %v2972_v8 = vadd.f32 %v2971_v1, %v2970_v21  ;;  %v3045_v30 = vadd.f32 %v3044_v55, %v3043_v16  ;;  %v2922_v59 = vmul.f32 %v5337_v41, %v2698_v22 }
 0x213   : > { %v2973_v57 = vsel %vm2931_vm0, %v2920_v62, 0.0  ;;  %v3951_v58 = vadd.f32 %v3950_v29, %v3949_v15  ;;  %v3952_v56 = vpop.f32.mrb[138].mxu1  ;;  %v4028_v18 = vpop.f32.mrb[138].mxu0  ;;  %v2636_v28 = vadd.f32 %v2635_v12, %v5335_v0  ;;  %v3048_v53 = vsel %vm2931_vm0, %v2698_v22, 0.0  ;;  %v5441_v15 = vld [vmem:[#allocation2_spill] sm:$0xff] }
 0x214   : > { %v3953_v47 = vpop.f32.mrb[139].mxu1  ;;  %v2638_v6 = vpop.f32.mrb[139].mxu0  ;;  %v2974_v25 = vadd.f32 %v2973_v57, %v2972_v8  ;;  %v3047_v17 = vadd.f32 %v3046_v9, %v3045_v30  ;;  %v2701_v19 = vmul.f32 %v5097_v61, %v2644_v20  ;;  %v2647_v14 = vadd.f32 %v4028_v18, %v2486_v38  ;;  %v5442_v30 = vld [vmem:[#allocation3_spill] sm:$0xff] }
 0x215   : > { %v3954_v44 = vadd.f32 %v3953_v47, %v3952_v56  ;;  %v2639_v52 = vadd.f32 %v2638_v6, %v2478_v26  ;;  %v2699_v50 = vmul.f32 %v5097_v61, %v2636_v28  ;;  %v2491_v0 = vadd.f32 %v3951_v58, %v5180_v35  ;;  %v2877_v31 = vpop.permute.xlu1 %2876  ;;  %v2882_v27 = vpop.permute.xlu0 %2881 }
 0x216   : > { %v2976_v11 = vadd.f32 %v2975_v37, %v2974_v25  ;;  %v3049_v48 = vadd.f32 %v3048_v53, %v3047_v17  ;;  %v2977_v10 = vsel %vm2931_vm0, %v2922_v59, 0.0  ;;  %v2702_v23 = vmul.f32 %v5097_v61, %v2647_v14 }
 0x217   : > { %v2700_v41 = vmul.f32 %v5097_v61, %v2639_v52  ;;  %v2923_v24 = vmul.f32 %v5339_v45, %v2699_v50  ;;  %v3050_v5 = vsel %vm2931_vm0, %v2699_v50, 0.0  ;;  %v2925_v2 = vmul.f32 %v2872_v33, %v2701_v19 }
 0x218   : > { %v2978_v26 = vadd.f32 %v2977_v10, %v2976_v11  ;;  %v3051_v36 = vadd.f32 %v3050_v5, %v3049_v48  ;;  %v2494_v63 = vadd.f32 %v3954_v44, %v5186_v3  ;;  %v2926_v60 = vmul.f32 %v2877_v31, %v2702_v23 }
 0x219   : > { %v2924_v54 = vmul.f32 %v2867_v13, %v2700_v41  ;;  %v3052_v49 = vsel %vm2931_vm0, %v2700_v41, 0.0  ;;  %v3955_v39 = vpop.f32.mrb[140].mxu1  ;;  %v4031_v34 = vpop.f32.mrb[140].mxu0  ;;  %v2979_v35 = vsel %vm2931_vm0, %v2923_v24, 0.0  ;;  %v3054_v13 = vsel %vm2931_vm0, %v2701_v19, 0.0 }
 0x21a   : > { %v3956_v7 = vpop.f32.mrb[141].mxu1  ;;  %v2651_v43 = vpop.f32.mrb[141].mxu0  ;;  %v2980_v51 = vadd.f32 %v2979_v35, %v2978_v26  ;;  %v3053_v40 = vadd.f32 %v3052_v49, %v3051_v36  ;;  %v2983_v3 = vsel %vm2931_vm0, %v2925_v2, 0.0  ;;  %v3056_v55 = vsel %vm2931_vm0, %v2702_v23, 0.0 }
 0x21b   : > { %v2981_v45 = vsel %vm2931_vm0, %v2924_v54, 0.0  ;;  %v3957_v32 = vadd.f32 %v3956_v7, %v3955_v39  ;;  %v3958_v46 = vpop.f32.mrb[142].mxu1  ;;  %v4032_v42 = vpop.f32.mrb[142].mxu0  ;;  %v2652_v22 = vadd.f32 %v2651_v43, %v2491_v0  ;;  %v2985_v56 = vsel %vm2931_vm0, %v2926_v60, 0.0 }
 0x21c   : > { %v3959_v21 = vpop.f32.mrb[143].mxu1  ;;  %v2654_v16 = vpop.f32.mrb[143].mxu0  ;;  %v2982_v33 = vadd.f32 %v2981_v45, %v2980_v51  ;;  %v3055_v62 = vadd.f32 %v3054_v13, %v3053_v40  ;;  %v3125_v60 = vlaneseq }
 0x21d   : > { %v2499_v4 = vadd.f32 %v3957_v32, %v5441_v15  ;;  %v3960_v9 = vadd.f32 %v3959_v21, %v3958_v46  ;;  %v2887_v1 = vpop.permute.xlu1 %2886  ;;  %v2703_v20 = vmul.f32 %v5097_v61, %v2652_v22  ;;  %v2655_v29 = vadd.f32 %v2654_v16, %v2494_v63  ;;  %v2892_v25 = vpop.permute.xlu0 %2891  ;;  %v3075_v46 = vld [vmem:[%s5434_s5] sm:$0x55] }
 0x21e   : > { %v2984_v12 = vadd.f32 %v2983_v3, %v2982_v33  ;;  %v3057_v57 = vadd.f32 %v3056_v55, %v3055_v62  ;;  %v4373_v32 = vmov 2   ;;  %v4375_v22 = vmov 858989090   ;;  %v3101_v62 = vld [vmem:[%s5434_s5] sm:$0xaa] }
 0x21f   : > { %v2660_v8 = vadd.f32 %v4031_v34, %v2499_v4  ;;  %v2502_v58 = vadd.f32 %v3960_v9, %v5442_v30  ;;  %v2927_v18 = vmul.f32 %v2882_v27, %v2703_v20  ;;  %v3058_v37 = vsel %vm2931_vm0, %v2703_v20, 0.0 }
 0x220   : > { %v2704_v59 = vmul.f32 %v5097_v61, %v2655_v29  ;;  %v2986_v38 = vadd.f32 %v2985_v56, %v2984_v12  ;;  %v3059_v47 = vadd.f32 %v3058_v37, %v3057_v57  ;;  %v3130_v21 = vunpack.c.l.s4 %v4375_v22  ;;  %v3120_v56 = vld [vmem:[%s5435_s6] sm:$0xf] }
 0x221   : > { %v2705_v28 = vmul.f32 %v5097_v61, %v2660_v8  ;;  %v2663_v6 = vadd.f32 %v4032_v42, %v2502_v58  ;;  %v2987_v17 = vsel %vm2931_vm0, %v2927_v18, 0.0  ;;  %v2897_v11 = vpop.permute.xlu1 %2896  ;;  %v4374_v42 = vmov 286326784  }
 0x222   : > { %v2928_v44 = vmul.f32 %v2887_v1, %v2704_v59  ;;  %v3060_v52 = vsel %vm2931_vm0, %v2704_v59, 0.0  ;;  %v2988_v19 = vadd.f32 %v2987_v17, %v2986_v38  ;;  %v3123_v13 = vunpack.c.l.s4 %v4374_v42 }
 0x223   : > { %v2929_v53 = vmul.f32 %v2892_v25, %v2705_v28  ;;  %v2706_v50 = vmul.f32 %v5097_v61, %v2663_v6  ;;  %v3061_v14 = vadd.f32 %v3060_v52, %v3059_v47  ;;  %v3062_v41 = vsel %vm2931_vm0, %v2705_v28, 0.0 }
 0x224   : > { %v2989_v48 = vsel %vm2931_vm0, %v2928_v44, 0.0  ;;  %v3076_v16 = vunpack.c.l.bf16 %v3075_v46  ;;  %v3077_v33 = vunpack.c.h.bf16 %v3075_v46  ;;  %v3124_v15 = vunpack.c.0.s8 %v3123_v13 }
 0x225   : > { %v2930_v0 = vmul.f32 %v2897_v11, %v2706_v50  ;;  %v3064_v31 = vsel %vm2931_vm0, %v2706_v50, 0.0  ;;  %v2990_v27 = vadd.f32 %v2989_v48, %v2988_v19  ;;  %v2991_v10 = vsel %vm2931_vm0, %v2929_v53, 0.0 }
 0x226   : > { %v3063_v24 = vadd.f32 %v3062_v41, %v3061_v14  ;;  %v3126_v4 = vshrl.u32 %v3125_v60, 7  ;;  %v3131_v9 = vunpack.c.0.s8 %v3130_v21  ;;  %v3102_v29 = vunpack.c.l.bf16 %v3101_v62 }
 0x227   : > { %v2993_v5 = vsel %vm2931_vm0, %v2930_v0, 0.0  ;;  %v2992_v23 = vadd.f32 %v2991_v10, %v2990_v27  ;;  %v3103_v12 = vunpack.c.h.bf16 %v3101_v62 }
 0x228   : > { %v3065_v26 = vadd.f32 %v3064_v31, %v3063_v24  ;;  %v3127_v8 = vsub.s32 %v3124_v15, %v3126_v4  ;;  %v3134_v57 = vsub.s32 %v3131_v9, %v3126_v4 }
 0x229   : > { %v2994_v61 = vadd.f32 %v2993_v5, %v2992_v23 }
 0x22a   : > { %v3066_v36 = vrot.slane %v3065_v26, 4  ;;  %v3128_v47 = vrot.slane %v3120_v56, %v3127_v8  ;;  %v3135_v6 = vrot.slane %v3120_v56, %v3134_v57 }
 0x22b   : > { %v2995_v54 = vrot.slane %v2994_v61, 4 }
 0x22c   : > { %v3067_v49 = vadd.f32 %v3066_v36, %v3065_v26 }
 0x22d   : > { %v2996_v39 = vadd.f32 %v2995_v54, %v2994_v61 }
 0x22e   : > { %v3068_v34 = vrot.slane %v3067_v49, 2 }
 0x22f   : > { %v2997_v2 = vrot.slane %v2996_v39, 2 }
 0x230   : > { %v3069_v35 = vadd.f32 %v3068_v34, %v3067_v49 }
 0x231   : > { %v2998_v7 = vadd.f32 %v2997_v2, %v2996_v39 }
 0x232   : > { %v3070_v43 = vrot.slane %v3069_v35, 1 }
 0x233   : > { %v2999_v63 = vrot.slane %v2998_v7, 1 }
 0x234   : > { %v3071_v51 = vadd.f32 %v3070_v43, %v3069_v35 }
 0x235   : > { %v3000_v45 = vadd.f32 %v2999_v63, %v2998_v7 }
 0x236   : > { %v3073_v40 = vmul.f32 0.00390625, %v3071_v51 }
 0x237   : > { %3080 = vperm.xlu1 %4066, %v3000_v45   ;;  %3002 = vst.msk [vmem:[%s373_s24] sm:$0x1] %vm3001_vm1, %v3000_v45  ;;  %3086 = vperm.xlu0 %4067, %v3000_v45  }
 0x238   : > { %3074 = vst.msk [vmem:[%s376_s27] sm:$0x1] %vm3001_vm1, %v3073_v40 }
 0x23b   : > { %4068 = vset.pattern.permute.xlu1 %v4373_v32  ;;  %4069 = vset.pattern.permute.xlu0 %v4373_v32 }
 0x23c   : > { %3105 = vperm.xlu1 %4068, %v3000_v45  }
 0x2b6   : > { %v3081_v1 = vpop.permute.xlu1 %3080  ;;  %v3087_v3 = vpop.permute.xlu0 %3086 }
 0x2b7   : > { %v3089_v55 = vmul.f32 %v3087_v3, %v3076_v16  ;;  %v3090_v20 = vmul.f32 %v3087_v3, %v3077_v33  ;;  %v3083_v37 = vmul.f32 %v3081_v1, %v3076_v16  ;;  %v3084_v59 = vmul.f32 %v3081_v1, %v3077_v33 }
 0x2b9   : > { %v3504_v30 = vrot.slane %v3089_v55, 9  ;;  %v3505_v58 = vrot.slane %v3090_v20, 9 }
 0x2bb   : > { %v3106_v18 = vpop.permute.xlu1 %3105  ;;  %v3099_v25 = vadd.f32 %v3504_v30, %v3083_v37  ;;  %v3100_v17 = vadd.f32 %v3505_v58, %v3084_v59 }
 0x2bc   : > { %v3108_v28 = vmul.f32 %v3106_v18, %v3102_v29  ;;  %v3109_v38 = vmul.f32 %v3106_v18, %v3103_v12 }
 0x2be   : > { %v3506_v44 = vrot.slane %v3108_v28, 10  ;;  %v3507_v52 = vrot.slane %v3109_v38, 10 }
 0x2c0   : > { %v3118_v53 = vadd.f32 %v3506_v44, %v3099_v25  ;;  %v3119_v19 = vadd.f32 %v3507_v52, %v3100_v17 }
 0x2c2   : > { %v3138_v50 = vadd.f32 %v3128_v47, %v3118_v53  ;;  %v3139_v14 = vadd.f32 %v3135_v6, %v3119_v19 }
 0x2c4   : > { %v3508_v11 = vmul.f32 -1.442695, %v3138_v50  ;;  %v3148_v48 = vrot.slane %v3139_v14, 4 }
 0x2c6   : > { %4350 = vpow2.f32 %v3508_v11  ;;  %v3509_v41 = vmul.f32 -1.442695, %v3148_v48 }
 0x2c8   : > { %4352 = vpow2.f32 %v3509_v41 }
 0x2c9   : > { %4354 = vtanh.f32 %v3139_v14 }
 0x2d0   : > { %v4351_v0 = vpop.eup %4350 }
 0x2d1   : > { %v3143_v31 = vadd.f32 1.0, %v4351_v0 }
 0x2d2   : > { %v4353_v27 = vpop.eup %4352 }
 0x2d3   : > { %4356 = vrcp.f32 %v3143_v31  ;;  %v3153_v10 = vadd.f32 1.0, %v4353_v27  ;;  %v4355_v24 = vpop.eup %4354 }
 0x2d5   : > { %4358 = vrcp.f32 %v3153_v10 }
 0x2dd   : > { %v4357_v5 = vpop.eup %4356 }
 0x2de   : > { %v3156_v23 = vmul.f32 %v4357_v5, %v4355_v24 }
 0x2df   : > { %v4359_v26 = vpop.eup %4358 }
 0x2e0   : > { %4360 = vtanh.f32 %v3156_v23 }
 0x2ea   : > { %v4361_v61 = vpop.eup %4360 }
 0x2eb   : > { %v3158_v36 = vmul.f32 %v4361_v61, %v4359_v26 }
 0x2ed   : > { %3159 = vst [vmem:[%s379_s18] sm:$0x1] %v3158_v36 }
 0x2ee PF: > { %s20_s30 = sadd.s32 1, %s4368_s30  }
 0x2ef   : > { %p17_p4 = scmp.ge.s32.totalorder %s20_s30, 4  }
 0x2f1   :  { %19 = sbr.rel (!%p17_p4) target bundleno = 1 (0x1), region = 108 }

// kernel: forward.6
= control target key start
LH: loop header
LB: loop body
LE: loop exit
PB: predicated region body
PF: predicated region fallthrough
CT: control target
= control target key end

     0   :  { %s22281_s0 = inlined_call_operand.vmem [shape: bf16[2,256,576], index: 0, kind: input, shape index: {}]   ;;  %s22282_s1 = inlined_call_operand.vmem [shape: bf16[576,128], index: 1, kind: input, shape index: {}]   ;;  %s22283_s2 = inlined_call_operand.vmem [shape: f32[1,128], index: 2, kind: input, shape index: {}]   ;;  %s22284_s3 = inlined_call_operand.vmem [shape: bf16[2,1,16384], index: 3, kind: input, shape index: {}]   ;;  %s22285_s4 = inlined_call_operand.vmem [shape: bf16[16384,5], index: 4, kind: input, shape index: {}]   ;;  %s22286_s5 = inlined_call_operand.vmem [shape: f32[1,5], index: 5, kind: input, shape index: {}]   ;;  %s22287_s6 = inlined_call_operand.vmem [shape: bf16[2,1,1600], index: 6, kind: input, shape index: {}]   ;;  %s22288_s7 = inlined_call_operand.vmem [shape: bf16[1,1600], index: 7, kind: input, shape index: {}]   ;;  %s22289_s8 = inlined_call_operand.<no memory space> [shape: f32[1,1], index: 8, kind: input, shape index: {}]   ;;  %s22290_s9 = inlined_call_operand.vmem [shape: f32[2,1,10], index: 9, kind: input, shape index: {}]   ;;  %s22291_s10 = inlined_call_operand.vmem [shape: f32[2,256,128], index: 10, kind: output, shape index: {0}]   ;;  %s22292_s11 = inlined_call_operand.hbm [shape: f32[2,1,5], index: 11, kind: output, shape index: {1}]   ;;  %s22293_s12 = inlined_call_operand.vmem [shape: f32[2,1,1], index: 12, kind: output, shape index: {2}]  }
   0x1   :  { %22295 = sst [smem:[#allocation8_spill]] %s22281_s0  ;;  %v18_v0 = vstv %s22289_s8 }
   0x2   :  { %22296 = sst [smem:[#allocation9_spill]] %s22282_s1  ;;  %19 = vst [vmem:[#allocation2] sm:$0x1] %v18_v0 }
   0x3   :  { %20 = vsyncpa [#allocation4], 0 }
   0x4   :  { %22 = vsyncpa [#allocation4 + $0x1], 0  ;;  %s18135_s23 = smov 0   ;;  %s18137_s24 = smov 0  }
   0x5   :  { %s18139_s25 = smov 0   ;;  %s18141_s26 = smov 0  }
   0x6 LB: > { %22297 = sst [smem:[#allocation6_spill]] %s18055_s25  ;;  %s18156_s8 = sadd.s32 4294967295, %s18059_s26   ;;  %s18059_s26 = sphi %s18141_s26, %s22307_s26   ;;  %s18055_s25 = sphi %s18139_s25, %s22304_s25   ;;  %s18051_s24 = sphi %s18137_s24, %s22306_s24   ;;  %s18047_s23 = sphi %s18135_s23, %s22305_s23  }
   0x7   : > { %s13893_s27 = sadd.s32 4294967294, %s18059_s26   ;;  %s18160_s28 = sadd.s32 1, %s18059_s26  }
   0x8   : > { %s291_s29 = sadd.s32 1, %s18055_s25  ;;  %s288_s30 = ssub.s32 %s18059_s26, %s18160_s28 }
   0x9   : > { %p301_p0 = scmp.ne.s32.totalorder %s18055_s25, %s18051_s24  ;;  %p289_p1 = scmp.eq.s32.totalorder %s288_s30, 0 }
   0xa   : > { %p302_p2 = scmp.eq.s32.totalorder %s18156_s8, 1  ;;  %p307_p3 = scmp.ne.s32.totalorder %s18051_s24, %s18047_s23 }
   0xb   : > { %p308_p4 = scmp.eq.s32.totalorder %s13893_s27, 1  ;;  %p13896_p7 = scmp.ge.s32.totalorder %s18059_s26, 1 }
   0xc   : > { %s18171_s13 = scalar_select %p289_p1, %s18055_s25, %s291_s29  }
   0xd   : > { %p18173_p5 = por %p302_p2, %p301_p0  ;;  %p18177_p6 = por %p308_p4, %p307_p3 }
   0xe   : > { %22298 = sst [smem:[#allocation7_spill]] %s18171_s13  ;;  %p398_p8 = scmp.lt.s32.totalorder %s18059_s26, 3 }
  0x10   : > { %p399_p9 = pnand %p13896_p7, %p398_p8 }
  0x11   : > { %s22301_s1 = sld [smem:[#allocation9_spill]] (!%p399_p9)  ;;  %p458_p10 = scmp.lt.s32.totalorder (!%p399_p9), %s18156_s8, 1  ;;  %v16843_v38 = vld [vmem:[%s22285_s4 + $0x40] sm:$0xff] (!%p399_p9)   ;;  %v16857_v46 = vld [vmem:[%s22285_s4 + $0x48] sm:$0xff] (!%p399_p9)   ;;  %v16872_v53 = vld [vmem:[%s22285_s4 + $0x50] sm:$0xff] (!%p399_p9)   ;;  %vm1275_vm0 = vcmask (!%p399_p9), 523264  }
  0x12   : > { %402 = sbr.rel (%p399_p9) target bundleno = 1900 (0x76c), region = 60  ;;  %s22302_s0 = sld [smem:[#allocation8_spill]] (!%p399_p9)  ;;  %v16844_v39 = vld [vmem:[%s22285_s4] sm:$0xff] (!%p399_p9)   ;;  %v16858_v47 = vld [vmem:[%s22285_s4 + $0x8] sm:$0xff] (!%p399_p9)   ;;  %v16873_v54 = vld [vmem:[%s22285_s4 + $0x10] sm:$0xff] (!%p399_p9)   ;;  %vm13686_vm1 = vcmask (!%p399_p9), 1040384  }
  0x13   : > { %v16886_v59 = vld [vmem:[%s22285_s4 + $0x58] sm:$0xff] (!%p399_p9)   ;;  %vm13710_vm2 = vcmask (!%p399_p9), 516096   ;;  %vm13588_vm3 = vcmask (!%p399_p9), 32768   ;;  %s18065_s29 = smov (!%p399_p9), 125  }
  0x14   : > { %v16887_v60 = vld [vmem:[%s22285_s4 + $0x18] sm:$0xff] (!%p399_p9)  }
  0x17   : > { %v16804_v1 = vld [vmem:[%s22301_s1 + $0x40] sm:$0xff] (!%p399_p9)   ;;  %v16808_v5 = vld [vmem:[%s22301_s1 + $0x48] sm:$0xff] (!%p399_p9)   ;;  %v16812_v9 = vld [vmem:[%s22301_s1 + $0x50] sm:$0xff] (!%p399_p9)  }
  0x18   : > { %v16805_v2 = vld [vmem:[%s22301_s1 + $0xc0] sm:$0xff] (!%p399_p9)   ;;  %15062 = vmatprep.subr.bf16.mxu0 (!%p399_p9), %v16804_v1  ;;  %v16809_v6 = vld [vmem:[%s22301_s1 + $0xc8] sm:$0xff] (!%p399_p9)   ;;  %v16813_v10 = vld [vmem:[%s22301_s1 + $0xd0] sm:$0xff] (!%p399_p9)  }
  0x19   : > { %v16806_v3 = vld [vmem:[%s22301_s1] sm:$0xff]   ;;  %15174 = vmatprep.subr.bf16.mxu1 %v16805_v2  ;;  %v16810_v7 = vld [vmem:[%s22301_s1 + $0x8] sm:$0xff]   ;;  %v16814_v11 = vld [vmem:[%s22301_s1 + $0x10] sm:$0xff]   ;;  %s18251_s20 = scalar_select %p458_p10, %s18156_s8, 1 }
  0x1a   : > { %v16807_v4 = vld [vmem:[%s22301_s1 + $0x80] sm:$0xff]   ;;  %15063 = vmatpush3.bf16.msra.mxu0 %v16806_v3  ;;  %v16811_v8 = vld [vmem:[%s22301_s1 + $0x88] sm:$0xff]   ;;  %v16815_v12 = vld [vmem:[%s22301_s1 + $0x90] sm:$0xff]  }
  0x1b   : > { %15175 = vmatpush3.bf16.msra.mxu1 %v16807_v4  ;;  %15064 = vmatprep.subr.bf16.mxu0 %v16808_v5  ;;  %v16816_v13 = vld [vmem:[%s22301_s1 + $0x58] sm:$0xff]   ;;  %v16820_v17 = vld [vmem:[%s22301_s1 + $0x60] sm:$0xff]   ;;  %v16824_v21 = vld [vmem:[%s22301_s1 + $0x68] sm:$0xff]   ;;  %s16754_s19 = smul.u32 640, %s18251_s20  ;;  %s13898_s17 = sshll.u32 %s18251_s20, 7 }
  0x1c   : > { %15176 = vmatprep.subr.bf16.mxu1 %v16809_v6  ;;  %v16817_v14 = vld [vmem:[%s22301_s1 + $0xd8] sm:$0xff]   ;;  %v16821_v18 = vld [vmem:[%s22301_s1 + $0xe0] sm:$0xff]   ;;  %v16825_v22 = vld [vmem:[%s22301_s1 + $0xe8] sm:$0xff]   ;;  %s18419_s22 = scalar_lea.vmem %s22284_s3, %s13898_s17  ;;  %s473_s16 = scalar_lea.vmem %s22290_s9, %s18251_s20 }
  0x1d   : > { %v16818_v15 = vld [vmem:[%s22301_s1 + $0x18] sm:$0xff]   ;;  %v16822_v19 = vld [vmem:[%s22301_s1 + $0x20] sm:$0xff]   ;;  %v16826_v23 = vld [vmem:[%s22301_s1 + $0x28] sm:$0xff]   ;;  %s18281_s13 = scalar_lea.vmem %s22302_s0, %s16754_s19  ;;  %s16755_s17 = smul.u32 13, %s18251_s20 }
  0x1e   : > { %15065 = vmatpush3.bf16.msra.mxu0 %v16810_v7  ;;  %v16819_v16 = vld [vmem:[%s22301_s1 + $0x98] sm:$0xff]   ;;  %v16823_v20 = vld [vmem:[%s22301_s1 + $0xa0] sm:$0xff]   ;;  %v16827_v24 = vld [vmem:[%s22301_s1 + $0xa8] sm:$0xff]  }
  0x1f   : > { %15177 = vmatpush3.bf16.msra.mxu1 %v16811_v8  ;;  %15066 = vmatprep.subr.bf16.mxu0 %v16812_v9  ;;  %v16828_v25 = vld [vmem:[%s22301_s1 + $0x70] sm:$0xff]   ;;  %v16832_v29 = vld [vmem:[%s22301_s1 + $0x78] sm:$0xff]   ;;  %v16841_v36 = vld [vmem:[%s18281_s13 + $0xc] ss:$20 sps:$4 sm:$0xff]   ;;  %s22120_s21 = scalar_lea.vmem %s22287_s6, %s16755_s17 }
  0x20   : > { %15178 = vmatprep.subr.bf16.mxu1 %v16813_v10  ;;  %v16829_v26 = vld [vmem:[%s22301_s1 + $0xf0] sm:$0xff]   ;;  %v16833_v30 = vld [vmem:[%s22301_s1 + $0xf8] sm:$0xff]   ;;  %v16842_v37 = vld [vmem:[%s22301_s1 + $0x100] sm:$0xff]   ;;  %1517 = vmatprep.mubr.bf16.mxu1 %v16841_v36 }
  0x21   : > { %v16830_v27 = vld [vmem:[%s22301_s1 + $0x30] sm:$0xff]   ;;  %v16834_v31 = vld [vmem:[%s22301_s1 + $0x38] sm:$0xff]   ;;  %v16845_v40 = vld [vmem:[%s18281_s13 + $0x2c] ss:$20 sps:$4 sm:$0xff]  }
  0x22   : > { %15067 = vmatpush3.bf16.msra.mxu0 %v16814_v11  ;;  %v16831_v28 = vld [vmem:[%s22301_s1 + $0xb0] sm:$0xff]   ;;  %v16835_v32 = vld [vmem:[%s22301_s1 + $0xb8] sm:$0xff]   ;;  %v16871_v52 = vld [vmem:[%s22301_s1 + $0x108] sm:$0xff]  }
  0x23   : > { %15179 = vmatpush3.bf16.msra.mxu1 %v16815_v12  ;;  %15068 = vmatprep.subr.bf16.mxu0 %v16816_v13  ;;  %v16836_v33 = vld [vmem:[%s18281_s13] ss:$20 sps:$4 sm:$0xff]   ;;  %v16838_v34 = vld [vmem:[%s18281_s13 + $0x4] ss:$20 sps:$4 sm:$0xff]   ;;  %v16839_v35 = vld [vmem:[%s18281_s13 + $0x8] ss:$20 sps:$4 sm:$0xff]  }
  0x24   : > { %15180 = vmatprep.subr.bf16.mxu1 %v16817_v14  ;;  %1356 = vmatprep.mubr.bf16.mxu0 %v16838_v34  ;;  %v16847_v41 = vld [vmem:[%s18281_s13 + $0x34] ss:$20 sps:$4 sm:$0xff]   ;;  %v16850_v43 = vld [vmem:[%s18281_s13 + $0x30] ss:$20 sps:$4 sm:$0xff]   ;;  %v16856_v49 = vld [vmem:[%s18281_s13 + $0x58] ss:$20 sps:$4 sm:$0xff]  }
  0x25   : > { %v16849_v42 = vld [vmem:[%s18281_s13 + $0x28] ss:$20 sps:$4 sm:$0xff]   ;;  %v16855_v48 = vld [vmem:[%s18281_s13 + $0x50] ss:$20 sps:$4 sm:$0xff]   ;;  %v16863_v55 = vld [vmem:[%s18281_s13 + $0x78] ss:$20 sps:$4 sm:$0xff]  }
  0x26   : > { %15069 = vmatpush3.bf16.msra.mxu0 %v16818_v15  ;;  %v16851_v44 = vld [vmem:[%s18281_s13 + $0x54] ss:$20 sps:$4 sm:$0xff]   ;;  %v16853_v45 = vld [vmem:[%s18281_s13 + $0x5c] ss:$20 sps:$4 sm:$0xff]   ;;  %v16861_v51 = vld [vmem:[%s18281_s13 + $0x84] ss:$20 sps:$4 sm:$0xff]  }
  0x27   : > { %15181 = vmatpush3.bf16.msra.mxu1 %v16819_v16  ;;  %15070 = vmatprep.subr.bf16.mxu0 %v16820_v17  ;;  %v16859_v50 = vld [vmem:[%s18281_s13 + $0x7c] ss:$20 sps:$4 sm:$0xff]   ;;  %v16864_v56 = vld [vmem:[%s18281_s13 + $0x80] ss:$20 sps:$4 sm:$0xff]   ;;  %v16865_v57 = vld [vmem:[%s18281_s13 + $0xa4] ss:$20 sps:$4 sm:$0xff]  }
  0x28   : > { %15182 = vmatprep.subr.bf16.mxu1 %v16821_v18  ;;  %v16867_v58 = vld [vmem:[%s18281_s13 + $0xac] ss:$20 sps:$4 sm:$0xff]   ;;  %v16870_v62 = vld [vmem:[%s18281_s13 + $0xa8] ss:$20 sps:$4 sm:$0xff]   ;;  %v16900_v1 = vld [vmem:[%s22301_s1 + $0x110] sm:$0xff]  }
  0x29   : > { %v16869_v61 = vld [vmem:[%s18281_s13 + $0xa0] ss:$20 sps:$4 sm:$0xff]   ;;  %v16878_v4 = vld [vmem:[%s18281_s13 + $0xc8] ss:$20 sps:$4 sm:$0xff]   ;;  %v16879_v5 = vld [vmem:[%s18281_s13 + $0xd0] ss:$20 sps:$4 sm:$0xff]  }
  0x2a   : > { %15071 = vmatpush3.bf16.msra.mxu0 %v16822_v19  ;;  %v16874_v63 = vld [vmem:[%s18281_s13 + $0xcc] ss:$20 sps:$4 sm:$0xff]   ;;  %v16876_v0 = vld [vmem:[%s18281_s13 + $0xd4] ss:$20 sps:$4 sm:$0xff]   ;;  %v16882_v7 = vld [vmem:[%s18281_s13 + $0xfc] ss:$20 sps:$4 sm:$0xff]  }
  0x2b   : > { %15183 = vmatpush3.bf16.msra.mxu1 %v16823_v20  ;;  %15072 = vmatprep.subr.bf16.mxu0 %v16824_v21  ;;  %v16901_v2 = vld [vmem:[%s22285_s4 + $0x60] sm:$0xff]   ;;  %v16880_v6 = vld [vmem:[%s18281_s13 + $0xf4] ss:$20 sps:$4 sm:$0xff]   ;;  %v16885_v11 = vld [vmem:[%s18281_s13 + $0xf8] ss:$20 sps:$4 sm:$0xff]  }
  0x2c   : > { %15184 = vmatprep.subr.bf16.mxu1 %v16825_v22  ;;  %v16902_v3 = vld [vmem:[%s22285_s4 + $0x20] sm:$0xff]   ;;  %v16915_v8 = vld [vmem:[%s22285_s4 + $0x68] sm:$0xff]   ;;  %v16888_v12 = vld [vmem:[%s18281_s13 + $0x11c] ss:$20 sps:$4 sm:$0xff]  }
  0x2d   : > { %v16916_v9 = vld [vmem:[%s22285_s4 + $0x28] sm:$0xff]   ;;  %v16884_v10 = vld [vmem:[%s18281_s13 + $0xf0] ss:$20 sps:$4 sm:$0xff]   ;;  %v16929_v14 = vld [vmem:[%s22301_s1 + $0x118] sm:$0xff]  }
  0x2e   : > { %15073 = vmatpush3.bf16.msra.mxu0 %v16826_v23  ;;  %v16890_v13 = vld [vmem:[%s18281_s13 + $0x124] ss:$20 sps:$4 sm:$0xff]   ;;  %v16930_v15 = vld [vmem:[%s22285_s4 + $0x70] sm:$0xff]   ;;  %v16896_v20 = vld [vmem:[%s18281_s13 + $0x14c] ss:$20 sps:$4 sm:$0xff]  }
  0x2f   : > { %15185 = vmatpush3.bf16.msra.mxu1 %v16827_v24  ;;  %15074 = vmatprep.subr.bf16.mxu0 %v16828_v25  ;;  %v16931_v16 = vld [vmem:[%s22285_s4 + $0x30] sm:$0xff]   ;;  %v16892_v17 = vld [vmem:[%s18281_s13 + $0x118] ss:$20 sps:$4 sm:$0xff]   ;;  %v16899_v24 = vld [vmem:[%s18281_s13 + $0x148] ss:$20 sps:$4 sm:$0xff]  }
  0x30   : > { %15186 = vmatprep.subr.bf16.mxu1 %v16829_v26  ;;  %v16893_v18 = vld [vmem:[%s18281_s13 + $0x120] ss:$20 sps:$4 sm:$0xff]   ;;  %v16894_v19 = vld [vmem:[%s18281_s13 + $0x144] ss:$20 sps:$4 sm:$0xff]  }
  0x31   : > { %v16944_v21 = vld [vmem:[%s22285_s4 + $0x78] sm:$0xff]   ;;  %v16898_v23 = vld [vmem:[%s18281_s13 + $0x140] ss:$20 sps:$4 sm:$0xff]  }
  0x32   : > { %15075 = vmatpush3.bf16.msra.mxu0 %v16830_v27  ;;  %v16945_v22 = vld [vmem:[%s22285_s4 + $0x38] sm:$0xff]   ;;  %v16953_v25 = vld [vmem:[%s22285_s4 + $0xc0] sm:$0xff]   ;;  %v16905_v27 = vld [vmem:[%s18281_s13 + $0x174] ss:$20 sps:$4 sm:$0xff]  }
  0x33   : > { %15187 = vmatpush3.bf16.msra.mxu1 %v16831_v28  ;;  %15076 = vmatprep.subr.bf16.mxu0 %v16832_v29  ;;  %v16903_v26 = vld [vmem:[%s18281_s13 + $0x16c] ss:$20 sps:$4 sm:$0xff]   ;;  %v16907_v29 = vld [vmem:[%s18281_s13 + $0x168] ss:$20 sps:$4 sm:$0xff]   ;;  %v16919_v36 = vld [vmem:[%s18281_s13 + $0x1c4] ss:$20 sps:$4 sm:$0xff]  }
  0x34   : > { %15188 = vmatprep.subr.bf16.mxu1 %v16833_v30  ;;  %v16956_v28 = vld [vmem:[%s22285_s4 + $0x140] sm:$0xff]   ;;  %v16914_v34 = vld [vmem:[%s18281_s13 + $0x198] ss:$20 sps:$4 sm:$0xff]  }
  0x35   : > { %v16908_v30 = vld [vmem:[%s18281_s13 + $0x170] ss:$20 sps:$4 sm:$0xff]  }
  0x36   : > { %15077 = vmatpush3.bf16.msra.mxu0 %v16834_v31  ;;  %v16909_v31 = vld [vmem:[%s18281_s13 + $0x194] ss:$20 sps:$4 sm:$0xff]  }
  0x37   : > { %15189 = vmatpush3.bf16.msra.mxu1 %v16835_v32  ;;  %16714 = vmatprep.subr.bf16.mxu0 %v16842_v37  ;;  %v16911_v32 = vld [vmem:[%s18281_s13 + $0x19c] ss:$20 sps:$4 sm:$0xff]  }
  0x38   : > { %15306 = vmatprep.subr.bf16.mxu1 %v16843_v38  ;;  %v16922_v38 = vld [vmem:[%s18281_s13 + $0x1c0] ss:$20 sps:$4 sm:$0xff]  }
  0x39   : > { %1357 = vmatmul.mubr.bf16.vlgmr.msra.gmra.mrb[0].mxu0 %v16836_v33  ;;  %v16913_v33 = vld [vmem:[%s18281_s13 + $0x190] ss:$20 sps:$4 sm:$0xff]  }
  0x3a   : > { %1518 = vmatmul.mubr.bf16.vlgmr.msra.gmra.mrb[0].mxu1 %v16839_v35  ;;  %16715 = vmatpush3.bf16.msra.mxu0 %v16842_v37  ;;  %v16917_v35 = vld [vmem:[%s18281_s13 + $0x1bc] ss:$20 sps:$4 sm:$0xff]   ;;  %v16921_v37 = vld [vmem:[%s18281_s13 + $0x1b8] ss:$20 sps:$4 sm:$0xff]  }
  0x3b   : > { %15307 = vmatpush3.bf16.msra.mxu1 %v16844_v39  ;;  %1364 = vmatprep.mubr.bf16.mxu0 %v16845_v40  ;;  %v16923_v39 = vld [vmem:[%s18281_s13 + $0x1e4] ss:$20 sps:$4 sm:$0xff]   ;;  %v16925_v40 = vld [vmem:[%s18281_s13 + $0x1ec] ss:$20 sps:$4 sm:$0xff]  }
  0x3c   : > { %1525 = vmatprep.mubr.bf16.mxu1 %v16847_v41  ;;  %15308 = vmatprep.subr.bf16.mxu1 %v16857_v46  ;;  %v16927_v41 = vld [vmem:[%s18281_s13 + $0x1e0] ss:$20 sps:$4 sm:$0xff]  }
  0x3d   : > { %16716 = vmatprep.subr.bf16.mxu0 %v16871_v52 }
  0x3e   : > { %16717 = vmatpush3.bf16.msra.mxu0 %v16871_v52  ;;  %v16940_v52 = vld [vmem:[%s18281_s13 + $0x23c] ss:$20 sps:$4 sm:$0xff]  }
  0x3f   : > { %15309 = vmatpush3.bf16.msra.mxu1 %v16858_v47  ;;  %16718 = vmatprep.subr.bf16.mxu0 %v16900_v1  ;;  %v18061_v47 = vmov 1966171168  }
  0x40   : > { %15310 = vmatprep.subr.bf16.mxu1 %v16872_v53 }
  0x41   : > { %1365 = vmatmul.mubr.bf16.gmra.mrb[4].mxu0 %v16849_v42  ;;  %v16928_v42 = vld [vmem:[%s18281_s13 + $0x1e8] ss:$20 sps:$4 sm:$0xff]  }
  0x42   : > { %1526 = vmatmul.mubr.bf16.gmra.mrb[4].mxu1 %v16850_v43  ;;  %1372 = vmatprep.mubr.bf16.mxu0 %v16851_v44  ;;  %v16932_v43 = vld [vmem:[%s18281_s13 + $0x20c] ss:$20 sps:$4 sm:$0xff]   ;;  %v16934_v44 = vld [vmem:[%s18281_s13 + $0x214] ss:$20 sps:$4 sm:$0xff]  }
  0x43   : > { %1533 = vmatprep.mubr.bf16.mxu1 %v16853_v45  ;;  %15311 = vmatpush3.bf16.msra.mxu1 %v16873_v54  ;;  %v1808_v45 = vlaneseq  ;;  %v16942_v54 = vld [vmem:[%s18281_s13 + $0x230] ss:$20 sps:$4 sm:$0xff]  }
  0x44   : > { %15312 = vmatprep.subr.bf16.mxu1 %v16886_v59  ;;  %16719 = vmatpush3.bf16.msra.mxu0 %v16900_v1  ;;  %v16948_v59 = vld [vmem:[%s18281_s13 + $0x264] ss:$20 sps:$4 sm:$0xff]  }
  0x45   : > { %16720 = vmatprep.subr.bf16.mxu0 %v16929_v14  ;;  %v18410_v46 = vshrl.u32 %v1808_v45, 7 }
  0x47   : > { %15313 = vmatpush3.bf16.msra.mxu1 %v16887_v60 }
  0x48   : > { %15314 = vmatprep.subr.bf16.mxu1 %v16901_v2  ;;  %16721 = vmatpush3.bf16.msra.mxu0 %v16929_v14  ;;  %v16954_v2 = vld [vmem:[%s18281_s13 + $0x38] ss:$20 sps:$4 sm:$0xff]   ;;  %v16962_v14 = vld [vmem:[%s18281_s13 + $0x88] ss:$20 sps:$4 sm:$0xff]  }
  0x49   : > { %1373 = vmatmul.mubr.bf16.gmra.mrb[8].mxu0 %v16855_v48  ;;  %15350 = vmatprep.subr.bf16.mxu0 %v16956_v28  ;;  %v3962_v48 = vunpack.c.l.s4 %v18061_v47  ;;  %v16995_v28 = vld [vmem:[%s22285_s4 + $0x168] sm:$0xff]   ;;  %v17017_v47 = vld [vmem:[%s22285_s4 + $0x240] sm:$0xff]  }
  0x4a   : > { %1534 = vmatmul.mubr.bf16.gmra.mrb[8].mxu1 %v16856_v49  ;;  %1380 = vmatprep.mubr.bf16.mxu0 %v16859_v50  ;;  %v16936_v49 = vld [vmem:[%s18281_s13 + $0x208] ss:$20 sps:$4 sm:$0xff]   ;;  %v16937_v50 = vld [vmem:[%s18281_s13 + $0x210] ss:$20 sps:$4 sm:$0xff]  }
  0x4b   : > { %1541 = vmatprep.mubr.bf16.mxu1 %v16861_v51  ;;  %15315 = vmatpush3.bf16.msra.mxu1 %v16902_v3  ;;  %v16938_v51 = vld [vmem:[%s18281_s13 + $0x234] ss:$20 sps:$4 sm:$0xff]   ;;  %v3963_v53 = vunpack.c.0.s8 %v3962_v48  ;;  %v16955_v3 = vld [vmem:[%s22285_s4 + $0x80] sm:$0xff]  }
  0x4c   : > { %15316 = vmatprep.subr.bf16.mxu1 %v16915_v8  ;;  %v16964_v8 = vld [vmem:[%s22285_s4 + $0x148] sm:$0xff]   ;;  %v16985_v48 = vld [vmem:[%s22285_s4 + $0x1c0] sm:$0xff]  }
  0x4f   : > { %15317 = vmatpush3.bf16.msra.mxu1 %v16916_v9  ;;  %v16959_v9 = vld [vmem:[%s22285_s4 + $0x88] sm:$0xff]  }
  0x50   : > { %15318 = vmatprep.subr.bf16.mxu1 %v16930_v15  ;;  %v16963_v15 = vld [vmem:[%s22285_s4 + $0x90] sm:$0xff]  }
  0x51   : > { %1381 = vmatmul.mubr.bf16.gmra.mrb[12].mxu0 %v16863_v55  ;;  %v18423_v55 = vsub.s32 %v3963_v53, %v18410_v46 }
  0x52   : > { %1542 = vmatmul.mubr.bf16.gmra.mrb[12].mxu1 %v16864_v56  ;;  %1388 = vmatprep.mubr.bf16.mxu0 %v16865_v57  ;;  %v18426_v56 = vld [vmem:[%s18419_s22] sm:$0xff]  ;;  %v16943_v57 = vld [vmem:[%s18281_s13 + $0x238] ss:$20 sps:$4 sm:$0xff]  }
  0x53   : > { %1549 = vmatprep.mubr.bf16.mxu1 %v16867_v58  ;;  %15319 = vmatpush3.bf16.msra.mxu1 %v16931_v16  ;;  %v16946_v58 = vld [vmem:[%s18281_s13 + $0x25c] ss:$20 sps:$4 sm:$0xff]   ;;  %v3967_v60 = vrot.slane %v18426_v56, %v18423_v55 }
  0x54   : > { %15320 = vmatprep.subr.bf16.mxu1 %v16944_v21  ;;  %v16968_v16 = vld [vmem:[%s18281_s13 + $0xb0] ss:$20 sps:$4 sm:$0xff]  }
  0x55   : > { %v16969_v21 = vld [vmem:[%s22285_s4 + $0xe0] sm:$0xff]  }
  0x57   : > { %15321 = vmatpush3.bf16.msra.mxu1 %v16945_v22  ;;  %v16981_v22 = vld [vmem:[%s22285_s4 + $0x118] sm:$0xff]  }
  0x58   : > { %15328 = vmatprep.subr.bf16.mxu1 %v16953_v25  ;;  %v16971_v25 = vld [vmem:[%s22285_s4 + $0xa0] sm:$0xff]  }
  0x59   : > { %1389 = vmatmul.mubr.bf16.gmra.mrb[16].mxu0 %v16869_v61  ;;  %v3975_v61 = vcombine.high %v3967_v60, %v3967_v60 }
  0x5a   : > { %1550 = vmatmul.mubr.bf16.gmra.mrb[16].mxu1 %v16870_v62  ;;  %1396 = vmatprep.mubr.bf16.mxu0 %v16874_v63  ;;  %v16950_v62 = vld [vmem:[%s18281_s13 + $0x258] ss:$20 sps:$4 sm:$0xff]   ;;  %v16951_v63 = vld [vmem:[%s18281_s13 + $0x260] ss:$20 sps:$4 sm:$0xff]  }
  0x5b   : > { %1557 = vmatprep.mubr.bf16.mxu1 %v16876_v0  ;;  %v16952_v0 = vld [vmem:[%s18281_s13 + $0x10] ss:$20 sps:$4 sm:$0xff]   ;;  %v3997_v1 = vrot.slane %v3975_v61, %v18423_v55  ;;  %v16998_v61 = vld [vmem:[%s22285_s4 + $0x1d8] sm:$0xff]  }
  0x61   : > { %1397 = vmatmul.mubr.bf16.gmra.mrb[20].mxu0 %v16878_v4  ;;  %v16957_v4 = vld [vmem:[%s22285_s4 + $0x100] sm:$0xff]  }
  0x62   : > { %1558 = vmatmul.mubr.bf16.gmra.mrb[20].mxu1 %v16879_v5  ;;  %1404 = vmatprep.mubr.bf16.mxu0 %v16880_v6  ;;  %v18446_v5 = vrot.slane %v3967_v60, %v18423_v55  ;;  %v16958_v6 = vld [vmem:[%s22285_s4 + $0xc8] sm:$0xff]   ;;  %v16996_v60 = vld [vmem:[%s22285_s4 + $0x190] sm:$0xff]  }
  0x63   : > { %1565 = vmatprep.mubr.bf16.mxu1 %v16882_v7  ;;  %v16960_v7 = vld [vmem:[%s18281_s13 + $0x60] ss:$20 sps:$4 sm:$0xff]  }
  0x69   : > { %1405 = vmatmul.mubr.bf16.gmra.mrb[24].mxu0 %v16884_v10  ;;  %v4007_v10 = vcombine.high %v3997_v1, %v3997_v1 }
  0x6a   : > { %1566 = vmatmul.mubr.bf16.gmra.mrb[24].mxu1 %v16885_v11  ;;  %1412 = vmatprep.mubr.bf16.mxu0 %v16888_v12  ;;  %v16961_v11 = vld [vmem:[%s22285_s4 + $0xd0] sm:$0xff]   ;;  %v16965_v12 = vld [vmem:[%s22285_s4 + $0x108] sm:$0xff]  }
  0x6b   : > { %1573 = vmatprep.mubr.bf16.mxu1 %v16890_v13  ;;  %v16972_v13 = vld [vmem:[%s22285_s4 + $0x150] sm:$0xff]  }
  0x71   : > { %1413 = vmatmul.mubr.bf16.gmra.mrb[28].mxu0 %v16892_v17  ;;  %v16973_v17 = vld [vmem:[%s22285_s4 + $0x110] sm:$0xff]  }
  0x72   : > { %1574 = vmatmul.mubr.bf16.gmra.mrb[28].mxu1 %v16893_v18  ;;  %1420 = vmatprep.mubr.bf16.mxu0 %v16894_v19  ;;  %v16980_v18 = vld [vmem:[%s22285_s4 + $0x158] sm:$0xff]  }
  0x73   : > { %1581 = vmatprep.mubr.bf16.mxu1 %v16896_v20  ;;  %v16966_v19 = vld [vmem:[%s22285_s4 + $0xd8] sm:$0xff]  }
  0x74   : > { %v16967_v20 = vld [vmem:[%s22285_s4 + $0x98] sm:$0xff]  }
  0x79   : > { %1421 = vmatmul.mubr.bf16.gmra.mrb[32].mxu0 %v16898_v23  ;;  %v16987_v23 = vld [vmem:[%s22285_s4 + $0x160] sm:$0xff]  }
  0x7a   : > { %1582 = vmatmul.mubr.bf16.gmra.mrb[32].mxu1 %v16899_v24  ;;  %1428 = vmatprep.mubr.bf16.mxu0 %v16903_v26  ;;  %v16970_v24 = vld [vmem:[%s18281_s13 + $0xd8] ss:$20 sps:$4 sm:$0xff]   ;;  %v16976_v26 = vld [vmem:[%s18281_s13 + $0x100] ss:$20 sps:$4 sm:$0xff]  }
  0x7b   : > { %1589 = vmatprep.mubr.bf16.mxu1 %v16905_v27  ;;  %v16989_v27 = vld [vmem:[%s22285_s4 + $0x120] sm:$0xff]  }
  0x81   : > { %1429 = vmatmul.mubr.bf16.gmra.mrb[36].mxu0 %v16907_v29  ;;  %v3960_v29 = vcombine.high %v18426_v56, %v18426_v56  ;;  %v16991_v56 = vld [vmem:[%s22285_s4 + $0x188] sm:$0xff]  }
  0x82   : > { %1590 = vmatmul.mubr.bf16.gmra.mrb[36].mxu1 %v16908_v30  ;;  %1436 = vmatprep.mubr.bf16.mxu0 %v16909_v31  ;;  %v16974_v30 = vld [vmem:[%s22285_s4 + $0xe8] sm:$0xff]  }
  0x83   : > { %1597 = vmatprep.mubr.bf16.mxu1 %v16911_v32  ;;  %v16975_v31 = vld [vmem:[%s22285_s4 + $0xa8] sm:$0xff]   ;;  %v16977_v32 = vld [vmem:[%s22285_s4 + $0xf0] sm:$0xff]  }
  0x89   : > { %1437 = vmatmul.mubr.bf16.gmra.mrb[40].mxu0 %v16913_v33  ;;  %v16997_v33 = vld [vmem:[%s22285_s4 + $0x128] sm:$0xff]  }
  0x8a   : > { %1598 = vmatmul.mubr.bf16.gmra.mrb[40].mxu1 %v16914_v34  ;;  %1444 = vmatprep.mubr.bf16.mxu0 %v16917_v35  ;;  %v17003_v34 = vld [vmem:[%s22285_s4 + $0x170] sm:$0xff]   ;;  %v18529_v35 = vrot.slane %v3960_v29, %v18423_v55  ;;  %v17030_v29 = vld [vmem:[%s22285_s4 + $0x2d8] sm:$0xff]  }
  0x8b   : > { %1605 = vmatprep.mubr.bf16.mxu1 %v16919_v36  ;;  %v16978_v36 = vld [vmem:[%s18281_s13 + $0x128] ss:$20 sps:$4 sm:$0xff]  }
  0x91   : > { %1445 = vmatmul.mubr.bf16.gmra.mrb[44].mxu0 %v16921_v37  ;;  %v16979_v37 = vld [vmem:[%s22285_s4 + $0xb0] sm:$0xff]  }
  0x92   : > { %1606 = vmatmul.mubr.bf16.gmra.mrb[44].mxu1 %v16922_v38  ;;  %1452 = vmatprep.mubr.bf16.mxu0 %v16923_v39  ;;  %v16984_v38 = vld [vmem:[%s18281_s13 + $0x150] ss:$20 sps:$4 sm:$0xff]  }
  0x93   : > { %1613 = vmatprep.mubr.bf16.mxu1 %v16925_v40  ;;  %v17005_v39 = vld [vmem:[%s22285_s4 + $0x130] sm:$0xff]   ;;  %v17011_v40 = vld [vmem:[%s22285_s4 + $0x178] sm:$0xff]  }
  0x99   : > { %1453 = vmatmul.mubr.bf16.gmra.mrb[48].mxu0 %v16927_v41  ;;  %v3976_v41 = vcombine.high %v18529_v35, %v18529_v35 }
  0x9a   : > { %1614 = vmatmul.mubr.bf16.gmra.mrb[48].mxu1 %v16928_v42  ;;  %1460 = vmatprep.mubr.bf16.mxu0 %v16932_v43  ;;  %v16982_v42 = vld [vmem:[%s22285_s4 + $0xf8] sm:$0xff]  }
  0x9b   : > { %1621 = vmatprep.mubr.bf16.mxu1 %v16934_v44  ;;  %v16983_v43 = vld [vmem:[%s22285_s4 + $0xb8] sm:$0xff]   ;;  %v4004_v45 = vrot.slane %v3976_v41, %v18423_v55  ;;  %v17041_v41 = vld [vmem:[%s22285_s4 + $0x270] sm:$0xff]  }
  0x9c   : > { %v17013_v44 = vld [vmem:[%s22285_s4 + $0x138] sm:$0xff]  }
  0x9d   : > { %v4008_v53 = vcombine.high %v4004_v45, %v4004_v45 }
  0xa1   : > { %1461 = vmatmul.mubr.bf16.gmra.mrb[52].mxu0 %v16936_v49  ;;  %v16986_v49 = vld [vmem:[%s18281_s13 + $0x178] ss:$20 sps:$4 sm:$0xff]  }
  0xa2   : > { %1622 = vmatmul.mubr.bf16.gmra.mrb[52].mxu1 %v16937_v50  ;;  %1468 = vmatprep.mubr.bf16.mxu0 %v16938_v51  ;;  %v4005_v50 = vcombine.high %v18446_v5, %v18446_v5  ;;  %v16992_v51 = vld [vmem:[%s18281_s13 + $0x1a0] ss:$20 sps:$4 sm:$0xff]  }
  0xa3   : > { %1629 = vmatprep.mubr.bf16.mxu1 %v16940_v52  ;;  %v16988_v52 = vld [vmem:[%s22285_s4 + $0x180] sm:$0xff]  }
  0xa9   : > { %1469 = vmatmul.mubr.bf16.gmra.mrb[56].mxu0 %v16942_v54  ;;  %v16990_v54 = vld [vmem:[%s22285_s4 + $0x1c8] sm:$0xff]  }
  0xaa   : > { %1630 = vmatmul.mubr.bf16.gmra.mrb[56].mxu1 %v16943_v57  ;;  %1476 = vmatprep.mubr.bf16.mxu0 %v16946_v58  ;;  %v16993_v57 = vld [vmem:[%s22285_s4 + $0x1d0] sm:$0xff]   ;;  %v16994_v58 = vld [vmem:[%s18281_s13 + $0x1c8] ss:$20 sps:$4 sm:$0xff]  }
  0xab   : > { %1637 = vmatprep.mubr.bf16.mxu1 %v16948_v59  ;;  %v17000_v59 = vld [vmem:[%s18281_s13 + $0x1f0] ss:$20 sps:$4 sm:$0xff]  }
  0xb1   : > { %1477 = vmatmul.mubr.bf16.gmra.mrb[60].mxu0 %v16950_v62  ;;  %v16999_v62 = vld [vmem:[%s22285_s4 + $0x198] sm:$0xff]  }
  0xb2   : > { %1638 = vmatmul.mubr.bf16.gmra.mrb[60].mxu1 %v16951_v63  ;;  %16722 = vmatprep.mubr.msk.bf16.mxu0 %vm1275_vm0, %v16952_v0  ;;  %v17001_v63 = vld [vmem:[%s22285_s4 + $0x1e0] sm:$0xff]   ;;  %v17002_v0 = vld [vmem:[%s18281_s13 + $0x218] ss:$20 sps:$4 sm:$0xff]  }
  0xb3   : > { %11048 = vmatprep.mubr.bf16.mxu1 %v3997_v1  ;;  %v17008_v1 = vld [vmem:[%s18281_s13 + $0x240] ss:$20 sps:$4 sm:$0xff]  }
  0xb9   : > { %16723 = vmatmul.mubr.msk.bf16.vlgmr.msra.gmra.mrb[64].mxu0 %vm1275_vm0, %v16954_v2  ;;  %v17004_v2 = vld [vmem:[%s22285_s4 + $0x1a0] sm:$0xff]  }
  0xba   : > { %11049 = vmatmul.mubr.bf16.vlgmr.msra.gmra.mrb[64].mxu1 %v18446_v5  ;;  %15351 = vmatpush3.bf16.msra.mxu0 %v16957_v4  ;;  %v18607_v4 = vld [vmem:[%s18419_s22 + $0x8] sm:$0xff] }
  0xbb   : > { %15329 = vmatpush3.bf16.msra.mxu1 %v16955_v3  ;;  %16726 = vmatprep.mubr.msk.bf16.mxu0 %vm1275_vm0, %v16960_v7  ;;  %v17006_v3 = vld [vmem:[%s22285_s4 + $0x1e8] sm:$0xff]  }
  0xbc   : > { %15330 = vmatprep.subr.bf16.mxu1 %v16958_v6  ;;  %15352 = vmatprep.subr.bf16.mxu0 %v16964_v8  ;;  %v17007_v5 = vld [vmem:[%s22285_s4 + $0x1a8] sm:$0xff]   ;;  %v17009_v6 = vld [vmem:[%s22285_s4 + $0x1f0] sm:$0xff]   ;;  %v18618_v8 = vrot.slane %v18607_v4, %v18423_v55 }
  0xbd   : > { %11088 = vmatprep.mubr.bf16.mxu1 %v4007_v10  ;;  %v17010_v7 = vld [vmem:[%s18281_s13 + $0x268] ss:$20 sps:$4 sm:$0xff]   ;;  %s15058_s13 = sshll.u32 %s18156_s8, 4 }
  0xbe   : > { %15353 = vmatpush3.bf16.msra.mxu0 %v16965_v12  ;;  %v17014_v10 = vld [vmem:[%s22285_s4 + $0x1f8] sm:$0xff]   ;;  %s22241_s30 = scalar_lea.hbm %s22292_s11, %s15058_s13 }
  0xbf   : > { %15331 = vmatpush3.bf16.msra.mxu1 %v16959_v9  ;;  %15354 = vmatprep.subr.bf16.mxu0 %v16972_v13  ;;  %v17012_v9 = vld [vmem:[%s22285_s4 + $0x1b0] sm:$0xff]   ;;  %v17015_v12 = vld [vmem:[%s22285_s4 + $0x1b8] sm:$0xff]   ;;  %v3990_v13 = vrot.slane %v18529_v35, %v18423_v55  ;;  %v17036_v35 = vld [vmem:[%s22285_s4 + $0x2a0] sm:$0xff]  }
  0xc0   : > { %15332 = vmatprep.subr.bf16.mxu1 %v16961_v11  ;;  %v4024_v11 = vcombine.high %v18618_v8, %v18618_v8 }
  0xc1   : > { %16727 = vmatmul.mubr.msk.bf16.gmra.mrb[68].mxu0 %vm1275_vm0, %v16962_v14  ;;  %v17018_v14 = vld [vmem:[%s22285_s4 + $0x2c0] sm:$0xff]  }
  0xc2   : > { %16730 = vmatprep.mubr.msk.bf16.mxu0 %vm1275_vm0, %v16968_v16  ;;  %15355 = vmatpush3.bf16.msra.mxu0 %v16973_v17  ;;  %v17020_v16 = vld [vmem:[%s22285_s4 + $0x280] sm:$0xff]   ;;  %v4046_v17 = vrot.slane %v4024_v11, %v18423_v55 }
  0xc3   : > { %15333 = vmatpush3.bf16.msra.mxu1 %v16963_v15  ;;  %15356 = vmatprep.subr.bf16.mxu0 %v16980_v18  ;;  %v17019_v15 = vld [vmem:[%s22285_s4 + $0x200] sm:$0xff]   ;;  %v4006_v18 = vcombine.high %v3990_v13, %v3990_v13 }
  0xc4   : > { %15334 = vmatprep.subr.bf16.mxu1 %v16966_v19  ;;  %v17021_v19 = vld [vmem:[%s22285_s4 + $0x248] sm:$0xff]  }
  0xc6   : > { %15357 = vmatpush3.bf16.msra.mxu0 %v16981_v22  ;;  %v17024_v22 = vld [vmem:[%s22285_s4 + $0x288] sm:$0xff]  }
  0xc7   : > { %15335 = vmatpush3.bf16.msra.mxu1 %v16967_v20  ;;  %15358 = vmatprep.subr.bf16.mxu0 %v16987_v23  ;;  %v17022_v20 = vld [vmem:[%s22285_s4 + $0x2c8] sm:$0xff]   ;;  %v4056_v23 = vcombine.high %v4046_v17, %v4046_v17 }
  0xc8   : > { %15336 = vmatprep.subr.bf16.mxu1 %v16969_v21  ;;  %v17023_v21 = vld [vmem:[%s22285_s4 + $0x208] sm:$0xff]  }
  0xc9   : > { %16731 = vmatmul.mubr.msk.bf16.gmra.mrb[72].mxu0 %vm1275_vm0, %v16970_v24  ;;  %v17025_v24 = vld [vmem:[%s22285_s4 + $0x250] sm:$0xff]  }
  0xca   : > { %16734 = vmatprep.mubr.msk.bf16.mxu0 %vm1275_vm0, %v16976_v26  ;;  %15359 = vmatpush3.bf16.msra.mxu0 %v16989_v27  ;;  %v17027_v26 = vld [vmem:[%s22285_s4 + $0x210] sm:$0xff]  }
  0xcb   : > { %15337 = vmatpush3.bf16.msra.mxu1 %v16971_v25  ;;  %15360 = vmatprep.subr.bf16.mxu0 %v16995_v28  ;;  %v17026_v25 = vld [vmem:[%s22285_s4 + $0x2d0] sm:$0xff]   ;;  %v17029_v28 = vld [vmem:[%s22285_s4 + $0x258] sm:$0xff]  }
  0xcc   : > { %15338 = vmatprep.subr.bf16.mxu1 %v16974_v30  ;;  %v17028_v27 = vld [vmem:[%s22285_s4 + $0x290] sm:$0xff]   ;;  %v17031_v30 = vld [vmem:[%s22285_s4 + $0x218] sm:$0xff]  }
  0xce   : > { %15361 = vmatpush3.bf16.msra.mxu0 %v16997_v33  ;;  %v17034_v33 = vld [vmem:[%s22285_s4 + $0x2e0] sm:$0xff]  }
  0xcf   : > { %15339 = vmatpush3.bf16.msra.mxu1 %v16975_v31  ;;  %15362 = vmatprep.subr.bf16.mxu0 %v17003_v34  ;;  %v17032_v31 = vld [vmem:[%s22285_s4 + $0x298] sm:$0xff]   ;;  %v17035_v34 = vld [vmem:[%s22285_s4 + $0x220] sm:$0xff]  }
  0xd0   : > { %15340 = vmatprep.subr.bf16.mxu1 %v16977_v32  ;;  %v17033_v32 = vld [vmem:[%s22285_s4 + $0x260] sm:$0xff]  }
  0xd1   : > { %16735 = vmatmul.mubr.msk.bf16.gmra.mrb[76].mxu0 %vm1275_vm0, %v16978_v36  ;;  %v17037_v36 = vld [vmem:[%s22285_s4 + $0x268] sm:$0xff]  }
  0xd2   : > { %16738 = vmatprep.mubr.msk.bf16.mxu0 %vm1275_vm0, %v16984_v38  ;;  %15363 = vmatpush3.bf16.msra.mxu0 %v17005_v39  ;;  %v17039_v38 = vld [vmem:[%s22285_s4 + $0x228] sm:$0xff]  }
  0xd3   : > { %15341 = vmatpush3.bf16.msra.mxu1 %v16979_v37  ;;  %15364 = vmatprep.subr.bf16.mxu0 %v17011_v40  ;;  %v17038_v37 = vld [vmem:[%s22285_s4 + $0x2e8] sm:$0xff]   ;;  %v4009_v40 = vcombine.high %v18607_v4, %v18607_v4  ;;  %v4032_v4 = vrot.slane %v18618_v8, %v18423_v55  ;;  %v17051_v8 = vld [vmem:[%s22285_s4 + $0x300] sm:$0xff]  }
  0xd4   : > { %15342 = vmatprep.subr.bf16.mxu1 %v16982_v42  ;;  %v17040_v39 = vld [vmem:[%s22285_s4 + $0x2a8] sm:$0xff]   ;;  %v18712_v42 = vld [vmem:[%s22283_s2] ss:$0 sm:$0xff] }
  0xd6   : > { %15365 = vmatpush3.bf16.msra.mxu0 %v17013_v44 }
  0xd7   : > { %15343 = vmatpush3.bf16.msra.mxu1 %v16983_v43  ;;  %15394 = vmatprep.subr.bf16.mxu0 %v17017_v47  ;;  %v17042_v43 = vld [vmem:[%s22285_s4 + $0x2f0] sm:$0xff]  }
  0xd8   : > { %15372 = vmatprep.subr.bf16.mxu1 %v16985_v48 }
  0xd9   : > { %16739 = vmatmul.mubr.msk.bf16.gmra.mrb[80].mxu0 %vm1275_vm0, %v16986_v49  ;;  %v17044_v49 = vld [vmem:[%s22285_s4 + $0x2b0] sm:$0xff]  }
  0xda   : > { %11089 = vmatmul.mubr.bf16.vlgmr.msra.gmra.mrb[68].mxu1 %v4005_v50  ;;  %16742 = vmatprep.mubr.msk.bf16.mxu0 %vm1275_vm0, %v16992_v51  ;;  %v17045_v50 = vld [vmem:[%s22285_s4 + $0x278] sm:$0xff]   ;;  %v18727_v51 = vrot.slane %v4009_v40, %v18423_v55  ;;  %v17060_v40 = vld [vmem:[%s22285_s4 + $0x390] sm:$0xff]  }
  0xdb   : > { %15373 = vmatpush3.bf16.msra.mxu1 %v16988_v52  ;;  %11168 = vmatprep.mubr.bf16.mxu1 %v4008_v53 }
  0xdc   : > { %15374 = vmatprep.subr.bf16.mxu1 %v16990_v54 }
  0xdf   : > { %15375 = vmatpush3.bf16.msra.mxu1 %v16991_v56 }
  0xe0   : > { %15376 = vmatprep.subr.bf16.mxu1 %v16993_v57 }
  0xe1   : > { %16743 = vmatmul.mubr.msk.bf16.gmra.mrb[84].mxu0 %vm1275_vm0, %v16994_v58 }
  0xe2   : > { %16746 = vmatprep.mubr.msk.bf16.mxu0 %vm1275_vm0, %v17000_v59 }
  0xe3   : > { %15377 = vmatpush3.bf16.msra.mxu1 %v16996_v60 }
  0xe4   : > { %15378 = vmatprep.subr.bf16.mxu1 %v16998_v61 }
  0xe7   : > { %15379 = vmatpush3.bf16.msra.mxu1 %v16999_v62  ;;  %v17046_v62 = vld [vmem:[%s22285_s4 + $0x2f8] sm:$0xff]  }
  0xe8   : > { %15380 = vmatprep.subr.bf16.mxu1 %v17001_v63 }
  0xe9   : > { %16747 = vmatmul.mubr.msk.bf16.gmra.mrb[88].mxu0 %vm1275_vm0, %v17002_v0  ;;  %v17047_v0 = vld [vmem:[%s22285_s4 + $0x238] sm:$0xff]  }
  0xea   : > { %16750 = vmatprep.mubr.msk.bf16.mxu0 %vm1275_vm0, %v17008_v1  ;;  %v4025_v1 = vcombine.high %v18727_v51, %v18727_v51 }
  0xeb   : > { %15381 = vmatpush3.bf16.msra.mxu1 %v17004_v2 }
  0xec   : > { %15382 = vmatprep.subr.bf16.mxu1 %v17006_v3  ;;  %v17048_v3 = vld [vmem:[%s22285_s4 + $0x2b8] sm:$0xff]  }
  0xef   : > { %15383 = vmatpush3.bf16.msra.mxu1 %v17007_v5 }
  0xf0   : > { %15384 = vmatprep.subr.bf16.mxu1 %v17009_v6  ;;  %v17049_v6 = vld [vmem:[%s22285_s4 + $0x340] sm:$0xff]  }
  0xf1   : > { %16751 = vmatmul.mubr.msk.bf16.gmra.mrb[92].mxu0 %vm1275_vm0, %v17010_v7 }
  0xf2   : > { %11128 = vmatprep.mubr.bf16.mxu0 %v4004_v45  ;;  %v17043_v45 = vld [vmem:[%s22285_s4 + $0x230] sm:$0xff]  }
  0xf3   : > { %15385 = vmatpush3.bf16.msra.mxu1 %v17012_v9  ;;  %v17050_v9 = vld [vmem:[%s22285_s4 + $0x3c0] sm:$0xff]  }
  0xf4   : > { %15386 = vmatprep.subr.bf16.mxu1 %v17014_v10 }
  0xf7   : > { %15387 = vmatpush3.bf16.msra.mxu1 %v17015_v12 }
  0xf8   : > { %15416 = vmatprep.subr.bf16.mxu1 %v17018_v14  ;;  %v4053_v14 = vrot.slane %v4025_v1, %v18423_v55 }
  0xf9   : > { %11129 = vmatmul.mubr.bf16.vlgmr.msra.gmra.mrb[96].mxu0 %v3990_v13  ;;  %v17052_v13 = vld [vmem:[%s22285_s4 + $0x380] sm:$0xff]  }
  0xfa   : > { %11169 = vmatmul.mubr.bf16.vlgmr.msra.gmra.mrb[72].mxu1 %v4006_v18  ;;  %15395 = vmatpush3.bf16.msra.mxu0 %v17019_v15  ;;  %v4054_v18 = vcombine.high %v4032_v4, %v4032_v4 }
  0xfb   : > { %15417 = vmatpush3.bf16.msra.mxu1 %v17020_v16  ;;  %15396 = vmatprep.subr.bf16.mxu0 %v17021_v19  ;;  %v17053_v19 = vld [vmem:[%s22285_s4 + $0x348] sm:$0xff]  }
  0xfc   : > { %15418 = vmatprep.subr.bf16.mxu1 %v17022_v20  ;;  %11208 = vmatprep.mubr.bf16.mxu0 %v4046_v17  ;;  %v17054_v20 = vld [vmem:[%s22285_s4 + $0x3c8] sm:$0xff]  }
  0xfd   : > { %11248 = vmatprep.mubr.bf16.mxu1 %v4056_v23 }
  0xfe   : > { %15397 = vmatpush3.bf16.msra.mxu0 %v17023_v21 }
  0xff   : > { %15419 = vmatpush3.bf16.msra.mxu1 %v17024_v22  ;;  %15398 = vmatprep.subr.bf16.mxu0 %v17025_v24 }
 0x100   : > { %15420 = vmatprep.subr.bf16.mxu1 %v17026_v25 }
 0x102   : > { %15399 = vmatpush3.bf16.msra.mxu0 %v17027_v26 }
 0x103   : > { %15421 = vmatpush3.bf16.msra.mxu1 %v17028_v27  ;;  %15400 = vmatprep.subr.bf16.mxu0 %v17029_v28  ;;  %v17055_v27 = vld [vmem:[%s22285_s4 + $0x308] sm:$0xff]  }
 0x104   : > { %15422 = vmatprep.subr.bf16.mxu1 %v17030_v29  ;;  %v17056_v29 = vld [vmem:[%s22285_s4 + $0x388] sm:$0xff]  }
 0x106   : > { %15401 = vmatpush3.bf16.msra.mxu0 %v17031_v30  ;;  %v4057_v30 = vcombine.high %v4053_v14, %v4053_v14 }
 0x107   : > { %15423 = vmatpush3.bf16.msra.mxu1 %v17032_v31  ;;  %15402 = vmatprep.subr.bf16.mxu0 %v17033_v32  ;;  %v17057_v32 = vld [vmem:[%s22285_s4 + $0x350] sm:$0xff]  }
 0x108   : > { %15424 = vmatprep.subr.bf16.mxu1 %v17034_v33  ;;  %v17058_v33 = vld [vmem:[%s22285_s4 + $0x3d0] sm:$0xff]  }
 0x10a   : > { %15403 = vmatpush3.bf16.msra.mxu0 %v17035_v34 }
 0x10b   : > { %15425 = vmatpush3.bf16.msra.mxu1 %v17036_v35  ;;  %15404 = vmatprep.subr.bf16.mxu0 %v17037_v36  ;;  %v17059_v36 = vld [vmem:[%s22285_s4 + $0x310] sm:$0xff]  }
 0x10c   : > { %v15078_v44 = vpop.f32.mrb[0].mxu0  ;;  %15426 = vmatprep.subr.bf16.mxu1 %v17038_v37 }
 0x10d   : > { %v15190_v47 = vpop.f32.mrb[0].mxu1  ;;  %v15079_v48 = vpop.f32.mrb[1].mxu0 }
 0x10e   : > { %v15080_v52 = vadd.f32 %v15079_v48, %v15078_v44  ;;  %v15191_v53 = vpop.f32.mrb[1].mxu1  ;;  %15405 = vmatpush3.bf16.msra.mxu0 %v17039_v38  ;;  %v15081_v54 = vpop.f32.mrb[2].mxu0 }
 0x10f   : > { %v15192_v56 = vadd.f32 %v15191_v53, %v15190_v47  ;;  %15427 = vmatpush3.bf16.msra.mxu1 %v17040_v39  ;;  %v15193_v57 = vpop.f32.mrb[2].mxu1  ;;  %v15082_v58 = vpop.f32.mrb[3].mxu0  ;;  %15406 = vmatprep.subr.bf16.mxu0 %v17041_v41  ;;  %v17062_v47 = vld [vmem:[%s22285_s4 + $0x3d8] sm:$0xff]  }
 0x110   : > { %v1359_v59 = vadd.f32 %v15080_v52, %v18712_v42  ;;  %v15083_v60 = vadd.f32 %v15082_v58, %v15081_v54  ;;  %v15194_v61 = vpop.f32.mrb[3].mxu1  ;;  %15428 = vmatprep.subr.bf16.mxu1 %v17042_v43  ;;  %v17064_v58 = vld [vmem:[%s22285_s4 + $0x398] sm:$0xff]  }
 0x111   : > { %v15195_v63 = vadd.f32 %v15194_v61, %v15193_v57 }
 0x112   : > { %v1362_v2 = vadd.f32 %v15083_v60, %v18712_v42  ;;  %15407 = vmatpush3.bf16.msra.mxu0 %v17043_v45  ;;  %v18744_v5 = vadd.f32 %v15192_v56, %v1359_v59  ;;  %v17061_v45 = vld [vmem:[%s22285_s4 + $0x358] sm:$0xff]   ;;  %v17065_v60 = vld [vmem:[%s22285_s4 + $0x360] sm:$0xff]  }
 0x113   : > { %15429 = vmatpush3.bf16.msra.mxu1 %v17044_v49  ;;  %15408 = vmatprep.subr.bf16.mxu0 %v17045_v50  ;;  %v17063_v56 = vld [vmem:[%s22285_s4 + $0x318] sm:$0xff]  }
 0x114   : > { %v15084_v7 = vpop.f32.mrb[4].mxu0  ;;  %15430 = vmatprep.subr.bf16.mxu1 %v17046_v62  ;;  %v18752_v10 = vadd.f32 %v15195_v63, %v1362_v2  ;;  %v17066_v62 = vld [vmem:[%s22285_s4 + $0x3e0] sm:$0xff]  }
 0x115   : > { %v15196_v11 = vpop.f32.mrb[4].mxu1  ;;  %v15085_v12 = vpop.f32.mrb[5].mxu0 }
 0x116   : > { %v15086_v15 = vadd.f32 %v15085_v12, %v15084_v7  ;;  %v15197_v16 = vpop.f32.mrb[5].mxu1  ;;  %15409 = vmatpush3.bf16.msra.mxu0 %v17047_v0  ;;  %v15087_v17 = vpop.f32.mrb[6].mxu0  ;;  %v17067_v0 = vld [vmem:[%s22285_s4 + $0x320] sm:$0xff]   ;;  %v17070_v12 = vld [vmem:[%s22285_s4 + $0x3e8] sm:$0xff]  }
 0x117   : > { %v15198_v21 = vadd.f32 %v15197_v16, %v15196_v11  ;;  %15431 = vmatpush3.bf16.msra.mxu1 %v17048_v3  ;;  %v15199_v22 = vpop.f32.mrb[6].mxu1  ;;  %v15088_v23 = vpop.f32.mrb[7].mxu0  ;;  %15438 = vmatprep.subr.bf16.mxu0 %v17049_v6  ;;  %v17069_v6 = vld [vmem:[%s22285_s4 + $0x368] sm:$0xff]  }
 0x118   : > { %v1367_v24 = vadd.f32 %v15086_v15, %v18712_v42  ;;  %v15089_v25 = vadd.f32 %v15088_v23, %v15087_v17  ;;  %v15200_v26 = vpop.f32.mrb[7].mxu1  ;;  %15460 = vmatprep.subr.bf16.mxu1 %v17050_v9 }
 0x119   : > { %v15201_v28 = vadd.f32 %v15200_v26, %v15199_v22  ;;  %11209 = vmatmul.mubr.bf16.vlgmr.msra.gmra.mrb[100].mxu0 %v4032_v4  ;;  %v17068_v4 = vld [vmem:[%s22285_s4 + $0x3a0] sm:$0xff]   ;;  %v18836_v22 = vld [vmem:[%s18419_s22 + $0x10] sm:$0xff] }
 0x11a   : > { %v1370_v31 = vadd.f32 %v15089_v25, %v18712_v42  ;;  %11249 = vmatmul.mubr.bf16.vlgmr.msra.gmra.mrb[76].mxu1 %v4054_v18  ;;  %15439 = vmatpush3.bf16.msra.mxu0 %v17051_v8  ;;  %v18781_v34 = vadd.f32 %v15198_v21, %v1367_v24  ;;  %v17071_v18 = vld [vmem:[%s22285_s4 + $0x328] sm:$0xff]   ;;  %v17073_v24 = vld [vmem:[%s22285_s4 + $0x370] sm:$0xff]  }
 0x11b   : > { %15461 = vmatpush3.bf16.msra.mxu1 %v17052_v13  ;;  %15440 = vmatprep.subr.bf16.mxu0 %v17053_v19  ;;  %v17074_v26 = vld [vmem:[%s22285_s4 + $0x3f0] sm:$0xff]  }
 0x11c   : > { %v15090_v35 = vpop.f32.mrb[8].mxu0  ;;  %15462 = vmatprep.subr.bf16.mxu1 %v17054_v20  ;;  %11288 = vmatprep.mubr.bf16.mxu0 %v4053_v14  ;;  %v18786_v37 = vadd.f32 %v15201_v28, %v1370_v31  ;;  %v17072_v20 = vld [vmem:[%s22285_s4 + $0x3a8] sm:$0xff]   ;;  %v17076_v31 = vld [vmem:[%s22285_s4 + $0x3b0] sm:$0xff]  }
 0x11d   : > { %v15202_v38 = vpop.f32.mrb[8].mxu1  ;;  %v15091_v39 = vpop.f32.mrb[9].mxu0  ;;  %11328 = vmatprep.mubr.bf16.mxu1 %v4057_v30  ;;  %v17075_v30 = vld [vmem:[%s22285_s4 + $0x330] sm:$0xff]  }
 0x11e   : > { %v15092_v41 = vadd.f32 %v15091_v39, %v15090_v35  ;;  %v15203_v43 = vpop.f32.mrb[9].mxu1  ;;  %15441 = vmatpush3.bf16.msra.mxu0 %v17055_v27  ;;  %v15093_v44 = vpop.f32.mrb[10].mxu0 }
 0x11f   : > { %v15204_v48 = vadd.f32 %v15203_v43, %v15202_v38  ;;  %15463 = vmatpush3.bf16.msra.mxu1 %v17056_v29  ;;  %v15205_v49 = vpop.f32.mrb[10].mxu1  ;;  %v15094_v50 = vpop.f32.mrb[11].mxu0  ;;  %15442 = vmatprep.subr.bf16.mxu0 %v17057_v32  ;;  %v18856_v32 = vrot.slane %v18836_v22, %v18423_v55  ;;  %v17078_v43 = vld [vmem:[%s22285_s4 + $0x3f8] sm:$0xff]  }
 0x120   : > { %v1375_v52 = vadd.f32 %v15092_v41, %v18712_v42  ;;  %v15095_v53 = vadd.f32 %v15094_v50, %v15093_v44  ;;  %v15206_v54 = vpop.f32.mrb[11].mxu1  ;;  %15464 = vmatprep.subr.bf16.mxu1 %v17058_v33  ;;  %v17077_v41 = vld [vmem:[%s22285_s4 + $0x378] sm:$0xff]  }
 0x121   : > { %v15207_v57 = vadd.f32 %v15206_v54, %v15205_v49  ;;  %v17080_v50 = vld [vmem:[%s22285_s4 + $0x3b8] sm:$0xff]   ;;  %v4039_v54 = vrot.slane %v18727_v51, %v18423_v55 }
 0x122   : > { %v1378_v59 = vadd.f32 %v15095_v53, %v18712_v42  ;;  %15443 = vmatpush3.bf16.msra.mxu0 %v17059_v36  ;;  %v18808_v61 = vadd.f32 %v15204_v48, %v1375_v52  ;;  %v17079_v48 = vld [vmem:[%s22285_s4 + $0x338] sm:$0xff]   ;;  %v4073_v52 = vcombine.high %v18856_v32, %v18856_v32 }
 0x123   : > { %15465 = vmatpush3.bf16.msra.mxu1 %v17060_v40  ;;  %15444 = vmatprep.subr.bf16.mxu0 %v17061_v45 }
 0x124   : > { %v15096_v63 = vpop.f32.mrb[12].mxu0  ;;  %15466 = vmatprep.subr.bf16.mxu1 %v17062_v47  ;;  %v18816_v1 = vadd.f32 %v15207_v57, %v1378_v59 }
 0x125   : > { %v15208_v2 = vpop.f32.mrb[12].mxu1  ;;  %v15097_v3 = vpop.f32.mrb[13].mxu0 }
 0x126   : > { %v15098_v7 = vadd.f32 %v15097_v3, %v15096_v63  ;;  %v15209_v9 = vpop.f32.mrb[13].mxu1  ;;  %15445 = vmatpush3.bf16.msra.mxu0 %v17063_v56  ;;  %v15099_v11 = vpop.f32.mrb[14].mxu0  ;;  %v17082_v56 = vld [vmem:[%s22285_s4 + $0x440] sm:$0xff]   ;;  %v4095_v3 = vrot.slane %v4073_v52, %v18423_v55 }
 0x127   : > { %v15210_v8 = vadd.f32 %v15209_v9, %v15208_v2  ;;  %15467 = vmatpush3.bf16.msra.mxu1 %v17064_v58  ;;  %v15211_v13 = vpop.f32.mrb[14].mxu1  ;;  %v15100_v14 = vpop.f32.mrb[15].mxu0  ;;  %15446 = vmatprep.subr.bf16.mxu0 %v17065_v60  ;;  %v17083_v58 = vld [vmem:[%s22285_s4 + $0x4c0] sm:$0xff]   ;;  %v17086_v2 = vld [vmem:[%s22285_s4 + $0x448] sm:$0xff]   ;;  %v4055_v9 = vcombine.high %v4039_v54, %v4039_v54 }
 0x128   : > { %v1383_v15 = vadd.f32 %v15098_v7, %v18712_v42  ;;  %v15101_v16 = vadd.f32 %v15100_v14, %v15099_v11  ;;  %v15212_v17 = vpop.f32.mrb[15].mxu1  ;;  %15468 = vmatprep.subr.bf16.mxu1 %v17066_v62  ;;  %v17084_v60 = vld [vmem:[%s22285_s4 + $0x400] sm:$0xff]  }
 0x129   : > { %v15213_v19 = vadd.f32 %v15212_v17, %v15211_v13 }
 0x12a   : > { %v1386_v21 = vadd.f32 %v15101_v16, %v18712_v42  ;;  %15447 = vmatpush3.bf16.msra.mxu0 %v17067_v0  ;;  %v18838_v23 = vadd.f32 %v15210_v8, %v1383_v15  ;;  %v17085_v0 = vld [vmem:[%s22285_s4 + $0x480] sm:$0xff]   ;;  %v17087_v16 = vld [vmem:[%s22285_s4 + $0x4c8] sm:$0xff]  }
 0x12b   : > { %15469 = vmatpush3.bf16.msra.mxu1 %v17068_v4  ;;  %15448 = vmatprep.subr.bf16.mxu0 %v17069_v6 }
 0x12c   : > { %v15102_v25 = vpop.f32.mrb[16].mxu0  ;;  %15470 = vmatprep.subr.bf16.mxu1 %v17070_v12  ;;  %v18846_v27 = vadd.f32 %v15213_v19, %v1386_v21  ;;  %v4105_v19 = vcombine.high %v4095_v3, %v4095_v3  ;;  %v17089_v21 = vld [vmem:[%s22285_s4 + $0x488] sm:$0xff]  }
 0x12d   : > { %v15214_v28 = vpop.f32.mrb[16].mxu1  ;;  %v15103_v29 = vpop.f32.mrb[17].mxu0 }
 0x12e   : > { %v15104_v33 = vadd.f32 %v15103_v29, %v15102_v25  ;;  %v15215_v35 = vpop.f32.mrb[17].mxu1  ;;  %15449 = vmatpush3.bf16.msra.mxu0 %v17071_v18  ;;  %v15105_v36 = vpop.f32.mrb[18].mxu0  ;;  %v17088_v18 = vld [vmem:[%s22285_s4 + $0x408] sm:$0xff]   ;;  %v17090_v25 = vld [vmem:[%s22285_s4 + $0x450] sm:$0xff]  }
 0x12f   : > { %v15216_v38 = vadd.f32 %v15215_v35, %v15214_v28  ;;  %15471 = vmatpush3.bf16.msra.mxu1 %v17072_v20  ;;  %v15217_v39 = vpop.f32.mrb[18].mxu1  ;;  %v15106_v40 = vpop.f32.mrb[19].mxu0  ;;  %15450 = vmatprep.subr.bf16.mxu0 %v17073_v24  ;;  %v17091_v28 = vld [vmem:[%s22285_s4 + $0x4d0] sm:$0xff]  }
 0x130   : > { %v1391_v44 = vadd.f32 %v15104_v33, %v18712_v42  ;;  %v15107_v45 = vadd.f32 %v15106_v40, %v15105_v36  ;;  %v15218_v47 = vpop.f32.mrb[19].mxu1  ;;  %15472 = vmatprep.subr.bf16.mxu1 %v17074_v26  ;;  %v17092_v33 = vld [vmem:[%s22285_s4 + $0x410] sm:$0xff]  }
 0x131   : > { %v15219_v49 = vadd.f32 %v15218_v47, %v15217_v39  ;;  %v17093_v35 = vld [vmem:[%s22285_s4 + $0x490] sm:$0xff]  }
 0x132   : > { %v1394_v53 = vadd.f32 %v15107_v45, %v18712_v42  ;;  %15451 = vmatpush3.bf16.msra.mxu0 %v17075_v30  ;;  %v18879_v57 = vadd.f32 %v15216_v38, %v1391_v44  ;;  %v17094_v44 = vld [vmem:[%s22285_s4 + $0x458] sm:$0xff]  }
 0x133   : > { %15473 = vmatpush3.bf16.msra.mxu1 %v17076_v31  ;;  %15452 = vmatprep.subr.bf16.mxu0 %v17077_v41  ;;  %v17095_v45 = vld [vmem:[%s22285_s4 + $0x4d8] sm:$0xff]  }
 0x134   : > { %v15108_v59 = vpop.f32.mrb[20].mxu0  ;;  %15474 = vmatprep.subr.bf16.mxu1 %v17078_v43  ;;  %v18887_v62 = vadd.f32 %v15219_v49, %v1394_v53  ;;  %v17097_v53 = vld [vmem:[%s22285_s4 + $0x498] sm:$0xff]  }
 0x135   : > { %v15220_v51 = vpop.f32.mrb[20].mxu1  ;;  %v15109_v63 = vpop.f32.mrb[21].mxu0 }
 0x136   : > { %v15110_v4 = vadd.f32 %v15109_v63, %v15108_v59  ;;  %v15221_v6 = vpop.f32.mrb[21].mxu1  ;;  %15453 = vmatpush3.bf16.msra.mxu0 %v17079_v48  ;;  %v15111_v7 = vpop.f32.mrb[22].mxu0  ;;  %v17099_v59 = vld [vmem:[%s22285_s4 + $0x4e0] sm:$0xff]  }
 0x137   : > { %v15222_v11 = vadd.f32 %v15221_v6, %v15220_v51  ;;  %15475 = vmatpush3.bf16.msra.mxu1 %v17080_v50  ;;  %v15223_v12 = vpop.f32.mrb[22].mxu1  ;;  %v15112_v8 = vpop.f32.mrb[23].mxu0  ;;  %15482 = vmatprep.subr.bf16.mxu0 %v17082_v56  ;;  %v17096_v50 = vld [vmem:[%s22285_s4 + $0x418] sm:$0xff]   ;;  %v17098_v56 = vld [vmem:[%s22285_s4 + $0x460] sm:$0xff]  }
 0x138   : > { %v1399_v13 = vadd.f32 %v15110_v4, %v18712_v42  ;;  %v15113_v14 = vadd.f32 %v15112_v8, %v15111_v7  ;;  %v15224_v15 = vpop.f32.mrb[23].mxu1  ;;  %15504 = vmatprep.subr.bf16.mxu1 %v17083_v58  ;;  %v17100_v51 = vld [vmem:[%s22285_s4 + $0x420] sm:$0xff]   ;;  %v17102_v4 = vld [vmem:[%s22285_s4 + $0x468] sm:$0xff]  }
 0x139   : > { %v15225_v17 = vadd.f32 %v15224_v15, %v15223_v12  ;;  %11289 = vmatmul.mubr.bf16.vlgmr.msra.gmra.mrb[104].mxu0 %v4039_v54 }
 0x13a   : > { %v1402_v20 = vadd.f32 %v15113_v14, %v18712_v42  ;;  %11329 = vmatmul.mubr.bf16.vlgmr.msra.gmra.mrb[80].mxu1 %v4055_v9  ;;  %15483 = vmatpush3.bf16.msra.mxu0 %v17084_v60  ;;  %v18907_v24 = vadd.f32 %v15222_v11, %v1399_v13 }
 0x13b   : > { %15505 = vmatpush3.bf16.msra.mxu1 %v17085_v0  ;;  %15484 = vmatprep.subr.bf16.mxu0 %v17086_v2 }
 0x13c   : > { %v15114_v26 = vpop.f32.mrb[24].mxu0  ;;  %15506 = vmatprep.subr.bf16.mxu1 %v17087_v16  ;;  %11368 = vmatprep.mubr.bf16.mxu0 %v4095_v3  ;;  %v18915_v29 = vadd.f32 %v15225_v17, %v1402_v20  ;;  %v17101_v3 = vld [vmem:[%s22285_s4 + $0x4a0] sm:$0xff]   ;;  %v17103_v16 = vld [vmem:[%s22285_s4 + $0x4e8] sm:$0xff]  }
 0x13d   : > { %v15226_v30 = vpop.f32.mrb[24].mxu1  ;;  %v15115_v31 = vpop.f32.mrb[25].mxu0  ;;  %11408 = vmatprep.mubr.bf16.mxu1 %v4105_v19  ;;  %v4058_v19 = vcombine.high %v18836_v22, %v18836_v22  ;;  %v17107_v22 = vld [vmem:[%s22285_s4 + $0x4f0] sm:$0xff]  }
 0x13e   : > { %v15116_v36 = vadd.f32 %v15115_v31, %v15114_v26  ;;  %v15227_v38 = vpop.f32.mrb[25].mxu1  ;;  %15485 = vmatpush3.bf16.msra.mxu0 %v17088_v18  ;;  %v15117_v39 = vpop.f32.mrb[26].mxu0  ;;  %v17104_v18 = vld [vmem:[%s22285_s4 + $0x428] sm:$0xff]   ;;  %v17106_v26 = vld [vmem:[%s22285_s4 + $0x470] sm:$0xff]  }
 0x13f   : > { %v15228_v40 = vadd.f32 %v15227_v38, %v15226_v30  ;;  %15507 = vmatpush3.bf16.msra.mxu1 %v17089_v21  ;;  %v15229_v41 = vpop.f32.mrb[26].mxu1  ;;  %v15118_v43 = vpop.f32.mrb[27].mxu0  ;;  %15486 = vmatprep.subr.bf16.mxu0 %v17090_v25  ;;  %v17105_v21 = vld [vmem:[%s22285_s4 + $0x4a8] sm:$0xff]   ;;  %v18986_v38 = vrot.slane %v4058_v19, %v18423_v55 }
 0x140   : > { %v1407_v47 = vadd.f32 %v15116_v36, %v18712_v42  ;;  %v15119_v48 = vadd.f32 %v15118_v43, %v15117_v39  ;;  %v15230_v49 = vpop.f32.mrb[27].mxu1  ;;  %15508 = vmatprep.subr.bf16.mxu1 %v17091_v28  ;;  %v17109_v36 = vld [vmem:[%s22285_s4 + $0x4b0] sm:$0xff]  }
 0x141   : > { %v15231_v52 = vadd.f32 %v15230_v49, %v15229_v41 }
 0x142   : > { %v1410_v54 = vadd.f32 %v15119_v48, %v18712_v42  ;;  %15487 = vmatpush3.bf16.msra.mxu0 %v17092_v33  ;;  %v18940_v58 = vadd.f32 %v15228_v40, %v1407_v47  ;;  %v17110_v47 = vld [vmem:[%s22285_s4 + $0x478] sm:$0xff]  }
 0x143   : > { %15509 = vmatpush3.bf16.msra.mxu1 %v17093_v35  ;;  %15488 = vmatprep.subr.bf16.mxu0 %v17094_v44  ;;  %v17108_v35 = vld [vmem:[%s22285_s4 + $0x430] sm:$0xff]   ;;  %v17111_v48 = vld [vmem:[%s22285_s4 + $0x4f8] sm:$0xff]  }
 0x144   : > { %v15120_v60 = vpop.f32.mrb[28].mxu0  ;;  %15510 = vmatprep.subr.bf16.mxu1 %v17095_v45  ;;  %v18948_v63 = vadd.f32 %v15231_v52, %v1410_v54 }
 0x145   : > { %v15232_v0 = vpop.f32.mrb[28].mxu1  ;;  %v15121_v2 = vpop.f32.mrb[29].mxu0 }
 0x146   : > { %v15122_v6 = vadd.f32 %v15121_v2, %v15120_v60  ;;  %v15233_v7 = vpop.f32.mrb[29].mxu1  ;;  %15489 = vmatpush3.bf16.msra.mxu0 %v17096_v50  ;;  %v15123_v9 = vpop.f32.mrb[30].mxu0 }
 0x147   : > { %v15234_v11 = vadd.f32 %v15233_v7, %v15232_v0  ;;  %15511 = vmatpush3.bf16.msra.mxu1 %v17097_v53  ;;  %v15235_v12 = vpop.f32.mrb[30].mxu1  ;;  %v15124_v8 = vpop.f32.mrb[31].mxu0  ;;  %15490 = vmatprep.subr.bf16.mxu0 %v17098_v56  ;;  %v17112_v53 = vld [vmem:[%s22285_s4 + $0x438] sm:$0xff]   ;;  %v17114_v0 = vld [vmem:[%s22285_s4 + $0x540] sm:$0xff]  }
 0x148   : > { %v1415_v13 = vadd.f32 %v15122_v6, %v18712_v42  ;;  %v15125_v14 = vadd.f32 %v15124_v8, %v15123_v9  ;;  %v15236_v15 = vpop.f32.mrb[31].mxu1  ;;  %15512 = vmatprep.subr.bf16.mxu1 %v17099_v59  ;;  %v17113_v56 = vld [vmem:[%s22285_s4 + $0x4b8] sm:$0xff]   ;;  %v4074_v59 = vcombine.high %v18986_v38, %v18986_v38  ;;  %v17116_v6 = vld [vmem:[%s22285_s4 + $0x500] sm:$0xff]  }
 0x149   : > { %v15237_v17 = vadd.f32 %v15236_v15, %v15235_v12  ;;  %v17118_v12 = vld [vmem:[%s22285_s4 + $0x548] sm:$0xff]  }
 0x14a   : > { %v1418_v20 = vadd.f32 %v15125_v14, %v18712_v42  ;;  %15491 = vmatpush3.bf16.msra.mxu0 %v17100_v51  ;;  %v18969_v25 = vadd.f32 %v15234_v11, %v1415_v13  ;;  %v4081_v51 = vrot.slane %v18856_v32, %v18423_v55  ;;  %v17117_v11 = vld [vmem:[%s22285_s4 + $0x580] sm:$0xff]   ;;  %v4102_v8 = vrot.slane %v4074_v59, %v18423_v55 }
 0x14b   : > { %15513 = vmatpush3.bf16.msra.mxu1 %v17101_v3  ;;  %15492 = vmatprep.subr.bf16.mxu0 %v17102_v4  ;;  %v17115_v3 = vld [vmem:[%s22285_s4 + $0x5c0] sm:$0xff]  }
 0x14c   : > { %v15126_v28 = vpop.f32.mrb[32].mxu0  ;;  %15514 = vmatprep.subr.bf16.mxu1 %v17103_v16  ;;  %v18977_v30 = vadd.f32 %v15237_v17, %v1418_v20  ;;  %v4103_v16 = vcombine.high %v4081_v51, %v4081_v51 }
 0x14d   : > { %v15238_v31 = vpop.f32.mrb[32].mxu1  ;;  %v15127_v33 = vpop.f32.mrb[33].mxu0 }
 0x14e   : > { %v15128_v39 = vadd.f32 %v15127_v33, %v15126_v28  ;;  %v15239_v40 = vpop.f32.mrb[33].mxu1  ;;  %15493 = vmatpush3.bf16.msra.mxu0 %v17104_v18  ;;  %v15129_v41 = vpop.f32.mrb[34].mxu0  ;;  %v17119_v28 = vld [vmem:[%s22285_s4 + $0x5c8] sm:$0xff]   ;;  %v4106_v33 = vcombine.high %v4102_v8, %v4102_v8 }
 0x14f   : > { %v15240_v43 = vadd.f32 %v15239_v40, %v15238_v31  ;;  %15515 = vmatpush3.bf16.msra.mxu1 %v17105_v21  ;;  %v15241_v44 = vpop.f32.mrb[34].mxu1  ;;  %v15130_v45 = vpop.f32.mrb[35].mxu0  ;;  %15494 = vmatprep.subr.bf16.mxu0 %v17106_v26  ;;  %v17120_v31 = vld [vmem:[%s22285_s4 + $0x508] sm:$0xff]  }
 0x150   : > { %v1423_v49 = vadd.f32 %v15128_v39, %v18712_v42  ;;  %v15131_v50 = vadd.f32 %v15130_v45, %v15129_v41  ;;  %v15242_v52 = vpop.f32.mrb[35].mxu1  ;;  %15516 = vmatprep.subr.bf16.mxu1 %v17107_v22  ;;  %v17122_v39 = vld [vmem:[%s22285_s4 + $0x550] sm:$0xff]  }
 0x151   : > { %v15243_v54 = vadd.f32 %v15242_v52, %v15241_v44  ;;  %v17123_v41 = vld [vmem:[%s22285_s4 + $0x5d0] sm:$0xff]  }
 0x152   : > { %v1426_v60 = vadd.f32 %v15131_v50, %v18712_v42  ;;  %15495 = vmatpush3.bf16.msra.mxu0 %v17108_v35  ;;  %v19009_v2 = vadd.f32 %v15240_v43, %v1423_v49  ;;  %v17126_v49 = vld [vmem:[%s22285_s4 + $0x558] sm:$0xff]  }
 0x153   : > { %15517 = vmatpush3.bf16.msra.mxu1 %v17109_v36  ;;  %15496 = vmatprep.subr.bf16.mxu0 %v17110_v47  ;;  %v17121_v36 = vld [vmem:[%s22285_s4 + $0x588] sm:$0xff]  }
 0x154   : > { %v15132_v4 = vpop.f32.mrb[36].mxu0  ;;  %15518 = vmatprep.subr.bf16.mxu1 %v17111_v48  ;;  %v19017_v7 = vadd.f32 %v15243_v54, %v1426_v60  ;;  %v17125_v48 = vld [vmem:[%s22285_s4 + $0x590] sm:$0xff]   ;;  %v19059_v60 = vld [vmem:[%s22283_s2] ss:$0 sm:$0xff] }
 0x155   : > { %v15244_v32 = vpop.f32.mrb[36].mxu1  ;;  %v15133_v9 = vpop.f32.mrb[37].mxu0 }
 0x156   : > { %v15134_v13 = vadd.f32 %v15133_v9, %v15132_v4  ;;  %v15245_v14 = vpop.f32.mrb[37].mxu1  ;;  %15497 = vmatpush3.bf16.msra.mxu0 %v17112_v53  ;;  %v15135_v15 = vpop.f32.mrb[38].mxu0  ;;  %v17127_v4 = vld [vmem:[%s22285_s4 + $0x5d8] sm:$0xff]  }
 0x157   : > { %v15246_v17 = vadd.f32 %v15245_v14, %v15244_v32  ;;  %15519 = vmatpush3.bf16.msra.mxu1 %v17113_v56  ;;  %v15247_v18 = vpop.f32.mrb[38].mxu1  ;;  %v15136_v19 = vpop.f32.mrb[39].mxu0  ;;  %15526 = vmatprep.subr.bf16.mxu0 %v17114_v0  ;;  %v17128_v32 = vld [vmem:[%s22285_s4 + $0x518] sm:$0xff]   ;;  %v17131_v14 = vld [vmem:[%s22285_s4 + $0x5e0] sm:$0xff]  }
 0x158   : > { %v1431_v20 = vadd.f32 %v15134_v13, %v18712_v42  ;;  %v15137_v21 = vadd.f32 %v15136_v19, %v15135_v15  ;;  %v15248_v26 = vpop.f32.mrb[39].mxu1  ;;  %15548 = vmatprep.subr.bf16.mxu1 %v17115_v3  ;;  %v17133_v19 = vld [vmem:[%s22285_s4 + $0x5a0] sm:$0xff]  }
 0x159   : > { %v15249_v22 = vadd.f32 %v15248_v26, %v15247_v18  ;;  %11369 = vmatmul.mubr.bf16.vlgmr.msra.gmra.mrb[108].mxu0 %v4081_v51  ;;  %v17132_v18 = vld [vmem:[%s22285_s4 + $0x520] sm:$0xff]  }
 0x15a   : > { %v1434_v35 = vadd.f32 %v15137_v21, %v18712_v42  ;;  %11409 = vmatmul.mubr.bf16.vlgmr.msra.gmra.mrb[84].mxu1 %v4103_v16  ;;  %15527 = vmatpush3.bf16.msra.mxu0 %v17116_v6  ;;  %v19040_v40 = vadd.f32 %v15246_v17, %v1431_v20  ;;  %v17124_v42 = vld [vmem:[%s22285_s4 + $0x510] sm:$0xff]  }
 0x15b   : > { %15549 = vmatpush3.bf16.msra.mxu1 %v17117_v11  ;;  %15528 = vmatprep.subr.bf16.mxu0 %v17118_v12  ;;  %v17129_v11 = vld [vmem:[%s22285_s4 + $0x598] sm:$0xff]  }
 0x15c   : > { %v15138_v43 = vpop.f32.mrb[40].mxu0  ;;  %15550 = vmatprep.subr.bf16.mxu1 %v17119_v28  ;;  %11448 = vmatprep.mubr.bf16.mxu0 %v4102_v8  ;;  %v19048_v44 = vadd.f32 %v15249_v22, %v1434_v35  ;;  %v17130_v8 = vld [vmem:[%s22285_s4 + $0x560] sm:$0xff]   ;;  %v17135_v35 = vld [vmem:[%s22285_s4 + $0x5e8] sm:$0xff]  }
 0x15d   : > { %v15250_v45 = vpop.f32.mrb[40].mxu1  ;;  %v15139_v47 = vpop.f32.mrb[41].mxu0  ;;  %11488 = vmatprep.mubr.bf16.mxu1 %v4106_v33  ;;  %v17134_v33 = vld [vmem:[%s22285_s4 + $0x568] sm:$0xff]  }
 0x15e   : > { %v15140_v50 = vadd.f32 %v15139_v47, %v15138_v43  ;;  %v15251_v52 = vpop.f32.mrb[41].mxu1  ;;  %15529 = vmatpush3.bf16.msra.mxu0 %v17120_v31  ;;  %v15141_v53 = vpop.f32.mrb[42].mxu0  ;;  %v17136_v43 = vld [vmem:[%s22285_s4 + $0x528] sm:$0xff]   ;;  %v17138_v47 = vld [vmem:[%s22285_s4 + $0x570] sm:$0xff]  }
 0x15f   : > { %v15252_v54 = vadd.f32 %v15251_v52, %v15250_v45  ;;  %15551 = vmatpush3.bf16.msra.mxu1 %v17121_v36  ;;  %v15253_v56 = vpop.f32.mrb[42].mxu1  ;;  %v15142_v59 = vpop.f32.mrb[43].mxu0  ;;  %15530 = vmatprep.subr.bf16.mxu0 %v17122_v39  ;;  %v17137_v45 = vld [vmem:[%s22285_s4 + $0x5a8] sm:$0xff]   ;;  %v17139_v52 = vld [vmem:[%s22285_s4 + $0x5f0] sm:$0xff]  }
 0x160   : > { %v1439_v51 = vadd.f32 %v19059_v60, %v15140_v50  ;;  %v15143_v0 = vadd.f32 %v15142_v59, %v15141_v53  ;;  %v15254_v3 = vpop.f32.mrb[43].mxu1  ;;  %15552 = vmatprep.subr.bf16.mxu1 %v17123_v41 }
 0x161   : > { %v15255_v6 = vadd.f32 %v15254_v3, %v15253_v56  ;;  %v17142_v3 = vld [vmem:[%s22285_s4 + $0x578] sm:$0xff]  }
 0x162   : > { %v1442_v9 = vadd.f32 %v19059_v60, %v15143_v0  ;;  %15531 = vmatpush3.bf16.msra.mxu0 %v17124_v42  ;;  %v19072_v12 = vadd.f32 %v15252_v54, %v1439_v51  ;;  %v17140_v54 = vld [vmem:[%s22285_s4 + $0x530] sm:$0xff]  }
 0x163   : > { %15553 = vmatpush3.bf16.msra.mxu1 %v17125_v48  ;;  %15532 = vmatprep.subr.bf16.mxu0 %v17126_v49  ;;  %v19106_v49 = vld [vmem:[%s18419_s22 + $0x18] sm:$0xff]  ;;  %v17141_v0 = vld [vmem:[%s22285_s4 + $0x5b0] sm:$0xff]  }
 0x164   : > { %v15144_v13 = vpop.f32.mrb[44].mxu0  ;;  %15554 = vmatprep.subr.bf16.mxu1 %v17127_v4  ;;  %v19080_v15 = vadd.f32 %v15255_v6, %v1442_v9  ;;  %v19126_v4 = vrot.slane %v19106_v49, %v18423_v55 }
 0x165   : > { %v15256_v16 = vpop.f32.mrb[44].mxu1  ;;  %v15145_v17 = vpop.f32.mrb[45].mxu0 }
 0x166   : > { %v15146_v20 = vadd.f32 %v15145_v17, %v15144_v13  ;;  %v15257_v21 = vpop.f32.mrb[45].mxu1  ;;  %15533 = vmatpush3.bf16.msra.mxu0 %v17128_v32  ;;  %v15147_v26 = vpop.f32.mrb[46].mxu0 }
 0x167   : > { %v15258_v28 = vadd.f32 %v15257_v21, %v15256_v16  ;;  %15555 = vmatpush3.bf16.msra.mxu1 %v17129_v11  ;;  %v15259_v22 = vpop.f32.mrb[46].mxu1  ;;  %v15148_v31 = vpop.f32.mrb[47].mxu0  ;;  %15534 = vmatprep.subr.bf16.mxu0 %v17130_v8  ;;  %v4122_v21 = vcombine.high %v19126_v4, %v19126_v4 }
 0x168   : > { %v1447_v36 = vadd.f32 %v19059_v60, %v15146_v20  ;;  %v15149_v39 = vadd.f32 %v15148_v31, %v15147_v26  ;;  %v15260_v41 = vpop.f32.mrb[47].mxu1  ;;  %15556 = vmatprep.subr.bf16.mxu1 %v17131_v14  ;;  %v17144_v20 = vld [vmem:[%s22285_s4 + $0x538] sm:$0xff]  }
 0x169   : > { %v15261_v42 = vadd.f32 %v15260_v41, %v15259_v22  ;;  %v4088_v22 = vrot.slane %v18986_v38, %v18423_v55  ;;  %v17149_v38 = vld [vmem:[%s22285_s4 + $0x600] sm:$0xff]  }
 0x16a   : > { %v1450_v48 = vadd.f32 %v19059_v60, %v15149_v39  ;;  %15535 = vmatpush3.bf16.msra.mxu0 %v17132_v18  ;;  %v19108_v50 = vadd.f32 %v15258_v28, %v1447_v36  ;;  %v17143_v18 = vld [vmem:[%s22285_s4 + $0x5f8] sm:$0xff]   ;;  %v17148_v36 = vld [vmem:[%s22285_s4 + $0x6c0] sm:$0xff]  }
 0x16b   : > { %15557 = vmatpush3.bf16.msra.mxu1 %v17133_v19  ;;  %15536 = vmatprep.subr.bf16.mxu0 %v17134_v33  ;;  %v17145_v28 = vld [vmem:[%s22285_s4 + $0x5b8] sm:$0xff]   ;;  %v17147_v33 = vld [vmem:[%s22285_s4 + $0x640] sm:$0xff]  }
 0x16c   : > { %v15150_v53 = vpop.f32.mrb[48].mxu0  ;;  %15558 = vmatprep.subr.bf16.mxu1 %v17135_v35  ;;  %v19116_v56 = vadd.f32 %v15261_v42, %v1450_v48  ;;  %v17150_v42 = vld [vmem:[%s22285_s4 + $0x680] sm:$0xff]  }
 0x16d   : > { %v15262_v59 = vpop.f32.mrb[48].mxu1  ;;  %v15151_v51 = vpop.f32.mrb[49].mxu0 }
 0x16e   : > { %v15152_v6 = vadd.f32 %v15151_v51, %v15150_v53  ;;  %v15263_v32 = vpop.f32.mrb[49].mxu1  ;;  %15537 = vmatpush3.bf16.msra.mxu0 %v17136_v43  ;;  %v15153_v9 = vpop.f32.mrb[50].mxu0  ;;  %v4104_v53 = vcombine.high %v4088_v22, %v4088_v22 }
 0x16f   : > { %v15264_v11 = vadd.f32 %v15263_v32, %v15262_v59  ;;  %15559 = vmatpush3.bf16.msra.mxu1 %v17137_v45  ;;  %v15265_v8 = vpop.f32.mrb[50].mxu1  ;;  %v15154_v13 = vpop.f32.mrb[51].mxu0  ;;  %15538 = vmatprep.subr.bf16.mxu0 %v17138_v47  ;;  %v4144_v45 = vrot.slane %v4122_v21, %v18423_v55  ;;  %v17157_v21 = vld [vmem:[%s22285_s4 + $0x610] sm:$0xff]  }
 0x170   : > { %v1455_v14 = vadd.f32 %v19059_v60, %v15152_v6  ;;  %v15155_v16 = vadd.f32 %v15154_v13, %v15153_v9  ;;  %v15266_v17 = vpop.f32.mrb[51].mxu1  ;;  %15560 = vmatprep.subr.bf16.mxu1 %v17139_v52  ;;  %v17154_v13 = vld [vmem:[%s22285_s4 + $0x688] sm:$0xff]  }
 0x171   : > { %v15267_v19 = vadd.f32 %v15266_v17, %v15265_v8  ;;  %v17155_v17 = vld [vmem:[%s22285_s4 + $0x650] sm:$0xff]  }
 0x172   : > { %v1458_v26 = vadd.f32 %v19059_v60, %v15155_v16  ;;  %15539 = vmatpush3.bf16.msra.mxu0 %v17140_v54  ;;  %v19143_v31 = vadd.f32 %v15264_v11, %v1455_v14  ;;  %v17153_v11 = vld [vmem:[%s22285_s4 + $0x608] sm:$0xff]   ;;  %v4154_v14 = vcombine.high %v4144_v45, %v4144_v45 }
 0x173   : > { %15561 = vmatpush3.bf16.msra.mxu1 %v17141_v0  ;;  %15540 = vmatprep.subr.bf16.mxu0 %v17142_v3  ;;  %v17151_v0 = vld [vmem:[%s22285_s4 + $0x648] sm:$0xff]  }
 0x174   : > { %v15156_v35 = vpop.f32.mrb[52].mxu0  ;;  %15562 = vmatprep.subr.bf16.mxu1 %v17143_v18  ;;  %v19151_v39 = vadd.f32 %v15267_v19, %v1458_v26  ;;  %v17152_v3 = vld [vmem:[%s22285_s4 + $0x6c8] sm:$0xff]   ;;  %v17156_v19 = vld [vmem:[%s22285_s4 + $0x6d0] sm:$0xff]  }
 0x175   : > { %v15268_v41 = vpop.f32.mrb[52].mxu1  ;;  %v15157_v43 = vpop.f32.mrb[53].mxu0 }
 0x176   : > { %v15158_v47 = vadd.f32 %v15157_v43, %v15156_v35  ;;  %v15269_v48 = vpop.f32.mrb[53].mxu1  ;;  %15541 = vmatpush3.bf16.msra.mxu0 %v17144_v20  ;;  %v15159_v52 = vpop.f32.mrb[54].mxu0  ;;  %v17159_v35 = vld [vmem:[%s22285_s4 + $0x658] sm:$0xff]  }
 0x177   : > { %v15270_v54 = vadd.f32 %v15269_v48, %v15268_v41  ;;  %15563 = vmatpush3.bf16.msra.mxu1 %v17145_v28  ;;  %v15271_v59 = vpop.f32.mrb[54].mxu1  ;;  %v15160_v51 = vpop.f32.mrb[55].mxu0  ;;  %15570 = vmatprep.subr.bf16.mxu0 %v17147_v33  ;;  %v17158_v33 = vld [vmem:[%s22285_s4 + $0x690] sm:$0xff]  }
 0x178   : > { %v1463_v6 = vadd.f32 %v19059_v60, %v15158_v47  ;;  %v15161_v32 = vadd.f32 %v15160_v51, %v15159_v52  ;;  %v15272_v9 = vpop.f32.mrb[55].mxu1  ;;  %15592 = vmatprep.subr.bf16.mxu1 %v17148_v36 }
 0x179   : > { %v15273_v8 = vadd.f32 %v15272_v9, %v15271_v59  ;;  %11449 = vmatmul.mubr.bf16.vlgmr.msra.gmra.mrb[112].mxu0 %v4088_v22  ;;  %v17161_v59 = vld [vmem:[%s22285_s4 + $0x618] sm:$0xff]   ;;  %v17164_v9 = vld [vmem:[%s22285_s4 + $0x6e0] sm:$0xff]  }
 0x17a   : > { %v1466_v16 = vadd.f32 %v19059_v60, %v15161_v32  ;;  %11489 = vmatmul.mubr.bf16.vlgmr.msra.gmra.mrb[88].mxu1 %v4104_v53  ;;  %15571 = vmatpush3.bf16.msra.mxu0 %v17149_v38  ;;  %v19177_v18 = vadd.f32 %v15270_v54, %v1463_v6  ;;  %v17160_v53 = vld [vmem:[%s22285_s4 + $0x6d8] sm:$0xff]   ;;  %v17163_v6 = vld [vmem:[%s22285_s4 + $0x660] sm:$0xff]  }
 0x17b   : > { %15593 = vmatpush3.bf16.msra.mxu1 %v17150_v42  ;;  %15572 = vmatprep.subr.bf16.mxu0 %v17151_v0  ;;  %v17162_v0 = vld [vmem:[%s22285_s4 + $0x698] sm:$0xff]  }
 0x17c   : > { %v15162_v20 = vpop.f32.mrb[56].mxu0  ;;  %15594 = vmatprep.subr.bf16.mxu1 %v17152_v3  ;;  %11528 = vmatprep.mubr.bf16.mxu0 %v4144_v45  ;;  %v19185_v26 = vadd.f32 %v15273_v8, %v1466_v16  ;;  %v17166_v16 = vld [vmem:[%s22285_s4 + $0x6a0] sm:$0xff]  }
 0x17d   : > { %v15274_v28 = vpop.f32.mrb[56].mxu1  ;;  %v15163_v22 = vpop.f32.mrb[57].mxu0  ;;  %11568 = vmatprep.mubr.bf16.mxu1 %v4154_v14  ;;  %v17165_v14 = vld [vmem:[%s22285_s4 + $0x620] sm:$0xff]  }
 0x17e   : > { %v15164_v36 = vadd.f32 %v15163_v22, %v15162_v20  ;;  %v15275_v41 = vpop.f32.mrb[57].mxu1  ;;  %15573 = vmatpush3.bf16.msra.mxu0 %v17153_v11  ;;  %v15165_v43 = vpop.f32.mrb[58].mxu0 }
 0x17f   : > { %v15276_v38 = vadd.f32 %v15275_v41, %v15274_v28  ;;  %15595 = vmatpush3.bf16.msra.mxu1 %v17154_v13  ;;  %v15277_v42 = vpop.f32.mrb[58].mxu1  ;;  %v15166_v45 = vpop.f32.mrb[59].mxu0  ;;  %15574 = vmatprep.subr.bf16.mxu0 %v17155_v17 }
 0x180   : > { %v1471_v47 = vadd.f32 %v19059_v60, %v15164_v36  ;;  %v15167_v48 = vadd.f32 %v15166_v45, %v15165_v43  ;;  %v15278_v52 = vpop.f32.mrb[59].mxu1  ;;  %15596 = vmatprep.subr.bf16.mxu1 %v17156_v19  ;;  %v17170_v45 = vld [vmem:[%s22285_s4 + $0x6a8] sm:$0xff]  }
 0x181   : > { %v15279_v54 = vadd.f32 %v15278_v52, %v15277_v42  ;;  %v17171_v52 = vld [vmem:[%s22285_s4 + $0x670] sm:$0xff]  }
 0x182   : > { %v1474_v51 = vadd.f32 %v19059_v60, %v15167_v48  ;;  %15575 = vmatpush3.bf16.msra.mxu0 %v17157_v21  ;;  %v19204_v3 = vadd.f32 %v15276_v38, %v1471_v47  ;;  %v17169_v38 = vld [vmem:[%s22285_s4 + $0x628] sm:$0xff]   ;;  %v4107_v47 = vcombine.high %v19106_v49, %v19106_v49  ;;  %v17173_v49 = vld [vmem:[%s22285_s4 + $0x630] sm:$0xff]  }
 0x183   : > { %15597 = vmatpush3.bf16.msra.mxu1 %v17158_v33  ;;  %15576 = vmatprep.subr.bf16.mxu0 %v17159_v35  ;;  %v17167_v33 = vld [vmem:[%s22285_s4 + $0x668] sm:$0xff]  }
 0x184   : > { %v15168_v32 = vpop.f32.mrb[60].mxu0  ;;  %15598 = vmatprep.subr.bf16.mxu1 %v17160_v53  ;;  %v19212_v11 = vadd.f32 %v15279_v54, %v1474_v51  ;;  %v17168_v35 = vld [vmem:[%s22285_s4 + $0x6e8] sm:$0xff]   ;;  %v17172_v54 = vld [vmem:[%s22285_s4 + $0x6f0] sm:$0xff]  }
 0x185   : > { %v15280_v8 = vpop.f32.mrb[60].mxu1  ;;  %v15169_v13 = vpop.f32.mrb[61].mxu0 }
 0x186   : > { %v15170_v17 = vadd.f32 %v15169_v13, %v15168_v32  ;;  %v15281_v19 = vpop.f32.mrb[61].mxu1  ;;  %15577 = vmatpush3.bf16.msra.mxu0 %v17161_v59  ;;  %v15171_v20 = vpop.f32.mrb[62].mxu0  ;;  %v17174_v32 = vld [vmem:[%s22285_s4 + $0x6b0] sm:$0xff]  }
 0x187   : > { %v15282_v21 = vadd.f32 %v15281_v19, %v15280_v8  ;;  %15599 = vmatpush3.bf16.msra.mxu1 %v17162_v0  ;;  %v15283_v28 = vpop.f32.mrb[62].mxu1  ;;  %v15172_v22 = vpop.f32.mrb[63].mxu0  ;;  %15578 = vmatprep.subr.bf16.mxu0 %v17163_v6  ;;  %v19259_v8 = vrot.slane %v4107_v47, %v18423_v55 }
 0x188   : > { %v1479_v36 = vadd.f32 %v19059_v60, %v15170_v17  ;;  %v15173_v41 = vadd.f32 %v15172_v22, %v15171_v20  ;;  %v15284_v43 = vpop.f32.mrb[63].mxu1  ;;  %15600 = vmatprep.subr.bf16.mxu1 %v17164_v9  ;;  %v17175_v9 = vld [vmem:[%s22285_s4 + $0x678] sm:$0xff]  }
 0x189   : > { %v15285_v42 = vadd.f32 %v15284_v43, %v15283_v28  ;;  %v17177_v22 = vld [vmem:[%s22285_s4 + $0x638] sm:$0xff]  }
 0x18a   : > { %v1482_v48 = vadd.f32 %v19059_v60, %v15173_v41  ;;  %15579 = vmatpush3.bf16.msra.mxu0 %v17165_v14  ;;  %v19239_v53 = vadd.f32 %v15282_v21, %v1479_v36  ;;  %v17180_v41 = vld [vmem:[%s22285_s4 + $0x7c0] sm:$0xff]  }
 0x18b   : > { %15601 = vmatpush3.bf16.msra.mxu1 %v17166_v16  ;;  %15580 = vmatprep.subr.bf16.mxu0 %v17167_v33  ;;  %v17178_v33 = vld [vmem:[%s22285_s4 + $0x6b8] sm:$0xff]  }
 0x18c   : > { %v16724_v59 = vpop.f32.mrb[64].mxu0  ;;  %15602 = vmatprep.subr.bf16.mxu1 %v17168_v35  ;;  %v19247_v60 = vadd.f32 %v15285_v42, %v1482_v48  ;;  %v17179_v35 = vld [vmem:[%s22285_s4 + $0x740] sm:$0xff]  }
 0x18d   : > { %v19250_v51 = vadd.f32 %v16724_v59, %v18781_v34  ;;  %v15322_v0 = vpop.f32.mrb[64].mxu1  ;;  %v1680_v6 = vpop.f32.mrb[65].mxu0  ;;  %v17183_v59 = vld [vmem:[%s22285_s4 + $0x748] sm:$0xff]  }
 0x18e   : > { %v19262_v13 = vadd.f32 %v1680_v6, %v18744_v5  ;;  %v15323_v14 = vpop.f32.mrb[65].mxu1  ;;  %15581 = vmatpush3.bf16.msra.mxu0 %v17169_v38  ;;  %v16725_v34 = vpop.f32.mrb[66].mxu0  ;;  %v17176_v5 = vld [vmem:[%s22285_s4 + $0x6f8] sm:$0xff]   ;;  %v17186_v6 = vld [vmem:[%s22285_s4 + $0x788] sm:$0xff]  }
 0x18f   : > { %v19264_v16 = vadd.f32 %v15323_v14, %v15322_v0  ;;  %15603 = vmatpush3.bf16.msra.mxu1 %v17170_v45  ;;  %v19267_v17 = vadd.f32 %v16725_v34, %v18786_v37  ;;  %v15325_v19 = vpop.f32.mrb[66].mxu1  ;;  %v1683_v20 = vpop.f32.mrb[67].mxu0  ;;  %15582 = vmatprep.subr.bf16.mxu0 %v17171_v52  ;;  %v4123_v37 = vcombine.high %v19259_v8, %v19259_v8  ;;  %v17182_v52 = vld [vmem:[%s22285_s4 + $0x780] sm:$0xff]  }
 0x190   : > { %v19270_v21 = vadd.f32 %v1683_v20, %v18752_v10  ;;  %v15326_v28 = vpop.f32.mrb[67].mxu1  ;;  %15604 = vmatprep.subr.bf16.mxu1 %v17172_v54  ;;  %v4130_v10 = vrot.slane %v19126_v4, %v18423_v55  ;;  %v17181_v4 = vld [vmem:[%s22285_s4 + $0x700] sm:$0xff]   ;;  %v17189_v19 = vld [vmem:[%s22285_s4 + $0x710] sm:$0xff]  }
 0x191   : > { %v4151_v42 = vrot.slane %v4123_v37, %v18423_v55 }
 0x192   : > { %15583 = vmatpush3.bf16.msra.mxu0 %v17173_v49  ;;  %v4152_v48 = vcombine.high %v4130_v10, %v4130_v10  ;;  %v17184_v49 = vld [vmem:[%s22285_s4 + $0x7c8] sm:$0xff]  }
 0x193   : > { %15605 = vmatpush3.bf16.msra.mxu1 %v17174_v32  ;;  %15584 = vmatprep.subr.bf16.mxu0 %v17175_v9  ;;  %v4155_v0 = vcombine.high %v4151_v42, %v4151_v42  ;;  %v17188_v9 = vld [vmem:[%s22285_s4 + $0x7d0] sm:$0xff]  }
 0x194   : > { %v16728_v36 = vpop.f32.mrb[68].mxu0  ;;  %15606 = vmatprep.subr.bf16.mxu1 %v17176_v5  ;;  %v17190_v5 = vld [vmem:[%s22285_s4 + $0x790] sm:$0xff]  }
 0x195   : > { %v19292_v43 = vadd.f32 %v16728_v36, %v18838_v23  ;;  %v1696_v38 = vpop.f32.mrb[69].mxu0 }
 0x196   : > { %v19299_v45 = vadd.f32 %v1696_v38, %v18808_v61  ;;  %15585 = vmatpush3.bf16.msra.mxu0 %v17177_v22  ;;  %v16729_v47 = vpop.f32.mrb[70].mxu0 }
 0x197   : > { %15607 = vmatpush3.bf16.msra.mxu1 %v17178_v33  ;;  %v19305_v23 = vadd.f32 %v16729_v47, %v18846_v27  ;;  %v1699_v54 = vpop.f32.mrb[71].mxu0  ;;  %15614 = vmatprep.subr.bf16.mxu0 %v17179_v35  ;;  %v17185_v27 = vld [vmem:[%s22285_s4 + $0x708] sm:$0xff]   ;;  %v17194_v35 = vld [vmem:[%s22285_s4 + $0x798] sm:$0xff]  }
 0x198   : > { %v19311_v61 = vadd.f32 %v1699_v54, %v18816_v1  ;;  %15636 = vmatprep.subr.bf16.mxu1 %v17180_v41  ;;  %v17187_v1 = vld [vmem:[%s22285_s4 + $0x750] sm:$0xff]   ;;  %v17197_v41 = vld [vmem:[%s22285_s4 + $0x720] sm:$0xff]  }
 0x199   : > { %11529 = vmatmul.mubr.bf16.vlgmr.msra.gmra.mrb[116].mxu0 %v4130_v10  ;;  %v17193_v10 = vld [vmem:[%s22285_s4 + $0x718] sm:$0xff]  }
 0x19a   : > { %11569 = vmatmul.mubr.bf16.vlgmr.msra.gmra.mrb[92].mxu1 %v4152_v48  ;;  %15615 = vmatpush3.bf16.msra.mxu0 %v17181_v4 }
 0x19b   : > { %15637 = vmatpush3.bf16.msra.mxu1 %v17182_v52  ;;  %15616 = vmatprep.subr.bf16.mxu0 %v17183_v59  ;;  %v17199_v52 = vld [vmem:[%s22285_s4 + $0x768] sm:$0xff]  }
 0x19c   : > { %v16732_v32 = vpop.f32.mrb[72].mxu0  ;;  %15638 = vmatprep.subr.bf16.mxu1 %v17184_v49  ;;  %11608 = vmatprep.mubr.bf16.mxu0 %v4151_v42  ;;  %v17198_v42 = vld [vmem:[%s22285_s4 + $0x7a0] sm:$0xff]   ;;  %v17200_v59 = vld [vmem:[%s22285_s4 + $0x7e8] sm:$0xff]  }
 0x19d   : > { %v19329_v14 = vadd.f32 %v16732_v32, %v18907_v24  ;;  %v1712_v34 = vpop.f32.mrb[73].mxu0  ;;  %11648 = vmatprep.mubr.bf16.mxu1 %v4155_v0  ;;  %v17191_v24 = vld [vmem:[%s22285_s4 + $0x758] sm:$0xff]   ;;  %v19398_v0 = vld [vmem:[%s18419_s22 + $0x20] sm:$0xff] }
 0x19e   : > { %v19335_v20 = vadd.f32 %v1712_v34, %v18879_v57  ;;  %15617 = vmatpush3.bf16.msra.mxu0 %v17185_v27  ;;  %v16733_v28 = vpop.f32.mrb[74].mxu0  ;;  %v17192_v57 = vld [vmem:[%s22285_s4 + $0x7d8] sm:$0xff]   ;;  %v17202_v27 = vld [vmem:[%s22285_s4 + $0x7a8] sm:$0xff]  }
 0x19f   : > { %15639 = vmatpush3.bf16.msra.mxu1 %v17186_v6  ;;  %v19344_v22 = vadd.f32 %v16733_v28, %v18915_v29  ;;  %v1715_v37 = vpop.f32.mrb[75].mxu0  ;;  %15618 = vmatprep.subr.bf16.mxu0 %v17187_v1  ;;  %v17195_v29 = vld [vmem:[%s22285_s4 + $0x760] sm:$0xff]   ;;  %v17205_v1 = vld [vmem:[%s22285_s4 + $0x730] sm:$0xff]   ;;  %v17207_v28 = vld [vmem:[%s22285_s4 + $0x778] sm:$0xff]  }
 0x1a0   : > { %v19350_v33 = vadd.f32 %v1715_v37, %v18887_v62  ;;  %15640 = vmatprep.subr.bf16.mxu1 %v17188_v9  ;;  %v17196_v62 = vld [vmem:[%s22285_s4 + $0x7e0] sm:$0xff]  }
 0x1a2   : > { %15619 = vmatpush3.bf16.msra.mxu0 %v17189_v19  ;;  %v17206_v19 = vld [vmem:[%s22285_s4 + $0x7b0] sm:$0xff]  }
 0x1a3   : > { %15641 = vmatpush3.bf16.msra.mxu1 %v17190_v5  ;;  %15620 = vmatprep.subr.bf16.mxu0 %v17191_v24  ;;  %v19417_v5 = vrot.slane %v19398_v0, %v18423_v55 }
 0x1a4   : > { %v16736_v36 = vpop.f32.mrb[76].mxu0  ;;  %15642 = vmatprep.subr.bf16.mxu1 %v17192_v57 }
 0x1a5   : > { %v19368_v38 = vadd.f32 %v16736_v36, %v18969_v25  ;;  %v1728_v4 = vpop.f32.mrb[77].mxu0 }
 0x1a6   : > { %v19374_v47 = vadd.f32 %v1728_v4, %v18940_v58  ;;  %15621 = vmatpush3.bf16.msra.mxu0 %v17193_v10  ;;  %v16737_v48 = vpop.f32.mrb[78].mxu0  ;;  %v17201_v58 = vld [vmem:[%s22285_s4 + $0x728] sm:$0xff]   ;;  %v4171_v4 = vcombine.high %v19417_v5, %v19417_v5 }
 0x1a7   : > { %15643 = vmatpush3.bf16.msra.mxu1 %v17194_v35  ;;  %v19380_v54 = vadd.f32 %v16737_v48, %v18977_v30  ;;  %v1731_v25 = vpop.f32.mrb[79].mxu0  ;;  %15622 = vmatprep.subr.bf16.mxu0 %v17195_v29  ;;  %v17203_v30 = vld [vmem:[%s22285_s4 + $0x770] sm:$0xff]  }
 0x1a8   : > { %v19386_v49 = vadd.f32 %v1731_v25, %v18948_v63  ;;  %15644 = vmatprep.subr.bf16.mxu1 %v17196_v62  ;;  %v17204_v63 = vld [vmem:[%s22285_s4 + $0x7f0] sm:$0xff]  }
 0x1aa   : > { %15623 = vmatpush3.bf16.msra.mxu0 %v17197_v41 }
 0x1ab   : > { %15645 = vmatpush3.bf16.msra.mxu1 %v17198_v42  ;;  %15624 = vmatprep.subr.bf16.mxu0 %v17199_v52  ;;  %v4137_v42 = vrot.slane %v19259_v8, %v18423_v55  ;;  %v17213_v52 = vld [vmem:[%s22285_s4 + $0x8c0] sm:$0xff]  }
 0x1ac   : > { %v16740_v6 = vpop.f32.mrb[80].mxu0  ;;  %15646 = vmatprep.subr.bf16.mxu1 %v17200_v59  ;;  %v17214_v8 = vld [vmem:[%s22285_s4 + $0x800] sm:$0xff]  }
 0x1ad   : > { %v15344_v32 = vpop.f32.mrb[68].mxu1  ;;  %v19407_v9 = vadd.f32 %v16740_v6, %v19040_v40  ;;  %v1744_v34 = vpop.f32.mrb[81].mxu0  ;;  %v17215_v6 = vld [vmem:[%s22285_s4 + $0x880] sm:$0xff]  }
 0x1ae   : > { %v15345_v24 = vpop.f32.mrb[69].mxu1  ;;  %v19420_v37 = vadd.f32 %v1744_v34, %v19009_v2  ;;  %15625 = vmatpush3.bf16.msra.mxu0 %v17201_v58  ;;  %v16741_v40 = vpop.f32.mrb[82].mxu0  ;;  %v17208_v2 = vld [vmem:[%s22285_s4 + $0x7f8] sm:$0xff]   ;;  %v4193_v58 = vrot.slane %v4171_v4, %v18423_v55  ;;  %v17217_v34 = vld [vmem:[%s22285_s4 + $0x8c8] sm:$0xff]  }
 0x1af   : > { %v15346_v57 = vadd.f32 %v15345_v24, %v15344_v32  ;;  %15647 = vmatpush3.bf16.msra.mxu1 %v17202_v27  ;;  %v19423_v10 = vadd.f32 %v16741_v40, %v19048_v44  ;;  %v15347_v35 = vpop.f32.mrb[70].mxu1  ;;  %v1747_v29 = vpop.f32.mrb[83].mxu0  ;;  %15626 = vmatprep.subr.bf16.mxu0 %v17203_v30  ;;  %v17209_v44 = vld [vmem:[%s22285_s4 + $0x738] sm:$0xff]   ;;  %v17216_v32 = vld [vmem:[%s22285_s4 + $0x848] sm:$0xff]   ;;  %v17221_v40 = vld [vmem:[%s22285_s4 + $0x8d0] sm:$0xff]  }
 0x1b0   : > { %v19426_v62 = vadd.f32 %v1747_v29, %v19017_v7  ;;  %v15348_v36 = vpop.f32.mrb[71].mxu1  ;;  %15648 = vmatprep.subr.bf16.mxu1 %v17204_v63  ;;  %v17210_v7 = vld [vmem:[%s22285_s4 + $0x7b8] sm:$0xff]   ;;  %v4153_v63 = vcombine.high %v4137_v42, %v4137_v42  ;;  %v17222_v29 = vld [vmem:[%s22285_s4 + $0x810] sm:$0xff]  }
 0x1b1   : > { %v19432_v41 = vadd.f32 %v15346_v57, %v19264_v16  ;;  %v17212_v16 = vld [vmem:[%s22285_s4 + $0x840] sm:$0xff]  }
 0x1b2   : > { %15627 = vmatpush3.bf16.msra.mxu0 %v17205_v1 }
 0x1b3   : > { %15649 = vmatpush3.bf16.msra.mxu1 %v17206_v19  ;;  %15628 = vmatprep.subr.bf16.mxu0 %v17207_v28  ;;  %v4203_v19 = vcombine.high %v4193_v58, %v4193_v58  ;;  %v17219_v28 = vld [vmem:[%s22285_s4 + $0x888] sm:$0xff]  }
 0x1b4   : > { %v16744_v48 = vpop.f32.mrb[84].mxu0  ;;  %15650 = vmatprep.subr.bf16.mxu1 %v17208_v2 }
 0x1b5   : > { %v19451_v25 = vadd.f32 %v16744_v48, %v19108_v50  ;;  %v1760_v59 = vpop.f32.mrb[85].mxu0 }
 0x1b6   : > { %v19458_v27 = vadd.f32 %v1760_v59, %v19072_v12  ;;  %15629 = vmatpush3.bf16.msra.mxu0 %v17209_v44  ;;  %v16745_v30 = vpop.f32.mrb[86].mxu0  ;;  %v17223_v44 = vld [vmem:[%s22285_s4 + $0x890] sm:$0xff]  }
 0x1b7   : > { %15651 = vmatpush3.bf16.msra.mxu1 %v17210_v7  ;;  %v19464_v50 = vadd.f32 %v16745_v30, %v19116_v56  ;;  %v1763_v1 = vpop.f32.mrb[87].mxu0  ;;  %15658 = vmatprep.subr.bf16.mxu0 %v17212_v16  ;;  %v17218_v56 = vld [vmem:[%s22285_s4 + $0x808] sm:$0xff]   ;;  %v17224_v7 = vld [vmem:[%s22285_s4 + $0x858] sm:$0xff]  }
 0x1b8   : > { %v19470_v12 = vadd.f32 %v1763_v1, %v19080_v15  ;;  %15680 = vmatprep.subr.bf16.mxu1 %v17213_v52  ;;  %v17220_v15 = vld [vmem:[%s22285_s4 + $0x850] sm:$0xff]   ;;  %v17226_v16 = vld [vmem:[%s22285_s4 + $0x818] sm:$0xff]   ;;  %v17229_v52 = vld [vmem:[%s22285_s4 + $0x8e0] sm:$0xff]  }
 0x1b9   : > { %11609 = vmatmul.mubr.bf16.vlgmr.msra.gmra.mrb[120].mxu0 %v4137_v42 }
 0x1ba   : > { %11649 = vmatmul.mubr.bf16.vlgmr.msra.gmra.mrb[96].mxu1 %v4153_v63  ;;  %15659 = vmatpush3.bf16.msra.mxu0 %v17214_v8 }
 0x1bb   : > { %15681 = vmatpush3.bf16.msra.mxu1 %v17215_v6  ;;  %15660 = vmatprep.subr.bf16.mxu0 %v17216_v32  ;;  %v17231_v6 = vld [vmem:[%s22285_s4 + $0x8a0] sm:$0xff]   ;;  %v17232_v32 = vld [vmem:[%s22285_s4 + $0x868] sm:$0xff]  }
 0x1bc   : > { %v16748_v24 = vpop.f32.mrb[88].mxu0  ;;  %15682 = vmatprep.subr.bf16.mxu1 %v17217_v34  ;;  %11688 = vmatprep.mubr.bf16.mxu0 %v4193_v58  ;;  %v17230_v58 = vld [vmem:[%s22285_s4 + $0x820] sm:$0xff]  }
 0x1bd   : > { %v19488_v57 = vadd.f32 %v16748_v24, %v19177_v18  ;;  %v1776_v35 = vpop.f32.mrb[89].mxu0  ;;  %11728 = vmatprep.mubr.bf16.mxu1 %v4203_v19  ;;  %v17235_v19 = vld [vmem:[%s22285_s4 + $0x8a8] sm:$0xff]  }
 0x1be   : > { %v19494_v36 = vadd.f32 %v1776_v35, %v19143_v31  ;;  %15661 = vmatpush3.bf16.msra.mxu0 %v17218_v56  ;;  %v16749_v2 = vpop.f32.mrb[90].mxu0  ;;  %v17225_v31 = vld [vmem:[%s22285_s4 + $0x8d8] sm:$0xff]   ;;  %v17234_v56 = vld [vmem:[%s22285_s4 + $0x828] sm:$0xff]   ;;  %v17239_v35 = vld [vmem:[%s22285_s4 + $0x8b0] sm:$0xff]  }
 0x1bf   : > { %15683 = vmatpush3.bf16.msra.mxu1 %v17219_v28  ;;  %v19500_v4 = vadd.f32 %v16749_v2, %v19185_v26  ;;  %v1779_v18 = vpop.f32.mrb[91].mxu0  ;;  %15662 = vmatprep.subr.bf16.mxu0 %v17220_v15  ;;  %v17227_v26 = vld [vmem:[%s22285_s4 + $0x898] sm:$0xff]   ;;  %v17237_v15 = vld [vmem:[%s22285_s4 + $0x8f0] sm:$0xff]  }
 0x1c0   : > { %v19506_v42 = vadd.f32 %v1779_v18, %v19151_v39  ;;  %15684 = vmatprep.subr.bf16.mxu1 %v17221_v40  ;;  %v17228_v39 = vld [vmem:[%s22285_s4 + $0x860] sm:$0xff]  }
 0x1c2   : > { %15663 = vmatpush3.bf16.msra.mxu0 %v17222_v29 }
 0x1c3   : > { %15685 = vmatpush3.bf16.msra.mxu1 %v17223_v44  ;;  %15664 = vmatprep.subr.bf16.mxu0 %v17224_v7 }
 0x1c4   : > { %v16752_v48 = vpop.f32.mrb[92].mxu0  ;;  %15686 = vmatprep.subr.bf16.mxu1 %v17225_v31 }
 0x1c5   : > { %v19524_v59 = vadd.f32 %v16752_v48, %v19239_v53  ;;  %v1792_v8 = vpop.f32.mrb[93].mxu0 }
 0x1c6   : > { %v19530_v30 = vadd.f32 %v1792_v8, %v19204_v3  ;;  %15665 = vmatpush3.bf16.msra.mxu0 %v17226_v16  ;;  %v16753_v63 = vpop.f32.mrb[94].mxu0  ;;  %v17233_v3 = vld [vmem:[%s22285_s4 + $0x8e8] sm:$0xff]   ;;  %v17242_v8 = vld [vmem:[%s22285_s4 + $0x838] sm:$0xff]  }
 0x1c7   : > { %15687 = vmatpush3.bf16.msra.mxu1 %v17227_v26  ;;  %v19536_v1 = vadd.f32 %v16753_v63, %v19247_v60  ;;  %v1795_v53 = vpop.f32.mrb[95].mxu0  ;;  %15666 = vmatprep.subr.bf16.mxu0 %v17228_v39  ;;  %v4156_v60 = vcombine.high %v19398_v0, %v19398_v0  ;;  %v17238_v0 = vld [vmem:[%s22285_s4 + $0x830] sm:$0xff]   ;;  %v17240_v26 = vld [vmem:[%s22285_s4 + $0x878] sm:$0xff]  }
 0x1c8   : > { %v19542_v34 = vadd.f32 %v1795_v53, %v19212_v11  ;;  %15688 = vmatprep.subr.bf16.mxu1 %v17229_v52  ;;  %v17236_v11 = vld [vmem:[%s22285_s4 + $0x870] sm:$0xff]   ;;  %v17241_v39 = vld [vmem:[%s22285_s4 + $0x8f8] sm:$0xff]   ;;  %v4179_v53 = vrot.slane %v19417_v5, %v18423_v55  ;;  %v17247_v5 = vld [vmem:[%s22285_s4 + $0x980] sm:$0xff]  }
 0x1c9   : > { %v19568_v29 = vrot.slane %v4156_v60, %v18423_v55 }
 0x1ca   : > { %15667 = vmatpush3.bf16.msra.mxu0 %v17230_v58  ;;  %v4201_v60 = vcombine.high %v4179_v53, %v4179_v53 }
 0x1cb   : > { %15689 = vmatpush3.bf16.msra.mxu1 %v17231_v6  ;;  %15668 = vmatprep.subr.bf16.mxu0 %v17232_v32  ;;  %v4172_v58 = vcombine.high %v19568_v29, %v19568_v29  ;;  %v17243_v6 = vld [vmem:[%s22285_s4 + $0x8b8] sm:$0xff]   ;;  %v17245_v32 = vld [vmem:[%s22285_s4 + $0x9c0] sm:$0xff]  }
 0x1cc   : > { %v15366_v28 = vpop.f32.mrb[96].mxu0  ;;  %15690 = vmatprep.subr.bf16.mxu1 %v17233_v3  ;;  %v17246_v3 = vld [vmem:[%s22285_s4 + $0x900] sm:$0xff]  }
 0x1cd   : > { %v15388_v24 = vpop.f32.mrb[72].mxu1  ;;  %v15367_v40 = vpop.f32.mrb[97].mxu0 }
 0x1ce   : > { %v15368_v2 = vadd.f32 %v15367_v40, %v15366_v28  ;;  %v15389_v44 = vpop.f32.mrb[73].mxu1  ;;  %15669 = vmatpush3.bf16.msra.mxu0 %v17234_v56  ;;  %v15369_v18 = vpop.f32.mrb[98].mxu0  ;;  %v4200_v56 = vrot.slane %v4172_v58, %v18423_v55  ;;  %v17250_v28 = vld [vmem:[%s22285_s4 + $0x908] sm:$0xff]   ;;  %v17252_v40 = vld [vmem:[%s22285_s4 + $0x950] sm:$0xff]  }
 0x1cf   : > { %v15390_v7 = vadd.f32 %v15389_v44, %v15388_v24  ;;  %15691 = vmatpush3.bf16.msra.mxu1 %v17235_v19  ;;  %v15391_v31 = vpop.f32.mrb[74].mxu1  ;;  %v15370_v16 = vpop.f32.mrb[99].mxu0  ;;  %15670 = vmatprep.subr.bf16.mxu0 %v17236_v11  ;;  %v17248_v19 = vld [vmem:[%s22285_s4 + $0x948] sm:$0xff]   ;;  %v17256_v44 = vld [vmem:[%s22285_s4 + $0x958] sm:$0xff]  }
 0x1d0   : > { %v11131_v48 = vadd.f32 %v15368_v2, %v19432_v41  ;;  %v15392_v52 = vpop.f32.mrb[75].mxu1  ;;  %15692 = vmatprep.subr.bf16.mxu1 %v17237_v15  ;;  %v17244_v41 = vld [vmem:[%s22285_s4 + $0x940] sm:$0xff]   ;;  %v17249_v11 = vld [vmem:[%s22285_s4 + $0x9c8] sm:$0xff]   ;;  %v4204_v15 = vcombine.high %v4200_v56, %v4200_v56  ;;  %v17255_v2 = vld [vmem:[%s22285_s4 + $0x990] sm:$0xff]  }
 0x1d1   : > { %v17251_v24 = vld [vmem:[%s22285_s4 + $0x988] sm:$0xff]   ;;  %v17257_v18 = vld [vmem:[%s22285_s4 + $0x9d8] sm:$0xff]   ;;  %v17260_v16 = vld [vmem:[%s22285_s4 + $0x960] sm:$0xff]  }
 0x1d2   : > { %v19582_v63 = vadd.f32 %v15390_v7, %v11131_v48  ;;  %15671 = vmatpush3.bf16.msra.mxu0 %v17238_v0  ;;  %v17253_v0 = vld [vmem:[%s22285_s4 + $0x9d0] sm:$0xff]   ;;  %v17258_v7 = vld [vmem:[%s22285_s4 + $0x918] sm:$0xff]   ;;  %v17263_v48 = vld [vmem:[%s22285_s4 + $0x9a0] sm:$0xff]  }
 0x1d3   : > { %15693 = vmatpush3.bf16.msra.mxu1 %v17239_v35  ;;  %15672 = vmatprep.subr.bf16.mxu0 %v17240_v26  ;;  %v17254_v35 = vld [vmem:[%s22285_s4 + $0x910] sm:$0xff]   ;;  %v17259_v31 = vld [vmem:[%s22285_s4 + $0x998] sm:$0xff]   ;;  %v17261_v26 = vld [vmem:[%s22285_s4 + $0x9e0] sm:$0xff]  }
 0x1d4   : > { %15694 = vmatprep.subr.bf16.mxu1 %v17241_v39  ;;  %v17262_v39 = vld [vmem:[%s22285_s4 + $0x920] sm:$0xff]   ;;  %v17264_v52 = vld [vmem:[%s22285_s4 + $0x968] sm:$0xff]  }
 0x1d5   : > { %v17266_v58 = vld [vmem:[%s22285_s4 + $0x928] sm:$0xff]  }
 0x1d6   : > { %15673 = vmatpush3.bf16.msra.mxu0 %v17242_v8  ;;  %v17265_v8 = vld [vmem:[%s22285_s4 + $0x9e8] sm:$0xff]  }
 0x1d7   : > { %15695 = vmatpush3.bf16.msra.mxu1 %v17243_v6  ;;  %15702 = vmatprep.subr.bf16.mxu0 %v17244_v41  ;;  %v17267_v6 = vld [vmem:[%s22285_s4 + $0x9a8] sm:$0xff]  }
 0x1d8   : > { %15724 = vmatprep.subr.bf16.mxu1 %v17245_v32  ;;  %v19666_v41 = vld [vmem:[%s18419_s22 + $0x28] sm:$0xff]  ;;  %v17269_v32 = vld [vmem:[%s22285_s4 + $0x9f0] sm:$0xff]  }
 0x1d9   : > { %11689 = vmatmul.mubr.bf16.vlgmr.msra.gmra.mrb[124].mxu0 %v4179_v53  ;;  %v17268_v53 = vld [vmem:[%s22285_s4 + $0x970] sm:$0xff]  }
 0x1da   : > { %11729 = vmatmul.mubr.bf16.vlgmr.msra.gmra.mrb[100].mxu1 %v4201_v60  ;;  %15703 = vmatpush3.bf16.msra.mxu0 %v17246_v3 }
 0x1db   : > { %15725 = vmatpush3.bf16.msra.mxu1 %v17247_v5  ;;  %15704 = vmatprep.subr.bf16.mxu0 %v17248_v19  ;;  %v17271_v19 = vld [vmem:[%s22285_s4 + $0x9b0] sm:$0xff]  }
 0x1dc   : > { %15726 = vmatprep.subr.bf16.mxu1 %v17249_v11  ;;  %11768 = vmatprep.mubr.bf16.mxu0 %v4200_v56  ;;  %v17270_v56 = vld [vmem:[%s22285_s4 + $0x930] sm:$0xff]   ;;  %v19679_v11 = vrot.slane %v19666_v41, %v18423_v55 }
 0x1dd   : > { %11808 = vmatprep.mubr.bf16.mxu1 %v4204_v15 }
 0x1de   : > { %15705 = vmatpush3.bf16.msra.mxu0 %v17250_v28 }
 0x1df   : > { %15727 = vmatpush3.bf16.msra.mxu1 %v17251_v24  ;;  %15706 = vmatprep.subr.bf16.mxu0 %v17252_v40  ;;  %v17272_v40 = vld [vmem:[%s22285_s4 + $0x978] sm:$0xff]  }
 0x1e0   : > { %15728 = vmatprep.subr.bf16.mxu1 %v17253_v0  ;;  %v17273_v0 = vld [vmem:[%s22285_s4 + $0x9f8] sm:$0xff]  }
 0x1e2   : > { %15707 = vmatpush3.bf16.msra.mxu0 %v17254_v35 }
 0x1e3   : > { %15729 = vmatpush3.bf16.msra.mxu1 %v17255_v2  ;;  %15708 = vmatprep.subr.bf16.mxu0 %v17256_v44 }
 0x1e4   : > { %15730 = vmatprep.subr.bf16.mxu1 %v17257_v18 }
 0x1e6   : > { %15709 = vmatpush3.bf16.msra.mxu0 %v17258_v7 }
 0x1e7   : > { %15731 = vmatpush3.bf16.msra.mxu1 %v17259_v31  ;;  %15710 = vmatprep.subr.bf16.mxu0 %v17260_v16  ;;  %v17274_v31 = vld [vmem:[%s22285_s4 + $0x938] sm:$0xff]  }
 0x1e8   : > { %15732 = vmatprep.subr.bf16.mxu1 %v17261_v26  ;;  %v17275_v16 = vld [vmem:[%s22285_s4 + $0x9b8] sm:$0xff]   ;;  %v4220_v26 = vcombine.high %v19679_v11, %v19679_v11 }
 0x1ea   : > { %15711 = vmatpush3.bf16.msra.mxu0 %v17262_v39 }
 0x1eb   : > { %15733 = vmatpush3.bf16.msra.mxu1 %v17263_v48  ;;  %15712 = vmatprep.subr.bf16.mxu0 %v17264_v52  ;;  %v4186_v48 = vrot.slane %v19568_v29, %v18423_v55  ;;  %v17278_v52 = vld [vmem:[%s22285_s4 + $0xac0] sm:$0xff]   ;;  %v4242_v29 = vrot.slane %v4220_v26, %v18423_v55  ;;  %v17299_v26 = vld [vmem:[%s22285_s4 + $0xa28] sm:$0xff]  }
 0x1ec   : > { %v15410_v3 = vpop.f32.mrb[100].mxu0  ;;  %15734 = vmatprep.subr.bf16.mxu1 %v17265_v8  ;;  %v17279_v8 = vld [vmem:[%s22285_s4 + $0xa00] sm:$0xff]  }
 0x1ed   : > { %v15411_v60 = vpop.f32.mrb[101].mxu0  ;;  %v15432_v5 = vpop.f32.mrb[76].mxu1 }
 0x1ee   : > { %v15412_v28 = vadd.f32 %v15411_v60, %v15410_v3  ;;  %v15413_v15 = vpop.f32.mrb[102].mxu0  ;;  %v15433_v24 = vpop.f32.mrb[77].mxu1  ;;  %15713 = vmatpush3.bf16.msra.mxu0 %v17266_v58  ;;  %v17280_v58 = vld [vmem:[%s22285_s4 + $0xa80] sm:$0xff]   ;;  %v17283_v3 = vld [vmem:[%s22285_s4 + $0xa08] sm:$0xff]   ;;  %v4252_v60 = vcombine.high %v4242_v29, %v4242_v29 }
 0x1ef   : > { %v15434_v35 = vadd.f32 %v15433_v24, %v15432_v5  ;;  %15735 = vmatpush3.bf16.msra.mxu1 %v17267_v6  ;;  %v15414_v2 = vpop.f32.mrb[103].mxu0  ;;  %v15435_v44 = vpop.f32.mrb[78].mxu1  ;;  %15714 = vmatprep.subr.bf16.mxu0 %v17268_v53  ;;  %v4202_v6 = vcombine.high %v4186_v48, %v4186_v48  ;;  %v17281_v53 = vld [vmem:[%s22285_s4 + $0xa48] sm:$0xff]   ;;  %v17285_v5 = vld [vmem:[%s22285_s4 + $0xa50] sm:$0xff]   ;;  %v17289_v24 = vld [vmem:[%s22285_s4 + $0xa58] sm:$0xff]  }
 0x1f0   : > { %v11211_v18 = vadd.f32 %v15412_v28, %v19582_v63  ;;  %v15436_v7 = vpop.f32.mrb[79].mxu1  ;;  %15736 = vmatprep.subr.bf16.mxu1 %v17269_v32  ;;  %v17277_v63 = vld [vmem:[%s22285_s4 + $0xa40] sm:$0xff]   ;;  %v17282_v32 = vld [vmem:[%s22285_s4 + $0xac8] sm:$0xff]   ;;  %v17287_v28 = vld [vmem:[%s22285_s4 + $0xa10] sm:$0xff]  }
 0x1f1   : > { %v17288_v15 = vld [vmem:[%s22285_s4 + $0xa90] sm:$0xff]   ;;  %v17293_v2 = vld [vmem:[%s22285_s4 + $0xa60] sm:$0xff]  }
 0x1f2   : > { %v19696_v39 = vadd.f32 %v15434_v35, %v11211_v18  ;;  %15715 = vmatpush3.bf16.msra.mxu0 %v17270_v56  ;;  %v17284_v56 = vld [vmem:[%s22285_s4 + $0xa88] sm:$0xff]   ;;  %v17292_v35 = vld [vmem:[%s22285_s4 + $0xa98] sm:$0xff]   ;;  %v17294_v44 = vld [vmem:[%s22285_s4 + $0xae0] sm:$0xff]  }
 0x1f3   : > { %15737 = vmatpush3.bf16.msra.mxu1 %v17271_v19  ;;  %15716 = vmatprep.subr.bf16.mxu0 %v17272_v40  ;;  %v17286_v19 = vld [vmem:[%s22285_s4 + $0xad0] sm:$0xff]   ;;  %v17290_v40 = vld [vmem:[%s22285_s4 + $0xad8] sm:$0xff]   ;;  %v17295_v18 = vld [vmem:[%s22285_s4 + $0xa20] sm:$0xff]  }
 0x1f4   : > { %15738 = vmatprep.subr.bf16.mxu1 %v17273_v0  ;;  %v17291_v0 = vld [vmem:[%s22285_s4 + $0xa18] sm:$0xff]   ;;  %v17296_v7 = vld [vmem:[%s22285_s4 + $0xaa0] sm:$0xff]  }
 0x1f6   : > { %15717 = vmatpush3.bf16.msra.mxu0 %v17274_v31  ;;  %v17297_v31 = vld [vmem:[%s22285_s4 + $0xa68] sm:$0xff]  }
 0x1f7   : > { %15739 = vmatpush3.bf16.msra.mxu1 %v17275_v16  ;;  %15746 = vmatprep.subr.bf16.mxu0 %v17277_v63  ;;  %v17298_v16 = vld [vmem:[%s22285_s4 + $0xae8] sm:$0xff]   ;;  %v4205_v63 = vcombine.high %v19666_v41, %v19666_v41  ;;  %v17304_v41 = vld [vmem:[%s22285_s4 + $0xab0] sm:$0xff]  }
 0x1f8   : > { %15768 = vmatprep.subr.bf16.mxu1 %v17278_v52  ;;  %v17301_v52 = vld [vmem:[%s22285_s4 + $0xa70] sm:$0xff]  }
 0x1f9   : > { %11769 = vmatmul.mubr.bf16.vlgmr.msra.gmra.mrb[128].mxu0 %v4186_v48  ;;  %v17300_v48 = vld [vmem:[%s22285_s4 + $0xaa8] sm:$0xff]  }
 0x1fa   : > { %11809 = vmatmul.mubr.bf16.vlgmr.msra.gmra.mrb[104].mxu1 %v4202_v6  ;;  %15747 = vmatpush3.bf16.msra.mxu0 %v17279_v8  ;;  %v17302_v8 = vld [vmem:[%s22285_s4 + $0xaf0] sm:$0xff]  }
 0x1fb   : > { %15769 = vmatpush3.bf16.msra.mxu1 %v17280_v58  ;;  %15748 = vmatprep.subr.bf16.mxu0 %v17281_v53 }
 0x1fc   : > { %15770 = vmatprep.subr.bf16.mxu1 %v17282_v32  ;;  %11848 = vmatprep.mubr.bf16.mxu0 %v4242_v29  ;;  %v17303_v29 = vld [vmem:[%s22285_s4 + $0xa30] sm:$0xff]   ;;  %v17305_v32 = vld [vmem:[%s22285_s4 + $0xa78] sm:$0xff]  }
 0x1fd   : > { %11888 = vmatprep.mubr.bf16.mxu1 %v4252_v60 }
 0x1fe   : > { %15749 = vmatpush3.bf16.msra.mxu0 %v17283_v3  ;;  %v19791_v3 = vrot.slane %v4205_v63, %v18423_v55  ;;  %v17313_v63 = vld [vmem:[%s22285_s4 + $0xb48] sm:$0xff]  }
 0x1ff   : > { %15771 = vmatpush3.bf16.msra.mxu1 %v17284_v56  ;;  %15750 = vmatprep.subr.bf16.mxu0 %v17285_v5 }
 0x200   : > { %15772 = vmatprep.subr.bf16.mxu1 %v17286_v19 }
 0x202   : > { %15751 = vmatpush3.bf16.msra.mxu0 %v17287_v28 }
 0x203   : > { %15773 = vmatpush3.bf16.msra.mxu1 %v17288_v15  ;;  %15752 = vmatprep.subr.bf16.mxu0 %v17289_v24 }
 0x204   : > { %15774 = vmatprep.subr.bf16.mxu1 %v17290_v40 }
 0x206   : > { %15753 = vmatpush3.bf16.msra.mxu0 %v17291_v0  ;;  %v17306_v0 = vld [vmem:[%s22285_s4 + $0xaf8] sm:$0xff]  }
 0x207   : > { %15775 = vmatpush3.bf16.msra.mxu1 %v17292_v35  ;;  %15754 = vmatprep.subr.bf16.mxu0 %v17293_v2  ;;  %v17307_v35 = vld [vmem:[%s22285_s4 + $0xa38] sm:$0xff]   ;;  %v4221_v2 = vcombine.high %v19791_v3, %v19791_v3 }
 0x208   : > { %15776 = vmatprep.subr.bf16.mxu1 %v17294_v44 }
 0x20a   : > { %15755 = vmatpush3.bf16.msra.mxu0 %v17295_v18  ;;  %v4228_v18 = vrot.slane %v19679_v11, %v18423_v55  ;;  %v17312_v11 = vld [vmem:[%s22285_s4 + $0xb80] sm:$0xff]  }
 0x20b   : > { %15777 = vmatpush3.bf16.msra.mxu1 %v17296_v7  ;;  %15756 = vmatprep.subr.bf16.mxu0 %v17297_v31  ;;  %v17309_v7 = vld [vmem:[%s22285_s4 + $0xb40] sm:$0xff]  }
 0x20c   : > { %v15454_v58 = vpop.f32.mrb[104].mxu0  ;;  %15778 = vmatprep.subr.bf16.mxu1 %v17298_v16  ;;  %v17310_v31 = vld [vmem:[%s22285_s4 + $0xbc0] sm:$0xff]  }
 0x20d   : > { %v15455_v6 = vpop.f32.mrb[105].mxu0  ;;  %v15476_v53 = vpop.f32.mrb[80].mxu1  ;;  %v17311_v16 = vld [vmem:[%s22285_s4 + $0xb00] sm:$0xff]  }
 0x20e   : > { %v15456_v56 = vadd.f32 %v15455_v6, %v15454_v58  ;;  %v15457_v60 = vpop.f32.mrb[106].mxu0  ;;  %v15477_v5 = vpop.f32.mrb[81].mxu1  ;;  %15757 = vmatpush3.bf16.msra.mxu0 %v17299_v26  ;;  %v4249_v26 = vrot.slane %v4221_v2, %v18423_v55  ;;  %v17317_v6 = vld [vmem:[%s22285_s4 + $0xb50] sm:$0xff]   ;;  %v17331_v2 = vld [vmem:[%s22285_s4 + $0xb28] sm:$0xff]  }
 0x20f   : > { %v15478_v19 = vadd.f32 %v15477_v5, %v15476_v53  ;;  %15779 = vmatpush3.bf16.msra.mxu1 %v17300_v48  ;;  %v15458_v28 = vpop.f32.mrb[107].mxu0  ;;  %v15479_v15 = vpop.f32.mrb[82].mxu1  ;;  %15758 = vmatprep.subr.bf16.mxu0 %v17301_v52  ;;  %v4250_v48 = vcombine.high %v4228_v18, %v4228_v18  ;;  %v17314_v52 = vld [vmem:[%s22285_s4 + $0xbc8] sm:$0xff]   ;;  %v17318_v53 = vld [vmem:[%s22285_s4 + $0xbd0] sm:$0xff]   ;;  %v17322_v60 = vld [vmem:[%s22285_s4 + $0xbd8] sm:$0xff]  }
 0x210   : > { %v11291_v24 = vadd.f32 %v15456_v56, %v19696_v39  ;;  %v15480_v40 = vpop.f32.mrb[83].mxu1  ;;  %15780 = vmatprep.subr.bf16.mxu1 %v17302_v8  ;;  %v17308_v39 = vld [vmem:[%s22285_s4 + $0xab8] sm:$0xff]   ;;  %v17315_v8 = vld [vmem:[%s22285_s4 + $0xb08] sm:$0xff]   ;;  %v4253_v58 = vcombine.high %v4249_v26, %v4249_v26  ;;  %v17325_v28 = vld [vmem:[%s22285_s4 + $0xb60] sm:$0xff]  }
 0x211   : > { %v17321_v56 = vld [vmem:[%s22285_s4 + $0xb58] sm:$0xff]   ;;  %v17326_v15 = vld [vmem:[%s22285_s4 + $0xbe0] sm:$0xff]  }
 0x212   : > { %v19802_v44 = vadd.f32 %v15478_v19, %v11291_v24  ;;  %15759 = vmatpush3.bf16.msra.mxu0 %v17303_v29  ;;  %v17316_v29 = vld [vmem:[%s22285_s4 + $0xb88] sm:$0xff]   ;;  %v17323_v5 = vld [vmem:[%s22285_s4 + $0xb18] sm:$0xff]   ;;  %v17327_v24 = vld [vmem:[%s22285_s4 + $0xb20] sm:$0xff]  }
 0x213   : > { %15781 = vmatpush3.bf16.msra.mxu1 %v17304_v41  ;;  %15760 = vmatprep.subr.bf16.mxu0 %v17305_v32  ;;  %v17319_v41 = vld [vmem:[%s22285_s4 + $0xb10] sm:$0xff]   ;;  %v17324_v19 = vld [vmem:[%s22285_s4 + $0xb98] sm:$0xff]   ;;  %v17328_v40 = vld [vmem:[%s22285_s4 + $0xba0] sm:$0xff]  }
 0x214   : > { %15782 = vmatprep.subr.bf16.mxu1 %v17306_v0  ;;  %v17320_v32 = vld [vmem:[%s22285_s4 + $0xb90] sm:$0xff]   ;;  %v17329_v0 = vld [vmem:[%s22285_s4 + $0xb68] sm:$0xff]  }
 0x216   : > { %15761 = vmatpush3.bf16.msra.mxu0 %v17307_v35  ;;  %v17330_v35 = vld [vmem:[%s22285_s4 + $0xbe8] sm:$0xff]  }
 0x217   : > { %15783 = vmatpush3.bf16.msra.mxu1 %v17308_v39  ;;  %15790 = vmatprep.subr.bf16.mxu0 %v17309_v7  ;;  %v17332_v39 = vld [vmem:[%s22285_s4 + $0xba8] sm:$0xff]   ;;  %v19886_v7 = vld [vmem:[%s18419_s22 + $0x30] sm:$0xff] }
 0x218   : > { %15812 = vmatprep.subr.bf16.mxu1 %v17310_v31  ;;  %v17334_v31 = vld [vmem:[%s22285_s4 + $0xbf0] sm:$0xff]  }
 0x219   : > { %11849 = vmatmul.mubr.bf16.vlgmr.msra.gmra.mrb[132].mxu0 %v4228_v18  ;;  %v17333_v18 = vld [vmem:[%s22285_s4 + $0xb70] sm:$0xff]  }
 0x21a   : > { %11889 = vmatmul.mubr.bf16.vlgmr.msra.gmra.mrb[108].mxu1 %v4250_v48  ;;  %15791 = vmatpush3.bf16.msra.mxu0 %v17311_v16 }
 0x21b   : > { %15813 = vmatpush3.bf16.msra.mxu1 %v17312_v11  ;;  %15792 = vmatprep.subr.bf16.mxu0 %v17313_v63  ;;  %v17336_v63 = vld [vmem:[%s22285_s4 + $0xbb0] sm:$0xff]  }
 0x21c   : > { %15814 = vmatprep.subr.bf16.mxu1 %v17314_v52  ;;  %11928 = vmatprep.mubr.bf16.mxu0 %v4249_v26  ;;  %v17335_v26 = vld [vmem:[%s22285_s4 + $0xb30] sm:$0xff]   ;;  %v17337_v52 = vld [vmem:[%s22285_s4 + $0xb78] sm:$0xff]  }
 0x21d   : > { %11968 = vmatprep.mubr.bf16.mxu1 %v4253_v58 }
 0x21e   : > { %15793 = vmatpush3.bf16.msra.mxu0 %v17315_v8  ;;  %v19902_v8 = vrot.slane %v19886_v7, %v18423_v55 }
 0x21f   : > { %15815 = vmatpush3.bf16.msra.mxu1 %v17316_v29  ;;  %15794 = vmatprep.subr.bf16.mxu0 %v17317_v6 }
 0x220   : > { %15816 = vmatprep.subr.bf16.mxu1 %v17318_v53 }
 0x222   : > { %15795 = vmatpush3.bf16.msra.mxu0 %v17319_v41 }
 0x223   : > { %15817 = vmatpush3.bf16.msra.mxu1 %v17320_v32  ;;  %15796 = vmatprep.subr.bf16.mxu0 %v17321_v56 }
 0x224   : > { %15818 = vmatprep.subr.bf16.mxu1 %v17322_v60 }
 0x226   : > { %15797 = vmatpush3.bf16.msra.mxu0 %v17323_v5  ;;  %v17338_v5 = vld [vmem:[%s22285_s4 + $0xbf8] sm:$0xff]  }
 0x227   : > { %15819 = vmatpush3.bf16.msra.mxu1 %v17324_v19  ;;  %15798 = vmatprep.subr.bf16.mxu0 %v17325_v28  ;;  %v17339_v19 = vld [vmem:[%s22285_s4 + $0xb38] sm:$0xff]   ;;  %v4269_v28 = vcombine.high %v19902_v8, %v19902_v8 }
 0x228   : > { %15820 = vmatprep.subr.bf16.mxu1 %v17326_v15 }
 0x22a   : > { %15799 = vmatpush3.bf16.msra.mxu0 %v17327_v24  ;;  %v4235_v24 = vrot.slane %v19791_v3, %v18423_v55  ;;  %v17345_v3 = vld [vmem:[%s22285_s4 + $0xc80] sm:$0xff]  }
 0x22b   : > { %15821 = vmatpush3.bf16.msra.mxu1 %v17328_v40  ;;  %15800 = vmatprep.subr.bf16.mxu0 %v17329_v0  ;;  %v17342_v40 = vld [vmem:[%s22285_s4 + $0xc40] sm:$0xff]  }
 0x22c   : > { %v15498_v16 = vpop.f32.mrb[108].mxu0  ;;  %15822 = vmatprep.subr.bf16.mxu1 %v17330_v35  ;;  %v17343_v0 = vld [vmem:[%s22285_s4 + $0xcc0] sm:$0xff]  }
 0x22d   : > { %v15499_v48 = vpop.f32.mrb[109].mxu0  ;;  %v15520_v11 = vpop.f32.mrb[84].mxu1  ;;  %v17344_v35 = vld [vmem:[%s22285_s4 + $0xc00] sm:$0xff]  }
 0x22e   : > { %v15500_v58 = vadd.f32 %v15499_v48, %v15498_v16  ;;  %v15501_v29 = vpop.f32.mrb[110].mxu0  ;;  %v15521_v6 = vpop.f32.mrb[85].mxu1  ;;  %15801 = vmatpush3.bf16.msra.mxu0 %v17331_v2  ;;  %v4291_v2 = vrot.slane %v4269_v28, %v18423_v55  ;;  %v17348_v16 = vld [vmem:[%s22285_s4 + $0xc08] sm:$0xff]  }
 0x22f   : > { %v15522_v53 = vadd.f32 %v15521_v6, %v15520_v11  ;;  %15823 = vmatpush3.bf16.msra.mxu1 %v17332_v39  ;;  %v15502_v41 = vpop.f32.mrb[111].mxu0  ;;  %v15523_v32 = vpop.f32.mrb[86].mxu1  ;;  %15802 = vmatprep.subr.bf16.mxu0 %v17333_v18  ;;  %v4251_v39 = vcombine.high %v4235_v24, %v4235_v24  ;;  %v17346_v18 = vld [vmem:[%s22285_s4 + $0xc48] sm:$0xff]   ;;  %v17350_v11 = vld [vmem:[%s22285_s4 + $0xc50] sm:$0xff]   ;;  %v17354_v29 = vld [vmem:[%s22285_s4 + $0xc58] sm:$0xff]  }
 0x230   : > { %v11371_v56 = vadd.f32 %v15500_v58, %v19802_v44  ;;  %v15524_v60 = vpop.f32.mrb[87].mxu1  ;;  %15824 = vmatprep.subr.bf16.mxu1 %v17334_v31  ;;  %v17340_v44 = vld [vmem:[%s22285_s4 + $0xbb8] sm:$0xff]   ;;  %v17347_v31 = vld [vmem:[%s22285_s4 + $0xcc8] sm:$0xff]   ;;  %v17353_v58 = vld [vmem:[%s22285_s4 + $0xc90] sm:$0xff]  }
 0x231   : > { %v17349_v48 = vld [vmem:[%s22285_s4 + $0xc88] sm:$0xff]   ;;  %v17355_v6 = vld [vmem:[%s22285_s4 + $0xcd8] sm:$0xff]   ;;  %v17358_v32 = vld [vmem:[%s22285_s4 + $0xc60] sm:$0xff]  }
 0x232   : > { %v19913_v15 = vadd.f32 %v15522_v53, %v11371_v56  ;;  %15803 = vmatpush3.bf16.msra.mxu0 %v17335_v26  ;;  %v4301_v26 = vcombine.high %v4291_v2, %v4291_v2  ;;  %v17356_v53 = vld [vmem:[%s22285_s4 + $0xc18] sm:$0xff]   ;;  %v17359_v56 = vld [vmem:[%s22285_s4 + $0xce0] sm:$0xff]   ;;  %v17363_v28 = vld [vmem:[%s22285_s4 + $0xce8] sm:$0xff]  }
 0x233   : > { %15825 = vmatpush3.bf16.msra.mxu1 %v17336_v63  ;;  %15804 = vmatprep.subr.bf16.mxu0 %v17337_v52  ;;  %v17351_v63 = vld [vmem:[%s22285_s4 + $0xcd0] sm:$0xff]   ;;  %v17357_v41 = vld [vmem:[%s22285_s4 + $0xc98] sm:$0xff]   ;;  %v17360_v60 = vld [vmem:[%s22285_s4 + $0xc20] sm:$0xff]  }
 0x234   : > { %15826 = vmatprep.subr.bf16.mxu1 %v17338_v5  ;;  %v17352_v52 = vld [vmem:[%s22285_s4 + $0xc10] sm:$0xff]   ;;  %v17361_v5 = vld [vmem:[%s22285_s4 + $0xca0] sm:$0xff]  }
 0x236   : > { %15805 = vmatpush3.bf16.msra.mxu0 %v17339_v19  ;;  %v17362_v19 = vld [vmem:[%s22285_s4 + $0xc68] sm:$0xff]  }
 0x237   : > { %15827 = vmatpush3.bf16.msra.mxu1 %v17340_v44  ;;  %15834 = vmatprep.subr.bf16.mxu0 %v17342_v40  ;;  %v17364_v44 = vld [vmem:[%s22285_s4 + $0xc28] sm:$0xff]  }
 0x238   : > { %15856 = vmatprep.subr.bf16.mxu1 %v17343_v0  ;;  %v17365_v40 = vld [vmem:[%s22285_s4 + $0xca8] sm:$0xff]   ;;  %v17366_v0 = vld [vmem:[%s22285_s4 + $0xc70] sm:$0xff]  }
 0x239   : > { %11929 = vmatmul.mubr.bf16.vlgmr.msra.gmra.mrb[136].mxu0 %v4235_v24  ;;  %v4254_v24 = vcombine.high %v19886_v7, %v19886_v7  ;;  %v17368_v7 = vld [vmem:[%s22285_s4 + $0xc30] sm:$0xff]  }
 0x23a   : > { %11969 = vmatmul.mubr.bf16.vlgmr.msra.gmra.mrb[112].mxu1 %v4251_v39  ;;  %15835 = vmatpush3.bf16.msra.mxu0 %v17344_v35 }
 0x23b   : > { %15857 = vmatpush3.bf16.msra.mxu1 %v17345_v3  ;;  %15836 = vmatprep.subr.bf16.mxu0 %v17346_v18  ;;  %v17369_v18 = vld [vmem:[%s22285_s4 + $0xcb0] sm:$0xff]  }
 0x23c   : > { %15858 = vmatprep.subr.bf16.mxu1 %v17347_v31  ;;  %12008 = vmatprep.mubr.bf16.mxu0 %v4291_v2  ;;  %v17367_v2 = vld [vmem:[%s22285_s4 + $0xcf0] sm:$0xff]   ;;  %v20008_v31 = vrot.slane %v4254_v24, %v18423_v55 }
 0x23d   : > { %12048 = vmatprep.mubr.bf16.mxu1 %v4301_v26 }
 0x23e   : > { %15837 = vmatpush3.bf16.msra.mxu0 %v17348_v16 }
 0x23f   : > { %15859 = vmatpush3.bf16.msra.mxu1 %v17349_v48  ;;  %15838 = vmatprep.subr.bf16.mxu0 %v17350_v11 }
 0x240   : > { %15860 = vmatprep.subr.bf16.mxu1 %v17351_v63 }
 0x242   : > { %15839 = vmatpush3.bf16.msra.mxu0 %v17352_v52 }
 0x243   : > { %15861 = vmatpush3.bf16.msra.mxu1 %v17353_v58  ;;  %15840 = vmatprep.subr.bf16.mxu0 %v17354_v29  ;;  %v17370_v58 = vld [vmem:[%s22285_s4 + $0xc78] sm:$0xff]  }
 0x244   : > { %15862 = vmatprep.subr.bf16.mxu1 %v17355_v6  ;;  %v17371_v29 = vld [vmem:[%s22285_s4 + $0xcf8] sm:$0xff]  }
 0x246   : > { %15841 = vmatpush3.bf16.msra.mxu0 %v17356_v53 }
 0x247   : > { %15863 = vmatpush3.bf16.msra.mxu1 %v17357_v41  ;;  %15842 = vmatprep.subr.bf16.mxu0 %v17358_v32  ;;  %v17372_v41 = vld [vmem:[%s22285_s4 + $0xc38] sm:$0xff]   ;;  %v4270_v32 = vcombine.high %v20008_v31, %v20008_v31 }
 0x248   : > { %15864 = vmatprep.subr.bf16.mxu1 %v17359_v56 }
 0x24a   : > { %15843 = vmatpush3.bf16.msra.mxu0 %v17360_v60  ;;  %v17373_v60 = vld [vmem:[%s22285_s4 + $0xcb8] sm:$0xff]  }
 0x24b   : > { %15865 = vmatpush3.bf16.msra.mxu1 %v17361_v5  ;;  %15844 = vmatprep.subr.bf16.mxu0 %v17362_v19  ;;  %v4277_v5 = vrot.slane %v19902_v8, %v18423_v55  ;;  %v17375_v19 = vld [vmem:[%s22285_s4 + $0xdc0] sm:$0xff]  }
 0x24c   : > { %v15542_v35 = vpop.f32.mrb[112].mxu0  ;;  %15866 = vmatprep.subr.bf16.mxu1 %v17363_v28  ;;  %v17376_v28 = vld [vmem:[%s22285_s4 + $0xd00] sm:$0xff]  }
 0x24d   : > { %v15543_v39 = vpop.f32.mrb[113].mxu0  ;;  %v15564_v3 = vpop.f32.mrb[88].mxu1  ;;  %v4299_v24 = vcombine.high %v4277_v5, %v4277_v5  ;;  %v17377_v8 = vld [vmem:[%s22285_s4 + $0xd80] sm:$0xff]  }
 0x24e   : > { %v15544_v16 = vadd.f32 %v15543_v39, %v15542_v35  ;;  %v15545_v26 = vpop.f32.mrb[114].mxu0  ;;  %v15565_v48 = vpop.f32.mrb[89].mxu1  ;;  %15845 = vmatpush3.bf16.msra.mxu0 %v17364_v44  ;;  %v4298_v44 = vrot.slane %v4270_v32, %v18423_v55  ;;  %v17380_v35 = vld [vmem:[%s22285_s4 + $0xd08] sm:$0xff]  }
 0x24f   : > { %v15566_v11 = vadd.f32 %v15565_v48, %v15564_v3  ;;  %15867 = vmatpush3.bf16.msra.mxu1 %v17365_v40  ;;  %v15546_v63 = vpop.f32.mrb[115].mxu0  ;;  %v15567_v52 = vpop.f32.mrb[90].mxu1  ;;  %15846 = vmatprep.subr.bf16.mxu0 %v17366_v0  ;;  %v17378_v40 = vld [vmem:[%s22285_s4 + $0xd48] sm:$0xff]   ;;  %v17382_v3 = vld [vmem:[%s22285_s4 + $0xd50] sm:$0xff]   ;;  %v17386_v26 = vld [vmem:[%s22285_s4 + $0xd58] sm:$0xff]  }
 0x250   : > { %v11451_v6 = vadd.f32 %v15544_v16, %v19913_v15  ;;  %v15568_v53 = vpop.f32.mrb[91].mxu1  ;;  %15868 = vmatprep.subr.bf16.mxu1 %v17367_v2  ;;  %v17374_v15 = vld [vmem:[%s22285_s4 + $0xd40] sm:$0xff]   ;;  %v17379_v0 = vld [vmem:[%s22285_s4 + $0xdc8] sm:$0xff]   ;;  %v4302_v2 = vcombine.high %v4298_v44, %v4298_v44  ;;  %v17385_v16 = vld [vmem:[%s22285_s4 + $0xd90] sm:$0xff]  }
 0x251   : > { %v17381_v39 = vld [vmem:[%s22285_s4 + $0xd88] sm:$0xff]   ;;  %v17387_v48 = vld [vmem:[%s22285_s4 + $0xdd8] sm:$0xff]   ;;  %v17390_v52 = vld [vmem:[%s22285_s4 + $0xd60] sm:$0xff]  }
 0x252   : > { %v20022_v56 = vadd.f32 %v15566_v11, %v11451_v6  ;;  %15847 = vmatpush3.bf16.msra.mxu0 %v17368_v7  ;;  %v17383_v7 = vld [vmem:[%s22285_s4 + $0xdd0] sm:$0xff]   ;;  %v17388_v11 = vld [vmem:[%s22285_s4 + $0xd18] sm:$0xff]   ;;  %v17393_v6 = vld [vmem:[%s22285_s4 + $0xda0] sm:$0xff]  }
 0x253   : > { %15869 = vmatpush3.bf16.msra.mxu1 %v17369_v18  ;;  %15848 = vmatprep.subr.bf16.mxu0 %v17370_v58  ;;  %v17384_v18 = vld [vmem:[%s22285_s4 + $0xd10] sm:$0xff]   ;;  %v17389_v63 = vld [vmem:[%s22285_s4 + $0xd98] sm:$0xff]   ;;  %v17391_v58 = vld [vmem:[%s22285_s4 + $0xde0] sm:$0xff]  }
 0x254   : > { %15870 = vmatprep.subr.bf16.mxu1 %v17371_v29  ;;  %v17392_v29 = vld [vmem:[%s22285_s4 + $0xd20] sm:$0xff]   ;;  %v17394_v53 = vld [vmem:[%s22285_s4 + $0xd68] sm:$0xff]  }
 0x255   : > { %v17396_v32 = vld [vmem:[%s22285_s4 + $0xd28] sm:$0xff]  }
 0x256   : > { %15849 = vmatpush3.bf16.msra.mxu0 %v17372_v41  ;;  %v17395_v41 = vld [vmem:[%s22285_s4 + $0xde8] sm:$0xff]  }
 0x257   : > { %15871 = vmatpush3.bf16.msra.mxu1 %v17373_v60  ;;  %15878 = vmatprep.subr.bf16.mxu0 %v17374_v15  ;;  %v17397_v60 = vld [vmem:[%s22285_s4 + $0xda8] sm:$0xff]   ;;  %v20106_v15 = vld [vmem:[%s18419_s22 + $0x38] sm:$0xff] }
 0x258   : > { %15900 = vmatprep.subr.bf16.mxu1 %v17375_v19  ;;  %v17399_v19 = vld [vmem:[%s22285_s4 + $0xdf0] sm:$0xff]  }
 0x259   : > { %12009 = vmatmul.mubr.bf16.vlgmr.msra.gmra.mrb[140].mxu0 %v4277_v5  ;;  %v17398_v5 = vld [vmem:[%s22285_s4 + $0xd70] sm:$0xff]  }
 0x25a   : > { %12049 = vmatmul.mubr.bf16.vlgmr.msra.gmra.mrb[116].mxu1 %v4299_v24  ;;  %15879 = vmatpush3.bf16.msra.mxu0 %v17376_v28 }
 0x25b   : > { %15901 = vmatpush3.bf16.msra.mxu1 %v17377_v8  ;;  %15880 = vmatprep.subr.bf16.mxu0 %v17378_v40  ;;  %v17401_v40 = vld [vmem:[%s22285_s4 + $0xdb0] sm:$0xff]  }
 0x25c   : > { %15902 = vmatprep.subr.bf16.mxu1 %v17379_v0  ;;  %12088 = vmatprep.mubr.bf16.mxu0 %v4298_v44  ;;  %v17400_v44 = vld [vmem:[%s22285_s4 + $0xd30] sm:$0xff]   ;;  %v20119_v0 = vrot.slane %v20106_v15, %v18423_v55 }
 0x25d   : > { %12128 = vmatprep.mubr.bf16.mxu1 %v4302_v2 }
 0x25e   : > { %15881 = vmatpush3.bf16.msra.mxu0 %v17380_v35 }
 0x25f   : > { %15903 = vmatpush3.bf16.msra.mxu1 %v17381_v39  ;;  %15882 = vmatprep.subr.bf16.mxu0 %v17382_v3  ;;  %v17402_v3 = vld [vmem:[%s22285_s4 + $0xd78] sm:$0xff]  }
 0x260   : > { %15904 = vmatprep.subr.bf16.mxu1 %v17383_v7  ;;  %v17403_v7 = vld [vmem:[%s22285_s4 + $0xdf8] sm:$0xff]  }
 0x262   : > { %15883 = vmatpush3.bf16.msra.mxu0 %v17384_v18 }
 0x263   : > { %15905 = vmatpush3.bf16.msra.mxu1 %v17385_v16  ;;  %15884 = vmatprep.subr.bf16.mxu0 %v17386_v26 }
 0x264   : > { %15906 = vmatprep.subr.bf16.mxu1 %v17387_v48 }
 0x266   : > { %15885 = vmatpush3.bf16.msra.mxu0 %v17388_v11 }
 0x267   : > { %15907 = vmatpush3.bf16.msra.mxu1 %v17389_v63  ;;  %15886 = vmatprep.subr.bf16.mxu0 %v17390_v52  ;;  %v17404_v63 = vld [vmem:[%s22285_s4 + $0xd38] sm:$0xff]  }
 0x268   : > { %15908 = vmatprep.subr.bf16.mxu1 %v17391_v58  ;;  %v17405_v52 = vld [vmem:[%s22285_s4 + $0xdb8] sm:$0xff]   ;;  %v4318_v58 = vcombine.high %v20119_v0, %v20119_v0 }
 0x26a   : > { %15887 = vmatpush3.bf16.msra.mxu0 %v17392_v29 }
 0x26b   : > { %15909 = vmatpush3.bf16.msra.mxu1 %v17393_v6  ;;  %15888 = vmatprep.subr.bf16.mxu0 %v17394_v53  ;;  %v4284_v6 = vrot.slane %v20008_v31, %v18423_v55  ;;  %v17408_v53 = vld [vmem:[%s22285_s4 + $0xec0] sm:$0xff]   ;;  %v4340_v31 = vrot.slane %v4318_v58, %v18423_v55  ;;  %v17429_v58 = vld [vmem:[%s22285_s4 + $0xe28] sm:$0xff]  }
 0x26c   : > { %v15586_v28 = vpop.f32.mrb[116].mxu0  ;;  %15910 = vmatprep.subr.bf16.mxu1 %v17395_v41  ;;  %v17409_v41 = vld [vmem:[%s22285_s4 + $0xe00] sm:$0xff]  }
 0x26d   : > { %v15587_v24 = vpop.f32.mrb[117].mxu0  ;;  %v15608_v8 = vpop.f32.mrb[92].mxu1 }
 0x26e   : > { %v15588_v35 = vadd.f32 %v15587_v24, %v15586_v28  ;;  %v15589_v2 = vpop.f32.mrb[118].mxu0  ;;  %v15609_v39 = vpop.f32.mrb[93].mxu1  ;;  %15889 = vmatpush3.bf16.msra.mxu0 %v17396_v32  ;;  %v17410_v32 = vld [vmem:[%s22285_s4 + $0xe80] sm:$0xff]   ;;  %v17413_v28 = vld [vmem:[%s22285_s4 + $0xe08] sm:$0xff]   ;;  %v4350_v24 = vcombine.high %v4340_v31, %v4340_v31 }
 0x26f   : > { %v15610_v18 = vadd.f32 %v15609_v39, %v15608_v8  ;;  %15911 = vmatpush3.bf16.msra.mxu1 %v17397_v60  ;;  %v15590_v16 = vpop.f32.mrb[119].mxu0  ;;  %v15611_v26 = vpop.f32.mrb[94].mxu1  ;;  %15890 = vmatprep.subr.bf16.mxu0 %v17398_v5  ;;  %v4300_v60 = vcombine.high %v4284_v6, %v4284_v6  ;;  %v17411_v5 = vld [vmem:[%s22285_s4 + $0xe48] sm:$0xff]   ;;  %v17415_v8 = vld [vmem:[%s22285_s4 + $0xe50] sm:$0xff]   ;;  %v17419_v39 = vld [vmem:[%s22285_s4 + $0xe58] sm:$0xff]  }
 0x270   : > { %v11531_v48 = vadd.f32 %v15588_v35, %v20022_v56  ;;  %v15612_v11 = vpop.f32.mrb[95].mxu1  ;;  %15912 = vmatprep.subr.bf16.mxu1 %v17399_v19  ;;  %v17407_v56 = vld [vmem:[%s22285_s4 + $0xe40] sm:$0xff]   ;;  %v17412_v19 = vld [vmem:[%s22285_s4 + $0xec8] sm:$0xff]   ;;  %v17417_v35 = vld [vmem:[%s22285_s4 + $0xe10] sm:$0xff]  }
 0x271   : > { %v17418_v2 = vld [vmem:[%s22285_s4 + $0xe90] sm:$0xff]   ;;  %v17423_v16 = vld [vmem:[%s22285_s4 + $0xe60] sm:$0xff]  }
 0x272   : > { %v20136_v29 = vadd.f32 %v15610_v18, %v11531_v48  ;;  %15891 = vmatpush3.bf16.msra.mxu0 %v17400_v44  ;;  %v17414_v44 = vld [vmem:[%s22285_s4 + $0xe88] sm:$0xff]   ;;  %v17422_v18 = vld [vmem:[%s22285_s4 + $0xe98] sm:$0xff]   ;;  %v17424_v26 = vld [vmem:[%s22285_s4 + $0xee0] sm:$0xff]  }
 0x273   : > { %15913 = vmatpush3.bf16.msra.mxu1 %v17401_v40  ;;  %15892 = vmatprep.subr.bf16.mxu0 %v17402_v3  ;;  %v17416_v40 = vld [vmem:[%s22285_s4 + $0xed0] sm:$0xff]   ;;  %v17420_v3 = vld [vmem:[%s22285_s4 + $0xed8] sm:$0xff]   ;;  %v17425_v48 = vld [vmem:[%s22285_s4 + $0xe20] sm:$0xff]  }
 0x274   : > { %15914 = vmatprep.subr.bf16.mxu1 %v17403_v7  ;;  %v17421_v7 = vld [vmem:[%s22285_s4 + $0xe18] sm:$0xff]   ;;  %v17426_v11 = vld [vmem:[%s22285_s4 + $0xea0] sm:$0xff]  }
 0x276   : > { %15893 = vmatpush3.bf16.msra.mxu0 %v17404_v63  ;;  %v17427_v63 = vld [vmem:[%s22285_s4 + $0xe68] sm:$0xff]  }
 0x277   : > { %15915 = vmatpush3.bf16.msra.mxu1 %v17405_v52  ;;  %15922 = vmatprep.subr.bf16.mxu0 %v17407_v56  ;;  %v17428_v52 = vld [vmem:[%s22285_s4 + $0xee8] sm:$0xff]   ;;  %v4303_v56 = vcombine.high %v20106_v15, %v20106_v15  ;;  %v17434_v15 = vld [vmem:[%s22285_s4 + $0xeb0] sm:$0xff]  }
 0x278   : > { %15944 = vmatprep.subr.bf16.mxu1 %v17408_v53  ;;  %v17431_v53 = vld [vmem:[%s22285_s4 + $0xe70] sm:$0xff]  }
 0x279   : > { %12089 = vmatmul.mubr.bf16.vlgmr.msra.gmra.mrb[144].mxu0 %v4284_v6  ;;  %v17430_v6 = vld [vmem:[%s22285_s4 + $0xea8] sm:$0xff]  }
 0x27a   : > { %12129 = vmatmul.mubr.bf16.vlgmr.msra.gmra.mrb[120].mxu1 %v4300_v60  ;;  %15923 = vmatpush3.bf16.msra.mxu0 %v17409_v41  ;;  %v17432_v41 = vld [vmem:[%s22285_s4 + $0xef0] sm:$0xff]  }
 0x27b   : > { %15945 = vmatpush3.bf16.msra.mxu1 %v17410_v32  ;;  %15924 = vmatprep.subr.bf16.mxu0 %v17411_v5 }
 0x27c   : > { %15946 = vmatprep.subr.bf16.mxu1 %v17412_v19  ;;  %12168 = vmatprep.mubr.bf16.mxu0 %v4340_v31  ;;  %v17433_v31 = vld [vmem:[%s22285_s4 + $0xe30] sm:$0xff]   ;;  %v17435_v19 = vld [vmem:[%s22285_s4 + $0xe78] sm:$0xff]  }
 0x27d   : > { %12208 = vmatprep.mubr.bf16.mxu1 %v4350_v24 }
 0x27e   : > { %15925 = vmatpush3.bf16.msra.mxu0 %v17413_v28  ;;  %v20231_v28 = vrot.slane %v4303_v56, %v18423_v55  ;;  %v17443_v56 = vld [vmem:[%s22285_s4 + $0xf48] sm:$0xff]  }
 0x27f   : > { %15947 = vmatpush3.bf16.msra.mxu1 %v17414_v44  ;;  %15926 = vmatprep.subr.bf16.mxu0 %v17415_v8 }
 0x280   : > { %15948 = vmatprep.subr.bf16.mxu1 %v17416_v40 }
 0x282   : > { %15927 = vmatpush3.bf16.msra.mxu0 %v17417_v35 }
 0x283   : > { %15949 = vmatpush3.bf16.msra.mxu1 %v17418_v2  ;;  %15928 = vmatprep.subr.bf16.mxu0 %v17419_v39 }
 0x284   : > { %15950 = vmatprep.subr.bf16.mxu1 %v17420_v3 }
 0x286   : > { %15929 = vmatpush3.bf16.msra.mxu0 %v17421_v7  ;;  %v17436_v7 = vld [vmem:[%s22285_s4 + $0xef8] sm:$0xff]  }
 0x287   : > { %15951 = vmatpush3.bf16.msra.mxu1 %v17422_v18  ;;  %15930 = vmatprep.subr.bf16.mxu0 %v17423_v16  ;;  %v17437_v18 = vld [vmem:[%s22285_s4 + $0xe38] sm:$0xff]   ;;  %v4319_v16 = vcombine.high %v20231_v28, %v20231_v28 }
 0x288   : > { %15952 = vmatprep.subr.bf16.mxu1 %v17424_v26 }
 0x28a   : > { %15931 = vmatpush3.bf16.msra.mxu0 %v17425_v48  ;;  %v4326_v48 = vrot.slane %v20119_v0, %v18423_v55  ;;  %v17442_v0 = vld [vmem:[%s22285_s4 + $0xf80] sm:$0xff]  }
 0x28b   : > { %15953 = vmatpush3.bf16.msra.mxu1 %v17426_v11  ;;  %15932 = vmatprep.subr.bf16.mxu0 %v17427_v63  ;;  %v17439_v11 = vld [vmem:[%s22285_s4 + $0xf40] sm:$0xff]  }
 0x28c   : > { %v15630_v32 = vpop.f32.mrb[120].mxu0  ;;  %15954 = vmatprep.subr.bf16.mxu1 %v17428_v52  ;;  %v17440_v63 = vld [vmem:[%s22285_s4 + $0xfc0] sm:$0xff]  }
 0x28d   : > { %v15631_v60 = vpop.f32.mrb[121].mxu0  ;;  %v15652_v5 = vpop.f32.mrb[96].mxu1  ;;  %v17441_v52 = vld [vmem:[%s22285_s4 + $0xf00] sm:$0xff]  }
 0x28e   : > { %v15632_v44 = vadd.f32 %v15631_v60, %v15630_v32  ;;  %v15633_v24 = vpop.f32.mrb[122].mxu0  ;;  %v15653_v8 = vpop.f32.mrb[97].mxu1  ;;  %15933 = vmatpush3.bf16.msra.mxu0 %v17429_v58  ;;  %v4347_v58 = vrot.slane %v4319_v16, %v18423_v55  ;;  %v17447_v60 = vld [vmem:[%s22285_s4 + $0xf50] sm:$0xff]   ;;  %v17461_v16 = vld [vmem:[%s22285_s4 + $0xf28] sm:$0xff]  }
 0x28f   : > { %v15654_v40 = vadd.f32 %v15653_v8, %v15652_v5  ;;  %15955 = vmatpush3.bf16.msra.mxu1 %v17430_v6  ;;  %v15634_v35 = vpop.f32.mrb[123].mxu0  ;;  %v15655_v2 = vpop.f32.mrb[98].mxu1  ;;  %15934 = vmatprep.subr.bf16.mxu0 %v17431_v53  ;;  %v4348_v6 = vcombine.high %v4326_v48, %v4326_v48  ;;  %v17444_v53 = vld [vmem:[%s22285_s4 + $0xfc8] sm:$0xff]   ;;  %v17448_v5 = vld [vmem:[%s22285_s4 + $0xfd0] sm:$0xff]   ;;  %v17452_v24 = vld [vmem:[%s22285_s4 + $0xfd8] sm:$0xff]  }
 0x290   : > { %v11611_v39 = vadd.f32 %v15632_v44, %v20136_v29  ;;  %v15656_v3 = vpop.f32.mrb[99].mxu1  ;;  %15956 = vmatprep.subr.bf16.mxu1 %v17432_v41  ;;  %v17438_v29 = vld [vmem:[%s22285_s4 + $0xeb8] sm:$0xff]   ;;  %v17445_v41 = vld [vmem:[%s22285_s4 + $0xf08] sm:$0xff]   ;;  %v4351_v32 = vcombine.high %v4347_v58, %v4347_v58  ;;  %v17455_v35 = vld [vmem:[%s22285_s4 + $0xf60] sm:$0xff]  }
 0x291   : > { %v17451_v44 = vld [vmem:[%s22285_s4 + $0xf58] sm:$0xff]   ;;  %v17456_v2 = vld [vmem:[%s22285_s4 + $0xfe0] sm:$0xff]  }
 0x292   : > { %v20242_v26 = vadd.f32 %v15654_v40, %v11611_v39  ;;  %15935 = vmatpush3.bf16.msra.mxu0 %v17433_v31  ;;  %v17446_v31 = vld [vmem:[%s22285_s4 + $0xf88] sm:$0xff]   ;;  %v17453_v8 = vld [vmem:[%s22285_s4 + $0xf18] sm:$0xff]   ;;  %v17457_v39 = vld [vmem:[%s22285_s4 + $0xf20] sm:$0xff]  }
 0x293   : > { %15957 = vmatpush3.bf16.msra.mxu1 %v17434_v15  ;;  %15936 = vmatprep.subr.bf16.mxu0 %v17435_v19  ;;  %v17449_v15 = vld [vmem:[%s22285_s4 + $0xf10] sm:$0xff]   ;;  %v17454_v40 = vld [vmem:[%s22285_s4 + $0xf98] sm:$0xff]   ;;  %v17458_v3 = vld [vmem:[%s22285_s4 + $0xfa0] sm:$0xff]  }
 0x294   : > { %15958 = vmatprep.subr.bf16.mxu1 %v17436_v7  ;;  %v17450_v19 = vld [vmem:[%s22285_s4 + $0xf90] sm:$0xff]   ;;  %v17459_v7 = vld [vmem:[%s22285_s4 + $0xf68] sm:$0xff]  }
 0x296   : > { %15937 = vmatpush3.bf16.msra.mxu0 %v17437_v18  ;;  %v17460_v18 = vld [vmem:[%s22285_s4 + $0xfe8] sm:$0xff]  }
 0x297   : > { %15959 = vmatpush3.bf16.msra.mxu1 %v17438_v29  ;;  %15966 = vmatprep.subr.bf16.mxu0 %v17439_v11  ;;  %v17462_v29 = vld [vmem:[%s22285_s4 + $0xfa8] sm:$0xff]   ;;  %v20326_v11 = vld [vmem:[%s18419_s22 + $0x40] sm:$0xff] }
 0x298   : > { %15988 = vmatprep.subr.bf16.mxu1 %v17440_v63  ;;  %v17464_v63 = vld [vmem:[%s22285_s4 + $0xff0] sm:$0xff]  }
 0x299   : > { %12169 = vmatmul.mubr.bf16.vlgmr.msra.gmra.mrb[148].mxu0 %v4326_v48  ;;  %v17463_v48 = vld [vmem:[%s22285_s4 + $0xf70] sm:$0xff]  }
 0x29a   : > { %12209 = vmatmul.mubr.bf16.vlgmr.msra.gmra.mrb[124].mxu1 %v4348_v6  ;;  %15967 = vmatpush3.bf16.msra.mxu0 %v17441_v52 }
 0x29b   : > { %15989 = vmatpush3.bf16.msra.mxu1 %v17442_v0  ;;  %15968 = vmatprep.subr.bf16.mxu0 %v17443_v56  ;;  %v17466_v56 = vld [vmem:[%s22285_s4 + $0xfb0] sm:$0xff]  }
 0x29c   : > { %15990 = vmatprep.subr.bf16.mxu1 %v17444_v53  ;;  %12248 = vmatprep.mubr.bf16.mxu0 %v4347_v58  ;;  %v17465_v58 = vld [vmem:[%s22285_s4 + $0xf30] sm:$0xff]   ;;  %v17467_v53 = vld [vmem:[%s22285_s4 + $0xf78] sm:$0xff]  }
 0x29d   : > { %12288 = vmatprep.mubr.bf16.mxu1 %v4351_v32 }
 0x29e   : > { %15969 = vmatpush3.bf16.msra.mxu0 %v17445_v41  ;;  %v20342_v41 = vrot.slane %v20326_v11, %v18423_v55 }
 0x29f   : > { %15991 = vmatpush3.bf16.msra.mxu1 %v17446_v31  ;;  %15970 = vmatprep.subr.bf16.mxu0 %v17447_v60 }
 0x2a0   : > { %15992 = vmatprep.subr.bf16.mxu1 %v17448_v5 }
 0x2a2   : > { %15971 = vmatpush3.bf16.msra.mxu0 %v17449_v15 }
 0x2a3   : > { %15993 = vmatpush3.bf16.msra.mxu1 %v17450_v19  ;;  %15972 = vmatprep.subr.bf16.mxu0 %v17451_v44 }
 0x2a4   : > { %15994 = vmatprep.subr.bf16.mxu1 %v17452_v24 }
 0x2a6   : > { %15973 = vmatpush3.bf16.msra.mxu0 %v17453_v8  ;;  %v17468_v8 = vld [vmem:[%s22285_s4 + $0xff8] sm:$0xff]  }
 0x2a7   : > { %15995 = vmatpush3.bf16.msra.mxu1 %v17454_v40  ;;  %15974 = vmatprep.subr.bf16.mxu0 %v17455_v35  ;;  %v17469_v40 = vld [vmem:[%s22285_s4 + $0xf38] sm:$0xff]   ;;  %v4367_v35 = vcombine.high %v20342_v41, %v20342_v41 }
 0x2a8   : > { %15996 = vmatprep.subr.bf16.mxu1 %v17456_v2 }
 0x2aa   : > { %15975 = vmatpush3.bf16.msra.mxu0 %v17457_v39  ;;  %v4333_v39 = vrot.slane %v20231_v28, %v18423_v55  ;;  %v17475_v28 = vld [vmem:[%s22285_s4 + $0x1080] sm:$0xff]  }
 0x2ab   : > { %15997 = vmatpush3.bf16.msra.mxu1 %v17458_v3  ;;  %15976 = vmatprep.subr.bf16.mxu0 %v17459_v7  ;;  %v17472_v3 = vld [vmem:[%s22285_s4 + $0x1040] sm:$0xff]  }
 0x2ac   : > { %v15674_v52 = vpop.f32.mrb[124].mxu0  ;;  %15998 = vmatprep.subr.bf16.mxu1 %v17460_v18  ;;  %v17473_v7 = vld [vmem:[%s22285_s4 + $0x10c0] sm:$0xff]  }
 0x2ad   : > { %v15675_v6 = vpop.f32.mrb[125].mxu0  ;;  %v15696_v0 = vpop.f32.mrb[100].mxu1  ;;  %v17474_v18 = vld [vmem:[%s22285_s4 + $0x1000] sm:$0xff]  }
 0x2ae   : > { %v15676_v32 = vadd.f32 %v15675_v6, %v15674_v52  ;;  %v15677_v31 = vpop.f32.mrb[126].mxu0  ;;  %v15697_v60 = vpop.f32.mrb[101].mxu1  ;;  %15977 = vmatpush3.bf16.msra.mxu0 %v17461_v16  ;;  %v4389_v16 = vrot.slane %v4367_v35, %v18423_v55  ;;  %v17478_v52 = vld [vmem:[%s22285_s4 + $0x1008] sm:$0xff]  }
 0x2af   : > { %v15698_v5 = vadd.f32 %v15697_v60, %v15696_v0  ;;  %15999 = vmatpush3.bf16.msra.mxu1 %v17462_v29  ;;  %v15678_v15 = vpop.f32.mrb[127].mxu0  ;;  %v15699_v19 = vpop.f32.mrb[102].mxu1  ;;  %15978 = vmatprep.subr.bf16.mxu0 %v17463_v48  ;;  %v4349_v29 = vcombine.high %v4333_v39, %v4333_v39  ;;  %v17476_v48 = vld [vmem:[%s22285_s4 + $0x1048] sm:$0xff]   ;;  %v17480_v0 = vld [vmem:[%s22285_s4 + $0x1050] sm:$0xff]   ;;  %v17484_v31 = vld [vmem:[%s22285_s4 + $0x1058] sm:$0xff]  }
 0x2b0   : > { %v11691_v44 = vadd.f32 %v15676_v32, %v20242_v26  ;;  %v15700_v24 = vpop.f32.mrb[103].mxu1  ;;  %16000 = vmatprep.subr.bf16.mxu1 %v17464_v63  ;;  %v17470_v26 = vld [vmem:[%s22285_s4 + $0xfb8] sm:$0xff]   ;;  %v17477_v63 = vld [vmem:[%s22285_s4 + $0x10c8] sm:$0xff]   ;;  %v17483_v32 = vld [vmem:[%s22285_s4 + $0x1090] sm:$0xff]  }
 0x2b1   : > { %v17479_v6 = vld [vmem:[%s22285_s4 + $0x1088] sm:$0xff]   ;;  %v17485_v60 = vld [vmem:[%s22285_s4 + $0x10d8] sm:$0xff]   ;;  %v17488_v19 = vld [vmem:[%s22285_s4 + $0x1060] sm:$0xff]  }
 0x2b2   : > { %v20353_v2 = vadd.f32 %v15698_v5, %v11691_v44  ;;  %15979 = vmatpush3.bf16.msra.mxu0 %v17465_v58  ;;  %v4399_v58 = vcombine.high %v4389_v16, %v4389_v16  ;;  %v17486_v5 = vld [vmem:[%s22285_s4 + $0x1018] sm:$0xff]   ;;  %v17489_v44 = vld [vmem:[%s22285_s4 + $0x10e0] sm:$0xff]   ;;  %v17493_v35 = vld [vmem:[%s22285_s4 + $0x10e8] sm:$0xff]  }
 0x2b3   : > { %16001 = vmatpush3.bf16.msra.mxu1 %v17466_v56  ;;  %15980 = vmatprep.subr.bf16.mxu0 %v17467_v53  ;;  %v17481_v56 = vld [vmem:[%s22285_s4 + $0x10d0] sm:$0xff]   ;;  %v17487_v15 = vld [vmem:[%s22285_s4 + $0x1098] sm:$0xff]   ;;  %v17490_v24 = vld [vmem:[%s22285_s4 + $0x1020] sm:$0xff]  }
 0x2b4   : > { %16002 = vmatprep.subr.bf16.mxu1 %v17468_v8  ;;  %v17482_v53 = vld [vmem:[%s22285_s4 + $0x1010] sm:$0xff]   ;;  %v17491_v8 = vld [vmem:[%s22285_s4 + $0x10a0] sm:$0xff]  }
 0x2b6   : > { %15981 = vmatpush3.bf16.msra.mxu0 %v17469_v40  ;;  %v17492_v40 = vld [vmem:[%s22285_s4 + $0x1068] sm:$0xff]  }
 0x2b7   : > { %16003 = vmatpush3.bf16.msra.mxu1 %v17470_v26  ;;  %16010 = vmatprep.subr.bf16.mxu0 %v17472_v3  ;;  %v17494_v26 = vld [vmem:[%s22285_s4 + $0x1028] sm:$0xff]  }
 0x2b8   : > { %16032 = vmatprep.subr.bf16.mxu1 %v17473_v7  ;;  %v17495_v3 = vld [vmem:[%s22285_s4 + $0x10a8] sm:$0xff]   ;;  %v17496_v7 = vld [vmem:[%s22285_s4 + $0x1070] sm:$0xff]  }
 0x2b9   : > { %12249 = vmatmul.mubr.bf16.vlgmr.msra.gmra.mrb[152].mxu0 %v4333_v39  ;;  %v4352_v39 = vcombine.high %v20326_v11, %v20326_v11  ;;  %v17498_v11 = vld [vmem:[%s22285_s4 + $0x1030] sm:$0xff]  }
 0x2ba   : > { %12289 = vmatmul.mubr.bf16.vlgmr.msra.gmra.mrb[128].mxu1 %v4349_v29  ;;  %16011 = vmatpush3.bf16.msra.mxu0 %v17474_v18 }
 0x2bb   : > { %16033 = vmatpush3.bf16.msra.mxu1 %v17475_v28  ;;  %16012 = vmatprep.subr.bf16.mxu0 %v17476_v48  ;;  %v17499_v48 = vld [vmem:[%s22285_s4 + $0x10b0] sm:$0xff]  }
 0x2bc   : > { %16034 = vmatprep.subr.bf16.mxu1 %v17477_v63  ;;  %12328 = vmatprep.mubr.bf16.mxu0 %v4389_v16  ;;  %v17497_v16 = vld [vmem:[%s22285_s4 + $0x10f0] sm:$0xff]   ;;  %v20448_v63 = vrot.slane %v4352_v39, %v18423_v55 }
 0x2bd   : > { %12368 = vmatprep.mubr.bf16.mxu1 %v4399_v58 }
 0x2be   : > { %16013 = vmatpush3.bf16.msra.mxu0 %v17478_v52 }
 0x2bf   : > { %16035 = vmatpush3.bf16.msra.mxu1 %v17479_v6  ;;  %16014 = vmatprep.subr.bf16.mxu0 %v17480_v0 }
 0x2c0   : > { %16036 = vmatprep.subr.bf16.mxu1 %v17481_v56 }
 0x2c2   : > { %16015 = vmatpush3.bf16.msra.mxu0 %v17482_v53 }
 0x2c3   : > { %16037 = vmatpush3.bf16.msra.mxu1 %v17483_v32  ;;  %16016 = vmatprep.subr.bf16.mxu0 %v17484_v31  ;;  %v17500_v32 = vld [vmem:[%s22285_s4 + $0x1078] sm:$0xff]  }
 0x2c4   : > { %16038 = vmatprep.subr.bf16.mxu1 %v17485_v60  ;;  %v17501_v31 = vld [vmem:[%s22285_s4 + $0x10f8] sm:$0xff]  }
 0x2c6   : > { %16017 = vmatpush3.bf16.msra.mxu0 %v17486_v5 }
 0x2c7   : > { %16039 = vmatpush3.bf16.msra.mxu1 %v17487_v15  ;;  %16018 = vmatprep.subr.bf16.mxu0 %v17488_v19  ;;  %v17502_v15 = vld [vmem:[%s22285_s4 + $0x1038] sm:$0xff]   ;;  %v4368_v19 = vcombine.high %v20448_v63, %v20448_v63 }
 0x2c8   : > { %16040 = vmatprep.subr.bf16.mxu1 %v17489_v44 }
 0x2ca   : > { %16019 = vmatpush3.bf16.msra.mxu0 %v17490_v24  ;;  %v17503_v24 = vld [vmem:[%s22285_s4 + $0x10b8] sm:$0xff]  }
 0x2cb   : > { %16041 = vmatpush3.bf16.msra.mxu1 %v17491_v8  ;;  %16020 = vmatprep.subr.bf16.mxu0 %v17492_v40  ;;  %v4375_v8 = vrot.slane %v20342_v41, %v18423_v55  ;;  %v17505_v40 = vld [vmem:[%s22285_s4 + $0x11c0] sm:$0xff]  }
 0x2cc   : > { %v15718_v18 = vpop.f32.mrb[128].mxu0  ;;  %16042 = vmatprep.subr.bf16.mxu1 %v17493_v35  ;;  %v17506_v35 = vld [vmem:[%s22285_s4 + $0x1100] sm:$0xff]  }
 0x2cd   : > { %v15719_v29 = vpop.f32.mrb[129].mxu0  ;;  %v15740_v28 = vpop.f32.mrb[104].mxu1  ;;  %v4397_v39 = vcombine.high %v4375_v8, %v4375_v8  ;;  %v17507_v41 = vld [vmem:[%s22285_s4 + $0x1180] sm:$0xff]  }
 0x2ce   : > { %v15720_v52 = vadd.f32 %v15719_v29, %v15718_v18  ;;  %v15721_v58 = vpop.f32.mrb[130].mxu0  ;;  %v15741_v6 = vpop.f32.mrb[105].mxu1  ;;  %16021 = vmatpush3.bf16.msra.mxu0 %v17494_v26  ;;  %v4396_v26 = vrot.slane %v4368_v19, %v18423_v55  ;;  %v17510_v18 = vld [vmem:[%s22285_s4 + $0x1108] sm:$0xff]  }
 0x2cf   : > { %v15742_v0 = vadd.f32 %v15741_v6, %v15740_v28  ;;  %16043 = vmatpush3.bf16.msra.mxu1 %v17495_v3  ;;  %v15722_v56 = vpop.f32.mrb[131].mxu0  ;;  %v15743_v53 = vpop.f32.mrb[106].mxu1  ;;  %16022 = vmatprep.subr.bf16.mxu0 %v17496_v7  ;;  %v17508_v3 = vld [vmem:[%s22285_s4 + $0x1148] sm:$0xff]   ;;  %v17512_v28 = vld [vmem:[%s22285_s4 + $0x1150] sm:$0xff]   ;;  %v17516_v58 = vld [vmem:[%s22285_s4 + $0x1158] sm:$0xff]  }
 0x2d0   : > { %v11771_v60 = vadd.f32 %v15720_v52, %v20353_v2  ;;  %v15744_v5 = vpop.f32.mrb[107].mxu1  ;;  %16044 = vmatprep.subr.bf16.mxu1 %v17497_v16  ;;  %v17504_v2 = vld [vmem:[%s22285_s4 + $0x1140] sm:$0xff]   ;;  %v17509_v7 = vld [vmem:[%s22285_s4 + $0x11c8] sm:$0xff]   ;;  %v4400_v16 = vcombine.high %v4396_v26, %v4396_v26  ;;  %v17515_v52 = vld [vmem:[%s22285_s4 + $0x1190] sm:$0xff]  }
 0x2d1   : > { %v17511_v29 = vld [vmem:[%s22285_s4 + $0x1188] sm:$0xff]   ;;  %v17517_v6 = vld [vmem:[%s22285_s4 + $0x11d8] sm:$0xff]   ;;  %v17520_v53 = vld [vmem:[%s22285_s4 + $0x1160] sm:$0xff]  }
 0x2d2   : > { %v20462_v44 = vadd.f32 %v15742_v0, %v11771_v60  ;;  %16023 = vmatpush3.bf16.msra.mxu0 %v17498_v11  ;;  %v17513_v11 = vld [vmem:[%s22285_s4 + $0x11d0] sm:$0xff]   ;;  %v17518_v0 = vld [vmem:[%s22285_s4 + $0x1118] sm:$0xff]   ;;  %v17523_v60 = vld [vmem:[%s22285_s4 + $0x11a0] sm:$0xff]  }
 0x2d3   : > { %16045 = vmatpush3.bf16.msra.mxu1 %v17499_v48  ;;  %16024 = vmatprep.subr.bf16.mxu0 %v17500_v32  ;;  %v17514_v48 = vld [vmem:[%s22285_s4 + $0x1110] sm:$0xff]   ;;  %v17519_v56 = vld [vmem:[%s22285_s4 + $0x1198] sm:$0xff]   ;;  %v17521_v32 = vld [vmem:[%s22285_s4 + $0x11e0] sm:$0xff]  }
 0x2d4   : > { %16046 = vmatprep.subr.bf16.mxu1 %v17501_v31  ;;  %v17522_v31 = vld [vmem:[%s22285_s4 + $0x1120] sm:$0xff]   ;;  %v17524_v5 = vld [vmem:[%s22285_s4 + $0x1168] sm:$0xff]  }
 0x2d5   : > { %v17526_v19 = vld [vmem:[%s22285_s4 + $0x1128] sm:$0xff]  }
 0x2d6   : > { %16025 = vmatpush3.bf16.msra.mxu0 %v17502_v15  ;;  %v17525_v15 = vld [vmem:[%s22285_s4 + $0x11e8] sm:$0xff]  }
 0x2d7   : > { %16047 = vmatpush3.bf16.msra.mxu1 %v17503_v24  ;;  %16054 = vmatprep.subr.bf16.mxu0 %v17504_v2  ;;  %v17527_v24 = vld [vmem:[%s22285_s4 + $0x11a8] sm:$0xff]  }
 0x2d8   : > { %16076 = vmatprep.subr.bf16.mxu1 %v17505_v40  ;;  %v20546_v2 = vld [vmem:[%s18419_s22 + $0x48] sm:$0xff]  ;;  %v17529_v40 = vld [vmem:[%s22285_s4 + $0x11f0] sm:$0xff]  }
 0x2d9   : > { %12329 = vmatmul.mubr.bf16.vlgmr.msra.gmra.mrb[156].mxu0 %v4375_v8  ;;  %v17528_v8 = vld [vmem:[%s22285_s4 + $0x1170] sm:$0xff]  }
 0x2da   : > { %12369 = vmatmul.mubr.bf16.vlgmr.msra.gmra.mrb[132].mxu1 %v4397_v39  ;;  %16055 = vmatpush3.bf16.msra.mxu0 %v17506_v35 }
 0x2db   : > { %16077 = vmatpush3.bf16.msra.mxu1 %v17507_v41  ;;  %16056 = vmatprep.subr.bf16.mxu0 %v17508_v3  ;;  %v17531_v3 = vld [vmem:[%s22285_s4 + $0x11b0] sm:$0xff]  }
 0x2dc   : > { %16078 = vmatprep.subr.bf16.mxu1 %v17509_v7  ;;  %12408 = vmatprep.mubr.bf16.mxu0 %v4396_v26  ;;  %v17530_v26 = vld [vmem:[%s22285_s4 + $0x1130] sm:$0xff]   ;;  %v20559_v7 = vrot.slane %v20546_v2, %v18423_v55 }
 0x2dd   : > { %12448 = vmatprep.mubr.bf16.mxu1 %v4400_v16 }
 0x2de   : > { %16057 = vmatpush3.bf16.msra.mxu0 %v17510_v18 }
 0x2df   : > { %16079 = vmatpush3.bf16.msra.mxu1 %v17511_v29  ;;  %16058 = vmatprep.subr.bf16.mxu0 %v17512_v28  ;;  %v17532_v28 = vld [vmem:[%s22285_s4 + $0x1178] sm:$0xff]  }
 0x2e0   : > { %16080 = vmatprep.subr.bf16.mxu1 %v17513_v11  ;;  %v17533_v11 = vld [vmem:[%s22285_s4 + $0x11f8] sm:$0xff]  }
 0x2e2   : > { %16059 = vmatpush3.bf16.msra.mxu0 %v17514_v48 }
 0x2e3   : > { %16081 = vmatpush3.bf16.msra.mxu1 %v17515_v52  ;;  %16060 = vmatprep.subr.bf16.mxu0 %v17516_v58 }
 0x2e4   : > { %16082 = vmatprep.subr.bf16.mxu1 %v17517_v6 }
 0x2e6   : > { %16061 = vmatpush3.bf16.msra.mxu0 %v17518_v0 }
 0x2e7   : > { %16083 = vmatpush3.bf16.msra.mxu1 %v17519_v56  ;;  %16062 = vmatprep.subr.bf16.mxu0 %v17520_v53  ;;  %v17534_v56 = vld [vmem:[%s22285_s4 + $0x1138] sm:$0xff]  }
 0x2e8   : > { %16084 = vmatprep.subr.bf16.mxu1 %v17521_v32  ;;  %v17535_v53 = vld [vmem:[%s22285_s4 + $0x11b8] sm:$0xff]   ;;  %v4416_v32 = vcombine.high %v20559_v7, %v20559_v7 }
 0x2ea   : > { %16063 = vmatpush3.bf16.msra.mxu0 %v17522_v31 }
 0x2eb   : > { %16085 = vmatpush3.bf16.msra.mxu1 %v17523_v60  ;;  %16064 = vmatprep.subr.bf16.mxu0 %v17524_v5  ;;  %v4382_v60 = vrot.slane %v20448_v63, %v18423_v55  ;;  %v17538_v5 = vld [vmem:[%s22285_s4 + $0x12c0] sm:$0xff]   ;;  %v4438_v63 = vrot.slane %v4416_v32, %v18423_v55  ;;  %v17559_v32 = vld [vmem:[%s22285_s4 + $0x1228] sm:$0xff]  }
 0x2ec   : > { %v15762_v35 = vpop.f32.mrb[132].mxu0  ;;  %16086 = vmatprep.subr.bf16.mxu1 %v17525_v15  ;;  %v17539_v15 = vld [vmem:[%s22285_s4 + $0x1200] sm:$0xff]  }
 0x2ed   : > { %v15763_v39 = vpop.f32.mrb[133].mxu0  ;;  %v15784_v41 = vpop.f32.mrb[108].mxu1 }
 0x2ee   : > { %v15764_v18 = vadd.f32 %v15763_v39, %v15762_v35  ;;  %v15765_v16 = vpop.f32.mrb[134].mxu0  ;;  %v15785_v29 = vpop.f32.mrb[109].mxu1  ;;  %16065 = vmatpush3.bf16.msra.mxu0 %v17526_v19  ;;  %v17540_v19 = vld [vmem:[%s22285_s4 + $0x1280] sm:$0xff]   ;;  %v17543_v35 = vld [vmem:[%s22285_s4 + $0x1208] sm:$0xff]   ;;  %v4448_v39 = vcombine.high %v4438_v63, %v4438_v63 }
 0x2ef   : > { %v15786_v48 = vadd.f32 %v15785_v29, %v15784_v41  ;;  %16087 = vmatpush3.bf16.msra.mxu1 %v17527_v24  ;;  %v15766_v52 = vpop.f32.mrb[135].mxu0  ;;  %v15787_v58 = vpop.f32.mrb[110].mxu1  ;;  %16066 = vmatprep.subr.bf16.mxu0 %v17528_v8  ;;  %v4398_v24 = vcombine.high %v4382_v60, %v4382_v60  ;;  %v17541_v8 = vld [vmem:[%s22285_s4 + $0x1248] sm:$0xff]   ;;  %v17545_v41 = vld [vmem:[%s22285_s4 + $0x1250] sm:$0xff]   ;;  %v17549_v29 = vld [vmem:[%s22285_s4 + $0x1258] sm:$0xff]  }
 0x2f0   : > { %v11851_v6 = vadd.f32 %v15764_v18, %v20462_v44  ;;  %v15788_v0 = vpop.f32.mrb[111].mxu1  ;;  %16088 = vmatprep.subr.bf16.mxu1 %v17529_v40  ;;  %v17537_v44 = vld [vmem:[%s22285_s4 + $0x1240] sm:$0xff]   ;;  %v17542_v40 = vld [vmem:[%s22285_s4 + $0x12c8] sm:$0xff]   ;;  %v17547_v18 = vld [vmem:[%s22285_s4 + $0x1210] sm:$0xff]  }
 0x2f1   : > { %v17548_v16 = vld [vmem:[%s22285_s4 + $0x1290] sm:$0xff]   ;;  %v17553_v52 = vld [vmem:[%s22285_s4 + $0x1260] sm:$0xff]  }
 0x2f2   : > { %v20576_v31 = vadd.f32 %v15786_v48, %v11851_v6  ;;  %16067 = vmatpush3.bf16.msra.mxu0 %v17530_v26  ;;  %v17544_v26 = vld [vmem:[%s22285_s4 + $0x1288] sm:$0xff]   ;;  %v17552_v48 = vld [vmem:[%s22285_s4 + $0x1298] sm:$0xff]   ;;  %v17554_v58 = vld [vmem:[%s22285_s4 + $0x12e0] sm:$0xff]  }
 0x2f3   : > { %16089 = vmatpush3.bf16.msra.mxu1 %v17531_v3  ;;  %16068 = vmatprep.subr.bf16.mxu0 %v17532_v28  ;;  %v17546_v3 = vld [vmem:[%s22285_s4 + $0x12d0] sm:$0xff]   ;;  %v17550_v28 = vld [vmem:[%s22285_s4 + $0x12d8] sm:$0xff]   ;;  %v17555_v6 = vld [vmem:[%s22285_s4 + $0x1220] sm:$0xff]  }
 0x2f4   : > { %16090 = vmatprep.subr.bf16.mxu1 %v17533_v11  ;;  %v17551_v11 = vld [vmem:[%s22285_s4 + $0x1218] sm:$0xff]   ;;  %v17556_v0 = vld [vmem:[%s22285_s4 + $0x12a0] sm:$0xff]  }
 0x2f6   : > { %16069 = vmatpush3.bf16.msra.mxu0 %v17534_v56  ;;  %v17557_v56 = vld [vmem:[%s22285_s4 + $0x1268] sm:$0xff]  }
 0x2f7   : > { %16091 = vmatpush3.bf16.msra.mxu1 %v17535_v53  ;;  %16098 = vmatprep.subr.bf16.mxu0 %v17537_v44  ;;  %v17558_v53 = vld [vmem:[%s22285_s4 + $0x12e8] sm:$0xff]   ;;  %v4401_v44 = vcombine.high %v20546_v2, %v20546_v2  ;;  %v17564_v2 = vld [vmem:[%s22285_s4 + $0x12b0] sm:$0xff]  }
 0x2f8   : > { %16120 = vmatprep.subr.bf16.mxu1 %v17538_v5  ;;  %v17561_v5 = vld [vmem:[%s22285_s4 + $0x1270] sm:$0xff]  }
 0x2f9   : > { %12409 = vmatmul.mubr.bf16.vlgmr.msra.gmra.mrb[160].mxu0 %v4382_v60  ;;  %v17560_v60 = vld [vmem:[%s22285_s4 + $0x12a8] sm:$0xff]  }
 0x2fa   : > { %12449 = vmatmul.mubr.bf16.vlgmr.msra.gmra.mrb[136].mxu1 %v4398_v24  ;;  %16099 = vmatpush3.bf16.msra.mxu0 %v17539_v15  ;;  %v17562_v15 = vld [vmem:[%s22285_s4 + $0x12f0] sm:$0xff]  }
 0x2fb   : > { %16121 = vmatpush3.bf16.msra.mxu1 %v17540_v19  ;;  %16100 = vmatprep.subr.bf16.mxu0 %v17541_v8 }
 0x2fc   : > { %16122 = vmatprep.subr.bf16.mxu1 %v17542_v40  ;;  %12488 = vmatprep.mubr.bf16.mxu0 %v4438_v63  ;;  %v17563_v63 = vld [vmem:[%s22285_s4 + $0x1230] sm:$0xff]   ;;  %v17565_v40 = vld [vmem:[%s22285_s4 + $0x1278] sm:$0xff]  }
 0x2fd   : > { %12528 = vmatprep.mubr.bf16.mxu1 %v4448_v39 }
 0x2fe   : > { %16101 = vmatpush3.bf16.msra.mxu0 %v17543_v35  ;;  %v20671_v35 = vrot.slane %v4401_v44, %v18423_v55  ;;  %v17573_v44 = vld [vmem:[%s22285_s4 + $0x1348] sm:$0xff]  }
 0x2ff   : > { %16123 = vmatpush3.bf16.msra.mxu1 %v17544_v26  ;;  %16102 = vmatprep.subr.bf16.mxu0 %v17545_v41 }
 0x300   : > { %16124 = vmatprep.subr.bf16.mxu1 %v17546_v3 }
 0x302   : > { %16103 = vmatpush3.bf16.msra.mxu0 %v17547_v18 }
 0x303   : > { %16125 = vmatpush3.bf16.msra.mxu1 %v17548_v16  ;;  %16104 = vmatprep.subr.bf16.mxu0 %v17549_v29 }
 0x304   : > { %16126 = vmatprep.subr.bf16.mxu1 %v17550_v28 }
 0x306   : > { %16105 = vmatpush3.bf16.msra.mxu0 %v17551_v11  ;;  %v17566_v11 = vld [vmem:[%s22285_s4 + $0x12f8] sm:$0xff]  }
 0x307   : > { %16127 = vmatpush3.bf16.msra.mxu1 %v17552_v48  ;;  %16106 = vmatprep.subr.bf16.mxu0 %v17553_v52  ;;  %v17567_v48 = vld [vmem:[%s22285_s4 + $0x1238] sm:$0xff]   ;;  %v4417_v52 = vcombine.high %v20671_v35, %v20671_v35 }
 0x308   : > { %16128 = vmatprep.subr.bf16.mxu1 %v17554_v58 }
 0x30a   : > { %16107 = vmatpush3.bf16.msra.mxu0 %v17555_v6  ;;  %v4424_v6 = vrot.slane %v20559_v7, %v18423_v55  ;;  %v17572_v7 = vld [vmem:[%s22285_s4 + $0x1380] sm:$0xff]  }
 0x30b   : > { %16129 = vmatpush3.bf16.msra.mxu1 %v17556_v0  ;;  %16108 = vmatprep.subr.bf16.mxu0 %v17557_v56  ;;  %v17569_v0 = vld [vmem:[%s22285_s4 + $0x1340] sm:$0xff]  }
 0x30c   : > { %v15806_v19 = vpop.f32.mrb[136].mxu0  ;;  %16130 = vmatprep.subr.bf16.mxu1 %v17558_v53  ;;  %v17570_v56 = vld [vmem:[%s22285_s4 + $0x13c0] sm:$0xff]  }
 0x30d   : > { %v15807_v24 = vpop.f32.mrb[137].mxu0  ;;  %v15828_v8 = vpop.f32.mrb[112].mxu1  ;;  %v17571_v53 = vld [vmem:[%s22285_s4 + $0x1300] sm:$0xff]  }
 0x30e   : > { %v15808_v26 = vadd.f32 %v15807_v24, %v15806_v19  ;;  %v15809_v39 = vpop.f32.mrb[138].mxu0  ;;  %v15829_v41 = vpop.f32.mrb[113].mxu1  ;;  %16109 = vmatpush3.bf16.msra.mxu0 %v17559_v32  ;;  %v4445_v32 = vrot.slane %v4417_v52, %v18423_v55  ;;  %v17577_v24 = vld [vmem:[%s22285_s4 + $0x1350] sm:$0xff]   ;;  %v17591_v52 = vld [vmem:[%s22285_s4 + $0x1328] sm:$0xff]  }
 0x30f   : > { %v15830_v3 = vadd.f32 %v15829_v41, %v15828_v8  ;;  %16131 = vmatpush3.bf16.msra.mxu1 %v17560_v60  ;;  %v15810_v18 = vpop.f32.mrb[139].mxu0  ;;  %v15831_v16 = vpop.f32.mrb[114].mxu1  ;;  %16110 = vmatprep.subr.bf16.mxu0 %v17561_v5  ;;  %v4446_v60 = vcombine.high %v4424_v6, %v4424_v6  ;;  %v17574_v5 = vld [vmem:[%s22285_s4 + $0x13c8] sm:$0xff]   ;;  %v17578_v8 = vld [vmem:[%s22285_s4 + $0x13d0] sm:$0xff]   ;;  %v17582_v39 = vld [vmem:[%s22285_s4 + $0x13d8] sm:$0xff]  }
 0x310   : > { %v11931_v29 = vadd.f32 %v15808_v26, %v20576_v31  ;;  %v15832_v28 = vpop.f32.mrb[115].mxu1  ;;  %16132 = vmatprep.subr.bf16.mxu1 %v17562_v15  ;;  %v17568_v31 = vld [vmem:[%s22285_s4 + $0x12b8] sm:$0xff]   ;;  %v17575_v15 = vld [vmem:[%s22285_s4 + $0x1308] sm:$0xff]   ;;  %v4449_v19 = vcombine.high %v4445_v32, %v4445_v32  ;;  %v17585_v18 = vld [vmem:[%s22285_s4 + $0x1360] sm:$0xff]  }
 0x311   : > { %v17581_v26 = vld [vmem:[%s22285_s4 + $0x1358] sm:$0xff]   ;;  %v17586_v16 = vld [vmem:[%s22285_s4 + $0x13e0] sm:$0xff]  }
 0x312   : > { %v20682_v58 = vadd.f32 %v15830_v3, %v11931_v29  ;;  %16111 = vmatpush3.bf16.msra.mxu0 %v17563_v63  ;;  %v17576_v63 = vld [vmem:[%s22285_s4 + $0x1388] sm:$0xff]   ;;  %v17583_v41 = vld [vmem:[%s22285_s4 + $0x1318] sm:$0xff]   ;;  %v17587_v29 = vld [vmem:[%s22285_s4 + $0x1320] sm:$0xff]  }
 0x313   : > { %16133 = vmatpush3.bf16.msra.mxu1 %v17564_v2  ;;  %16112 = vmatprep.subr.bf16.mxu0 %v17565_v40  ;;  %v17579_v2 = vld [vmem:[%s22285_s4 + $0x1310] sm:$0xff]   ;;  %v17584_v3 = vld [vmem:[%s22285_s4 + $0x1398] sm:$0xff]   ;;  %v17588_v28 = vld [vmem:[%s22285_s4 + $0x13a0] sm:$0xff]  }
 0x314   : > { %16134 = vmatprep.subr.bf16.mxu1 %v17566_v11  ;;  %v17580_v40 = vld [vmem:[%s22285_s4 + $0x1390] sm:$0xff]   ;;  %v17589_v11 = vld [vmem:[%s22285_s4 + $0x1368] sm:$0xff]  }
 0x316   : > { %16113 = vmatpush3.bf16.msra.mxu0 %v17567_v48  ;;  %v17590_v48 = vld [vmem:[%s22285_s4 + $0x13e8] sm:$0xff]  }
 0x317   : > { %16135 = vmatpush3.bf16.msra.mxu1 %v17568_v31  ;;  %16142 = vmatprep.subr.bf16.mxu0 %v17569_v0  ;;  %v17592_v31 = vld [vmem:[%s22285_s4 + $0x13a8] sm:$0xff]   ;;  %v20766_v0 = vld [vmem:[%s18419_s22 + $0x50] sm:$0xff] }
 0x318   : > { %16164 = vmatprep.subr.bf16.mxu1 %v17570_v56  ;;  %v17594_v56 = vld [vmem:[%s22285_s4 + $0x13f0] sm:$0xff]  }
 0x319   : > { %12489 = vmatmul.mubr.bf16.vlgmr.msra.gmra.mrb[164].mxu0 %v4424_v6  ;;  %v17593_v6 = vld [vmem:[%s22285_s4 + $0x1370] sm:$0xff]  }
 0x31a   : > { %12529 = vmatmul.mubr.bf16.vlgmr.msra.gmra.mrb[140].mxu1 %v4446_v60  ;;  %16143 = vmatpush3.bf16.msra.mxu0 %v17571_v53 }
 0x31b   : > { %16165 = vmatpush3.bf16.msra.mxu1 %v17572_v7  ;;  %16144 = vmatprep.subr.bf16.mxu0 %v17573_v44  ;;  %v17596_v44 = vld [vmem:[%s22285_s4 + $0x13b0] sm:$0xff]  }
 0x31c   : > { %16166 = vmatprep.subr.bf16.mxu1 %v17574_v5  ;;  %12568 = vmatprep.mubr.bf16.mxu0 %v4445_v32  ;;  %v17595_v32 = vld [vmem:[%s22285_s4 + $0x1330] sm:$0xff]   ;;  %v17597_v5 = vld [vmem:[%s22285_s4 + $0x1378] sm:$0xff]  }
 0x31d   : > { %12608 = vmatprep.mubr.bf16.mxu1 %v4449_v19 }
 0x31e   : > { %16145 = vmatpush3.bf16.msra.mxu0 %v17575_v15  ;;  %v20782_v15 = vrot.slane %v20766_v0, %v18423_v55 }
 0x31f   : > { %16167 = vmatpush3.bf16.msra.mxu1 %v17576_v63  ;;  %16146 = vmatprep.subr.bf16.mxu0 %v17577_v24 }
 0x320   : > { %16168 = vmatprep.subr.bf16.mxu1 %v17578_v8 }
 0x322   : > { %16147 = vmatpush3.bf16.msra.mxu0 %v17579_v2 }
 0x323   : > { %16169 = vmatpush3.bf16.msra.mxu1 %v17580_v40  ;;  %16148 = vmatprep.subr.bf16.mxu0 %v17581_v26 }
 0x324   : > { %16170 = vmatprep.subr.bf16.mxu1 %v17582_v39 }
 0x326   : > { %16149 = vmatpush3.bf16.msra.mxu0 %v17583_v41  ;;  %v17598_v41 = vld [vmem:[%s22285_s4 + $0x13f8] sm:$0xff]  }
 0x327   : > { %16171 = vmatpush3.bf16.msra.mxu1 %v17584_v3  ;;  %16150 = vmatprep.subr.bf16.mxu0 %v17585_v18  ;;  %v17599_v3 = vld [vmem:[%s22285_s4 + $0x1338] sm:$0xff]   ;;  %v4465_v18 = vcombine.high %v20782_v15, %v20782_v15 }
 0x328   : > { %16172 = vmatprep.subr.bf16.mxu1 %v17586_v16 }
 0x32a   : > { %16151 = vmatpush3.bf16.msra.mxu0 %v17587_v29  ;;  %v4431_v29 = vrot.slane %v20671_v35, %v18423_v55  ;;  %v17605_v35 = vld [vmem:[%s22285_s4 + $0x1480] sm:$0xff]  }
 0x32b   : > { %16173 = vmatpush3.bf16.msra.mxu1 %v17588_v28  ;;  %16152 = vmatprep.subr.bf16.mxu0 %v17589_v11  ;;  %v17602_v28 = vld [vmem:[%s22285_s4 + $0x1440] sm:$0xff]  }
 0x32c   : > { %v15850_v53 = vpop.f32.mrb[140].mxu0  ;;  %16174 = vmatprep.subr.bf16.mxu1 %v17590_v48  ;;  %v17603_v11 = vld [vmem:[%s22285_s4 + $0x14c0] sm:$0xff]  }
 0x32d   : > { %v15851_v60 = vpop.f32.mrb[141].mxu0  ;;  %v15872_v7 = vpop.f32.mrb[116].mxu1  ;;  %v17604_v48 = vld [vmem:[%s22285_s4 + $0x1400] sm:$0xff]  }
 0x32e   : > { %v15852_v19 = vadd.f32 %v15851_v60, %v15850_v53  ;;  %v15853_v63 = vpop.f32.mrb[142].mxu0  ;;  %v15873_v24 = vpop.f32.mrb[117].mxu1  ;;  %16153 = vmatpush3.bf16.msra.mxu0 %v17591_v52  ;;  %v4487_v52 = vrot.slane %v4465_v18, %v18423_v55  ;;  %v17608_v53 = vld [vmem:[%s22285_s4 + $0x1408] sm:$0xff]  }
 0x32f   : > { %v15874_v8 = vadd.f32 %v15873_v24, %v15872_v7  ;;  %16175 = vmatpush3.bf16.msra.mxu1 %v17592_v31  ;;  %v15854_v2 = vpop.f32.mrb[143].mxu0  ;;  %v15875_v40 = vpop.f32.mrb[118].mxu1  ;;  %16154 = vmatprep.subr.bf16.mxu0 %v17593_v6  ;;  %v4447_v31 = vcombine.high %v4431_v29, %v4431_v29  ;;  %v17606_v6 = vld [vmem:[%s22285_s4 + $0x1448] sm:$0xff]   ;;  %v17610_v7 = vld [vmem:[%s22285_s4 + $0x1450] sm:$0xff]   ;;  %v17614_v63 = vld [vmem:[%s22285_s4 + $0x1458] sm:$0xff]  }
 0x330   : > { %v12011_v26 = vadd.f32 %v15852_v19, %v20682_v58  ;;  %v15876_v39 = vpop.f32.mrb[119].mxu1  ;;  %16176 = vmatprep.subr.bf16.mxu1 %v17594_v56  ;;  %v17600_v58 = vld [vmem:[%s22285_s4 + $0x13b8] sm:$0xff]   ;;  %v17607_v56 = vld [vmem:[%s22285_s4 + $0x14c8] sm:$0xff]   ;;  %v17613_v19 = vld [vmem:[%s22285_s4 + $0x1490] sm:$0xff]  }
 0x331   : > { %v17609_v60 = vld [vmem:[%s22285_s4 + $0x1488] sm:$0xff]   ;;  %v17615_v24 = vld [vmem:[%s22285_s4 + $0x14d8] sm:$0xff]   ;;  %v17618_v40 = vld [vmem:[%s22285_s4 + $0x1460] sm:$0xff]  }
 0x332   : > { %v20793_v16 = vadd.f32 %v15874_v8, %v12011_v26  ;;  %16155 = vmatpush3.bf16.msra.mxu0 %v17595_v32  ;;  %v4497_v32 = vcombine.high %v4487_v52, %v4487_v52  ;;  %v17616_v8 = vld [vmem:[%s22285_s4 + $0x1418] sm:$0xff]   ;;  %v17619_v26 = vld [vmem:[%s22285_s4 + $0x14e0] sm:$0xff]   ;;  %v17623_v18 = vld [vmem:[%s22285_s4 + $0x14e8] sm:$0xff]  }
 0x333   : > { %16177 = vmatpush3.bf16.msra.mxu1 %v17596_v44  ;;  %16156 = vmatprep.subr.bf16.mxu0 %v17597_v5  ;;  %v17611_v44 = vld [vmem:[%s22285_s4 + $0x14d0] sm:$0xff]   ;;  %v17617_v2 = vld [vmem:[%s22285_s4 + $0x1498] sm:$0xff]   ;;  %v17620_v39 = vld [vmem:[%s22285_s4 + $0x1420] sm:$0xff]  }
 0x334   : > { %16178 = vmatprep.subr.bf16.mxu1 %v17598_v41  ;;  %v17612_v5 = vld [vmem:[%s22285_s4 + $0x1410] sm:$0xff]   ;;  %v17621_v41 = vld [vmem:[%s22285_s4 + $0x14a0] sm:$0xff]  }
 0x336   : > { %16157 = vmatpush3.bf16.msra.mxu0 %v17599_v3  ;;  %v17622_v3 = vld [vmem:[%s22285_s4 + $0x1468] sm:$0xff]  }
 0x337   : > { %16179 = vmatpush3.bf16.msra.mxu1 %v17600_v58  ;;  %16186 = vmatprep.subr.bf16.mxu0 %v17602_v28  ;;  %v17624_v58 = vld [vmem:[%s22285_s4 + $0x1428] sm:$0xff]  }
 0x338   : > { %16208 = vmatprep.subr.bf16.mxu1 %v17603_v11  ;;  %v17625_v28 = vld [vmem:[%s22285_s4 + $0x14a8] sm:$0xff]   ;;  %v17626_v11 = vld [vmem:[%s22285_s4 + $0x1470] sm:$0xff]  }
 0x339   : > { %12569 = vmatmul.mubr.bf16.vlgmr.msra.gmra.mrb[168].mxu0 %v4431_v29  ;;  %v4450_v29 = vcombine.high %v20766_v0, %v20766_v0  ;;  %v17628_v0 = vld [vmem:[%s22285_s4 + $0x1430] sm:$0xff]  }
 0x33a   : > { %12609 = vmatmul.mubr.bf16.vlgmr.msra.gmra.mrb[144].mxu1 %v4447_v31  ;;  %16187 = vmatpush3.bf16.msra.mxu0 %v17604_v48 }
 0x33b   : > { %16209 = vmatpush3.bf16.msra.mxu1 %v17605_v35  ;;  %16188 = vmatprep.subr.bf16.mxu0 %v17606_v6  ;;  %v17629_v6 = vld [vmem:[%s22285_s4 + $0x14b0] sm:$0xff]  }
 0x33c   : > { %16210 = vmatprep.subr.bf16.mxu1 %v17607_v56  ;;  %12648 = vmatprep.mubr.bf16.mxu0 %v4487_v52  ;;  %v17627_v52 = vld [vmem:[%s22285_s4 + $0x14f0] sm:$0xff]   ;;  %v20888_v56 = vrot.slane %v4450_v29, %v18423_v55 }
 0x33d   : > { %12688 = vmatprep.mubr.bf16.mxu1 %v4497_v32 }
 0x33e   : > { %16189 = vmatpush3.bf16.msra.mxu0 %v17608_v53 }
 0x33f   : > { %16211 = vmatpush3.bf16.msra.mxu1 %v17609_v60  ;;  %16190 = vmatprep.subr.bf16.mxu0 %v17610_v7 }
 0x340   : > { %16212 = vmatprep.subr.bf16.mxu1 %v17611_v44 }
 0x342   : > { %16191 = vmatpush3.bf16.msra.mxu0 %v17612_v5 }
 0x343   : > { %16213 = vmatpush3.bf16.msra.mxu1 %v17613_v19  ;;  %16192 = vmatprep.subr.bf16.mxu0 %v17614_v63  ;;  %v17630_v19 = vld [vmem:[%s22285_s4 + $0x1478] sm:$0xff]  }
 0x344   : > { %16214 = vmatprep.subr.bf16.mxu1 %v17615_v24  ;;  %v17631_v63 = vld [vmem:[%s22285_s4 + $0x14f8] sm:$0xff]  }
 0x346   : > { %16193 = vmatpush3.bf16.msra.mxu0 %v17616_v8 }
 0x347   : > { %16215 = vmatpush3.bf16.msra.mxu1 %v17617_v2  ;;  %16194 = vmatprep.subr.bf16.mxu0 %v17618_v40  ;;  %v17632_v2 = vld [vmem:[%s22285_s4 + $0x1438] sm:$0xff]   ;;  %v4466_v40 = vcombine.high %v20888_v56, %v20888_v56 }
 0x348   : > { %16216 = vmatprep.subr.bf16.mxu1 %v17619_v26 }
 0x34a   : > { %16195 = vmatpush3.bf16.msra.mxu0 %v17620_v39  ;;  %v17633_v39 = vld [vmem:[%s22285_s4 + $0x14b8] sm:$0xff]  }
 0x34b   : > { %16217 = vmatpush3.bf16.msra.mxu1 %v17621_v41  ;;  %16196 = vmatprep.subr.bf16.mxu0 %v17622_v3  ;;  %v4473_v41 = vrot.slane %v20782_v15, %v18423_v55  ;;  %v17635_v3 = vld [vmem:[%s22285_s4 + $0x15c0] sm:$0xff]  }
 0x34c   : > { %v15894_v48 = vpop.f32.mrb[144].mxu0  ;;  %16218 = vmatprep.subr.bf16.mxu1 %v17623_v18  ;;  %v17636_v18 = vld [vmem:[%s22285_s4 + $0x1500] sm:$0xff]  }
 0x34d   : > { %v15895_v31 = vpop.f32.mrb[145].mxu0  ;;  %v15916_v35 = vpop.f32.mrb[120].mxu1  ;;  %v4495_v29 = vcombine.high %v4473_v41, %v4473_v41  ;;  %v17637_v15 = vld [vmem:[%s22285_s4 + $0x1580] sm:$0xff]  }
 0x34e   : > { %v15896_v53 = vadd.f32 %v15895_v31, %v15894_v48  ;;  %v15897_v32 = vpop.f32.mrb[146].mxu0  ;;  %v15917_v60 = vpop.f32.mrb[121].mxu1  ;;  %16197 = vmatpush3.bf16.msra.mxu0 %v17624_v58  ;;  %v4494_v58 = vrot.slane %v4466_v40, %v18423_v55  ;;  %v17640_v48 = vld [vmem:[%s22285_s4 + $0x1508] sm:$0xff]  }
 0x34f   : > { %v15918_v7 = vadd.f32 %v15917_v60, %v15916_v35  ;;  %16219 = vmatpush3.bf16.msra.mxu1 %v17625_v28  ;;  %v15898_v44 = vpop.f32.mrb[147].mxu0  ;;  %v15919_v5 = vpop.f32.mrb[122].mxu1  ;;  %16198 = vmatprep.subr.bf16.mxu0 %v17626_v11  ;;  %v17638_v28 = vld [vmem:[%s22285_s4 + $0x1548] sm:$0xff]   ;;  %v17642_v35 = vld [vmem:[%s22285_s4 + $0x1550] sm:$0xff]   ;;  %v17646_v32 = vld [vmem:[%s22285_s4 + $0x1558] sm:$0xff]  }
 0x350   : > { %v12091_v24 = vadd.f32 %v15896_v53, %v20793_v16  ;;  %v15920_v8 = vpop.f32.mrb[123].mxu1  ;;  %16220 = vmatprep.subr.bf16.mxu1 %v17627_v52  ;;  %v17634_v16 = vld [vmem:[%s22285_s4 + $0x1540] sm:$0xff]   ;;  %v17639_v11 = vld [vmem:[%s22285_s4 + $0x15c8] sm:$0xff]   ;;  %v4498_v52 = vcombine.high %v4494_v58, %v4494_v58  ;;  %v17645_v53 = vld [vmem:[%s22285_s4 + $0x1590] sm:$0xff]  }
 0x351   : > { %v17641_v31 = vld [vmem:[%s22285_s4 + $0x1588] sm:$0xff]   ;;  %v17647_v60 = vld [vmem:[%s22285_s4 + $0x15d8] sm:$0xff]   ;;  %v17650_v5 = vld [vmem:[%s22285_s4 + $0x1560] sm:$0xff]  }
 0x352   : > { %v20902_v26 = vadd.f32 %v15918_v7, %v12091_v24  ;;  %16199 = vmatpush3.bf16.msra.mxu0 %v17628_v0  ;;  %v17643_v0 = vld [vmem:[%s22285_s4 + $0x15d0] sm:$0xff]   ;;  %v17648_v7 = vld [vmem:[%s22285_s4 + $0x1518] sm:$0xff]   ;;  %v17653_v24 = vld [vmem:[%s22285_s4 + $0x15a0] sm:$0xff]  }
 0x353   : > { %16221 = vmatpush3.bf16.msra.mxu1 %v17629_v6  ;;  %16200 = vmatprep.subr.bf16.mxu0 %v17630_v19  ;;  %v17644_v6 = vld [vmem:[%s22285_s4 + $0x1510] sm:$0xff]   ;;  %v17649_v44 = vld [vmem:[%s22285_s4 + $0x1598] sm:$0xff]   ;;  %v17651_v19 = vld [vmem:[%s22285_s4 + $0x15e0] sm:$0xff]  }
 0x354   : > { %16222 = vmatprep.subr.bf16.mxu1 %v17631_v63  ;;  %v17652_v63 = vld [vmem:[%s22285_s4 + $0x1520] sm:$0xff]   ;;  %v17654_v8 = vld [vmem:[%s22285_s4 + $0x1568] sm:$0xff]  }
 0x355   : > { %v17656_v40 = vld [vmem:[%s22285_s4 + $0x1528] sm:$0xff]  }
 0x356   : > { %16201 = vmatpush3.bf16.msra.mxu0 %v17632_v2  ;;  %v17655_v2 = vld [vmem:[%s22285_s4 + $0x15e8] sm:$0xff]  }
 0x357   : > { %16223 = vmatpush3.bf16.msra.mxu1 %v17633_v39  ;;  %16230 = vmatprep.subr.bf16.mxu0 %v17634_v16  ;;  %v17657_v39 = vld [vmem:[%s22285_s4 + $0x15a8] sm:$0xff]   ;;  %v20986_v16 = vld [vmem:[%s18419_s22 + $0x58] sm:$0xff] }
 0x358   : > { %16252 = vmatprep.subr.bf16.mxu1 %v17635_v3  ;;  %v17659_v3 = vld [vmem:[%s22285_s4 + $0x15f0] sm:$0xff]  }
 0x359   : > { %12649 = vmatmul.mubr.bf16.vlgmr.msra.gmra.mrb[172].mxu0 %v4473_v41  ;;  %v17658_v41 = vld [vmem:[%s22285_s4 + $0x1570] sm:$0xff]  }
 0x35a   : > { %12689 = vmatmul.mubr.bf16.vlgmr.msra.gmra.mrb[148].mxu1 %v4495_v29  ;;  %16231 = vmatpush3.bf16.msra.mxu0 %v17636_v18 }
 0x35b   : > { %16253 = vmatpush3.bf16.msra.mxu1 %v17637_v15  ;;  %16232 = vmatprep.subr.bf16.mxu0 %v17638_v28  ;;  %v17661_v28 = vld [vmem:[%s22285_s4 + $0x15b0] sm:$0xff]  }
 0x35c   : > { %16254 = vmatprep.subr.bf16.mxu1 %v17639_v11  ;;  %12728 = vmatprep.mubr.bf16.mxu0 %v4494_v58  ;;  %v17660_v58 = vld [vmem:[%s22285_s4 + $0x1530] sm:$0xff]   ;;  %v20999_v11 = vrot.slane %v20986_v16, %v18423_v55 }
 0x35d   : > { %12768 = vmatprep.mubr.bf16.mxu1 %v4498_v52 }
 0x35e   : > { %16233 = vmatpush3.bf16.msra.mxu0 %v17640_v48 }
 0x35f   : > { %16255 = vmatpush3.bf16.msra.mxu1 %v17641_v31  ;;  %16234 = vmatprep.subr.bf16.mxu0 %v17642_v35  ;;  %v17662_v35 = vld [vmem:[%s22285_s4 + $0x1578] sm:$0xff]  }
 0x360   : > { %16256 = vmatprep.subr.bf16.mxu1 %v17643_v0  ;;  %v17663_v0 = vld [vmem:[%s22285_s4 + $0x15f8] sm:$0xff]  }
 0x362   : > { %16235 = vmatpush3.bf16.msra.mxu0 %v17644_v6 }
 0x363   : > { %16257 = vmatpush3.bf16.msra.mxu1 %v17645_v53  ;;  %16236 = vmatprep.subr.bf16.mxu0 %v17646_v32 }
 0x364   : > { %16258 = vmatprep.subr.bf16.mxu1 %v17647_v60 }
 0x366   : > { %16237 = vmatpush3.bf16.msra.mxu0 %v17648_v7 }
 0x367   : > { %16259 = vmatpush3.bf16.msra.mxu1 %v17649_v44  ;;  %16238 = vmatprep.subr.bf16.mxu0 %v17650_v5  ;;  %v17664_v44 = vld [vmem:[%s22285_s4 + $0x1538] sm:$0xff]  }
 0x368   : > { %16260 = vmatprep.subr.bf16.mxu1 %v17651_v19  ;;  %v17665_v5 = vld [vmem:[%s22285_s4 + $0x15b8] sm:$0xff]   ;;  %v4514_v19 = vcombine.high %v20999_v11, %v20999_v11 }
 0x36a   : > { %16239 = vmatpush3.bf16.msra.mxu0 %v17652_v63 }
 0x36b   : > { %16261 = vmatpush3.bf16.msra.mxu1 %v17653_v24  ;;  %16240 = vmatprep.subr.bf16.mxu0 %v17654_v8  ;;  %v4480_v24 = vrot.slane %v20888_v56, %v18423_v55  ;;  %v17668_v8 = vld [vmem:[%s22285_s4 + $0x16c0] sm:$0xff]   ;;  %v4536_v56 = vrot.slane %v4514_v19, %v18423_v55  ;;  %v17689_v19 = vld [vmem:[%s22285_s4 + $0x1628] sm:$0xff]  }
 0x36c   : > { %v15938_v18 = vpop.f32.mrb[148].mxu0  ;;  %16262 = vmatprep.subr.bf16.mxu1 %v17655_v2  ;;  %v17669_v2 = vld [vmem:[%s22285_s4 + $0x1600] sm:$0xff]  }
 0x36d   : > { %v15939_v29 = vpop.f32.mrb[149].mxu0  ;;  %v15960_v15 = vpop.f32.mrb[124].mxu1 }
 0x36e   : > { %v15940_v48 = vadd.f32 %v15939_v29, %v15938_v18  ;;  %v15941_v52 = vpop.f32.mrb[150].mxu0  ;;  %v15961_v31 = vpop.f32.mrb[125].mxu1  ;;  %16241 = vmatpush3.bf16.msra.mxu0 %v17656_v40  ;;  %v17670_v40 = vld [vmem:[%s22285_s4 + $0x1680] sm:$0xff]   ;;  %v17673_v18 = vld [vmem:[%s22285_s4 + $0x1608] sm:$0xff]   ;;  %v4546_v29 = vcombine.high %v4536_v56, %v4536_v56 }
 0x36f   : > { %v15962_v6 = vadd.f32 %v15961_v31, %v15960_v15  ;;  %16263 = vmatpush3.bf16.msra.mxu1 %v17657_v39  ;;  %v15942_v53 = vpop.f32.mrb[151].mxu0  ;;  %v15963_v32 = vpop.f32.mrb[126].mxu1  ;;  %16242 = vmatprep.subr.bf16.mxu0 %v17658_v41  ;;  %v4496_v39 = vcombine.high %v4480_v24, %v4480_v24  ;;  %v17671_v41 = vld [vmem:[%s22285_s4 + $0x1648] sm:$0xff]   ;;  %v17675_v15 = vld [vmem:[%s22285_s4 + $0x1650] sm:$0xff]   ;;  %v17679_v31 = vld [vmem:[%s22285_s4 + $0x1658] sm:$0xff]  }
 0x370   : > { %v12171_v60 = vadd.f32 %v15940_v48, %v20902_v26  ;;  %v15964_v7 = vpop.f32.mrb[127].mxu1  ;;  %16264 = vmatprep.subr.bf16.mxu1 %v17659_v3  ;;  %v17667_v26 = vld [vmem:[%s22285_s4 + $0x1640] sm:$0xff]   ;;  %v17672_v3 = vld [vmem:[%s22285_s4 + $0x16c8] sm:$0xff]   ;;  %v17677_v48 = vld [vmem:[%s22285_s4 + $0x1610] sm:$0xff]  }
 0x371   : > { %v17678_v52 = vld [vmem:[%s22285_s4 + $0x1690] sm:$0xff]   ;;  %v17683_v53 = vld [vmem:[%s22285_s4 + $0x1660] sm:$0xff]  }
 0x372   : > { %v21016_v63 = vadd.f32 %v15962_v6, %v12171_v60  ;;  %16243 = vmatpush3.bf16.msra.mxu0 %v17660_v58  ;;  %v17674_v58 = vld [vmem:[%s22285_s4 + $0x1688] sm:$0xff]   ;;  %v17682_v6 = vld [vmem:[%s22285_s4 + $0x1698] sm:$0xff]   ;;  %v17684_v32 = vld [vmem:[%s22285_s4 + $0x16e0] sm:$0xff]  }
 0x373   : > { %16265 = vmatpush3.bf16.msra.mxu1 %v17661_v28  ;;  %16244 = vmatprep.subr.bf16.mxu0 %v17662_v35  ;;  %v17676_v28 = vld [vmem:[%s22285_s4 + $0x16d0] sm:$0xff]   ;;  %v17680_v35 = vld [vmem:[%s22285_s4 + $0x16d8] sm:$0xff]   ;;  %v17685_v60 = vld [vmem:[%s22285_s4 + $0x1620] sm:$0xff]  }
 0x374   : > { %16266 = vmatprep.subr.bf16.mxu1 %v17663_v0  ;;  %v17681_v0 = vld [vmem:[%s22285_s4 + $0x1618] sm:$0xff]   ;;  %v17686_v7 = vld [vmem:[%s22285_s4 + $0x16a0] sm:$0xff]  }
 0x376   : > { %16245 = vmatpush3.bf16.msra.mxu0 %v17664_v44  ;;  %v17687_v44 = vld [vmem:[%s22285_s4 + $0x1668] sm:$0xff]  }
 0x377   : > { %16267 = vmatpush3.bf16.msra.mxu1 %v17665_v5  ;;  %16274 = vmatprep.subr.bf16.mxu0 %v17667_v26  ;;  %v17688_v5 = vld [vmem:[%s22285_s4 + $0x16e8] sm:$0xff]   ;;  %v4499_v26 = vcombine.high %v20986_v16, %v20986_v16  ;;  %v17694_v16 = vld [vmem:[%s22285_s4 + $0x16b0] sm:$0xff]  }
 0x378   : > { %16296 = vmatprep.subr.bf16.mxu1 %v17668_v8  ;;  %v17691_v8 = vld [vmem:[%s22285_s4 + $0x1670] sm:$0xff]  }
 0x379   : > { %12729 = vmatmul.mubr.bf16.vlgmr.msra.gmra.mrb[176].mxu0 %v4480_v24  ;;  %v17690_v24 = vld [vmem:[%s22285_s4 + $0x16a8] sm:$0xff]  }
 0x37a   : > { %12769 = vmatmul.mubr.bf16.vlgmr.msra.gmra.mrb[152].mxu1 %v4496_v39  ;;  %16275 = vmatpush3.bf16.msra.mxu0 %v17669_v2  ;;  %v17692_v2 = vld [vmem:[%s22285_s4 + $0x16f0] sm:$0xff]  }
 0x37b   : > { %16297 = vmatpush3.bf16.msra.mxu1 %v17670_v40  ;;  %16276 = vmatprep.subr.bf16.mxu0 %v17671_v41 }
 0x37c   : > { %16298 = vmatprep.subr.bf16.mxu1 %v17672_v3  ;;  %12808 = vmatprep.mubr.bf16.mxu0 %v4536_v56  ;;  %v17693_v56 = vld [vmem:[%s22285_s4 + $0x1630] sm:$0xff]   ;;  %v17695_v3 = vld [vmem:[%s22285_s4 + $0x1678] sm:$0xff]  }
 0x37d   : > { %12848 = vmatprep.mubr.bf16.mxu1 %v4546_v29 }
 0x37e   : > { %16277 = vmatpush3.bf16.msra.mxu0 %v17673_v18  ;;  %v21111_v18 = vrot.slane %v4499_v26, %v18423_v55  ;;  %v17703_v26 = vld [vmem:[%s22285_s4 + $0x1748] sm:$0xff]  }
 0x37f   : > { %16299 = vmatpush3.bf16.msra.mxu1 %v17674_v58  ;;  %16278 = vmatprep.subr.bf16.mxu0 %v17675_v15 }
 0x380   : > { %16300 = vmatprep.subr.bf16.mxu1 %v17676_v28  ;;  %v17696_v28 = vld [vmem:[%s22285_s4 + $0x16f8] sm:$0xff]  }
 0x382   : > { %16279 = vmatpush3.bf16.msra.mxu0 %v17677_v48 }
 0x383   : > { %16301 = vmatpush3.bf16.msra.mxu1 %v17678_v52  ;;  %16280 = vmatprep.subr.bf16.mxu0 %v17679_v31 }
 0x384   : > { %16302 = vmatprep.subr.bf16.mxu1 %v17680_v35 }
 0x386   : > { %16281 = vmatpush3.bf16.msra.mxu0 %v17681_v0 }
 0x387   : > { %16303 = vmatpush3.bf16.msra.mxu1 %v17682_v6  ;;  %16282 = vmatprep.subr.bf16.mxu0 %v17683_v53  ;;  %v17697_v6 = vld [vmem:[%s22285_s4 + $0x1638] sm:$0xff]  }
 0x388   : > { %16304 = vmatprep.subr.bf16.mxu1 %v17684_v32  ;;  %v17698_v53 = vld [vmem:[%s22285_s4 + $0x16b8] sm:$0xff]   ;;  %v4515_v32 = vcombine.high %v21111_v18, %v21111_v18 }
 0x38a   : > { %16283 = vmatpush3.bf16.msra.mxu0 %v17685_v60 }
 0x38b   : > { %16305 = vmatpush3.bf16.msra.mxu1 %v17686_v7  ;;  %16284 = vmatprep.subr.bf16.mxu0 %v17687_v44  ;;  %v4522_v7 = vrot.slane %v20999_v11, %v18423_v55  ;;  %v17700_v44 = vld [vmem:[%s22285_s4 + $0x17c0] sm:$0xff]   ;;  %v4543_v11 = vrot.slane %v4515_v32, %v18423_v55  ;;  %v17722_v32 = vld [vmem:[%s22285_s4 + $0x17a8] sm:$0xff]  }
 0x38c   : > { %v15982_v40 = vpop.f32.mrb[152].mxu0  ;;  %16306 = vmatprep.subr.bf16.mxu1 %v17688_v5  ;;  %v17701_v5 = vld [vmem:[%s22285_s4 + $0x1700] sm:$0xff]  }
 0x38d   : > { %v15983_v39 = vpop.f32.mrb[153].mxu0  ;;  %v16004_v41 = vpop.f32.mrb[128].mxu1 }
 0x38e   : > { %v15984_v58 = vadd.f32 %v15983_v39, %v15982_v40  ;;  %v15985_v29 = vpop.f32.mrb[154].mxu0  ;;  %v16005_v15 = vpop.f32.mrb[129].mxu1  ;;  %16285 = vmatpush3.bf16.msra.mxu0 %v17689_v19  ;;  %v17702_v19 = vld [vmem:[%s22285_s4 + $0x1780] sm:$0xff]   ;;  %v17706_v40 = vld [vmem:[%s22285_s4 + $0x1788] sm:$0xff]   ;;  %v17707_v39 = vld [vmem:[%s22285_s4 + $0x1750] sm:$0xff]  }
 0x38f   : > { %v16006_v48 = vadd.f32 %v16005_v15, %v16004_v41  ;;  %16307 = vmatpush3.bf16.msra.mxu1 %v17690_v24  ;;  %v15986_v52 = vpop.f32.mrb[155].mxu0  ;;  %v16007_v31 = vpop.f32.mrb[130].mxu1  ;;  %16286 = vmatprep.subr.bf16.mxu0 %v17691_v8  ;;  %v4544_v24 = vcombine.high %v4522_v7, %v4522_v7  ;;  %v17704_v8 = vld [vmem:[%s22285_s4 + $0x17c8] sm:$0xff]   ;;  %v17708_v41 = vld [vmem:[%s22285_s4 + $0x17d0] sm:$0xff]   ;;  %v17712_v29 = vld [vmem:[%s22285_s4 + $0x17d8] sm:$0xff]  }
 0x390   : > { %v12251_v35 = vadd.f32 %v15984_v58, %v21016_v63  ;;  %v16008_v0 = vpop.f32.mrb[131].mxu1  ;;  %16308 = vmatprep.subr.bf16.mxu1 %v17692_v2  ;;  %v17699_v63 = vld [vmem:[%s22285_s4 + $0x1740] sm:$0xff]   ;;  %v17705_v2 = vld [vmem:[%s22285_s4 + $0x1708] sm:$0xff]   ;;  %v17711_v58 = vld [vmem:[%s22285_s4 + $0x1758] sm:$0xff]  }
 0x391   : > { %v17713_v15 = vld [vmem:[%s22285_s4 + $0x1718] sm:$0xff]   ;;  %v17716_v52 = vld [vmem:[%s22285_s4 + $0x17e0] sm:$0xff]   ;;  %v17719_v0 = vld [vmem:[%s22285_s4 + $0x1768] sm:$0xff]  }
 0x392   : > { %v21125_v60 = vadd.f32 %v16006_v48, %v12251_v35  ;;  %16287 = vmatpush3.bf16.msra.mxu0 %v17693_v56  ;;  %v4547_v56 = vcombine.high %v4543_v11, %v4543_v11  ;;  %v17715_v48 = vld [vmem:[%s22285_s4 + $0x1760] sm:$0xff]  }
 0x393   : > { %16309 = vmatpush3.bf16.msra.mxu1 %v17694_v16  ;;  %16288 = vmatprep.subr.bf16.mxu0 %v17695_v3  ;;  %v17709_v16 = vld [vmem:[%s22285_s4 + $0x1710] sm:$0xff]   ;;  %v17717_v31 = vld [vmem:[%s22285_s4 + $0x1720] sm:$0xff]  }
 0x394   : > { %16310 = vmatprep.subr.bf16.mxu1 %v17696_v28  ;;  %v17710_v3 = vld [vmem:[%s22285_s4 + $0x1790] sm:$0xff]   ;;  %v17714_v28 = vld [vmem:[%s22285_s4 + $0x1798] sm:$0xff]   ;;  %v17718_v35 = vld [vmem:[%s22285_s4 + $0x17a0] sm:$0xff]  }
 0x396   : > { %16289 = vmatpush3.bf16.msra.mxu0 %v17697_v6  ;;  %v17720_v6 = vld [vmem:[%s22285_s4 + $0x17e8] sm:$0xff]  }
 0x397   : > { %16311 = vmatpush3.bf16.msra.mxu1 %v17698_v53  ;;  %16318 = vmatprep.subr.bf16.mxu0 %v17699_v63  ;;  %v17721_v53 = vld [vmem:[%s22285_s4 + $0x1728] sm:$0xff]   ;;  %v21206_v63 = vld [vmem:[%s18419_s22 + $0x60] sm:$0xff] }
 0x398   : > { %16340 = vmatprep.subr.bf16.mxu1 %v17700_v44  ;;  %v17724_v44 = vld [vmem:[%s22285_s4 + $0x17f0] sm:$0xff]  }
 0x399   : > { %12809 = vmatmul.mubr.bf16.vlgmr.msra.gmra.mrb[180].mxu0 %v4522_v7  ;;  %v17723_v7 = vld [vmem:[%s22285_s4 + $0x1770] sm:$0xff]  }
 0x39a   : > { %12849 = vmatmul.mubr.bf16.vlgmr.msra.gmra.mrb[156].mxu1 %v4544_v24  ;;  %16319 = vmatpush3.bf16.msra.mxu0 %v17701_v5 }
 0x39b   : > { %16341 = vmatpush3.bf16.msra.mxu1 %v17702_v19  ;;  %16320 = vmatprep.subr.bf16.mxu0 %v17703_v26  ;;  %v17725_v19 = vld [vmem:[%s22285_s4 + $0x1730] sm:$0xff]  }
 0x39c   : > { %16342 = vmatprep.subr.bf16.mxu1 %v17704_v8  ;;  %12888 = vmatprep.mubr.bf16.mxu0 %v4543_v11  ;;  %v17726_v26 = vld [vmem:[%s22285_s4 + $0x17b0] sm:$0xff]   ;;  %v17727_v8 = vld [vmem:[%s22285_s4 + $0x1778] sm:$0xff]  }
 0x39d   : > { %12928 = vmatprep.mubr.bf16.mxu1 %v4547_v56 }
 0x39e   : > { %16321 = vmatpush3.bf16.msra.mxu0 %v17705_v2  ;;  %v21222_v2 = vrot.slane %v21206_v63, %v18423_v55 }
 0x39f   : > { %16343 = vmatpush3.bf16.msra.mxu1 %v17706_v40  ;;  %16322 = vmatprep.subr.bf16.mxu0 %v17707_v39 }
 0x3a0   : > { %16344 = vmatprep.subr.bf16.mxu1 %v17708_v41 }
 0x3a2   : > { %16323 = vmatpush3.bf16.msra.mxu0 %v17709_v16 }
 0x3a3   : > { %16345 = vmatpush3.bf16.msra.mxu1 %v17710_v3  ;;  %16324 = vmatprep.subr.bf16.mxu0 %v17711_v58 }
 0x3a4   : > { %16346 = vmatprep.subr.bf16.mxu1 %v17712_v29 }
 0x3a6   : > { %16325 = vmatpush3.bf16.msra.mxu0 %v17713_v15  ;;  %v17728_v15 = vld [vmem:[%s22285_s4 + $0x17f8] sm:$0xff]  }
 0x3a7   : > { %16347 = vmatpush3.bf16.msra.mxu1 %v17714_v28  ;;  %16326 = vmatprep.subr.bf16.mxu0 %v17715_v48  ;;  %v17729_v28 = vld [vmem:[%s22285_s4 + $0x1738] sm:$0xff]   ;;  %v4563_v48 = vcombine.high %v21222_v2, %v21222_v2 }
 0x3a8   : > { %16348 = vmatprep.subr.bf16.mxu1 %v17716_v52 }
 0x3aa   : > { %16327 = vmatpush3.bf16.msra.mxu0 %v17717_v31  ;;  %v4529_v31 = vrot.slane %v21111_v18, %v18423_v55  ;;  %v17735_v18 = vld [vmem:[%s22285_s4 + $0x1880] sm:$0xff]  }
 0x3ab   : > { %16349 = vmatpush3.bf16.msra.mxu1 %v17718_v35  ;;  %16328 = vmatprep.subr.bf16.mxu0 %v17719_v0  ;;  %v17732_v35 = vld [vmem:[%s22285_s4 + $0x1840] sm:$0xff]  }
 0x3ac   : > { %v16026_v5 = vpop.f32.mrb[156].mxu0  ;;  %16350 = vmatprep.subr.bf16.mxu1 %v17720_v6  ;;  %v17733_v0 = vld [vmem:[%s22285_s4 + $0x18c0] sm:$0xff]  }
 0x3ad   : > { %v16027_v11 = vpop.f32.mrb[157].mxu0  ;;  %v16048_v24 = vpop.f32.mrb[132].mxu1  ;;  %v17734_v6 = vld [vmem:[%s22285_s4 + $0x1800] sm:$0xff]  }
 0x3ae   : > { %v16028_v40 = vadd.f32 %v16027_v11, %v16026_v5  ;;  %v16029_v56 = vpop.f32.mrb[158].mxu0  ;;  %v16049_v39 = vpop.f32.mrb[133].mxu1  ;;  %16329 = vmatpush3.bf16.msra.mxu0 %v17721_v53  ;;  %v4585_v53 = vrot.slane %v4563_v48, %v18423_v55  ;;  %v17738_v5 = vld [vmem:[%s22285_s4 + $0x1808] sm:$0xff]  }
 0x3af   : > { %v16050_v41 = vadd.f32 %v16049_v39, %v16048_v24  ;;  %16351 = vmatpush3.bf16.msra.mxu1 %v17722_v32  ;;  %v16030_v16 = vpop.f32.mrb[159].mxu0  ;;  %v16051_v3 = vpop.f32.mrb[134].mxu1  ;;  %16330 = vmatprep.subr.bf16.mxu0 %v17723_v7  ;;  %v4545_v32 = vcombine.high %v4529_v31, %v4529_v31  ;;  %v17736_v7 = vld [vmem:[%s22285_s4 + $0x1848] sm:$0xff]   ;;  %v17740_v24 = vld [vmem:[%s22285_s4 + $0x1850] sm:$0xff]   ;;  %v17744_v56 = vld [vmem:[%s22285_s4 + $0x1858] sm:$0xff]  }
 0x3b0   : > { %v12331_v58 = vadd.f32 %v16028_v40, %v21125_v60  ;;  %v16052_v29 = vpop.f32.mrb[135].mxu1  ;;  %16352 = vmatprep.subr.bf16.mxu1 %v17724_v44  ;;  %v17730_v60 = vld [vmem:[%s22285_s4 + $0x17b8] sm:$0xff]   ;;  %v17737_v44 = vld [vmem:[%s22285_s4 + $0x18c8] sm:$0xff]   ;;  %v17743_v40 = vld [vmem:[%s22285_s4 + $0x1890] sm:$0xff]  }
 0x3b1   : > { %v17739_v11 = vld [vmem:[%s22285_s4 + $0x1888] sm:$0xff]   ;;  %v17745_v39 = vld [vmem:[%s22285_s4 + $0x18d8] sm:$0xff]   ;;  %v17748_v3 = vld [vmem:[%s22285_s4 + $0x1860] sm:$0xff]  }
 0x3b2   : > { %v21233_v52 = vadd.f32 %v16050_v41, %v12331_v58  ;;  %16331 = vmatpush3.bf16.msra.mxu0 %v17725_v19  ;;  %v4595_v19 = vcombine.high %v4585_v53, %v4585_v53  ;;  %v17746_v41 = vld [vmem:[%s22285_s4 + $0x1818] sm:$0xff]   ;;  %v17749_v58 = vld [vmem:[%s22285_s4 + $0x18e0] sm:$0xff]   ;;  %v17753_v48 = vld [vmem:[%s22285_s4 + $0x18e8] sm:$0xff]  }
 0x3b3   : > { %16353 = vmatpush3.bf16.msra.mxu1 %v17726_v26  ;;  %16332 = vmatprep.subr.bf16.mxu0 %v17727_v8  ;;  %v17741_v26 = vld [vmem:[%s22285_s4 + $0x18d0] sm:$0xff]   ;;  %v17747_v16 = vld [vmem:[%s22285_s4 + $0x1898] sm:$0xff]   ;;  %v17750_v29 = vld [vmem:[%s22285_s4 + $0x1820] sm:$0xff]  }
 0x3b4   : > { %16354 = vmatprep.subr.bf16.mxu1 %v17728_v15  ;;  %v17742_v8 = vld [vmem:[%s22285_s4 + $0x1810] sm:$0xff]   ;;  %v17751_v15 = vld [vmem:[%s22285_s4 + $0x18a0] sm:$0xff]  }
 0x3b6   : > { %16333 = vmatpush3.bf16.msra.mxu0 %v17729_v28  ;;  %v17752_v28 = vld [vmem:[%s22285_s4 + $0x1868] sm:$0xff]  }
 0x3b7   : > { %16355 = vmatpush3.bf16.msra.mxu1 %v17730_v60  ;;  %16362 = vmatprep.subr.bf16.mxu0 %v17732_v35  ;;  %v17754_v60 = vld [vmem:[%s22285_s4 + $0x1828] sm:$0xff]  }
 0x3b8   : > { %16384 = vmatprep.subr.bf16.mxu1 %v17733_v0  ;;  %v17755_v35 = vld [vmem:[%s22285_s4 + $0x18a8] sm:$0xff]   ;;  %v17756_v0 = vld [vmem:[%s22285_s4 + $0x1870] sm:$0xff]  }
 0x3b9   : > { %12889 = vmatmul.mubr.bf16.vlgmr.msra.gmra.mrb[184].mxu0 %v4529_v31  ;;  %v4548_v31 = vcombine.high %v21206_v63, %v21206_v63  ;;  %v17758_v63 = vld [vmem:[%s22285_s4 + $0x1830] sm:$0xff]  }
 0x3ba   : > { %12929 = vmatmul.mubr.bf16.vlgmr.msra.gmra.mrb[160].mxu1 %v4545_v32  ;;  %16363 = vmatpush3.bf16.msra.mxu0 %v17734_v6 }
 0x3bb   : > { %16385 = vmatpush3.bf16.msra.mxu1 %v17735_v18  ;;  %16364 = vmatprep.subr.bf16.mxu0 %v17736_v7  ;;  %v17759_v7 = vld [vmem:[%s22285_s4 + $0x18b0] sm:$0xff]  }
 0x3bc   : > { %16386 = vmatprep.subr.bf16.mxu1 %v17737_v44  ;;  %12968 = vmatprep.mubr.bf16.mxu0 %v4585_v53  ;;  %v17757_v53 = vld [vmem:[%s22285_s4 + $0x18f0] sm:$0xff]   ;;  %v21328_v44 = vrot.slane %v4548_v31, %v18423_v55 }
 0x3bd   : > { %13008 = vmatprep.mubr.bf16.mxu1 %v4595_v19 }
 0x3be   : > { %16365 = vmatpush3.bf16.msra.mxu0 %v17738_v5 }
 0x3bf   : > { %16387 = vmatpush3.bf16.msra.mxu1 %v17739_v11  ;;  %16366 = vmatprep.subr.bf16.mxu0 %v17740_v24 }
 0x3c0   : > { %16388 = vmatprep.subr.bf16.mxu1 %v17741_v26 }
 0x3c2   : > { %16367 = vmatpush3.bf16.msra.mxu0 %v17742_v8 }
 0x3c3   : > { %16389 = vmatpush3.bf16.msra.mxu1 %v17743_v40  ;;  %16368 = vmatprep.subr.bf16.mxu0 %v17744_v56  ;;  %v17760_v40 = vld [vmem:[%s22285_s4 + $0x1878] sm:$0xff]  }
 0x3c4   : > { %16390 = vmatprep.subr.bf16.mxu1 %v17745_v39  ;;  %v17761_v56 = vld [vmem:[%s22285_s4 + $0x18f8] sm:$0xff]  }
 0x3c6   : > { %16369 = vmatpush3.bf16.msra.mxu0 %v17746_v41 }
 0x3c7   : > { %16391 = vmatpush3.bf16.msra.mxu1 %v17747_v16  ;;  %16370 = vmatprep.subr.bf16.mxu0 %v17748_v3  ;;  %v17762_v16 = vld [vmem:[%s22285_s4 + $0x1838] sm:$0xff]  }
 0x3c8   : > { %16392 = vmatprep.subr.bf16.mxu1 %v17749_v58  ;;  %v17763_v3 = vld [vmem:[%s22285_s4 + $0x18b8] sm:$0xff]   ;;  %v4564_v58 = vcombine.high %v21328_v44, %v21328_v44 }
 0x3ca   : > { %16371 = vmatpush3.bf16.msra.mxu0 %v17750_v29 }
 0x3cb   : > { %16393 = vmatpush3.bf16.msra.mxu1 %v17751_v15  ;;  %16372 = vmatprep.subr.bf16.mxu0 %v17752_v28  ;;  %v4571_v15 = vrot.slane %v21222_v2, %v18423_v55  ;;  %v17765_v28 = vld [vmem:[%s22285_s4 + $0x19c0] sm:$0xff]   ;;  %v4592_v2 = vrot.slane %v4564_v58, %v18423_v55  ;;  %v17787_v58 = vld [vmem:[%s22285_s4 + $0x19a8] sm:$0xff]  }
 0x3cc   : > { %v16070_v6 = vpop.f32.mrb[160].mxu0  ;;  %16394 = vmatprep.subr.bf16.mxu1 %v17753_v48  ;;  %v17766_v48 = vld [vmem:[%s22285_s4 + $0x1900] sm:$0xff]  }
 0x3cd   : > { %v16071_v32 = vpop.f32.mrb[161].mxu0  ;;  %v16092_v18 = vpop.f32.mrb[136].mxu1  ;;  %v4593_v31 = vcombine.high %v4571_v15, %v4571_v15 }
 0x3ce   : > { %v16072_v5 = vadd.f32 %v16071_v32, %v16070_v6  ;;  %v16073_v19 = vpop.f32.mrb[162].mxu0  ;;  %v16093_v11 = vpop.f32.mrb[137].mxu1  ;;  %16373 = vmatpush3.bf16.msra.mxu0 %v17754_v60  ;;  %v17767_v60 = vld [vmem:[%s22285_s4 + $0x1980] sm:$0xff]   ;;  %v17770_v6 = vld [vmem:[%s22285_s4 + $0x1908] sm:$0xff]   ;;  %v4596_v32 = vcombine.high %v4592_v2, %v4592_v2 }
 0x3cf   : > { %v16094_v24 = vadd.f32 %v16093_v11, %v16092_v18  ;;  %16395 = vmatpush3.bf16.msra.mxu1 %v17755_v35  ;;  %v16074_v26 = vpop.f32.mrb[163].mxu0  ;;  %v16095_v8 = vpop.f32.mrb[138].mxu1  ;;  %16374 = vmatprep.subr.bf16.mxu0 %v17756_v0  ;;  %v17768_v35 = vld [vmem:[%s22285_s4 + $0x1948] sm:$0xff]   ;;  %v17772_v18 = vld [vmem:[%s22285_s4 + $0x1950] sm:$0xff]   ;;  %v17776_v19 = vld [vmem:[%s22285_s4 + $0x1958] sm:$0xff]  }
 0x3d0   : > { %v12411_v39 = vadd.f32 %v16072_v5, %v21233_v52  ;;  %v16096_v41 = vpop.f32.mrb[139].mxu1  ;;  %16396 = vmatprep.subr.bf16.mxu1 %v17757_v53  ;;  %v17764_v52 = vld [vmem:[%s22285_s4 + $0x1940] sm:$0xff]   ;;  %v17769_v0 = vld [vmem:[%s22285_s4 + $0x19c8] sm:$0xff]   ;;  %v17775_v5 = vld [vmem:[%s22285_s4 + $0x1990] sm:$0xff]  }
 0x3d1   : > { %v17771_v53 = vld [vmem:[%s22285_s4 + $0x1988] sm:$0xff]   ;;  %v17777_v11 = vld [vmem:[%s22285_s4 + $0x19d8] sm:$0xff]   ;;  %v17780_v8 = vld [vmem:[%s22285_s4 + $0x1960] sm:$0xff]  }
 0x3d2   : > { %v21345_v29 = vadd.f32 %v16094_v24, %v12411_v39  ;;  %16375 = vmatpush3.bf16.msra.mxu0 %v17758_v63  ;;  %v17773_v63 = vld [vmem:[%s22285_s4 + $0x19d0] sm:$0xff]   ;;  %v17778_v24 = vld [vmem:[%s22285_s4 + $0x1918] sm:$0xff]   ;;  %v17783_v39 = vld [vmem:[%s22285_s4 + $0x19a0] sm:$0xff]  }
 0x3d3   : > { %16397 = vmatpush3.bf16.msra.mxu1 %v17759_v7  ;;  %16376 = vmatprep.subr.bf16.mxu0 %v17760_v40  ;;  %v17774_v7 = vld [vmem:[%s22285_s4 + $0x1910] sm:$0xff]   ;;  %v17779_v26 = vld [vmem:[%s22285_s4 + $0x1998] sm:$0xff]   ;;  %v17781_v40 = vld [vmem:[%s22285_s4 + $0x19e0] sm:$0xff]  }
 0x3d4   : > { %16398 = vmatprep.subr.bf16.mxu1 %v17761_v56  ;;  %v17782_v56 = vld [vmem:[%s22285_s4 + $0x1920] sm:$0xff]   ;;  %v17784_v41 = vld [vmem:[%s22285_s4 + $0x1968] sm:$0xff]  }
 0x3d6   : > { %16377 = vmatpush3.bf16.msra.mxu0 %v17762_v16  ;;  %v17785_v16 = vld [vmem:[%s22285_s4 + $0x19e8] sm:$0xff]  }
 0x3d7   : > { %16399 = vmatpush3.bf16.msra.mxu1 %v17763_v3  ;;  %16406 = vmatprep.subr.bf16.mxu0 %v17764_v52  ;;  %v17786_v3 = vld [vmem:[%s22285_s4 + $0x1928] sm:$0xff]   ;;  %v17789_v52 = vld [vmem:[%s22285_s4 + $0x19f0] sm:$0xff]  }
 0x3d8   : > { %16428 = vmatprep.subr.bf16.mxu1 %v17765_v28  ;;  %v21429_v28 = vld [vmem:[%s18419_s22 + $0x68] sm:$0xff] }
 0x3d9   : > { %12969 = vmatmul.mubr.bf16.vlgmr.msra.gmra.mrb[188].mxu0 %v4571_v15  ;;  %v17788_v15 = vld [vmem:[%s22285_s4 + $0x1970] sm:$0xff]  }
 0x3da   : > { %13009 = vmatmul.mubr.bf16.vlgmr.msra.gmra.mrb[164].mxu1 %v4593_v31  ;;  %16407 = vmatpush3.bf16.msra.mxu0 %v17766_v48 }
 0x3db   : > { %16429 = vmatpush3.bf16.msra.mxu1 %v17767_v60  ;;  %16408 = vmatprep.subr.bf16.mxu0 %v17768_v35  ;;  %v17790_v60 = vld [vmem:[%s22285_s4 + $0x1930] sm:$0xff]  }
 0x3dc   : > { %16430 = vmatprep.subr.bf16.mxu1 %v17769_v0  ;;  %13048 = vmatprep.mubr.bf16.mxu0 %v4592_v2  ;;  %v17791_v35 = vld [vmem:[%s22285_s4 + $0x19b0] sm:$0xff]   ;;  %v21439_v0 = vrot.slane %v21429_v28, %v18423_v55 }
 0x3dd   : > { %13088 = vmatprep.mubr.bf16.mxu1 %v4596_v32 }
 0x3de   : > { %16409 = vmatpush3.bf16.msra.mxu0 %v17770_v6 }
 0x3df   : > { %16431 = vmatpush3.bf16.msra.mxu1 %v17771_v53  ;;  %16410 = vmatprep.subr.bf16.mxu0 %v17772_v18  ;;  %v17792_v18 = vld [vmem:[%s22285_s4 + $0x1978] sm:$0xff]  }
 0x3e0   : > { %16432 = vmatprep.subr.bf16.mxu1 %v17773_v63  ;;  %v17793_v63 = vld [vmem:[%s22285_s4 + $0x19f8] sm:$0xff]  }
 0x3e2   : > { %16411 = vmatpush3.bf16.msra.mxu0 %v17774_v7 }
 0x3e3   : > { %16433 = vmatpush3.bf16.msra.mxu1 %v17775_v5  ;;  %16412 = vmatprep.subr.bf16.mxu0 %v17776_v19 }
 0x3e4   : > { %16434 = vmatprep.subr.bf16.mxu1 %v17777_v11 }
 0x3e6   : > { %16413 = vmatpush3.bf16.msra.mxu0 %v17778_v24 }
 0x3e7   : > { %16435 = vmatpush3.bf16.msra.mxu1 %v17779_v26  ;;  %16414 = vmatprep.subr.bf16.mxu0 %v17780_v8  ;;  %v17794_v26 = vld [vmem:[%s22285_s4 + $0x1938] sm:$0xff]  }
 0x3e8   : > { %16436 = vmatprep.subr.bf16.mxu1 %v17781_v40  ;;  %v17795_v8 = vld [vmem:[%s22285_s4 + $0x19b8] sm:$0xff]   ;;  %v4612_v40 = vcombine.high %v21439_v0, %v21439_v0 }
 0x3ea   : > { %16415 = vmatpush3.bf16.msra.mxu0 %v17782_v56 }
 0x3eb   : > { %16437 = vmatpush3.bf16.msra.mxu1 %v17783_v39  ;;  %16416 = vmatprep.subr.bf16.mxu0 %v17784_v41  ;;  %v4578_v39 = vrot.slane %v21328_v44, %v18423_v55  ;;  %v17798_v41 = vld [vmem:[%s22285_s4 + $0x1ac0] sm:$0xff]   ;;  %v4634_v44 = vrot.slane %v4612_v40, %v18423_v55  ;;  %v17819_v40 = vld [vmem:[%s22285_s4 + $0x1a28] sm:$0xff]  }
 0x3ec   : > { %v16114_v48 = vpop.f32.mrb[164].mxu0  ;;  %16438 = vmatprep.subr.bf16.mxu1 %v17785_v16  ;;  %v17799_v16 = vld [vmem:[%s22285_s4 + $0x1a00] sm:$0xff]  }
 0x3ed   : > { %v16115_v2 = vpop.f32.mrb[165].mxu0  ;;  %v16136_v31 = vpop.f32.mrb[140].mxu1 }
 0x3ee   : > { %v16116_v6 = vadd.f32 %v16115_v2, %v16114_v48  ;;  %v16117_v53 = vpop.f32.mrb[166].mxu0  ;;  %v16137_v32 = vpop.f32.mrb[141].mxu1  ;;  %16417 = vmatpush3.bf16.msra.mxu0 %v17786_v3  ;;  %v17800_v3 = vld [vmem:[%s22285_s4 + $0x1a80] sm:$0xff]   ;;  %v17803_v48 = vld [vmem:[%s22285_s4 + $0x1a08] sm:$0xff]   ;;  %v4644_v2 = vcombine.high %v4634_v44, %v4634_v44 }
 0x3ef   : > { %v16138_v7 = vadd.f32 %v16137_v32, %v16136_v31  ;;  %16439 = vmatpush3.bf16.msra.mxu1 %v17787_v58  ;;  %v16118_v5 = vpop.f32.mrb[167].mxu0  ;;  %v16139_v19 = vpop.f32.mrb[142].mxu1  ;;  %16418 = vmatprep.subr.bf16.mxu0 %v17788_v15  ;;  %v4594_v58 = vcombine.high %v4578_v39, %v4578_v39  ;;  %v17801_v15 = vld [vmem:[%s22285_s4 + $0x1a48] sm:$0xff]   ;;  %v17805_v31 = vld [vmem:[%s22285_s4 + $0x1a50] sm:$0xff]   ;;  %v17809_v32 = vld [vmem:[%s22285_s4 + $0x1a58] sm:$0xff]  }
 0x3f0   : > { %v12491_v11 = vadd.f32 %v16116_v6, %v21345_v29  ;;  %v16140_v24 = vpop.f32.mrb[143].mxu1  ;;  %16440 = vmatprep.subr.bf16.mxu1 %v17789_v52  ;;  %v17797_v29 = vld [vmem:[%s22285_s4 + $0x1a40] sm:$0xff]   ;;  %v17802_v52 = vld [vmem:[%s22285_s4 + $0x1ac8] sm:$0xff]   ;;  %v17807_v6 = vld [vmem:[%s22285_s4 + $0x1a10] sm:$0xff]  }
 0x3f1   : > { %v17808_v53 = vld [vmem:[%s22285_s4 + $0x1a90] sm:$0xff]   ;;  %v17813_v5 = vld [vmem:[%s22285_s4 + $0x1a60] sm:$0xff]  }
 0x3f2   : > { %v21456_v56 = vadd.f32 %v16138_v7, %v12491_v11  ;;  %16419 = vmatpush3.bf16.msra.mxu0 %v17790_v60  ;;  %v17804_v60 = vld [vmem:[%s22285_s4 + $0x1a88] sm:$0xff]   ;;  %v17812_v7 = vld [vmem:[%s22285_s4 + $0x1a98] sm:$0xff]   ;;  %v17814_v19 = vld [vmem:[%s22285_s4 + $0x1ae0] sm:$0xff]  }
 0x3f3   : > { %16441 = vmatpush3.bf16.msra.mxu1 %v17791_v35  ;;  %16420 = vmatprep.subr.bf16.mxu0 %v17792_v18  ;;  %v17806_v35 = vld [vmem:[%s22285_s4 + $0x1ad0] sm:$0xff]   ;;  %v17810_v18 = vld [vmem:[%s22285_s4 + $0x1ad8] sm:$0xff]   ;;  %v17815_v11 = vld [vmem:[%s22285_s4 + $0x1a20] sm:$0xff]  }
 0x3f4   : > { %16442 = vmatprep.subr.bf16.mxu1 %v17793_v63  ;;  %v17811_v63 = vld [vmem:[%s22285_s4 + $0x1a18] sm:$0xff]   ;;  %v17816_v24 = vld [vmem:[%s22285_s4 + $0x1aa0] sm:$0xff]  }
 0x3f6   : > { %16421 = vmatpush3.bf16.msra.mxu0 %v17794_v26  ;;  %v17817_v26 = vld [vmem:[%s22285_s4 + $0x1a68] sm:$0xff]  }
 0x3f7   : > { %16443 = vmatpush3.bf16.msra.mxu1 %v17795_v8  ;;  %16450 = vmatprep.subr.bf16.mxu0 %v17797_v29  ;;  %v17818_v8 = vld [vmem:[%s22285_s4 + $0x1ae8] sm:$0xff]   ;;  %v4597_v29 = vcombine.high %v21429_v28, %v21429_v28  ;;  %v17824_v28 = vld [vmem:[%s22285_s4 + $0x1ab0] sm:$0xff]  }
 0x3f8   : > { %16472 = vmatprep.subr.bf16.mxu1 %v17798_v41  ;;  %v17821_v41 = vld [vmem:[%s22285_s4 + $0x1a70] sm:$0xff]  }
 0x3f9   : > { %13049 = vmatmul.mubr.bf16.vlgmr.msra.gmra.mrb[192].mxu0 %v4578_v39  ;;  %v17820_v39 = vld [vmem:[%s22285_s4 + $0x1aa8] sm:$0xff]  }
 0x3fa   : > { %13089 = vmatmul.mubr.bf16.vlgmr.msra.gmra.mrb[168].mxu1 %v4594_v58  ;;  %16451 = vmatpush3.bf16.msra.mxu0 %v17799_v16  ;;  %v17822_v16 = vld [vmem:[%s22285_s4 + $0x1af0] sm:$0xff]  }
 0x3fb   : > { %16473 = vmatpush3.bf16.msra.mxu1 %v17800_v3  ;;  %16452 = vmatprep.subr.bf16.mxu0 %v17801_v15 }
 0x3fc   : > { %16474 = vmatprep.subr.bf16.mxu1 %v17802_v52  ;;  %13128 = vmatprep.mubr.bf16.mxu0 %v4634_v44  ;;  %v17823_v44 = vld [vmem:[%s22285_s4 + $0x1a30] sm:$0xff]   ;;  %v17825_v52 = vld [vmem:[%s22285_s4 + $0x1a78] sm:$0xff]  }
 0x3fd   : > { %13168 = vmatprep.mubr.bf16.mxu1 %v4644_v2 }
 0x3fe   : > { %16453 = vmatpush3.bf16.msra.mxu0 %v17803_v48  ;;  %v21551_v48 = vrot.slane %v4597_v29, %v18423_v55  ;;  %v17833_v29 = vld [vmem:[%s22285_s4 + $0x1b48] sm:$0xff]  }
 0x3ff   : > { %16475 = vmatpush3.bf16.msra.mxu1 %v17804_v60  ;;  %16454 = vmatprep.subr.bf16.mxu0 %v17805_v31 }
 0x400   : > { %16476 = vmatprep.subr.bf16.mxu1 %v17806_v35  ;;  %v17826_v35 = vld [vmem:[%s22285_s4 + $0x1af8] sm:$0xff]  }
 0x402   : > { %16455 = vmatpush3.bf16.msra.mxu0 %v17807_v6 }
 0x403   : > { %16477 = vmatpush3.bf16.msra.mxu1 %v17808_v53  ;;  %16456 = vmatprep.subr.bf16.mxu0 %v17809_v32 }
 0x404   : > { %16478 = vmatprep.subr.bf16.mxu1 %v17810_v18 }
 0x406   : > { %16457 = vmatpush3.bf16.msra.mxu0 %v17811_v63 }
 0x407   : > { %16479 = vmatpush3.bf16.msra.mxu1 %v17812_v7  ;;  %16458 = vmatprep.subr.bf16.mxu0 %v17813_v5  ;;  %v17827_v7 = vld [vmem:[%s22285_s4 + $0x1a38] sm:$0xff]  }
 0x408   : > { %16480 = vmatprep.subr.bf16.mxu1 %v17814_v19  ;;  %v17828_v5 = vld [vmem:[%s22285_s4 + $0x1ab8] sm:$0xff]   ;;  %v4613_v19 = vcombine.high %v21551_v48, %v21551_v48 }
 0x40a   : > { %16459 = vmatpush3.bf16.msra.mxu0 %v17815_v11 }
 0x40b   : > { %16481 = vmatpush3.bf16.msra.mxu1 %v17816_v24  ;;  %16460 = vmatprep.subr.bf16.mxu0 %v17817_v26  ;;  %v4620_v24 = vrot.slane %v21439_v0, %v18423_v55  ;;  %v17830_v26 = vld [vmem:[%s22285_s4 + $0x1bc0] sm:$0xff]   ;;  %v4641_v0 = vrot.slane %v4613_v19, %v18423_v55  ;;  %v17852_v19 = vld [vmem:[%s22285_s4 + $0x1ba8] sm:$0xff]  }
 0x40c   : > { %v16158_v3 = vpop.f32.mrb[168].mxu0  ;;  %16482 = vmatprep.subr.bf16.mxu1 %v17818_v8  ;;  %v17831_v8 = vld [vmem:[%s22285_s4 + $0x1b00] sm:$0xff]  }
 0x40d   : > { %v16159_v58 = vpop.f32.mrb[169].mxu0  ;;  %v16180_v15 = vpop.f32.mrb[144].mxu1 }
 0x40e   : > { %v16160_v60 = vadd.f32 %v16159_v58, %v16158_v3  ;;  %v16161_v2 = vpop.f32.mrb[170].mxu0  ;;  %v16181_v31 = vpop.f32.mrb[145].mxu1  ;;  %16461 = vmatpush3.bf16.msra.mxu0 %v17819_v40  ;;  %v17832_v40 = vld [vmem:[%s22285_s4 + $0x1b80] sm:$0xff]   ;;  %v17836_v3 = vld [vmem:[%s22285_s4 + $0x1b88] sm:$0xff]   ;;  %v17837_v58 = vld [vmem:[%s22285_s4 + $0x1b50] sm:$0xff]  }
 0x40f   : > { %v16182_v6 = vadd.f32 %v16181_v31, %v16180_v15  ;;  %16483 = vmatpush3.bf16.msra.mxu1 %v17820_v39  ;;  %v16162_v53 = vpop.f32.mrb[171].mxu0  ;;  %v16183_v32 = vpop.f32.mrb[146].mxu1  ;;  %16462 = vmatprep.subr.bf16.mxu0 %v17821_v41  ;;  %v4642_v39 = vcombine.high %v4620_v24, %v4620_v24  ;;  %v17834_v41 = vld [vmem:[%s22285_s4 + $0x1bc8] sm:$0xff]   ;;  %v17838_v15 = vld [vmem:[%s22285_s4 + $0x1bd0] sm:$0xff]   ;;  %v17842_v2 = vld [vmem:[%s22285_s4 + $0x1bd8] sm:$0xff]  }
 0x410   : > { %v12571_v18 = vadd.f32 %v16160_v60, %v21456_v56  ;;  %v16184_v63 = vpop.f32.mrb[147].mxu1  ;;  %16484 = vmatprep.subr.bf16.mxu1 %v17822_v16  ;;  %v17829_v56 = vld [vmem:[%s22285_s4 + $0x1b40] sm:$0xff]   ;;  %v17835_v16 = vld [vmem:[%s22285_s4 + $0x1b08] sm:$0xff]   ;;  %v17841_v60 = vld [vmem:[%s22285_s4 + $0x1b58] sm:$0xff]  }
 0x411   : > { %v17843_v31 = vld [vmem:[%s22285_s4 + $0x1b18] sm:$0xff]   ;;  %v17846_v53 = vld [vmem:[%s22285_s4 + $0x1be0] sm:$0xff]   ;;  %v17849_v63 = vld [vmem:[%s22285_s4 + $0x1b68] sm:$0xff]  }
 0x412   : > { %v21565_v11 = vadd.f32 %v16182_v6, %v12571_v18  ;;  %16463 = vmatpush3.bf16.msra.mxu0 %v17823_v44  ;;  %v4645_v44 = vcombine.high %v4641_v0, %v4641_v0  ;;  %v17845_v6 = vld [vmem:[%s22285_s4 + $0x1b60] sm:$0xff]  }
 0x413   : > { %16485 = vmatpush3.bf16.msra.mxu1 %v17824_v28  ;;  %16464 = vmatprep.subr.bf16.mxu0 %v17825_v52  ;;  %v17839_v28 = vld [vmem:[%s22285_s4 + $0x1b10] sm:$0xff]   ;;  %v17847_v32 = vld [vmem:[%s22285_s4 + $0x1b20] sm:$0xff]  }
 0x414   : > { %16486 = vmatprep.subr.bf16.mxu1 %v17826_v35  ;;  %v17840_v52 = vld [vmem:[%s22285_s4 + $0x1b90] sm:$0xff]   ;;  %v17844_v35 = vld [vmem:[%s22285_s4 + $0x1b98] sm:$0xff]   ;;  %v17848_v18 = vld [vmem:[%s22285_s4 + $0x1ba0] sm:$0xff]  }
 0x416   : > { %16465 = vmatpush3.bf16.msra.mxu0 %v17827_v7  ;;  %v17850_v7 = vld [vmem:[%s22285_s4 + $0x1be8] sm:$0xff]  }
 0x417   : > { %16487 = vmatpush3.bf16.msra.mxu1 %v17828_v5  ;;  %16494 = vmatprep.subr.bf16.mxu0 %v17829_v56  ;;  %v17851_v5 = vld [vmem:[%s22285_s4 + $0x1b28] sm:$0xff]   ;;  %v17854_v56 = vld [vmem:[%s22285_s4 + $0x1bf0] sm:$0xff]  }
 0x418   : > { %16516 = vmatprep.subr.bf16.mxu1 %v17830_v26 }
 0x419   : > { %13129 = vmatmul.mubr.bf16.vlgmr.msra.gmra.mrb[196].mxu0 %v4620_v24  ;;  %v17853_v24 = vld [vmem:[%s22285_s4 + $0x1b70] sm:$0xff]  }
 0x41a   : > { %13169 = vmatmul.mubr.bf16.vlgmr.msra.gmra.mrb[172].mxu1 %v4642_v39  ;;  %16495 = vmatpush3.bf16.msra.mxu0 %v17831_v8  ;;  %v17855_v8 = vld [vmem:[%s22285_s4 + $0x1b30] sm:$0xff]  }
 0x41b   : > { %16517 = vmatpush3.bf16.msra.mxu1 %v17832_v40  ;;  %16496 = vmatprep.subr.bf16.mxu0 %v17833_v29  ;;  %v17856_v39 = vld [vmem:[%s22285_s4 + $0x1bb0] sm:$0xff]  }
 0x41c   : > { %16518 = vmatprep.subr.bf16.mxu1 %v17834_v41  ;;  %13208 = vmatprep.mubr.bf16.mxu0 %v4641_v0  ;;  %v21655_v29 = vld [vmem:[%s18419_s22 + $0x70] sm:$0xff] }
 0x41d   : > { %13248 = vmatprep.mubr.bf16.mxu1 %v4645_v44  ;;  %v17857_v44 = vld [vmem:[%s22285_s4 + $0x1b78] sm:$0xff]  }
 0x41e   : > { %16497 = vmatpush3.bf16.msra.mxu0 %v17835_v16 }
 0x41f   : > { %16519 = vmatpush3.bf16.msra.mxu1 %v17836_v3  ;;  %16498 = vmatprep.subr.bf16.mxu0 %v17837_v58  ;;  %v17858_v58 = vld [vmem:[%s22285_s4 + $0x1bf8] sm:$0xff]  }
 0x420   : > { %16520 = vmatprep.subr.bf16.mxu1 %v17838_v15  ;;  %v21665_v15 = vrot.slane %v21655_v29, %v18423_v55 }
 0x422   : > { %16499 = vmatpush3.bf16.msra.mxu0 %v17839_v28 }
 0x423   : > { %16521 = vmatpush3.bf16.msra.mxu1 %v17840_v52  ;;  %16500 = vmatprep.subr.bf16.mxu0 %v17841_v60 }
 0x424   : > { %16522 = vmatprep.subr.bf16.mxu1 %v17842_v2 }
 0x426   : > { %16501 = vmatpush3.bf16.msra.mxu0 %v17843_v31 }
 0x427   : > { %16523 = vmatpush3.bf16.msra.mxu1 %v17844_v35  ;;  %16502 = vmatprep.subr.bf16.mxu0 %v17845_v6  ;;  %v17859_v35 = vld [vmem:[%s22285_s4 + $0x1b38] sm:$0xff]  }
 0x428   : > { %16524 = vmatprep.subr.bf16.mxu1 %v17846_v53  ;;  %v17860_v6 = vld [vmem:[%s22285_s4 + $0x1bb8] sm:$0xff]   ;;  %v4661_v53 = vcombine.high %v21665_v15, %v21665_v15 }
 0x42a   : > { %16503 = vmatpush3.bf16.msra.mxu0 %v17847_v32 }
 0x42b   : > { %16525 = vmatpush3.bf16.msra.mxu1 %v17848_v18  ;;  %16504 = vmatprep.subr.bf16.mxu0 %v17849_v63  ;;  %v4627_v18 = vrot.slane %v21551_v48, %v18423_v55  ;;  %v17863_v63 = vld [vmem:[%s22285_s4 + $0x1cc0] sm:$0xff]   ;;  %v4683_v48 = vrot.slane %v4661_v53, %v18423_v55  ;;  %v17884_v53 = vld [vmem:[%s22285_s4 + $0x1c28] sm:$0xff]  }
 0x42c   : > { %v16202_v26 = vpop.f32.mrb[172].mxu0  ;;  %16526 = vmatprep.subr.bf16.mxu1 %v17850_v7  ;;  %v17864_v7 = vld [vmem:[%s22285_s4 + $0x1c00] sm:$0xff]  }
 0x42d   : > { %v16203_v40 = vpop.f32.mrb[173].mxu0  ;;  %v16224_v0 = vpop.f32.mrb[148].mxu1 }
 0x42e   : > { %v16204_v41 = vadd.f32 %v16203_v40, %v16202_v26  ;;  %v16205_v16 = vpop.f32.mrb[174].mxu0  ;;  %v16225_v3 = vpop.f32.mrb[149].mxu1  ;;  %16505 = vmatpush3.bf16.msra.mxu0 %v17851_v5  ;;  %v17865_v5 = vld [vmem:[%s22285_s4 + $0x1c80] sm:$0xff]   ;;  %v17868_v26 = vld [vmem:[%s22285_s4 + $0x1c08] sm:$0xff]   ;;  %v4693_v40 = vcombine.high %v4683_v48, %v4683_v48 }
 0x42f   : > { %v16226_v28 = vadd.f32 %v16225_v3, %v16224_v0  ;;  %16527 = vmatpush3.bf16.msra.mxu1 %v17852_v19  ;;  %v16206_v52 = vpop.f32.mrb[175].mxu0  ;;  %v16227_v60 = vpop.f32.mrb[150].mxu1  ;;  %16506 = vmatprep.subr.bf16.mxu0 %v17853_v24  ;;  %v4643_v19 = vcombine.high %v4627_v18, %v4627_v18  ;;  %v17866_v24 = vld [vmem:[%s22285_s4 + $0x1c48] sm:$0xff]   ;;  %v17870_v0 = vld [vmem:[%s22285_s4 + $0x1c50] sm:$0xff]   ;;  %v17874_v3 = vld [vmem:[%s22285_s4 + $0x1c58] sm:$0xff]  }
 0x430   : > { %v12651_v2 = vadd.f32 %v16204_v41, %v21565_v11  ;;  %v16228_v31 = vpop.f32.mrb[151].mxu1  ;;  %16528 = vmatprep.subr.bf16.mxu1 %v17854_v56  ;;  %v17862_v11 = vld [vmem:[%s22285_s4 + $0x1c40] sm:$0xff]   ;;  %v17867_v56 = vld [vmem:[%s22285_s4 + $0x1cc8] sm:$0xff]   ;;  %v17872_v41 = vld [vmem:[%s22285_s4 + $0x1c10] sm:$0xff]  }
 0x431   : > { %v17873_v16 = vld [vmem:[%s22285_s4 + $0x1c90] sm:$0xff]   ;;  %v17878_v52 = vld [vmem:[%s22285_s4 + $0x1c60] sm:$0xff]  }
 0x432   : > { %v21676_v32 = vadd.f32 %v16226_v28, %v12651_v2  ;;  %16507 = vmatpush3.bf16.msra.mxu0 %v17855_v8  ;;  %v17869_v8 = vld [vmem:[%s22285_s4 + $0x1c88] sm:$0xff]   ;;  %v17877_v28 = vld [vmem:[%s22285_s4 + $0x1c98] sm:$0xff]   ;;  %v17879_v60 = vld [vmem:[%s22285_s4 + $0x1ce0] sm:$0xff]  }
 0x433   : > { %16529 = vmatpush3.bf16.msra.mxu1 %v17856_v39  ;;  %16508 = vmatprep.subr.bf16.mxu0 %v17857_v44  ;;  %v17871_v39 = vld [vmem:[%s22285_s4 + $0x1cd0] sm:$0xff]   ;;  %v17875_v44 = vld [vmem:[%s22285_s4 + $0x1cd8] sm:$0xff]   ;;  %v17880_v2 = vld [vmem:[%s22285_s4 + $0x1c20] sm:$0xff]  }
 0x434   : > { %16530 = vmatprep.subr.bf16.mxu1 %v17858_v58  ;;  %v17876_v58 = vld [vmem:[%s22285_s4 + $0x1c18] sm:$0xff]   ;;  %v17881_v31 = vld [vmem:[%s22285_s4 + $0x1ca0] sm:$0xff]  }
 0x436   : > { %16509 = vmatpush3.bf16.msra.mxu0 %v17859_v35  ;;  %v17882_v35 = vld [vmem:[%s22285_s4 + $0x1c68] sm:$0xff]  }
 0x437   : > { %16531 = vmatpush3.bf16.msra.mxu1 %v17860_v6  ;;  %16538 = vmatprep.subr.bf16.mxu0 %v17862_v11  ;;  %v17883_v6 = vld [vmem:[%s22285_s4 + $0x1ce8] sm:$0xff]   ;;  %v4646_v11 = vcombine.high %v21655_v29, %v21655_v29  ;;  %v17889_v29 = vld [vmem:[%s22285_s4 + $0x1cb0] sm:$0xff]  }
 0x438   : > { %16560 = vmatprep.subr.bf16.mxu1 %v17863_v63  ;;  %v17886_v63 = vld [vmem:[%s22285_s4 + $0x1c70] sm:$0xff]  }
 0x439   : > { %13209 = vmatmul.mubr.bf16.vlgmr.msra.gmra.mrb[200].mxu0 %v4627_v18  ;;  %v17885_v18 = vld [vmem:[%s22285_s4 + $0x1ca8] sm:$0xff]  }
 0x43a   : > { %13249 = vmatmul.mubr.bf16.vlgmr.msra.gmra.mrb[176].mxu1 %v4643_v19  ;;  %16539 = vmatpush3.bf16.msra.mxu0 %v17864_v7  ;;  %v17887_v7 = vld [vmem:[%s22285_s4 + $0x1cf0] sm:$0xff]  }
 0x43b   : > { %16561 = vmatpush3.bf16.msra.mxu1 %v17865_v5  ;;  %16540 = vmatprep.subr.bf16.mxu0 %v17866_v24 }
 0x43c   : > { %16562 = vmatprep.subr.bf16.mxu1 %v17867_v56  ;;  %13288 = vmatprep.mubr.bf16.mxu0 %v4683_v48  ;;  %v17888_v48 = vld [vmem:[%s22285_s4 + $0x1c30] sm:$0xff]   ;;  %v21768_v56 = vrot.slane %v4646_v11, %v18423_v55  ;;  %v17898_v11 = vld [vmem:[%s22285_s4 + $0x1d48] sm:$0xff]  }
 0x43d   : > { %13328 = vmatprep.mubr.bf16.mxu1 %v4693_v40 }
 0x43e   : > { %16541 = vmatpush3.bf16.msra.mxu0 %v17868_v26 }
 0x43f   : > { %16563 = vmatpush3.bf16.msra.mxu1 %v17869_v8  ;;  %16542 = vmatprep.subr.bf16.mxu0 %v17870_v0  ;;  %v17890_v0 = vld [vmem:[%s22285_s4 + $0x1c78] sm:$0xff]  }
 0x440   : > { %16564 = vmatprep.subr.bf16.mxu1 %v17871_v39  ;;  %v17891_v39 = vld [vmem:[%s22285_s4 + $0x1cf8] sm:$0xff]  }
 0x442   : > { %16543 = vmatpush3.bf16.msra.mxu0 %v17872_v41 }
 0x443   : > { %16565 = vmatpush3.bf16.msra.mxu1 %v17873_v16  ;;  %16544 = vmatprep.subr.bf16.mxu0 %v17874_v3 }
 0x444   : > { %16566 = vmatprep.subr.bf16.mxu1 %v17875_v44 }
 0x446   : > { %16545 = vmatpush3.bf16.msra.mxu0 %v17876_v58 }
 0x447   : > { %16567 = vmatpush3.bf16.msra.mxu1 %v17877_v28  ;;  %16546 = vmatprep.subr.bf16.mxu0 %v17878_v52  ;;  %v17892_v28 = vld [vmem:[%s22285_s4 + $0x1c38] sm:$0xff]  }
 0x448   : > { %16568 = vmatprep.subr.bf16.mxu1 %v17879_v60  ;;  %v17893_v52 = vld [vmem:[%s22285_s4 + $0x1cb8] sm:$0xff]   ;;  %v4662_v60 = vcombine.high %v21768_v56, %v21768_v56 }
 0x44a   : > { %16547 = vmatpush3.bf16.msra.mxu0 %v17880_v2 }
 0x44b   : > { %16569 = vmatpush3.bf16.msra.mxu1 %v17881_v31  ;;  %16548 = vmatprep.subr.bf16.mxu0 %v17882_v35  ;;  %v4669_v31 = vrot.slane %v21665_v15, %v18423_v55  ;;  %v17895_v35 = vld [vmem:[%s22285_s4 + $0x1dc0] sm:$0xff]   ;;  %v4690_v15 = vrot.slane %v4662_v60, %v18423_v55  ;;  %v17917_v60 = vld [vmem:[%s22285_s4 + $0x1da8] sm:$0xff]  }
 0x44c   : > { %v16246_v5 = vpop.f32.mrb[176].mxu0  ;;  %16570 = vmatprep.subr.bf16.mxu1 %v17883_v6  ;;  %v17896_v6 = vld [vmem:[%s22285_s4 + $0x1d00] sm:$0xff]  }
 0x44d   : > { %v16247_v19 = vpop.f32.mrb[177].mxu0  ;;  %v16268_v24 = vpop.f32.mrb[152].mxu1 }
 0x44e   : > { %v16248_v26 = vadd.f32 %v16247_v19, %v16246_v5  ;;  %v16249_v8 = vpop.f32.mrb[178].mxu0  ;;  %v16269_v40 = vpop.f32.mrb[153].mxu1  ;;  %16549 = vmatpush3.bf16.msra.mxu0 %v17884_v53  ;;  %v17897_v53 = vld [vmem:[%s22285_s4 + $0x1d80] sm:$0xff]   ;;  %v17901_v5 = vld [vmem:[%s22285_s4 + $0x1d88] sm:$0xff]   ;;  %v17902_v19 = vld [vmem:[%s22285_s4 + $0x1d50] sm:$0xff]  }
 0x44f   : > { %v16270_v41 = vadd.f32 %v16269_v40, %v16268_v24  ;;  %16571 = vmatpush3.bf16.msra.mxu1 %v17885_v18  ;;  %v16250_v16 = vpop.f32.mrb[179].mxu0  ;;  %v16271_v3 = vpop.f32.mrb[154].mxu1  ;;  %16550 = vmatprep.subr.bf16.mxu0 %v17886_v63  ;;  %v4691_v18 = vcombine.high %v4669_v31, %v4669_v31  ;;  %v17899_v63 = vld [vmem:[%s22285_s4 + $0x1dc8] sm:$0xff]   ;;  %v17903_v24 = vld [vmem:[%s22285_s4 + $0x1dd0] sm:$0xff]   ;;  %v17906_v8 = vld [vmem:[%s22285_s4 + $0x1d58] sm:$0xff]  }
 0x450   : > { %v12731_v44 = vadd.f32 %v16248_v26, %v21676_v32  ;;  %v16272_v58 = vpop.f32.mrb[155].mxu1  ;;  %16572 = vmatprep.subr.bf16.mxu1 %v17887_v7  ;;  %v17894_v32 = vld [vmem:[%s22285_s4 + $0x1d40] sm:$0xff]   ;;  %v17900_v7 = vld [vmem:[%s22285_s4 + $0x1d08] sm:$0xff]   ;;  %v17905_v26 = vld [vmem:[%s22285_s4 + $0x1d90] sm:$0xff]  }
 0x451   : > { %v17907_v40 = vld [vmem:[%s22285_s4 + $0x1dd8] sm:$0xff]   ;;  %v17911_v16 = vld [vmem:[%s22285_s4 + $0x1de0] sm:$0xff]   ;;  %v17914_v58 = vld [vmem:[%s22285_s4 + $0x1d68] sm:$0xff]  }
 0x452   : > { %v21785_v2 = vadd.f32 %v16270_v41, %v12731_v44  ;;  %16551 = vmatpush3.bf16.msra.mxu0 %v17888_v48  ;;  %v4694_v48 = vcombine.high %v4690_v15, %v4690_v15  ;;  %v17910_v41 = vld [vmem:[%s22285_s4 + $0x1d60] sm:$0xff]  }
 0x453   : > { %16573 = vmatpush3.bf16.msra.mxu1 %v17889_v29  ;;  %16552 = vmatprep.subr.bf16.mxu0 %v17890_v0  ;;  %v17904_v29 = vld [vmem:[%s22285_s4 + $0x1d10] sm:$0xff]   ;;  %v17908_v0 = vld [vmem:[%s22285_s4 + $0x1d18] sm:$0xff]   ;;  %v17912_v3 = vld [vmem:[%s22285_s4 + $0x1d20] sm:$0xff]  }
 0x454   : > { %16574 = vmatprep.subr.bf16.mxu1 %v17891_v39  ;;  %v17909_v39 = vld [vmem:[%s22285_s4 + $0x1d98] sm:$0xff]   ;;  %v17913_v44 = vld [vmem:[%s22285_s4 + $0x1da0] sm:$0xff]  }
 0x456   : > { %16553 = vmatpush3.bf16.msra.mxu0 %v17892_v28  ;;  %v17915_v28 = vld [vmem:[%s22285_s4 + $0x1de8] sm:$0xff]  }
 0x457   : > { %16575 = vmatpush3.bf16.msra.mxu1 %v17893_v52  ;;  %16582 = vmatprep.subr.bf16.mxu0 %v17894_v32  ;;  %v17916_v52 = vld [vmem:[%s22285_s4 + $0x1d28] sm:$0xff]   ;;  %v17919_v32 = vld [vmem:[%s22285_s4 + $0x1df0] sm:$0xff]  }
 0x458   : > { %16604 = vmatprep.subr.bf16.mxu1 %v17895_v35 }
 0x459   : > { %13289 = vmatmul.mubr.bf16.vlgmr.msra.gmra.mrb[204].mxu0 %v4669_v31  ;;  %v17918_v31 = vld [vmem:[%s22285_s4 + $0x1d70] sm:$0xff]  }
 0x45a   : > { %13329 = vmatmul.mubr.bf16.vlgmr.msra.gmra.mrb[180].mxu1 %v4691_v18  ;;  %16583 = vmatpush3.bf16.msra.mxu0 %v17896_v6  ;;  %v17920_v6 = vld [vmem:[%s22285_s4 + $0x1d30] sm:$0xff]  }
 0x45b   : > { %16605 = vmatpush3.bf16.msra.mxu1 %v17897_v53  ;;  %16584 = vmatprep.subr.bf16.mxu0 %v17898_v11  ;;  %v17921_v18 = vld [vmem:[%s22285_s4 + $0x1db0] sm:$0xff]   ;;  %v17922_v11 = vld [vmem:[%s22285_s4 + $0x1d78] sm:$0xff]  }
 0x45c   : > { %16606 = vmatprep.subr.bf16.mxu1 %v17899_v63  ;;  %13368 = vmatprep.mubr.bf16.mxu0 %v4690_v15 }
 0x45d   : > { %13408 = vmatprep.mubr.bf16.mxu1 %v4694_v48 }
 0x45e   : > { %16585 = vmatpush3.bf16.msra.mxu0 %v17900_v7 }
 0x45f   : > { %16607 = vmatpush3.bf16.msra.mxu1 %v17901_v5  ;;  %16586 = vmatprep.subr.bf16.mxu0 %v17902_v19 }
 0x460   : > { %16608 = vmatprep.subr.bf16.mxu1 %v17903_v24 }
 0x462   : > { %16587 = vmatpush3.bf16.msra.mxu0 %v17904_v29  ;;  %v17923_v29 = vld [vmem:[%s22285_s4 + $0x1df8] sm:$0xff]  }
 0x463   : > { %16609 = vmatpush3.bf16.msra.mxu1 %v17905_v26  ;;  %16588 = vmatprep.subr.bf16.mxu0 %v17906_v8  ;;  %v21881_v26 = vld [vmem:[%s18419_s22 + $0x78] sm:$0xff] }
 0x464   : > { %16610 = vmatprep.subr.bf16.mxu1 %v17907_v40 }
 0x466   : > { %16589 = vmatpush3.bf16.msra.mxu0 %v17908_v0  ;;  %v17924_v0 = vld [vmem:[%s22285_s4 + $0x1d38] sm:$0xff]  }
 0x467   : > { %16611 = vmatpush3.bf16.msra.mxu1 %v17909_v39  ;;  %16590 = vmatprep.subr.bf16.mxu0 %v17910_v41  ;;  %v21889_v39 = vrot.slane %v21881_v26, %v18423_v55 }
 0x468   : > { %16612 = vmatprep.subr.bf16.mxu1 %v17911_v16  ;;  %v17925_v16 = vld [vmem:[%s22285_s4 + $0x1db8] sm:$0xff]  }
 0x46a   : > { %16591 = vmatpush3.bf16.msra.mxu0 %v17912_v3  ;;  %v4710_v3 = vcombine.high %v21889_v39, %v21889_v39 }
 0x46b   : > { %16613 = vmatpush3.bf16.msra.mxu1 %v17913_v44  ;;  %16592 = vmatprep.subr.bf16.mxu0 %v17914_v58  ;;  %v17927_v44 = vld [vmem:[%s22285_s4 + $0x1e40] sm:$0xff]  }
 0x46c   : > { %v16290_v35 = vpop.f32.mrb[180].mxu0  ;;  %16614 = vmatprep.subr.bf16.mxu1 %v17915_v28  ;;  %v17928_v58 = vld [vmem:[%s22285_s4 + $0x1ec0] sm:$0xff]  }
 0x46d   : > { %v16291_v53 = vpop.f32.mrb[181].mxu0  ;;  %v16312_v15 = vpop.f32.mrb[156].mxu1  ;;  %v17929_v28 = vld [vmem:[%s22285_s4 + $0x1e00] sm:$0xff]  }
 0x46e   : > { %v16292_v63 = vadd.f32 %v16291_v53, %v16290_v35  ;;  %v16293_v7 = vpop.f32.mrb[182].mxu0  ;;  %v16313_v5 = vpop.f32.mrb[157].mxu1  ;;  %16593 = vmatpush3.bf16.msra.mxu0 %v17916_v52  ;;  %v17933_v35 = vld [vmem:[%s22285_s4 + $0x1e08] sm:$0xff]  }
 0x46f   : > { %v16314_v48 = vadd.f32 %v16313_v5, %v16312_v15  ;;  %16615 = vmatpush3.bf16.msra.mxu1 %v17917_v60  ;;  %v16294_v19 = vpop.f32.mrb[183].mxu0  ;;  %v16315_v24 = vpop.f32.mrb[158].mxu1  ;;  %16594 = vmatprep.subr.bf16.mxu0 %v17918_v31  ;;  %v17930_v60 = vld [vmem:[%s22285_s4 + $0x1e80] sm:$0xff]   ;;  %v17931_v31 = vld [vmem:[%s22285_s4 + $0x1e48] sm:$0xff]   ;;  %v17935_v15 = vld [vmem:[%s22285_s4 + $0x1e50] sm:$0xff]  }
 0x470   : > { %v12811_v8 = vadd.f32 %v16292_v63, %v21785_v2  ;;  %v16316_v40 = vpop.f32.mrb[159].mxu1  ;;  %16616 = vmatprep.subr.bf16.mxu1 %v17919_v32  ;;  %v4676_v2 = vrot.slane %v21768_v56, %v18423_v55  ;;  %v4732_v56 = vrot.slane %v4710_v3, %v18423_v55  ;;  %v17932_v32 = vld [vmem:[%s22285_s4 + $0x1ec8] sm:$0xff]   ;;  %v17938_v63 = vld [vmem:[%s22285_s4 + $0x1e90] sm:$0xff]   ;;  %v17939_v7 = vld [vmem:[%s22285_s4 + $0x1e58] sm:$0xff]   ;;  %v4695_v3 = vcombine.high %v21881_v26, %v21881_v26 }
 0x471   : > { %v17934_v53 = vld [vmem:[%s22285_s4 + $0x1e88] sm:$0xff]   ;;  %v17940_v5 = vld [vmem:[%s22285_s4 + $0x1ed8] sm:$0xff]   ;;  %v17943_v24 = vld [vmem:[%s22285_s4 + $0x1e60] sm:$0xff]  }
 0x472   : > { %v21891_v41 = vadd.f32 %v16314_v48, %v12811_v8  ;;  %16595 = vmatpush3.bf16.msra.mxu0 %v17920_v6  ;;  %v4692_v52 = vcombine.high %v4676_v2, %v4676_v2  ;;  %v4742_v6 = vcombine.high %v4732_v56, %v4732_v56  ;;  %v17941_v48 = vld [vmem:[%s22285_s4 + $0x1e18] sm:$0xff]   ;;  %v17945_v8 = vld [vmem:[%s22285_s4 + $0x1e20] sm:$0xff]   ;;  %v17953_v26 = vld [vmem:[%s22285_s4 + $0x1e30] sm:$0xff]  }
 0x473   : > { %16617 = vmatpush3.bf16.msra.mxu1 %v17921_v18  ;;  %16596 = vmatprep.subr.bf16.mxu0 %v17922_v11  ;;  %v17936_v18 = vld [vmem:[%s22285_s4 + $0x1ed0] sm:$0xff]   ;;  %v17942_v19 = vld [vmem:[%s22285_s4 + $0x1e98] sm:$0xff]   ;;  %v17946_v40 = vld [vmem:[%s22285_s4 + $0x1ea0] sm:$0xff]  }
 0x474   : > { %16618 = vmatprep.subr.bf16.mxu1 %v17923_v29  ;;  %v17937_v11 = vld [vmem:[%s22285_s4 + $0x1e10] sm:$0xff]   ;;  %v17944_v29 = vld [vmem:[%s22285_s4 + $0x1ee0] sm:$0xff]  }
 0x476   : > { %16597 = vmatpush3.bf16.msra.mxu0 %v17924_v0  ;;  %v17947_v0 = vld [vmem:[%s22285_s4 + $0x1e68] sm:$0xff]  }
 0x477   : > { %16619 = vmatpush3.bf16.msra.mxu1 %v17925_v16  ;;  %16626 = vmatprep.subr.bf16.mxu0 %v17927_v44  ;;  %v17948_v16 = vld [vmem:[%s22285_s4 + $0x1ee8] sm:$0xff]  }
 0x478   : > { %16648 = vmatprep.subr.bf16.mxu1 %v17928_v58  ;;  %v17950_v44 = vld [vmem:[%s22285_s4 + $0x1ea8] sm:$0xff]   ;;  %v17951_v58 = vld [vmem:[%s22285_s4 + $0x1e70] sm:$0xff]  }
 0x479   : > { %13369 = vmatmul.mubr.bf16.vlgmr.msra.gmra.mrb[208].mxu0 %v4676_v2  ;;  %v17949_v2 = vld [vmem:[%s22285_s4 + $0x1e28] sm:$0xff]  }
 0x47a   : > { %13409 = vmatmul.mubr.bf16.vlgmr.msra.gmra.mrb[184].mxu1 %v4692_v52  ;;  %16627 = vmatpush3.bf16.msra.mxu0 %v17929_v28 }
 0x47b   : > { %16649 = vmatpush3.bf16.msra.mxu1 %v17930_v60  ;;  %16628 = vmatprep.subr.bf16.mxu0 %v17931_v31  ;;  %v21985_v31 = vrot.slane %v4695_v3, %v18423_v55 }
 0x47c   : > { %16650 = vmatprep.subr.bf16.mxu1 %v17932_v32  ;;  %13448 = vmatprep.mubr.bf16.mxu0 %v4732_v56  ;;  %v17952_v56 = vld [vmem:[%s22285_s4 + $0x1ef0] sm:$0xff]  }
 0x47d   : > { %13488 = vmatprep.mubr.bf16.mxu1 %v4742_v6 }
 0x47e   : > { %16629 = vmatpush3.bf16.msra.mxu0 %v17933_v35 }
 0x47f   : > { %16651 = vmatpush3.bf16.msra.mxu1 %v17934_v53  ;;  %16630 = vmatprep.subr.bf16.mxu0 %v17935_v15 }
 0x480   : > { %16652 = vmatprep.subr.bf16.mxu1 %v17936_v18 }
 0x482   : > { %16631 = vmatpush3.bf16.msra.mxu0 %v17937_v11  ;;  %v17954_v11 = vld [vmem:[%s22285_s4 + $0x1eb0] sm:$0xff]  }
 0x483   : > { %16653 = vmatpush3.bf16.msra.mxu1 %v17938_v63  ;;  %16632 = vmatprep.subr.bf16.mxu0 %v17939_v7  ;;  %v17955_v63 = vld [vmem:[%s22285_s4 + $0x1e78] sm:$0xff]  }
 0x484   : > { %16654 = vmatprep.subr.bf16.mxu1 %v17940_v5 }
 0x486   : > { %16633 = vmatpush3.bf16.msra.mxu0 %v17941_v48  ;;  %v17956_v48 = vld [vmem:[%s22285_s4 + $0x1ef8] sm:$0xff]  }
 0x487   : > { %16655 = vmatpush3.bf16.msra.mxu1 %v17942_v19  ;;  %16634 = vmatprep.subr.bf16.mxu0 %v17943_v24  ;;  %v4711_v19 = vcombine.high %v21985_v31, %v21985_v31 }
 0x488   : > { %16656 = vmatprep.subr.bf16.mxu1 %v17944_v29  ;;  %v17957_v29 = vld [vmem:[%s22285_s4 + $0x1e38] sm:$0xff]  }
 0x48a   : > { %16635 = vmatpush3.bf16.msra.mxu0 %v17945_v8  ;;  %v4718_v8 = vrot.slane %v21889_v39, %v18423_v55  ;;  %v17960_v39 = vld [vmem:[%s22285_s4 + $0x1fc0] sm:$0xff]  }
 0x48b   : > { %16657 = vmatpush3.bf16.msra.mxu1 %v17946_v40  ;;  %16636 = vmatprep.subr.bf16.mxu0 %v17947_v0  ;;  %v17959_v40 = vld [vmem:[%s22285_s4 + $0x1f40] sm:$0xff]  }
 0x48c   : > { %v16334_v28 = vpop.f32.mrb[184].mxu0  ;;  %16658 = vmatprep.subr.bf16.mxu1 %v17948_v16  ;;  %v22016_v0 = vld [vmem:[%s473_s16] sm:$0x1]  ;;  %v18062_v16 = vmov 2   ;;  %v4740_v3 = vcombine.high %v4718_v8, %v4718_v8  ;;  %s15061_s16 = sshll.u32 %s18251_s20, 8 }
 0x48d   : > { %v16335_v52 = vpop.f32.mrb[185].mxu0  ;;  %v16356_v60 = vpop.f32.mrb[160].mxu1  ;;  %16800 = vset.pattern.permute.xlu0 %v18062_v16  ;;  %s22166_s18 = scalar_lea.vmem %s22291_s10, %s15061_s16 }
 0x48e   : > { %v16336_v32 = vadd.f32 %v16335_v52, %v16334_v28  ;;  %v16337_v35 = vpop.f32.mrb[186].mxu0  ;;  %v16357_v6 = vpop.f32.mrb[161].mxu1  ;;  %16637 = vmatpush3.bf16.msra.mxu0 %v17949_v2  ;;  %v4739_v2 = vrot.slane %v4711_v19, %v18423_v55  ;;  %13580 = vperm.xlu0 %16800, %v22016_v0   ;;  %v17963_v28 = vld [vmem:[%s22285_s4 + $0x1f48] sm:$0xff]   ;;  %v17978_v19 = vld [vmem:[%s22285_s4 + $0x1fa0] sm:$0xff]  }
 0x48f   : > { %v16358_v53 = vadd.f32 %v16357_v6, %v16356_v60  ;;  %16659 = vmatpush3.bf16.msra.mxu1 %v17950_v44  ;;  %v16338_v15 = vpop.f32.mrb[187].mxu0  ;;  %v16359_v18 = vpop.f32.mrb[162].mxu1  ;;  %16638 = vmatprep.subr.bf16.mxu0 %v17951_v58  ;;  %v17961_v44 = vld [vmem:[%s22285_s4 + $0x1f00] sm:$0xff]   ;;  %v17965_v60 = vld [vmem:[%s22285_s4 + $0x1f08] sm:$0xff]   ;;  %v17968_v35 = vld [vmem:[%s22285_s4 + $0x1fd0] sm:$0xff]  }
 0x490   : > { %v12891_v7 = vadd.f32 %v16336_v32, %v21891_v41  ;;  %v16360_v5 = vpop.f32.mrb[163].mxu1  ;;  %16660 = vmatprep.subr.bf16.mxu1 %v17952_v56  ;;  %v17958_v41 = vld [vmem:[%s22285_s4 + $0x1eb8] sm:$0xff]   ;;  %v17962_v58 = vld [vmem:[%s22285_s4 + $0x1f80] sm:$0xff]   ;;  %v17964_v56 = vld [vmem:[%s22285_s4 + $0x1fc8] sm:$0xff]   ;;  %v4743_v52 = vcombine.high %v4739_v2, %v4739_v2 }
 0x491   : > { %v17967_v32 = vld [vmem:[%s22285_s4 + $0x1f50] sm:$0xff]   ;;  %v17971_v15 = vld [vmem:[%s22285_s4 + $0x1f58] sm:$0xff]   ;;  %v17976_v5 = vld [vmem:[%s22285_s4 + $0x1fe0] sm:$0xff]  }
 0x492   : > { %v21999_v24 = vadd.f32 %v16358_v53, %v12891_v7  ;;  %16639 = vmatpush3.bf16.msra.mxu0 %v17953_v26  ;;  %v17966_v26 = vld [vmem:[%s22285_s4 + $0x1f88] sm:$0xff]   ;;  %v17969_v6 = vld [vmem:[%s22285_s4 + $0x1f10] sm:$0xff]   ;;  %v17972_v18 = vld [vmem:[%s22285_s4 + $0x1fd8] sm:$0xff]  }
 0x493   : > { %16661 = vmatpush3.bf16.msra.mxu1 %v17954_v11  ;;  %16640 = vmatprep.subr.bf16.mxu0 %v17955_v63  ;;  %v17970_v53 = vld [vmem:[%s22285_s4 + $0x1f90] sm:$0xff]   ;;  %v17973_v11 = vld [vmem:[%s22285_s4 + $0x1f18] sm:$0xff]   ;;  %v17975_v7 = vld [vmem:[%s22285_s4 + $0x1f60] sm:$0xff]  }
 0x494   : > { %16662 = vmatprep.subr.bf16.mxu1 %v17956_v48  ;;  %v17974_v63 = vld [vmem:[%s22285_s4 + $0x1f98] sm:$0xff]   ;;  %v17977_v48 = vld [vmem:[%s22285_s4 + $0x1f20] sm:$0xff]  }
 0x496   : > { %16641 = vmatpush3.bf16.msra.mxu0 %v17957_v29  ;;  %v17979_v29 = vld [vmem:[%s22285_s4 + $0x1f68] sm:$0xff]  }
 0x497   : > { %16663 = vmatpush3.bf16.msra.mxu1 %v17958_v41  ;;  %16670 = vmatprep.subr.bf16.mxu0 %v17959_v40  ;;  %v17981_v41 = vld [vmem:[%s22285_s4 + $0x1f28] sm:$0xff]  }
 0x498   : > { %16692 = vmatprep.subr.bf16.mxu1 %v17960_v39  ;;  %v17982_v40 = vld [vmem:[%s22285_s4 + $0x1fa8] sm:$0xff]   ;;  %v17983_v39 = vld [vmem:[%s22285_s4 + $0x1f70] sm:$0xff]  }
 0x499   : > { %13449 = vmatmul.mubr.bf16.vlgmr.msra.gmra.mrb[212].mxu0 %v4718_v8  ;;  %v17980_v8 = vld [vmem:[%s22285_s4 + $0x1fe8] sm:$0xff]  }
 0x49a   : > { %13489 = vmatmul.mubr.bf16.vlgmr.msra.gmra.mrb[188].mxu1 %v4740_v3  ;;  %16671 = vmatpush3.bf16.msra.mxu0 %v17961_v44 }
 0x49b   : > { %16693 = vmatpush3.bf16.msra.mxu1 %v17962_v58  ;;  %16672 = vmatprep.subr.bf16.mxu0 %v17963_v28 }
 0x49c   : > { %16694 = vmatprep.subr.bf16.mxu1 %v17964_v56  ;;  %13528 = vmatprep.mubr.bf16.mxu0 %v4739_v2  ;;  %v17984_v2 = vld [vmem:[%s22285_s4 + $0x1ff0] sm:$0xff]  }
 0x49d   : > { %13568 = vmatprep.mubr.bf16.mxu1 %v4743_v52  ;;  %v17985_v52 = vld [vmem:[%s22285_s4 + $0x1f30] sm:$0xff]  }
 0x49e   : > { %16673 = vmatpush3.bf16.msra.mxu0 %v17965_v60 }
 0x49f   : > { %16695 = vmatpush3.bf16.msra.mxu1 %v17966_v26  ;;  %16674 = vmatprep.subr.bf16.mxu0 %v17967_v32 }
 0x4a0   : > { %16696 = vmatprep.subr.bf16.mxu1 %v17968_v35  ;;  %v17986_v35 = vld [vmem:[%s22285_s4 + $0x1fb0] sm:$0xff]  }
 0x4a2   : > { %16675 = vmatpush3.bf16.msra.mxu0 %v17969_v6  ;;  %v17987_v6 = vld [vmem:[%s22285_s4 + $0x1f78] sm:$0xff]  }
 0x4a3   : > { %16697 = vmatpush3.bf16.msra.mxu1 %v17970_v53  ;;  %16676 = vmatprep.subr.bf16.mxu0 %v17971_v15 }
 0x4a4   : > { %16698 = vmatprep.subr.bf16.mxu1 %v17972_v18  ;;  %v17988_v18 = vld [vmem:[%s22285_s4 + $0x1ff8] sm:$0xff]  }
 0x4a6   : > { %16677 = vmatpush3.bf16.msra.mxu0 %v17973_v11 }
 0x4a7   : > { %16699 = vmatpush3.bf16.msra.mxu1 %v17974_v63  ;;  %16678 = vmatprep.subr.bf16.mxu0 %v17975_v7  ;;  %v17989_v63 = vld [vmem:[%s22285_s4 + $0x1f38] sm:$0xff]   ;;  %v4725_v7 = vrot.slane %v21985_v31, %v18423_v55 }
 0x4a8   : > { %16700 = vmatprep.subr.bf16.mxu1 %v17976_v5 }
 0x4a9   : > { %v4741_v5 = vcombine.high %v4725_v7, %v4725_v7 }
 0x4aa   : > { %16679 = vmatpush3.bf16.msra.mxu0 %v17977_v48 }
 0x4ab   : > { %16701 = vmatpush3.bf16.msra.mxu1 %v17978_v19  ;;  %16680 = vmatprep.subr.bf16.mxu0 %v17979_v29 }
 0x4ac   : > { %v16378_v16 = vpop.f32.mrb[188].mxu0  ;;  %16702 = vmatprep.subr.bf16.mxu1 %v17980_v8 }
 0x4ad   : > { %v16379_v3 = vpop.f32.mrb[189].mxu0  ;;  %v16400_v44 = vpop.f32.mrb[164].mxu1 }
 0x4ae   : > { %v16380_v58 = vadd.f32 %v16379_v3, %v16378_v16  ;;  %v16381_v28 = vpop.f32.mrb[190].mxu0  ;;  %v16401_v56 = vpop.f32.mrb[165].mxu1  ;;  %16681 = vmatpush3.bf16.msra.mxu0 %v17981_v41 }
 0x4af   : > { %v16402_v60 = vadd.f32 %v16401_v56, %v16400_v44  ;;  %16703 = vmatpush3.bf16.msra.mxu1 %v17982_v40  ;;  %v16382_v26 = vpop.f32.mrb[191].mxu0  ;;  %v16403_v32 = vpop.f32.mrb[166].mxu1  ;;  %16682 = vmatprep.subr.bf16.mxu0 %v17983_v39 }
 0x4b0   : > { %v12971_v53 = vadd.f32 %v16380_v58, %v21999_v24  ;;  %v16404_v15 = vpop.f32.mrb[167].mxu1  ;;  %16704 = vmatprep.subr.bf16.mxu1 %v17984_v2  ;;  %v17990_v24 = vld [vmem:[%s22285_s4 + $0x1fb8] sm:$0xff]  }
 0x4b2   : > { %v13011_v11 = vadd.f32 %v16402_v60, %v12971_v53  ;;  %16683 = vmatpush3.bf16.msra.mxu0 %v17985_v52 }
 0x4b3   : > { %16705 = vmatpush3.bf16.msra.mxu1 %v17986_v35  ;;  %16684 = vmatprep.subr.bf16.mxu0 %v17987_v6 }
 0x4b4   : > { %16706 = vmatprep.subr.bf16.mxu1 %v17988_v18 }
 0x4b6   : > { %16685 = vmatpush3.bf16.msra.mxu0 %v17989_v63 }
 0x4b7   : > { %16707 = vmatpush3.bf16.msra.mxu1 %v17990_v24 }
 0x4b9   : > { %13529 = vmatmul.mubr.bf16.vlgmr.msra.gmra.mrb[216].mxu0 %v4725_v7 }
 0x4ba   : > { %13569 = vmatmul.mubr.bf16.vlgmr.msra.gmra.mrb[192].mxu1 %v4741_v5 }
 0x4cc   : > { %v16422_v48 = vpop.f32.mrb[192].mxu0 }
 0x4cd   : > { %v16423_v19 = vpop.f32.mrb[193].mxu0  ;;  %v16444_v29 = vpop.f32.mrb[168].mxu1 }
 0x4ce   : > { %v16424_v8 = vadd.f32 %v16423_v19, %v16422_v48  ;;  %v16425_v41 = vpop.f32.mrb[194].mxu0  ;;  %v16445_v40 = vpop.f32.mrb[169].mxu1 }
 0x4cf   : > { %v16446_v39 = vadd.f32 %v16445_v40, %v16444_v29  ;;  %v16426_v55 = vpop.f32.mrb[195].mxu0  ;;  %v16447_v31 = vpop.f32.mrb[170].mxu1 }
 0x4d0   : > { %v13051_v16 = vadd.f32 %v16424_v8, %v13011_v11  ;;  %v16448_v2 = vpop.f32.mrb[171].mxu1  ;;  %v13601_v55 = vld [vmem:[%s22120_s21] sm:$0xff] }
 0x4d1   : > { %v13607_v31 = vld [vmem:[%s22288_s7] sm:$0xff] }
 0x4d2   : > { %v13091_v3 = vadd.f32 %v16446_v39, %v13051_v16  ;;  %v18063_v39 = vmov 4   ;;  %v13603_v16 = vunpack.c.l.bf16 %v13601_v55  ;;  %v13609_v2 = vunpack.c.l.bf16 %v13607_v31 }
 0x4d3   : > { %16802 = vset.pattern.permute.xlu0 %v18063_v39 }
 0x4ec   : > { %v16466_v44 = vpop.f32.mrb[196].mxu0 }
 0x4ed   : > { %v16467_v58 = vpop.f32.mrb[197].mxu0  ;;  %v16488_v28 = vpop.f32.mrb[172].mxu1 }
 0x4ee   : > { %v16468_v56 = vadd.f32 %v16467_v58, %v16466_v44  ;;  %v16469_v52 = vpop.f32.mrb[198].mxu0  ;;  %v16489_v60 = vpop.f32.mrb[173].mxu1  ;;  %v13613_v44 = vmul.f32 %v13609_v2, %v13603_v16  ;;  %v13627_v58 = vsub.s32 2, %v18410_v46 }
 0x4ef   : > { %v16490_v26 = vadd.f32 %v16489_v60, %v16488_v28  ;;  %v16470_v32 = vpop.f32.mrb[199].mxu0  ;;  %v16491_v35 = vpop.f32.mrb[174].mxu1  ;;  %v13631_v52 = vsub.s32 4, %v18410_v46 }
 0x4f0   : > { %v13131_v6 = vadd.f32 %v16468_v56, %v13091_v3  ;;  %v16492_v53 = vpop.f32.mrb[175].mxu1  ;;  %v22127_v3 = vsub.s32 0, %v18410_v46  ;;  %v13628_v56 = vrot.slane %v13613_v44, %v13627_v58  ;;  %v13610_v32 = vunpack.c.h.bf16 %v13607_v31 }
 0x4f1   : > { %v13632_v35 = vrot.slane %v13613_v44, %v13631_v52 }
 0x4f2   : > { %v13171_v15 = vadd.f32 %v16490_v26, %v13131_v6  ;;  %v13624_v28 = vrot.slane %v13613_v44, %v22127_v3  ;;  %v13604_v26 = vunpack.c.h.bf16 %v13601_v55  ;;  %v13635_v6 = vsub.s32 6, %v18410_v46 }
 0x4f3   : > { %v13690_v39 = vsel %vm13686_vm1, %v13632_v35, 0.0 }
 0x50c   : > { %v16510_v18 = vpop.f32.mrb[200].mxu0 }
 0x50d   : > { %v16511_v63 = vpop.f32.mrb[201].mxu0  ;;  %v16532_v7 = vpop.f32.mrb[176].mxu1 }
 0x50e   : > { %v16512_v24 = vadd.f32 %v16511_v63, %v16510_v18  ;;  %v16513_v11 = vpop.f32.mrb[202].mxu0  ;;  %v16533_v5 = vpop.f32.mrb[177].mxu1  ;;  %v13687_v18 = vsel %vm13686_vm1, %v13624_v28, 0.0  ;;  %v13688_v63 = vsel %vm13686_vm1, %v13628_v56, 0.0  ;;  %v13602_v28 = vld [vmem:[%s22120_s21 + $0x8] sm:$0x1f] }
 0x50f   : > { %v16534_v48 = vadd.f32 %v16533_v5, %v16532_v7  ;;  %v16514_v19 = vpop.f32.mrb[203].mxu0  ;;  %v16535_v29 = vpop.f32.mrb[178].mxu1  ;;  %v13614_v5 = vmul.f32 %v13610_v32, %v13604_v26  ;;  %v13608_v56 = vld [vmem:[%s22288_s7 + $0x8] sm:$0x1f]  ;;  %v13605_v26 = vunpack.c.l.bf16 %v13602_v28  ;;  %s451_s21 = sand.u32 1, %s18051_s24  }
 0x510   : > { %v13211_v8 = vadd.f32 %v16512_v24, %v13171_v15  ;;  %v16536_v41 = vpop.f32.mrb[179].mxu1  ;;  %v13689_v19 = vadd.f32 %v13688_v63, %v13687_v18  ;;  %v13611_v32 = vunpack.c.l.bf16 %v13608_v56  ;;  %s452_s27 = scalar_lea.vmem [#allocation3], %s451_s21  ;;  %s13740_s17 = scalar_lea.sflag [#allocation4], %s451_s21 }
 0x511   : > { %v13640_v31 = vrot.slane %v13614_v5, %v22127_v3  ;;  %v13652_v18 = vrot.slane %v13614_v5, %v13635_v6  ;;  %s13758_s16 = sshll.u32 %s452_s27, 4  ;;  %s13759_s16 = int_to_ptr.vmem [resolvable:$true] %s13758_s16 }
 0x512   : > { %v13251_v40 = vadd.f32 %v16534_v48, %v13211_v8  ;;  %v13636_v48 = vrot.slane %v13613_v44, %v13635_v6  ;;  %v13691_v16 = vadd.f32 %v13690_v39, %v13689_v19  ;;  %s17997_s22 = scalar_lea.vmem %s13759_s16, 16 }
 0x513   : > { %v13694_v35 = vsel %vm13686_vm1, %v13640_v31, 0.0  ;;  %p17998_p11 = scmp.ne.s32.totalorder %s13759_s16, %s17997_s22 }
 0x514   : > { %v13692_v2 = vsel %vm13686_vm1, %v13636_v48, 0.0 }
 0x515   : > { %p17999_p12 = pnand %p17998_p11, %p18173_p5 }
 0x517   : > { %p18000_p13 = pneg %p17999_p12 }
 0x52c   : > { %v16554_v60 = vpop.f32.mrb[204].mxu0 }
 0x52d   : > { %v16555_v53 = vpop.f32.mrb[205].mxu0  ;;  %v16576_v15 = vpop.f32.mrb[180].mxu1 }
 0x52e   : > { %v16556_v7 = vadd.f32 %v16555_v53, %v16554_v60  ;;  %v16557_v24 = vpop.f32.mrb[206].mxu0  ;;  %v16577_v11 = vpop.f32.mrb[181].mxu1  ;;  %v13644_v60 = vrot.slane %v13614_v5, %v13627_v58  ;;  %v13648_v53 = vrot.slane %v13614_v5, %v13631_v52 }
 0x52f   : > { %v16578_v29 = vadd.f32 %v16577_v11, %v16576_v15  ;;  %v16558_v8 = vpop.f32.mrb[207].mxu0  ;;  %v16579_v41 = vpop.f32.mrb[182].mxu1  ;;  %v13693_v15 = vadd.f32 %v13692_v2, %v13691_v16  ;;  %v13606_v24 = vunpack.c.h.bf16 %v13602_v28  ;;  %v13612_v11 = vunpack.c.h.bf16 %v13608_v56 }
 0x530   : > { %v13291_v55 = vadd.f32 %v16556_v7, %v13251_v40  ;;  %v16580_v46 = vpop.f32.mrb[183].mxu1  ;;  %v13615_v40 = vmul.f32 %v13611_v32, %v13605_v26  ;;  %v13696_v63 = vsel %vm13686_vm1, %v13644_v60, 0.0  ;;  %v13698_v19 = vsel %vm13686_vm1, %v13648_v53, 0.0 }
 0x531   : > { %v13695_v7 = vadd.f32 %v13694_v35, %v13693_v15 }
 0x532   : > { %v13331_v44 = vadd.f32 %v16578_v29, %v13291_v55  ;;  %v13656_v48 = vrot.slane %v13615_v40, %v22127_v3  ;;  %v13660_v41 = vrot.slane %v13615_v40, %v13627_v58  ;;  %v13700_v29 = vsel %vm13686_vm1, %v13652_v18, 0.0 }
 0x533   : > { %v13697_v8 = vadd.f32 %v13696_v63, %v13695_v7  ;;  %v13616_v55 = vmul.f32 %v13612_v11, %v13606_v24  ;;  %v13664_v46 = vrot.slane %v13615_v40, %v13631_v52  ;;  %v13668_v5 = vrot.slane %v13615_v40, %v13635_v6 }
 0x534   : > { %v13702_v31 = vsel %vm13686_vm1, %v13656_v48, 0.0  ;;  %v13704_v2 = vsel %vm13686_vm1, %v13660_v41, 0.0 }
 0x535   : > { %v13699_v39 = vadd.f32 %v13698_v19, %v13697_v8  ;;  %v13672_v28 = vrot.slane %v13616_v55, %v22127_v3  ;;  %v13706_v56 = vsel %vm13686_vm1, %v13664_v46, 0.0  ;;  %v13708_v58 = vsel %vm13686_vm1, %v13668_v5, 0.0 }
 0x537   : > { %v13701_v16 = vadd.f32 %v13700_v29, %v13699_v39  ;;  %v13711_v53 = vsel %vm13710_vm2, %v13672_v28, 0.0 }
 0x539   : > { %v13703_v60 = vadd.f32 %v13702_v31, %v13701_v16 }
 0x53b   : > { %v13705_v26 = vadd.f32 %v13704_v2, %v13703_v60 }
 0x53d   : > { %v13707_v32 = vadd.f32 %v13706_v56, %v13705_v26 }
 0x53f   : > { %v13709_v15 = vadd.f32 %v13708_v58, %v13707_v32 }
 0x541   : > { %v13712_v35 = vadd.f32 %v13711_v53, %v13709_v15 }
 0x543   : > { %13713 = vadd.xlane.f32.xlu1 %v13712_v35 }
 0x54c   : > { %v16598_v52 = vpop.f32.mrb[208].mxu0 }
 0x54d   : > { %v16599_v18 = vpop.f32.mrb[209].mxu0  ;;  %v16620_v63 = vpop.f32.mrb[184].mxu1 }
 0x54e   : > { %v16600_v6 = vadd.f32 %v16599_v18, %v16598_v52  ;;  %v16601_v40 = vpop.f32.mrb[210].mxu0  ;;  %v16621_v7 = vpop.f32.mrb[185].mxu1 }
 0x54f   : > { %v16622_v24 = vadd.f32 %v16621_v7, %v16620_v63  ;;  %v16602_v11 = vpop.f32.mrb[211].mxu0  ;;  %v16623_v48 = vpop.f32.mrb[186].mxu1 }
 0x550   : > { %v13371_v19 = vadd.f32 %v16600_v6, %v13331_v44  ;;  %v16624_v8 = vpop.f32.mrb[187].mxu1  ;;  %v13581_v7 = vpop.permute.xlu0 %13580  ;;  %v13577_v11 = vld [vmem:[%s22286_s5] sm:$0x1] }
 0x552   : > { %v13411_v41 = vadd.f32 %v16622_v24, %v13371_v19  ;;  %v13586_v19 = vrot.slane %v13581_v7, %v22127_v3 }
 0x56c   : > { %v16642_v29 = vpop.f32.mrb[212].mxu0 }
 0x56d   : > { %v16643_v39 = vpop.f32.mrb[213].mxu0  ;;  %v16664_v55 = vpop.f32.mrb[188].mxu1 }
 0x56e   : > { %v16644_v46 = vadd.f32 %v16643_v39, %v16642_v29  ;;  %v16645_v31 = vpop.f32.mrb[214].mxu0  ;;  %v16665_v16 = vpop.f32.mrb[189].mxu1  ;;  %v22159_v39 = vrot.slane %v22016_v0, %v22127_v3 }
 0x56f   : > { %v16666_v5 = vadd.f32 %v16665_v16, %v16664_v55  ;;  %v16646_v2 = vpop.f32.mrb[215].mxu0  ;;  %v16667_v60 = vpop.f32.mrb[190].mxu1  ;;  %v18064_v55 = vmov 0  }
 0x570   : > { %v13451_v28 = vadd.f32 %v16644_v46, %v13411_v41  ;;  %v16668_v56 = vpop.f32.mrb[191].mxu1  ;;  %16801 = vset.pattern.permute.xlu1 %v18064_v55 }
 0x572   : > { %v13491_v26 = vadd.f32 %v16666_v5, %v13451_v28 }
 0x58c   : > { %v16686_v58 = vpop.f32.mrb[216].mxu0 }
 0x58d   : > { %v16708_v32 = vpop.f32.mrb[192].mxu1  ;;  %v16687_v53 = vpop.f32.mrb[217].mxu0 }
 0x58e   : > { %v16688_v15 = vadd.f32 %v16687_v53, %v16686_v58  ;;  %v16709_v35 = vpop.f32.mrb[193].mxu1  ;;  %v16689_v44 = vpop.f32.mrb[218].mxu0 }
 0x58f   : > { %v16710_v52 = vadd.f32 %v16709_v35, %v16708_v32  ;;  %v16711_v18 = vpop.f32.mrb[194].mxu1  ;;  %v16690_v63 = vpop.f32.mrb[219].mxu0 }
 0x590   : > { %v13531_v6 = vadd.f32 %v16688_v15, %v13491_v26  ;;  %v16712_v40 = vpop.f32.mrb[195].mxu1 }
 0x592   : > { %v13571_v24 = vadd.f32 %v16710_v52, %v13531_v6 }
 0x594   : > { %v13576_v48 = vmul.f32 0.0625, %v13571_v24 }
 0x596   : > { %v13578_v8 = vadd.f32 %v13577_v11, %v13576_v48 }
 0x598   : > { %v13587_v41 = vmul.f32 %v13586_v19, %v13578_v8 }
 0x59a   : > { %v13589_v29 = vsel %vm13588_vm3, %v13587_v41, -inf }
 0x59b   : > { %13590 = vmax.xlane.f32.xlu0 %v13589_v29 }
 0x5b1   : > { %1813 = vperm.xlu0 %16802, %v22159_v39  }
 0x5b5   : > { %16803 = vset.pattern.permute.xlu0 %v18064_v55 }
 0x628   : > { %v13591_v46 = vpop.xlane.xlu0 %13590 }
 0x629   : > { %v13592_v31 = vsub.f32 %v13587_v41, %v13591_v46 }
 0x62b   : > { %v13593_v16 = vmul.f32 1.442695, %v13592_v31 }
 0x62d   : > { %17992 = vpow2.f32 %v13593_v16 }
 0x630   : > { %v1814_v0 = vpop.permute.xlu0 %1813 }
 0x631   : > { %v1816_v3 = vmul.f32 %v1814_v0, %v19262_v13  ;;  %v1817_v5 = vmul.f32 %v1814_v0, %v19270_v21  ;;  %v1818_v2 = vmul.f32 %v1814_v0, %v19250_v51  ;;  %v1819_v60 = vmul.f32 %v1814_v0, %v19267_v17 }
 0x632   : > { %v1820_v28 = vmul.f32 %v1814_v0, %v19299_v45  ;;  %v1821_v56 = vmul.f32 %v1814_v0, %v19311_v61  ;;  %v1822_v26 = vmul.f32 %v1814_v0, %v19292_v43  ;;  %v1823_v58 = vmul.f32 %v1814_v0, %v19305_v23 }
 0x633   : > { %v1824_v13 = vmul.f32 %v1814_v0, %v19335_v20  ;;  %v1825_v21 = vmul.f32 %v1814_v0, %v19350_v33  ;;  %v1826_v51 = vmul.f32 %v1814_v0, %v19329_v14  ;;  %v1827_v17 = vmul.f32 %v1814_v0, %v19344_v22  ;;  %1848 = vst [vmem:[%s22166_s18] sm:$0xff] %v1816_v3 }
 0x634   : > { %1849 = vst [vmem:[%s22166_s18 + $0x8] sm:$0xff] %v1817_v5  ;;  %1850 = vst [vmem:[%s22166_s18 + $0x10] sm:$0xff] %v1818_v2  ;;  %v1828_v43 = vmul.f32 %v1814_v0, %v19374_v47  ;;  %v1829_v45 = vmul.f32 %v1814_v0, %v19386_v49  ;;  %v1830_v23 = vmul.f32 %v1814_v0, %v19368_v38 }
 0x635   : > { %1851 = vst [vmem:[%s22166_s18 + $0x18] sm:$0xff] %v1819_v60  ;;  %v1831_v61 = vmul.f32 %v1814_v0, %v19380_v54  ;;  %1852 = vst [vmem:[%s22166_s18 + $0x20] sm:$0xff] %v1820_v28  ;;  %v1832_v14 = vmul.f32 %v1814_v0, %v19420_v37  ;;  %v1833_v20 = vmul.f32 %v1814_v0, %v19426_v62 }
 0x636   : > { %1853 = vst [vmem:[%s22166_s18 + $0x28] sm:$0xff] %v1821_v56  ;;  %1854 = vst [vmem:[%s22166_s18 + $0x30] sm:$0xff] %v1822_v26  ;;  %v1834_v22 = vmul.f32 %v1814_v0, %v19407_v9  ;;  %v1835_v33 = vmul.f32 %v1814_v0, %v19423_v10  ;;  %v1836_v38 = vmul.f32 %v1814_v0, %v19458_v27 }
 0x637   : > { %1855 = vst [vmem:[%s22166_s18 + $0x38] sm:$0xff] %v1823_v58  ;;  %1856 = vst [vmem:[%s22166_s18 + $0x40] sm:$0xff] %v1824_v13  ;;  %v1837_v47 = vmul.f32 %v1814_v0, %v19470_v12  ;;  %v1838_v54 = vmul.f32 %v1814_v0, %v19451_v25  ;;  %v1839_v49 = vmul.f32 %v1814_v0, %v19464_v50  ;;  %v17993_v9 = vpop.eup %17992 }
 0x638   : > { %1857 = vst [vmem:[%s22166_s18 + $0x48] sm:$0xff] %v1825_v21  ;;  %1858 = vst [vmem:[%s22166_s18 + $0x50] sm:$0xff] %v1826_v51  ;;  %v1840_v37 = vmul.f32 %v1814_v0, %v19494_v36  ;;  %v1841_v10 = vmul.f32 %v1814_v0, %v19506_v42  ;;  %v1842_v62 = vmul.f32 %v1814_v0, %v19488_v57  ;;  %v13595_v36 = vsel %vm13588_vm3, %v17993_v9, 0.0  ;;  %v13714_v42 = vpop.xlane.xlu1 %13713 }
 0x639   : > { %1859 = vst [vmem:[%s22166_s18 + $0x58] sm:$0xff] %v1827_v17  ;;  %1860 = vst [vmem:[%s22166_s18 + $0x60] sm:$0xff] %v1828_v43  ;;  %v1843_v25 = vmul.f32 %v1814_v0, %v19500_v4  ;;  %v1844_v27 = vmul.f32 %v1814_v0, %v19530_v30  ;;  %v1845_v50 = vmul.f32 %v1814_v0, %v19542_v34  ;;  %13596 = vadd.xlane.f32.xlu1 %v13595_v36  ;;  %v13715_v4 = vld [vmem:[#allocation2] sm:$0x1] }
 0x63a   : > { %1861 = vst [vmem:[%s22166_s18 + $0x68] sm:$0xff] %v1829_v45  ;;  %1862 = vst [vmem:[%s22166_s18 + $0x70] sm:$0xff] %v1830_v23  ;;  %v1846_v12 = vmul.f32 %v1814_v0, %v19524_v59  ;;  %v1847_v57 = vmul.f32 %v1814_v0, %v19536_v1  ;;  %v13716_v59 = vadd.f32 %v13715_v4, %v13714_v42 }
 0x63b   : > { %1863 = vst [vmem:[%s22166_s18 + $0x78] sm:$0xff] %v1831_v61  ;;  %1864 = vst [vmem:[%s22166_s18 + $0x80] sm:$0xff] %v1832_v14 }
 0x63c   : > { %1865 = vst [vmem:[%s22166_s18 + $0x88] sm:$0xff] %v1833_v20  ;;  %1866 = vst [vmem:[%s22166_s18 + $0x90] sm:$0xff] %v1834_v22 }
 0x63d   : > { %1867 = vst [vmem:[%s22166_s18 + $0x98] sm:$0xff] %v1835_v33  ;;  %1868 = vst [vmem:[%s22166_s18 + $0xa0] sm:$0xff] %v1836_v38 }
 0x63e   : > { %1869 = vst [vmem:[%s22166_s18 + $0xa8] sm:$0xff] %v1837_v47  ;;  %1870 = vst [vmem:[%s22166_s18 + $0xb0] sm:$0xff] %v1838_v54 }
 0x63f   : > { %1871 = vst [vmem:[%s22166_s18 + $0xb8] sm:$0xff] %v1839_v49  ;;  %1872 = vst [vmem:[%s22166_s18 + $0xc0] sm:$0xff] %v1840_v37 }
 0x640   : > { %1873 = vst [vmem:[%s22166_s18 + $0xc8] sm:$0xff] %v1841_v10  ;;  %1874 = vst [vmem:[%s22166_s18 + $0xd0] sm:$0xff] %v1842_v62 }
 0x641   : > { %1875 = vst [vmem:[%s22166_s18 + $0xd8] sm:$0xff] %v1843_v25  ;;  %1876 = vst [vmem:[%s22166_s18 + $0xe0] sm:$0xff] %v1844_v27 }
 0x642   : > { %1877 = vst [vmem:[%s22166_s18 + $0xe8] sm:$0xff] %v1845_v50  ;;  %1878 = vst [vmem:[%s22166_s18 + $0xf0] sm:$0xff] %v1846_v12 }
 0x643   : > { %1879 = vst [vmem:[%s22166_s18 + $0xf8] sm:$0xff] %v1847_v57  ;;  %s18066_s18 = smov [#allocation3]  }
 0x644   : > { %s18001_s0 = sshll.u32 %s18066_s18, 4  ;;  %s18002_s0 = int_to_ptr.vmem [resolvable:$false] %s18001_s0 }
 0x645   : > { %s18003_s1 = scalar_lea.vmem %s18002_s0, 32  ;;  %p18004_p0 = scmp.lt.s32.totalorder %s13759_s16, %s18002_s0 }
 0x646   : > { %p18005_p1 = scmp.lt.s32.totalorder %s18003_s1, %s17997_s22 }
 0x648   : > { %p18006_p2 = por %p18005_p1, %p18004_p0 }
 0x64a   : > { %13719 = vperm.xlu1 %16801, %v13716_v59   ;;  %p18007_p3 = pnand %p18006_p2, %p18000_p13 }
 0x6c6   : > { %v13597_v30 = vpop.xlane.xlu1 %13596 }
 0x6c7   : > { %17994 = vrcp.f32 %v13597_v30 }
 0x6ca   : > { %v13720_v34 = vpop.permute.xlu1 %13719 }
 0x6d1   : > { %v17995_v1 = vpop.eup %17994 }
 0x6d2   : > { %v13599_v32 = vmul.f32 %v17995_v1, %v17993_v9 }
 0x6d4   : > { %v13722_v53 = vmul.f32 %v13720_v34, %v13599_v32  ;;  %13600 = vst.msk [vmem:[%s452_s27] sm:$0x1] %vm13588_vm3, %v13599_v32 }
 0x6d6   : > { %v13723_v15 = vsel %vm13588_vm3, %v13722_v53, 0.0 }
 0x6d7   : > { %13724 = vadd.xlane.f32.xlu1 %v13723_v15 }
 0x6e8   : > { %13728 = vrot.lane.b32.xlu1 %v22159_v39, %s18065_s29 }
 0x6e9   : > { %18010 = shalt.err (!%p18007_p3)
}
 0x6ea   : > { %s18011_s8 = scalar_lea.hbm %s22241_s30, 16  ;;  %s18015_s29 = scalar_lea.hbm %s22292_s11, 32 }
 0x6eb   : > { %p18012_p4 = scmp.ne.s32.totalorder %s22241_s30, %s18011_s8  ;;  %p18016_p9 = scmp.lt.u32.totalorder %s22241_s30, %s22292_s11 }
 0x6ec   : > { %p18017_p10 = scmp.lt.u32.totalorder %s18015_s29, %s18011_s8  ;;  %p18019_p12 = scmp.lt.u32.totalorder %s18011_s8, %s22241_s30 }
 0x6ed   : > { %p18013_p7 = pnand %p18012_p4, %p18173_p5 }
 0x6ee   : > { %p18018_p11 = por %p18017_p10, %p18016_p9 }
 0x6ef   : > { %p18014_p8 = pneg %p18013_p7 }
 0x6f0   : > { %p18020_p13 = por %p18019_p12, %p18018_p11 }
 0x6f2   : > { %p18021_p0 = pnand %p18020_p13, %p18014_p8 }
 0x6f4   : > { %18024 = shalt.err (!%p18021_p0)
}
 0x6f5   : > { %16756 = dma.vmem_to_hbm [thread:$0]  (%p18173_p5), %s13759_s16, 16, %s22241_s30, %s13740_s17   ;;  %vm13732_vm4 = vcmask 0  }
 0x6f6   : > { %s481_s19 = scalar_lea.vmem %s22293_s12, %s18251_s20 }
 0x764   : > { %v13725_v35 = vpop.xlane.xlu1 %13724 }
 0x765   : > { %v13727_v44 = vmul.f32 0.2, %v13725_v35 }
 0x768   : > { %v13729_v52 = vpop.permute.xlu1 %13728 }
 0x769   : > { %v13731_v18 = vmul.f32 %v13729_v52, %v13727_v44 }
 0x76b   : > { %13733 = vst.msk [vmem:[%s481_s19] sm:$0x1] %vm13732_vm4, %v13731_v18 }
 0x76c PF: > { %p16762_p1 = scmp.ge.s32.totalorder %s18059_s26, 2  ;;  %s13781_s22 = sand.u32 1, %s18047_s23  }
 0x76d   : > { %s13782_s14 = scalar_lea.sflag [#allocation4], %s13781_s22 }
 0x76e   : > { %p16759_p2 = pnand %p16762_p1, %p18177_p6 }
 0x770   : > { %18042 = dma.done.wait (!%p16759_p2), %s13782_s14, 16  }
 0x771   : > { %18044 = vsyncadd (!%p16759_p2), %s13782_s14, 4294967280  ;;  %s22303_s30 = sld [smem:[#allocation6_spill]]  ;;  %s22304_s25 = sld [smem:[#allocation7_spill]] }
 0x772   : > { %p25_p5 = scmp.ge.s32.totalorder %s18160_s28, 4   ;;  %s22305_s23 = smov %s18051_s24 }
 0x773   : > { %s22307_s26 = smov %s18160_s28 }
 0x774   :  { %27 = sbr.rel (!%p25_p5) target bundleno = 6 (0x6), region = 128 }
 0x777   : > { %s22306_s24 = smov %s22303_s30 }
 0x77b   :  { %13792 = vsyncpa [#allocation4], 1 }
 0x77c   :  { %13794 = vsyncpa [#allocation4 + $0x1], 1 }

</bundles_post_ra>
